<compile_context>
chip_gen: v5e
topology: v5e:2x2
jax: 0.10.0
libtpu: 0.0.40
codegen_flags: <defaults>
</compile_context>

<pallas_src>
import functools

import numpy as np
import jax
import jax.numpy as jnp
from jax.experimental import pallas as pl
from jax.experimental.pallas import tpu as pltpu

EPS = 1e-5
VMEM_LIMIT = 32 * 1024 * 1024  # safe on v5e/v6e (128 MiB) and v7x (64 MiB phys)


# ----------------------------------------------------------------------------
# Pallas kernels
# ----------------------------------------------------------------------------
def _conv1x1_kernel(x_ref, w_ref, b_ref, o_ref):
    """o = relu(x @ w + b); BN scale is pre-folded into w/b; bf16 in, f32 acc."""
    acc = jnp.dot(x_ref[...], w_ref[...], preferred_element_type=jnp.float32)
    o_ref[...] = jnp.maximum(acc + b_ref[...], 0.0).astype(o_ref.dtype)


def _upadd_smooth_kernel(u_ref, p_ref, lat_ref, w_ref, b_ref, o_ref, pad_ref,
                         *, Ho, Wo):
    """Fused per-image: bilinear-upsample(p) + lateral add + 3x3 conv + BN + ReLU.

    * resize: one (Ho*Wo, Hs*Ws) x (Hs*Ws, C) matmul -> channels stay on lanes,
      output stores are 128-lane dense.
    * 3x3 conv: in-kernel im2col against a zero-padded VMEM scratch; 9 shifted
      (Ho*Wo, C) x (C, Cout) MXU matmuls accumulated in f32.
    """
    C = pad_ref.shape[-1]
    Cout = o_ref.shape[-1]

    # bilinear upsample + lateral skip-add (f32)
    t = jnp.dot(u_ref[...], p_ref[...].astype(jnp.float32),
                preferred_element_type=jnp.float32)
    t = t + lat_ref[...].astype(jnp.float32)

    # zero-padded scratch (== conv padding of 1)
    pad_ref[...] = jnp.zeros_like(pad_ref)
    pad_ref[1:Ho + 1, 1:Wo + 1, :] = t.reshape(Ho, Wo, C).astype(pad_ref.dtype)

    # 9-tap in-kernel im2col
    acc = jnp.zeros((Ho * Wo, Cout), jnp.float32)
    for ky in range(3):
        for kx in range(3):
            win = pad_ref[ky:ky + Ho, kx:kx + Wo, :].reshape(Ho * Wo, C)
            acc = acc + jnp.dot(win, w_ref[ky * 3 + kx],
                                preferred_element_type=jnp.float32)

    o_ref[...] = jnp.maximum(acc + b_ref[...], 0.0).astype(o_ref.dtype)


def _final_kernel(p2_ref, p3_ref, p4_ref, p5_ref, u3_ref, u4_ref, u5_ref, o_ref):
    """Fused final upsamples + channel concat; NHWC->NCHW folded into the store."""
    C = p2_ref.shape[-1]

    def up(u_r, p_r):
        return jnp.dot(u_r[...], p_r[...].astype(jnp.float32),
                       preferred_element_type=jnp.float32)

    # o_ref is the (512, H2*W2) NCHW slab for this image.
    o_ref[0 * C:1 * C, :] = p2_ref[...].astype(jnp.float32).T
    o_ref[1 * C:2 * C, :] = up(u3_ref, p3_ref).T
    o_ref[2 * C:3 * C, :] = up(u4_ref, p4_ref).T
    o_ref[3 * C:4 * C, :] = up(u5_ref, p5_ref).T


# ----------------------------------------------------------------------------
# Pallas wrappers
# ----------------------------------------------------------------------------
def _pick_tm(M, Kin, bytes_per_elem=2, vmem_budget=4 << 20, cap=256):
    """Largest multiple of 8 that divides M, capped by a VMEM byte budget.

    cap<=256 keeps >=2 grid steps for large M (so the 'parallel' axis can be
    sharded across v7x's two TensorCores) and keeps double-buffered x tiles
    small relative to v7x's 64 MiB VMEM.  Falls back to a full-M block (legal
    full-extent block) only when no multiple-of-8 divisor exists.
    """
    cap = max(8, min(cap, vmem_budget // max(1, 2 * Kin * bytes_per_elem)))
    best = None
    for t in range(8, min(M, cap) + 1, 8):
        if M % t == 0:
            best = t
    return best if best is not None else M


def conv1x1_bn_relu(x_seq, p):
    """x_seq: (N, H*W, Cin) bf16 -> (N, H*W, Cout) bf16, fused conv+BN+ReLU."""
    N, HW, Cin = x_seq.shape
    Cout = p["w"].shape[-1]
    M = N * HW
    tm = _pick_tm(M, Cin)
    x2d = x_seq.reshape(M, Cin)
    out = pl.pallas_call(
        _conv1x1_kernel,
        out_shape=jax.ShapeDtypeStruct((M, Cout), jnp.bfloat16),
        grid=(M // tm,),
        in_specs=[
            pl.BlockSpec((tm, Cin), lambda i: (i, 0)),
            pl.BlockSpec((Cin, Cout), lambda i: (0, 0)),
            pl.BlockSpec((1, Cout), lambda i: (0, 0)),
        ],
        out_specs=pl.BlockSpec((tm, Cout), lambda i: (i, 0)),
        compiler_params=pltpu.CompilerParams(
            dimension_semantics=("parallel",),
            vmem_limit_bytes=VMEM_LIMIT),
    )(x2d, p["w"], p["b"])
    return out.reshape(N, HW, Cout)


def upsample_add_smooth(p_small, lat, U, p, out_hw):
    """relu(BN(conv3x3(bilinear_upsample(p_small) + lat))) in one pallas_call."""
    N, HWs, C = p_small.shape
    Ho, Wo = out_hw
    HWo = Ho * Wo
    Cout = p["w"].shape[-1]
    kernel = functools.partial(_upadd_smooth_kernel, Ho=Ho, Wo=Wo)
    return pl.pallas_call(
        kernel,
        out_shape=jax.ShapeDtypeStruct((N, HWo, Cout), jnp.bfloat16),
        grid=(N,),
        in_specs=[
            pl.BlockSpec((HWo, HWs), lambda n: (0, 0)),          # joint interp U
            pl.BlockSpec((None, HWs, C), lambda n: (n, 0, 0)),   # small level
            pl.BlockSpec((None, HWo, C), lambda n: (n, 0, 0)),   # lateral
            pl.BlockSpec((9, C, Cout), lambda n: (0, 0, 0)),     # 3x3 weights
            pl.BlockSpec((1, Cout), lambda n: (0, 0)),           # folded bias
        ],
        out_specs=pl.BlockSpec((None, HWo, Cout), lambda n: (n, 0, 0)),
        scratch_shapes=[pltpu.VMEM((Ho + 2, Wo + 2, C), jnp.bfloat16)],
        compiler_params=pltpu.CompilerParams(
            dimension_semantics=("parallel",),
            vmem_limit_bytes=VMEM_LIMIT),
    )(U, p_small, lat, p["w"], p["b"])


def final_upsample_concat(p2, p3, p4, p5, U3, U4, U5):
    """Upsample p3/p4/p5 to p2's size, concat on channels, emit NCHW directly."""
    N, HW2, C = p2.shape
    HW3, HW4, HW5 = p3.shape[1], p4.shape[1], p5.shape[1]
    return pl.pallas_call(
        _final_kernel,
        out_shape=jax.ShapeDtypeStruct((N, 4 * C, HW2), jnp.float32),
        grid=(N,),
        in_specs=[
            pl.BlockSpec((None, HW2, C), lambda n: (n, 0, 0)),
            pl.BlockSpec((None, HW3, C), lambda n: (n, 0, 0)),
            pl.BlockSpec((None, HW4, C), lambda n: (n, 0, 0)),
            pl.BlockSpec((None, HW5, C), lambda n: (n, 0, 0)),
            pl.BlockSpec((HW2, HW3), lambda n: (0, 0)),
            pl.BlockSpec((HW2, HW4), lambda n: (0, 0)),
            pl.BlockSpec((HW2, HW5), lambda n: (0, 0)),
        ],
        out_specs=pl.BlockSpec((None, 4 * C, HW2), lambda n: (n, 0, 0)),
        compiler_params=pltpu.CompilerParams(
            dimension_semantics=("parallel",),
            vmem_limit_bytes=VMEM_LIMIT),
    )(p2, p3, p4, p5, U3, U4, U5)


# ----------------------------------------------------------------------------
# Bilinear interpolation matrices (built once on host, become constants)
# ----------------------------------------------------------------------------
def _bilinear_matrix_1d(lout, lin):
    # align_corners=False (half-pixel), matching modern PyTorch F.upsample default.
    m = np.zeros((lout, lin), dtype=np.float32)
    scale = lin / lout
    for i in range(lout):
        src = max((i + 0.5) * scale - 0.5, 0.0)
        i0 = min(int(np.floor(src)), lin - 1)
        i1 = min(i0 + 1, lin - 1)
        w1 = src - i0
        m[i, i0] += 1.0 - w1
        m[i, i1] += w1
    return m


def _joint_bilinear_matrix(out_hw, in_hw):
    """Joint (Ho*Wo, Hi*Wi) matrix so resize is one matmul with C on lanes."""
    Ho, Wo = out_hw
    Hi, Wi = in_hw
    U = np.kron(_bilinear_matrix_1d(Ho, Hi), _bilinear_matrix_1d(Wo, Wi))
    return jnp.asarray(U, jnp.float32)


# ----------------------------------------------------------------------------
# Parameters (deterministic; BN eval-mode folded; weights stored bf16)
# ----------------------------------------------------------------------------
def _make_conv_params(key, cout, cin, k):
    kw, kb = jax.random.split(key)
    std = np.sqrt(2.0 / (k * k * cout))                 # module's custom init
    w = std * jax.random.normal(kw, (cout, cin, k, k), jnp.float32)
    bound = 1.0 / np.sqrt(cin * k * k)                  # PyTorch default bias init
    b = jax.random.uniform(kb, (cout,), jnp.float32, -bound, bound)
    bn_scale = 1.0 / np.sqrt(1.0 + EPS)                 # eval-mode BN fold
    if k == 1:
        w_mat = (jnp.transpose(w[:, :, 0, 0], (1, 0)) * bn_scale)       # (Cin, Cout)
        w_mat = w_mat.astype(jnp.bfloat16)
    else:
        # (ky, kx, Cin, Cout) -> (9, Cin, Cout), tap index = ky*3 + kx
        w_mat = (jnp.transpose(w, (2, 3, 1, 0)) * bn_scale)
        w_mat = w_mat.reshape(k * k, cin, cout).astype(jnp.bfloat16)
    bias = (b * bn_scale).reshape(1, cout).astype(jnp.float32)
    return {"w": w_mat, "b": bias}


def make_params(seed=0):
    keys = jax.random.split(jax.random.PRNGKey(seed), 7)
    return {
        "toplayer": _make_conv_params(keys[0], 128, 512, 1),
        "latlayer1": _make_conv_params(keys[1], 128, 512, 1),
        "latlayer2": _make_conv_params(keys[2], 128, 256, 1),
        "latlayer3": _make_conv_params(keys[3], 128, 128, 1),
        "smooth1": _make_conv_params(keys[4], 128, 128, 3),
        "smooth2": _make_conv_params(keys[5], 128, 128, 3),
        "smooth3": _make_conv_params(keys[6], 128, 128, 3),
    }


# ----------------------------------------------------------------------------
# Forward pass (mirrors merge.forward); inputs/outputs are NCHW like PyTorch.
# ----------------------------------------------------------------------------
def merge_forward(params, c2, c3, c4, c5):
    def to_seq(x):  # NCHW f32 -> (N, H*W, C) bf16, channels on the lane axis
        n, c, h, w = x.shape
        xs = jnp.transpose(x, (0, 2, 3, 1)).reshape(n, h * w, c)
        return xs.astype(jnp.bfloat16), (h, w)

    x5, (H5, W5) = to_seq(c5)
    x4, (H4, W4) = to_seq(c4)
    x3, (H3, W3) = to_seq(c3)
    x2, (H2, W2) = to_seq(c2)
    N = c2.shape[0]

    # lateral / top 1x1 convs (+BN+ReLU)
    p5 = conv1x1_bn_relu(x5, params["toplayer"])
    l4 = conv1x1_bn_relu(x4, params["latlayer1"])
    l3 = conv1x1_bn_relu(x3, params["latlayer2"])
    l2 = conv1x1_bn_relu(x2, params["latlayer3"])

    # joint bilinear interpolation matrices (trace-time constants)
    U54 = _joint_bilinear_matrix((H4, W4), (H5, W5))
    U43 = _joint_bilinear_matrix((H3, W3), (H4, W4))
    U32 = _joint_bilinear_matrix((H2, W2), (H3, W3))
    U42 = _joint_bilinear_matrix((H2, W2), (H4, W4))
    U52 = _joint_bilinear_matrix((H2, W2), (H5, W5))

    # fused _upsample_add + smooth (conv3x3+BN+ReLU), one kernel per level
    p4 = upsample_add_smooth(p5, l4, U54, params["smooth1"], (H4, W4))
    p3 = upsample_add_smooth(p4, l3, U43, params["smooth2"], (H3, W3))
    p2 = upsample_add_smooth(p3, l2, U32, params["smooth3"], (H2, W2))

    # fused final upsamples + concat; NCHW produced inside the kernel
    out = final_upsample_concat(p2, p3, p4, p5, U32, U42, U52)  # (N, 512, H2*W2)
    return out.reshape(N, 4 * 128, H2, W2)


# ----------------------------------------------------------------------------
if __name__ == "__main__":
    key = jax.random.PRNGKey(0)
    k2, k3, k4, k5 = jax.random.split(key, 4)
    N = 2
    # FPN-style pyramid: spatial halves per level, channels per module spec.
    c2 = jax.random.normal(k2, (N, 128, 16, 16), jnp.float32)
    c3 = jax.random.normal(k3, (N, 256, 8, 8), jnp.float32)
    c4 = jax.random.normal(k4, (N, 512, 4, 4), jnp.float32)
    c5 = jax.random.normal(k5, (N, 512, 2, 2), jnp.float32)

    params = make_params(seed=0)

    fwd = jax.jit(merge_forward)
    out = fwd(params, c2, c3, c4, c5)
    jax.block_until_ready(out)

    assert out.shape == (N, 512, 16, 16), out.shape
    assert bool(jnp.all(jnp.isfinite(out)))
    print("KERNEL_OK")
</pallas_src>

<mosaic_0001>
module attributes {stable_mosaic.version = 11 : i64} {
  func.func @_conv1x1_kernel(%arg0: i32, %arg1: memref<8x512xbf16, #tpu.memory_space<vmem>>, %arg2: memref<512x128xbf16, #tpu.memory_space<vmem>>, %arg3: memref<1x128xf32, #tpu.memory_space<vmem>>, %arg4: memref<8x128xbf16, #tpu.memory_space<vmem>>) attributes {dimension_semantics = [#tpu.dimension_semantics<parallel>], iteration_bounds = array<i64: 1>, scalar_prefetch = 0 : i64, scratch_operands = 0 : i64, tpu.core_type = #tpu.core_type<tc>, window_params = [{transform_indices = @transform_0, window_bounds = array<i64: 8, 512>}, {pipeline_mode = #tpu.pipeline_mode<synchronous>, transform_indices = @transform_1, window_bounds = array<i64: 512, 128>}, {pipeline_mode = #tpu.pipeline_mode<synchronous>, transform_indices = @transform_2, window_bounds = array<i64: 1, 128>}, {transform_indices = @transform_3, window_bounds = array<i64: 8, 128>}]} {
    %c0 = arith.constant 0 : index
    %c0_0 = arith.constant 0 : index
    %0 = vector.load %arg1[%c0, %c0_0] : memref<8x512xbf16, #tpu.memory_space<vmem>>, vector<8x512xbf16>
    %c0_1 = arith.constant 0 : index
    %c0_2 = arith.constant 0 : index
    %1 = vector.load %arg2[%c0_1, %c0_2] : memref<512x128xbf16, #tpu.memory_space<vmem>>, vector<512x128xbf16>
    %cst = arith.constant dense<0.000000e+00> : vector<8x128xf32>
    %2 = tpu.matmul %0, %1, %cst {dimension_numbers = #tpu.dot_dimension_numbers<[1], [0], [0], [1], [0, 0, 1, 1], [], []>} : vector<8x512xbf16>, vector<512x128xbf16>, vector<8x128xf32> -> vector<8x128xf32>
    %c0_3 = arith.constant 0 : index
    %c0_4 = arith.constant 0 : index
    %3 = vector.load %arg3[%c0_3, %c0_4] : memref<1x128xf32, #tpu.memory_space<vmem>>, vector<1x128xf32>
    %4 = vector.broadcast %3 : vector<1x128xf32> to vector<8x128xf32>
    %5 = arith.addf %2, %4 : vector<8x128xf32>
    %cst_5 = arith.constant 0.000000e+00 : f32
    %6 = vector.broadcast %cst_5 : f32 to vector<8x128xf32>
    %7 = arith.maximumf %5, %6 : vector<8x128xf32>
    %8 = arith.truncf %7 : vector<8x128xf32> to vector<8x128xbf16>
    %c0_6 = arith.constant 0 : index
    %c0_7 = arith.constant 0 : index
    %9 = vector.load %arg4[%c0_6, %c0_7] : memref<8x128xbf16, #tpu.memory_space<vmem>>, vector<8x128xbf16>
    tpu.vector_store %arg4[%c0_6, %c0_7], %8 {strides = array<i32>} : memref<8x128xbf16, #tpu.memory_space<vmem>>, vector<8x128xbf16>,
    return
  }
  func.func @transform_0(%arg0: i32) -> (i32, i32) {
    %c0_i32 = arith.constant 0 : i32
    %c0_i32_0 = arith.constant 0 : i32
    return %arg0, %c0_i32 : i32, i32
  }
  func.func @transform_1(%arg0: i32) -> (i32, i32) {
    %c0_i32 = arith.constant 0 : i32
    %c0_i32_0 = arith.constant 0 : i32
    %c0_i32_1 = arith.constant 0 : i32
    return %c0_i32, %c0_i32_0 : i32, i32
  }
  func.func @transform_2(%arg0: i32) -> (i32, i32) {
    %c0_i32 = arith.constant 0 : i32
    %c0_i32_0 = arith.constant 0 : i32
    %c0_i32_1 = arith.constant 0 : i32
    return %c0_i32, %c0_i32_0 : i32, i32
  }
  func.func @transform_3(%arg0: i32) -> (i32, i32) {
    %c0_i32 = arith.constant 0 : i32
    %c0_i32_0 = arith.constant 0 : i32
    return %arg0, %c0_i32 : i32, i32
  }
}

module attributes {stable_mosaic.version = 11 : i64} {
  func.func @_upadd_smooth_kernel(%arg0: i32, %arg1: memref<16x4xf32, #tpu.memory_space<vmem>>, %arg2: memref<1x4x128xbf16, #tpu.memory_space<vmem>>, %arg3: memref<1x16x128xbf16, #tpu.memory_space<vmem>>, %arg4: memref<9x128x128xbf16, #tpu.memory_space<vmem>>, %arg5: memref<1x128xf32, #tpu.memory_space<vmem>>, %arg6: memref<1x16x128xbf16, #tpu.memory_space<vmem>>, %arg7: memref<6x6x128xbf16, #tpu.memory_space<vmem>>) attributes {dimension_semantics = [#tpu.dimension_semantics<parallel>], iteration_bounds = array<i64: 2>, scalar_prefetch = 0 : i64, scratch_operands = 1 : i64, tpu.core_type = #tpu.core_type<tc>, window_params = [{pipeline_mode = #tpu.pipeline_mode<synchronous>, transform_indices = @transform_0, window_bounds = array<i64: 16, 4>}, {transform_indices = @transform_1, window_bounds = array<i64: 1, 4, 128>}, {transform_indices = @transform_2, window_bounds = array<i64: 1, 16, 128>}, {pipeline_mode = #tpu.pipeline_mode<synchronous>, transform_indices = @transform_3, window_bounds = array<i64: 9, 128, 128>}, {pipeline_mode = #tpu.pipeline_mode<synchronous>, transform_indices = @transform_4, window_bounds = array<i64: 1, 128>}, {transform_indices = @transform_5, window_bounds = array<i64: 1, 16, 128>}]} {
    %c0 = arith.constant 0 : index
    %c0_0 = arith.constant 0 : index
    %0 = vector.load %arg1[%c0, %c0_0] : memref<16x4xf32, #tpu.memory_space<vmem>>, vector<16x4xf32>
    %c0_1 = arith.constant 0 : index
    %c0_2 = arith.constant 0 : index
    %c0_3 = arith.constant 0 : index
    %1 = vector.load %arg2[%c0_1, %c0_2, %c0_3] : memref<1x4x128xbf16, #tpu.memory_space<vmem>>, vector<1x4x128xbf16>
    %2 = vector.shape_cast %1 : vector<1x4x128xbf16> to vector<4x128xbf16>
    %3 = arith.extf %2 : vector<4x128xbf16> to vector<4x128xf32>
    %cst = arith.constant dense<0.000000e+00> : vector<16x128xf32>
    %4 = tpu.matmul %0, %3, %cst {dimension_numbers = #tpu.dot_dimension_numbers<[1], [0], [0], [1], [0, 0, 1, 1], [], []>} : vector<16x4xf32>, vector<4x128xf32>, vector<16x128xf32> -> vector<16x128xf32>
    %c0_4 = arith.constant 0 : index
    %c0_5 = arith.constant 0 : index
    %c0_6 = arith.constant 0 : index
    %5 = vector.load %arg3[%c0_4, %c0_5, %c0_6] : memref<1x16x128xbf16, #tpu.memory_space<vmem>>, vector<1x16x128xbf16>
    %6 = vector.shape_cast %5 : vector<1x16x128xbf16> to vector<16x128xbf16>
    %7 = arith.extf %6 : vector<16x128xbf16> to vector<16x128xf32>
    %8 = arith.addf %4, %7 : vector<16x128xf32>
    %cst_7 = arith.constant 0.000000e+00 : bf16
    %9 = vector.broadcast %cst_7 : bf16 to vector<6x6x128xbf16>
    %c0_8 = arith.constant 0 : index
    %c0_9 = arith.constant 0 : index
    %c0_10 = arith.constant 0 : index
    %10 = vector.load %arg7[%c0_8, %c0_9, %c0_10] : memref<6x6x128xbf16, #tpu.memory_space<vmem>>, vector<6x6x128xbf16>
    tpu.vector_store %arg7[%c0_8, %c0_9, %c0_10], %9 {strides = array<i32>} : memref<6x6x128xbf16, #tpu.memory_space<vmem>>, vector<6x6x128xbf16>,
    %11 = vector.shape_cast %8 : vector<16x128xf32> to vector<4x4x128xf32>
    %12 = arith.truncf %11 : vector<4x4x128xf32> to vector<4x4x128xbf16>
    %c1 = arith.constant 1 : index
    %c1_11 = arith.constant 1 : index
    %c0_12 = arith.constant 0 : index
    %13 = vector.load %arg7[%c1, %c1_11, %c0_12] : memref<6x6x128xbf16, #tpu.memory_space<vmem>>, vector<4x4x128xbf16>
    tpu.vector_store %arg7[%c1, %c1_11, %c0_12], %12 {strides = array<i32>} : memref<6x6x128xbf16, #tpu.memory_space<vmem>>, vector<4x4x128xbf16>,
    %cst_13 = arith.constant 0.000000e+00 : f32
    %14 = vector.broadcast %cst_13 : f32 to vector<16x128xf32>
    %c0_14 = arith.constant 0 : index
    %c0_15 = arith.constant 0 : index
    %c0_16 = arith.constant 0 : index
    %15 = vector.load %arg7[%c0_14, %c0_15, %c0_16] : memref<6x6x128xbf16, #tpu.memory_space<vmem>>, vector<4x4x128xbf16>
    %16 = vector.shape_cast %15 : vector<4x4x128xbf16> to vector<16x128xbf16>
    %c0_17 = arith.constant 0 : index
    %c0_18 = arith.constant 0 : index
    %c0_19 = arith.constant 0 : index
    %17 = vector.load %arg4[%c0_17, %c0_18, %c0_19] : memref<9x128x128xbf16, #tpu.memory_space<vmem>>, vector<1x128x128xbf16>
    %18 = vector.shape_cast %17 : vector<1x128x128xbf16> to vector<128x128xbf16>
    %cst_20 = arith.constant dense<0.000000e+00> : vector<16x128xf32>
    %19 = tpu.matmul %16, %18, %cst_20 {dimension_numbers = #tpu.dot_dimension_numbers<[1], [0], [0], [1], [0, 0, 1, 1], [], []>} : vector<16x128xbf16>, vector<128x128xbf16>, vector<16x128xf32> -> vector<16x128xf32>
    %20 = arith.addf %14, %19 : vector<16x128xf32>
    %c0_21 = arith.constant 0 : index
    %c1_22 = arith.constant 1 : index
    %c0_23 = arith.constant 0 : index
    %21 = vector.load %arg7[%c0_21, %c1_22, %c0_23] : memref<6x6x128xbf16, #tpu.memory_space<vmem>>, vector<4x4x128xbf16>
    %22 = vector.shape_cast %21 : vector<4x4x128xbf16> to vector<16x128xbf16>
    %c1_24 = arith.constant 1 : index
    %c0_25 = arith.constant 0 : index
    %c0_26 = arith.constant 0 : index
    %23 = vector.load %arg4[%c1_24, %c0_25, %c0_26] : memref<9x128x128xbf16, #tpu.memory_space<vmem>>, vector<1x128x128xbf16>
    %24 = vector.shape_cast %23 : vector<1x128x128xbf16> to vector<128x128xbf16>
    %cst_27 = arith.constant dense<0.000000e+00> : vector<16x128xf32>
    %25 = tpu.matmul %22, %24, %cst_27 {dimension_numbers = #tpu.dot_dimension_numbers<[1], [0], [0], [1], [0, 0, 1, 1], [], []>} : vector<16x128xbf16>, vector<128x128xbf16>, vector<16x128xf32> -> vector<16x128xf32>
    %26 = arith.addf %20, %25 : vector<16x128xf32>
    %c0_28 = arith.constant 0 : index
    %c2 = arith.constant 2 : index
    %c0_29 = arith.constant 0 : index
    %27 = vector.load %arg7[%c0_28, %c2, %c0_29] : memref<6x6x128xbf16, #tpu.memory_space<vmem>>, vector<4x4x128xbf16>
    %28 = vector.shape_cast %27 : vector<4x4x128xbf16> to vector<16x128xbf16>
    %c2_30 = arith.constant 2 : index
    %c0_31 = arith.constant 0 : index
    %c0_32 = arith.constant 0 : index
    %29 = vector.load %arg4[%c2_30, %c0_31, %c0_32] : memref<9x128x128xbf16, #tpu.memory_space<vmem>>, vector<1x128x128xbf16>
    %30 = vector.shape_cast %29 : vector<1x128x128xbf16> to vector<128x128xbf16>
    %cst_33 = arith.constant dense<0.000000e+00> : vector<16x128xf32>
    %31 = tpu.matmul %28, %30, %cst_33 {dimension_numbers = #tpu.dot_dimension_numbers<[1], [0], [0], [1], [0, 0, 1, 1], [], []>} : vector<16x128xbf16>, vector<128x128xbf16>, vector<16x128xf32> -> vector<16x128xf32>
    %32 = arith.addf %26, %31 : vector<16x128xf32>
    %c1_34 = arith.constant 1 : index
    %c0_35 = arith.constant 0 : index
    %c0_36 = arith.constant 0 : index
    %33 = vector.load %arg7[%c1_34, %c0_35, %c0_36] : memref<6x6x128xbf16, #tpu.memory_space<vmem>>, vector<4x4x128xbf16>
    %34 = vector.shape_cast %33 : vector<4x4x128xbf16> to vector<16x128xbf16>
    %c3 = arith.constant 3 : index
    %c0_37 = arith.constant 0 : index
    %c0_38 = arith.constant 0 : index
    %35 = vector.load %arg4[%c3, %c0_37, %c0_38] : memref<9x128x128xbf16, #tpu.memory_space<vmem>>, vector<1x128x128xbf16>
    %36 = vector.shape_cast %35 : vector<1x128x128xbf16> to vector<128x128xbf16>
    %cst_39 = arith.constant dense<0.000000e+00> : vector<16x128xf32>
    %37 = tpu.matmul %34, %36, %cst_39 {dimension_numbers = #tpu.dot_dimension_numbers<[1], [0], [0], [1], [0, 0, 1, 1], [], []>} : vector<16x128xbf16>, vector<128x128xbf16>, vector<16x128xf32> -> vector<16x128xf32>
    %38 = arith.addf %32, %37 : vector<16x128xf32>
    %c1_40 = arith.constant 1 : index
    %c1_41 = arith.constant 1 : index
    %c0_42 = arith.constant 0 : index
    %39 = vector.load %arg7[%c1_40, %c1_41, %c0_42] : memref<6x6x128xbf16, #tpu.memory_space<vmem>>, vector<4x4x128xbf16>
    %40 = vector.shape_cast %39 : vector<4x4x128xbf16> to vector<16x128xbf16>
    %c4 = arith.constant 4 : index
    %c0_43 = arith.constant 0 : index
    %c0_44 = arith.constant 0 : index
    %41 = vector.load %arg4[%c4, %c0_43, %c0_44] : memref<9x128x128xbf16, #tpu.memory_space<vmem>>, vector<1x128x128xbf16>
    %42 = vector.shape_cast %41 : vector<1x128x128xbf16> to vector<128x128xbf16>
    %cst_45 = arith.constant dense<0.000000e+00> : vector<16x128xf32>
    %43 = tpu.matmul %40, %42, %cst_45 {dimension_numbers = #tpu.dot_dimension_numbers<[1], [0], [0], [1], [0, 0, 1, 1], [], []>} : vector<16x128xbf16>, vector<128x128xbf16>, vector<16x128xf32> -> vector<16x128xf32>
    %44 = arith.addf %38, %43 : vector<16x128xf32>
    %c1_46 = arith.constant 1 : index
    %c2_47 = arith.constant 2 : index
    %c0_48 = arith.constant 0 : index
    %45 = vector.load %arg7[%c1_46, %c2_47, %c0_48] : memref<6x6x128xbf16, #tpu.memory_space<vmem>>, vector<4x4x128xbf16>
    %46 = vector.shape_cast %45 : vector<4x4x128xbf16> to vector<16x128xbf16>
    %c5 = arith.constant 5 : index
    %c0_49 = arith.constant 0 : index
    %c0_50 = arith.constant 0 : index
    %47 = vector.load %arg4[%c5, %c0_49, %c0_50] : memref<9x128x128xbf16, #tpu.memory_space<vmem>>, vector<1x128x128xbf16>
    %48 = vector.shape_cast %47 : vector<1x128x128xbf16> to vector<128x128xbf16>
    %cst_51 = arith.constant dense<0.000000e+00> : vector<16x128xf32>
    %49 = tpu.matmul %46, %48, %cst_51 {dimension_numbers = #tpu.dot_dimension_numbers<[1], [0], [0], [1], [0, 0, 1, 1], [], []>} : vector<16x128xbf16>, vector<128x128xbf16>, vector<16x128xf32> -> vector<16x128xf32>
    %50 = arith.addf %44, %49 : vector<16x128xf32>
    %c2_52 = arith.constant 2 : index
    %c0_53 = arith.constant 0 : index
    %c0_54 = arith.constant 0 : index
    %51 = vector.load %arg7[%c2_52, %c0_53, %c0_54] : memref<6x6x128xbf16, #tpu.memory_space<vmem>>, vector<4x4x128xbf16>
    %52 = vector.shape_cast %51 : vector<4x4x128xbf16> to vector<16x128xbf16>
    %c6 = arith.constant 6 : index
    %c0_55 = arith.constant 0 : index
    %c0_56 = arith.constant 0 : index
    %53 = vector.load %arg4[%c6, %c0_55, %c0_56] : memref<9x128x128xbf16, #tpu.memory_space<vmem>>, vector<1x128x128xbf16>
    %54 = vector.shape_cast %53 : vector<1x128x128xbf16> to vector<128x128xbf16>
    %cst_57 = arith.constant dense<0.000000e+00> : vector<16x128xf32>
    %55 = tpu.matmul %52, %54, %cst_57 {dimension_numbers = #tpu.dot_dimension_numbers<[1], [0], [0], [1], [0, 0, 1, 1], [], []>} : vector<16x128xbf16>, vector<128x128xbf16>, vector<16x128xf32> -> vector<16x128xf32>
    %56 = arith.addf %50, %55 : vector<16x128xf32>
    %c2_58 = arith.constant 2 : index
    %c1_59 = arith.constant 1 : index
    %c0_60 = arith.constant 0 : index
    %57 = vector.load %arg7[%c2_58, %c1_59, %c0_60] : memref<6x6x128xbf16, #tpu.memory_space<vmem>>, vector<4x4x128xbf16>
    %58 = vector.shape_cast %57 : vector<4x4x128xbf16> to vector<16x128xbf16>
    %c7 = arith.constant 7 : index
    %c0_61 = arith.constant 0 : index
    %c0_62 = arith.constant 0 : index
    %59 = vector.load %arg4[%c7, %c0_61, %c0_62] : memref<9x128x128xbf16, #tpu.memory_space<vmem>>, vector<1x128x128xbf16>
    %60 = vector.shape_cast %59 : vector<1x128x128xbf16> to vector<128x128xbf16>
    %cst_63 = arith.constant dense<0.000000e+00> : vector<16x128xf32>
    %61 = tpu.matmul %58, %60, %cst_63 {dimension_numbers = #tpu.dot_dimension_numbers<[1], [0], [0], [1], [0, 0, 1, 1], [], []>} : vector<16x128xbf16>, vector<128x128xbf16>, vector<16x128xf32> -> vector<16x128xf32>
    %62 = arith.addf %56, %61 : vector<16x128xf32>
    %c2_64 = arith.constant 2 : index
    %c2_65 = arith.constant 2 : index
    %c0_66 = arith.constant 0 : index
    %63 = vector.load %arg7[%c2_64, %c2_65, %c0_66] : memref<6x6x128xbf16, #tpu.memory_space<vmem>>, vector<4x4x128xbf16>
    %64 = vector.shape_cast %63 : vector<4x4x128xbf16> to vector<16x128xbf16>
    %c8 = arith.constant 8 : index
    %c0_67 = arith.constant 0 : index
    %c0_68 = arith.constant 0 : index
    %65 = vector.load %arg4[%c8, %c0_67, %c0_68] : memref<9x128x128xbf16, #tpu.memory_space<vmem>>, vector<1x128x128xbf16>
    %66 = vector.shape_cast %65 : vector<1x128x128xbf16> to vector<128x128xbf16>
    %cst_69 = arith.constant dense<0.000000e+00> : vector<16x128xf32>
    %67 = tpu.matmul %64, %66, %cst_69 {dimension_numbers = #tpu.dot_dimension_numbers<[1], [0], [0], [1], [0, 0, 1, 1], [], []>} : vector<16x128xbf16>, vector<128x128xbf16>, vector<16x128xf32> -> vector<16x128xf32>
    %68 = arith.addf %62, %67 : vector<16x128xf32>
    %c0_70 = arith.constant 0 : index
    %c0_71 = arith.constant 0 : index
    %69 = vector.load %arg5[%c0_70, %c0_71] : memref<1x128xf32, #tpu.memory_space<vmem>>, vector<1x128xf32>
    %70 = vector.broadcast %69 : vector<1x128xf32> to vector<16x128xf32>
    %71 = arith.addf %68, %70 : vector<16x128xf32>
    %cst_72 = arith.constant 0.000000e+00 : f32
    %72 = vector.broadcast %cst_72 : f32 to vector<16x128xf32>
    %73 = arith.maximumf %71, %72 : vector<16x128xf32>
    %74 = arith.truncf %73 : vector<16x128xf32> to vector<16x128xbf16>
    %c0_73 = arith.constant 0 : index
    %c0_74 = arith.constant 0 : index
    %c0_75 = arith.constant 0 : index
    %75 = vector.load %arg6[%c0_73, %c0_74, %c0_75] : memref<1x16x128xbf16, #tpu.memory_space<vmem>>, vector<1x16x128xbf16>
    %76 = vector.shape_cast %75 : vector<1x16x128xbf16> to vector<16x128xbf16>
    %77 = vector.shape_cast %74 : vector<16x128xbf16> to vector<1x16x128xbf16>
    tpu.vector_store %arg6[%c0_73, %c0_74, %c0_75], %77 {strides = array<i32>} : memref<1x16x128xbf16, #tpu.memory_space<vmem>>, vector<1x16x128xbf16>,
    return
  }
  func.func @transform_0(%arg0: i32) -> (i32, i32) {
    %c0_i32 = arith.constant 0 : i32
    %c0_i32_0 = arith.constant 0 : i32
    %c0_i32_1 = arith.constant 0 : i32
    return %c0_i32, %c0_i32_0 : i32, i32
  }
  func.func @transform_1(%arg0: i32) -> (i32, i32, i32) {
    %c0_i32 = arith.constant 0 : i32
    %c0_i32_0 = arith.constant 0 : i32
    %c0_i32_1 = arith.constant 0 : i32
    return %arg0, %c0_i32, %c0_i32_0 : i32, i32, i32
  }
  func.func @transform_2(%arg0: i32) -> (i32, i32, i32) {
    %c0_i32 = arith.constant 0 : i32
    %c0_i32_0 = arith.constant 0 : i32
    %c0_i32_1 = arith.constant 0 : i32
    return %arg0, %c0_i32, %c0_i32_0 : i32, i32, i32
  }
  func.func @transform_3(%arg0: i32) -> (i32, i32, i32) {
    %c0_i32 = arith.constant 0 : i32
    %c0_i32_0 = arith.constant 0 : i32
    %c0_i32_1 = arith.constant 0 : i32
    %c0_i32_2 = arith.constant 0 : i32
    return %c0_i32, %c0_i32_0, %c0_i32_1 : i32, i32, i32
  }
  func.func @transform_4(%arg0: i32) -> (i32, i32) {
    %c0_i32 = arith.constant 0 : i32
    %c0_i32_0 = arith.constant 0 : i32
    %c0_i32_1 = arith.constant 0 : i32
    return %c0_i32, %c0_i32_0 : i32, i32
  }
  func.func @transform_5(%arg0: i32) -> (i32, i32, i32) {
    %c0_i32 = arith.constant 0 : i32
    %c0_i32_0 = arith.constant 0 : i32
    %c0_i32_1 = arith.constant 0 : i32
    return %arg0, %c0_i32, %c0_i32_0 : i32, i32, i32
  }
}

module attributes {stable_mosaic.version = 11 : i64} {
  func.func @_conv1x1_kernel(%arg0: i32, %arg1: memref<128x256xbf16, #tpu.memory_space<vmem>>, %arg2: memref<256x128xbf16, #tpu.memory_space<vmem>>, %arg3: memref<1x128xf32, #tpu.memory_space<vmem>>, %arg4: memref<128x128xbf16, #tpu.memory_space<vmem>>) attributes {dimension_semantics = [#tpu.dimension_semantics<parallel>], iteration_bounds = array<i64: 1>, scalar_prefetch = 0 : i64, scratch_operands = 0 : i64, tpu.core_type = #tpu.core_type<tc>, window_params = [{transform_indices = @transform_0, window_bounds = array<i64: 128, 256>}, {pipeline_mode = #tpu.pipeline_mode<synchronous>, transform_indices = @transform_1, window_bounds = array<i64: 256, 128>}, {pipeline_mode = #tpu.pipeline_mode<synchronous>, transform_indices = @transform_2, window_bounds = array<i64: 1, 128>}, {transform_indices = @transform_3, window_bounds = array<i64: 128, 128>}]} {
    %c0 = arith.constant 0 : index
    %c0_0 = arith.constant 0 : index
    %0 = vector.load %arg1[%c0, %c0_0] : memref<128x256xbf16, #tpu.memory_space<vmem>>, vector<128x256xbf16>
    %c0_1 = arith.constant 0 : index
    %c0_2 = arith.constant 0 : index
    %1 = vector.load %arg2[%c0_1, %c0_2] : memref<256x128xbf16, #tpu.memory_space<vmem>>, vector<256x128xbf16>
    %cst = arith.constant dense<0.000000e+00> : vector<128x128xf32>
    %2 = tpu.matmul %0, %1, %cst {dimension_numbers = #tpu.dot_dimension_numbers<[1], [0], [0], [1], [0, 0, 1, 1], [], []>} : vector<128x256xbf16>, vector<256x128xbf16>, vector<128x128xf32> -> vector<128x128xf32>
    %c0_3 = arith.constant 0 : index
    %c0_4 = arith.constant 0 : index
    %3 = vector.load %arg3[%c0_3, %c0_4] : memref<1x128xf32, #tpu.memory_space<vmem>>, vector<1x128xf32>
    %4 = vector.broadcast %3 : vector<1x128xf32> to vector<128x128xf32>
    %5 = arith.addf %2, %4 : vector<128x128xf32>
    %cst_5 = arith.constant 0.000000e+00 : f32
    %6 = vector.broadcast %cst_5 : f32 to vector<128x128xf32>
    %7 = arith.maximumf %5, %6 : vector<128x128xf32>
    %8 = arith.truncf %7 : vector<128x128xf32> to vector<128x128xbf16>
    %c0_6 = arith.constant 0 : index
    %c0_7 = arith.constant 0 : index
    %9 = vector.load %arg4[%c0_6, %c0_7] : memref<128x128xbf16, #tpu.memory_space<vmem>>, vector<128x128xbf16>
    tpu.vector_store %arg4[%c0_6, %c0_7], %8 {strides = array<i32>} : memref<128x128xbf16, #tpu.memory_space<vmem>>, vector<128x128xbf16>,
    return
  }
  func.func @transform_0(%arg0: i32) -> (i32, i32) {
    %c0_i32 = arith.constant 0 : i32
    %c0_i32_0 = arith.constant 0 : i32
    return %arg0, %c0_i32 : i32, i32
  }
  func.func @transform_1(%arg0: i32) -> (i32, i32) {
    %c0_i32 = arith.constant 0 : i32
    %c0_i32_0 = arith.constant 0 : i32
    %c0_i32_1 = arith.constant 0 : i32
    return %c0_i32, %c0_i32_0 : i32, i32
  }
  func.func @transform_2(%arg0: i32) -> (i32, i32) {
    %c0_i32 = arith.constant 0 : i32
    %c0_i32_0 = arith.constant 0 : i32
    %c0_i32_1 = arith.constant 0 : i32
    return %c0_i32, %c0_i32_0 : i32, i32
  }
  func.func @transform_3(%arg0: i32) -> (i32, i32) {
    %c0_i32 = arith.constant 0 : i32
    %c0_i32_0 = arith.constant 0 : i32
    return %arg0, %c0_i32 : i32, i32
  }
}

module attributes {stable_mosaic.version = 11 : i64} {
  func.func @_conv1x1_kernel(%arg0: i32, %arg1: memref<32x512xbf16, #tpu.memory_space<vmem>>, %arg2: memref<512x128xbf16, #tpu.memory_space<vmem>>, %arg3: memref<1x128xf32, #tpu.memory_space<vmem>>, %arg4: memref<32x128xbf16, #tpu.memory_space<vmem>>) attributes {dimension_semantics = [#tpu.dimension_semantics<parallel>], iteration_bounds = array<i64: 1>, scalar_prefetch = 0 : i64, scratch_operands = 0 : i64, tpu.core_type = #tpu.core_type<tc>, window_params = [{transform_indices = @transform_0, window_bounds = array<i64: 32, 512>}, {pipeline_mode = #tpu.pipeline_mode<synchronous>, transform_indices = @transform_1, window_bounds = array<i64: 512, 128>}, {pipeline_mode = #tpu.pipeline_mode<synchronous>, transform_indices = @transform_2, window_bounds = array<i64: 1, 128>}, {transform_indices = @transform_3, window_bounds = array<i64: 32, 128>}]} {
    %c0 = arith.constant 0 : index
    %c0_0 = arith.constant 0 : index
    %0 = vector.load %arg1[%c0, %c0_0] : memref<32x512xbf16, #tpu.memory_space<vmem>>, vector<32x512xbf16>
    %c0_1 = arith.constant 0 : index
    %c0_2 = arith.constant 0 : index
    %1 = vector.load %arg2[%c0_1, %c0_2] : memref<512x128xbf16, #tpu.memory_space<vmem>>, vector<512x128xbf16>
    %cst = arith.constant dense<0.000000e+00> : vector<32x128xf32>
    %2 = tpu.matmul %0, %1, %cst {dimension_numbers = #tpu.dot_dimension_numbers<[1], [0], [0], [1], [0, 0, 1, 1], [], []>} : vector<32x512xbf16>, vector<512x128xbf16>, vector<32x128xf32> -> vector<32x128xf32>
    %c0_3 = arith.constant 0 : index
    %c0_4 = arith.constant 0 : index
    %3 = vector.load %arg3[%c0_3, %c0_4] : memref<1x128xf32, #tpu.memory_space<vmem>>, vector<1x128xf32>
    %4 = vector.broadcast %3 : vector<1x128xf32> to vector<32x128xf32>
    %5 = arith.addf %2, %4 : vector<32x128xf32>
    %cst_5 = arith.constant 0.000000e+00 : f32
    %6 = vector.broadcast %cst_5 : f32 to vector<32x128xf32>
    %7 = arith.maximumf %5, %6 : vector<32x128xf32>
    %8 = arith.truncf %7 : vector<32x128xf32> to vector<32x128xbf16>
    %c0_6 = arith.constant 0 : index
    %c0_7 = arith.constant 0 : index
    %9 = vector.load %arg4[%c0_6, %c0_7] : memref<32x128xbf16, #tpu.memory_space<vmem>>, vector<32x128xbf16>
    tpu.vector_store %arg4[%c0_6, %c0_7], %8 {strides = array<i32>} : memref<32x128xbf16, #tpu.memory_space<vmem>>, vector<32x128xbf16>,
    return
  }
  func.func @transform_0(%arg0: i32) -> (i32, i32) {
    %c0_i32 = arith.constant 0 : i32
    %c0_i32_0 = arith.constant 0 : i32
    return %arg0, %c0_i32 : i32, i32
  }
  func.func @transform_1(%arg0: i32) -> (i32, i32) {
    %c0_i32 = arith.constant 0 : i32
    %c0_i32_0 = arith.constant 0 : i32
    %c0_i32_1 = arith.constant 0 : i32
    return %c0_i32, %c0_i32_0 : i32, i32
  }
  func.func @transform_2(%arg0: i32) -> (i32, i32) {
    %c0_i32 = arith.constant 0 : i32
    %c0_i32_0 = arith.constant 0 : i32
    %c0_i32_1 = arith.constant 0 : i32
    return %c0_i32, %c0_i32_0 : i32, i32
  }
  func.func @transform_3(%arg0: i32) -> (i32, i32) {
    %c0_i32 = arith.constant 0 : i32
    %c0_i32_0 = arith.constant 0 : i32
    return %arg0, %c0_i32 : i32, i32
  }
}

module attributes {stable_mosaic.version = 11 : i64} {
  func.func @_upadd_smooth_kernel(%arg0: i32, %arg1: memref<64x16xf32, #tpu.memory_space<vmem>>, %arg2: memref<1x16x128xbf16, #tpu.memory_space<vmem>>, %arg3: memref<1x64x128xbf16, #tpu.memory_space<vmem>>, %arg4: memref<9x128x128xbf16, #tpu.memory_space<vmem>>, %arg5: memref<1x128xf32, #tpu.memory_space<vmem>>, %arg6: memref<1x64x128xbf16, #tpu.memory_space<vmem>>, %arg7: memref<10x10x128xbf16, #tpu.memory_space<vmem>>) attributes {dimension_semantics = [#tpu.dimension_semantics<parallel>], iteration_bounds = array<i64: 2>, scalar_prefetch = 0 : i64, scratch_operands = 1 : i64, tpu.core_type = #tpu.core_type<tc>, window_params = [{pipeline_mode = #tpu.pipeline_mode<synchronous>, transform_indices = @transform_0, window_bounds = array<i64: 64, 16>}, {transform_indices = @transform_1, window_bounds = array<i64: 1, 16, 128>}, {transform_indices = @transform_2, window_bounds = array<i64: 1, 64, 128>}, {pipeline_mode = #tpu.pipeline_mode<synchronous>, transform_indices = @transform_3, window_bounds = array<i64: 9, 128, 128>}, {pipeline_mode = #tpu.pipeline_mode<synchronous>, transform_indices = @transform_4, window_bounds = array<i64: 1, 128>}, {transform_indices = @transform_5, window_bounds = array<i64: 1, 64, 128>}]} {
    %c0 = arith.constant 0 : index
    %c0_0 = arith.constant 0 : index
    %0 = vector.load %arg1[%c0, %c0_0] : memref<64x16xf32, #tpu.memory_space<vmem>>, vector<64x16xf32>
    %c0_1 = arith.constant 0 : index
    %c0_2 = arith.constant 0 : index
    %c0_3 = arith.constant 0 : index
    %1 = vector.load %arg2[%c0_1, %c0_2, %c0_3] : memref<1x16x128xbf16, #tpu.memory_space<vmem>>, vector<1x16x128xbf16>
    %2 = vector.shape_cast %1 : vector<1x16x128xbf16> to vector<16x128xbf16>
    %3 = arith.extf %2 : vector<16x128xbf16> to vector<16x128xf32>
    %cst = arith.constant dense<0.000000e+00> : vector<64x128xf32>
    %4 = tpu.matmul %0, %3, %cst {dimension_numbers = #tpu.dot_dimension_numbers<[1], [0], [0], [1], [0, 0, 1, 1], [], []>} : vector<64x16xf32>, vector<16x128xf32>, vector<64x128xf32> -> vector<64x128xf32>
    %c0_4 = arith.constant 0 : index
    %c0_5 = arith.constant 0 : index
    %c0_6 = arith.constant 0 : index
    %5 = vector.load %arg3[%c0_4, %c0_5, %c0_6] : memref<1x64x128xbf16, #tpu.memory_space<vmem>>, vector<1x64x128xbf16>
    %6 = vector.shape_cast %5 : vector<1x64x128xbf16> to vector<64x128xbf16>
    %7 = arith.extf %6 : vector<64x128xbf16> to vector<64x128xf32>
    %8 = arith.addf %4, %7 : vector<64x128xf32>
    %cst_7 = arith.constant 0.000000e+00 : bf16
    %9 = vector.broadcast %cst_7 : bf16 to vector<10x10x128xbf16>
    %c0_8 = arith.constant 0 : index
    %c0_9 = arith.constant 0 : index
    %c0_10 = arith.constant 0 : index
    %10 = vector.load %arg7[%c0_8, %c0_9, %c0_10] : memref<10x10x128xbf16, #tpu.memory_space<vmem>>, vector<10x10x128xbf16>
    tpu.vector_store %arg7[%c0_8, %c0_9, %c0_10], %9 {strides = array<i32>} : memref<10x10x128xbf16, #tpu.memory_space<vmem>>, vector<10x10x128xbf16>,
    %11 = vector.shape_cast %8 : vector<64x128xf32> to vector<8x8x128xf32>
    %12 = arith.truncf %11 : vector<8x8x128xf32> to vector<8x8x128xbf16>
    %c1 = arith.constant 1 : index
    %c1_11 = arith.constant 1 : index
    %c0_12 = arith.constant 0 : index
    %13 = vector.load %arg7[%c1, %c1_11, %c0_12] : memref<10x10x128xbf16, #tpu.memory_space<vmem>>, vector<8x8x128xbf16>
    tpu.vector_store %arg7[%c1, %c1_11, %c0_12], %12 {strides = array<i32>} : memref<10x10x128xbf16, #tpu.memory_space<vmem>>, vector<8x8x128xbf16>,
    %cst_13 = arith.constant 0.000000e+00 : f32
    %14 = vector.broadcast %cst_13 : f32 to vector<64x128xf32>
    %c0_14 = arith.constant 0 : index
    %c0_15 = arith.constant 0 : index
    %c0_16 = arith.constant 0 : index
    %15 = vector.load %arg7[%c0_14, %c0_15, %c0_16] : memref<10x10x128xbf16, #tpu.memory_space<vmem>>, vector<8x8x128xbf16>
    %16 = vector.shape_cast %15 : vector<8x8x128xbf16> to vector<64x128xbf16>
    %c0_17 = arith.constant 0 : index
    %c0_18 = arith.constant 0 : index
    %c0_19 = arith.constant 0 : index
    %17 = vector.load %arg4[%c0_17, %c0_18, %c0_19] : memref<9x128x128xbf16, #tpu.memory_space<vmem>>, vector<1x128x128xbf16>
    %18 = vector.shape_cast %17 : vector<1x128x128xbf16> to vector<128x128xbf16>
    %cst_20 = arith.constant dense<0.000000e+00> : vector<64x128xf32>
    %19 = tpu.matmul %16, %18, %cst_20 {dimension_numbers = #tpu.dot_dimension_numbers<[1], [0], [0], [1], [0, 0, 1, 1], [], []>} : vector<64x128xbf16>, vector<128x128xbf16>, vector<64x128xf32> -> vector<64x128xf32>
    %20 = arith.addf %14, %19 : vector<64x128xf32>
    %c0_21 = arith.constant 0 : index
    %c1_22 = arith.constant 1 : index
    %c0_23 = arith.constant 0 : index
    %21 = vector.load %arg7[%c0_21, %c1_22, %c0_23] : memref<10x10x128xbf16, #tpu.memory_space<vmem>>, vector<8x8x128xbf16>
    %22 = vector.shape_cast %21 : vector<8x8x128xbf16> to vector<64x128xbf16>
    %c1_24 = arith.constant 1 : index
    %c0_25 = arith.constant 0 : index
    %c0_26 = arith.constant 0 : index
    %23 = vector.load %arg4[%c1_24, %c0_25, %c0_26] : memref<9x128x128xbf16, #tpu.memory_space<vmem>>, vector<1x128x128xbf16>
    %24 = vector.shape_cast %23 : vector<1x128x128xbf16> to vector<128x128xbf16>
    %cst_27 = arith.constant dense<0.000000e+00> : vector<64x128xf32>
    %25 = tpu.matmul %22, %24, %cst_27 {dimension_numbers = #tpu.dot_dimension_numbers<[1], [0], [0], [1], [0, 0, 1, 1], [], []>} : vector<64x128xbf16>, vector<128x128xbf16>, vector<64x128xf32> -> vector<64x128xf32>
    %26 = arith.addf %20, %25 : vector<64x128xf32>
    %c0_28 = arith.constant 0 : index
    %c2 = arith.constant 2 : index
    %c0_29 = arith.constant 0 : index
    %27 = vector.load %arg7[%c0_28, %c2, %c0_29] : memref<10x10x128xbf16, #tpu.memory_space<vmem>>, vector<8x8x128xbf16>
    %28 = vector.shape_cast %27 : vector<8x8x128xbf16> to vector<64x128xbf16>
    %c2_30 = arith.constant 2 : index
    %c0_31 = arith.constant 0 : index
    %c0_32 = arith.constant 0 : index
    %29 = vector.load %arg4[%c2_30, %c0_31, %c0_32] : memref<9x128x128xbf16, #tpu.memory_space<vmem>>, vector<1x128x128xbf16>
    %30 = vector.shape_cast %29 : vector<1x128x128xbf16> to vector<128x128xbf16>
    %cst_33 = arith.constant dense<0.000000e+00> : vector<64x128xf32>
    %31 = tpu.matmul %28, %30, %cst_33 {dimension_numbers = #tpu.dot_dimension_numbers<[1], [0], [0], [1], [0, 0, 1, 1], [], []>} : vector<64x128xbf16>, vector<128x128xbf16>, vector<64x128xf32> -> vector<64x128xf32>
    %32 = arith.addf %26, %31 : vector<64x128xf32>
    %c1_34 = arith.constant 1 : index
    %c0_35 = arith.constant 0 : index
    %c0_36 = arith.constant 0 : index
    %33 = vector.load %arg7[%c1_34, %c0_35, %c0_36] : memref<10x10x128xbf16, #tpu.memory_space<vmem>>, vector<8x8x128xbf16>
    %34 = vector.shape_cast %33 : vector<8x8x128xbf16> to vector<64x128xbf16>
    %c3 = arith.constant 3 : index
    %c0_37 = arith.constant 0 : index
    %c0_38 = arith.constant 0 : index
    %35 = vector.load %arg4[%c3, %c0_37, %c0_38] : memref<9x128x128xbf16, #tpu.memory_space<vmem>>, vector<1x128x128xbf16>
    %36 = vector.shape_cast %35 : vector<1x128x128xbf16> to vector<128x128xbf16>
    %cst_39 = arith.constant dense<0.000000e+00> : vector<64x128xf32>
    %37 = tpu.matmul %34, %36, %cst_39 {dimension_numbers = #tpu.dot_dimension_numbers<[1], [0], [0], [1], [0, 0, 1, 1], [], []>} : vector<64x128xbf16>, vector<128x128xbf16>, vector<64x128xf32> -> vector<64x128xf32>
    %38 = arith.addf %32, %37 : vector<64x128xf32>
    %c1_40 = arith.constant 1 : index
    %c1_41 = arith.constant 1 : index
    %c0_42 = arith.constant 0 : index
    %39 = vector.load %arg7[%c1_40, %c1_41, %c0_42] : memref<10x10x128xbf16, #tpu.memory_space<vmem>>, vector<8x8x128xbf16>
    %40 = vector.shape_cast %39 : vector<8x8x128xbf16> to vector<64x128xbf16>
    %c4 = arith.constant 4 : index
    %c0_43 = arith.constant 0 : index
    %c0_44 = arith.constant 0 : index
    %41 = vector.load %arg4[%c4, %c0_43, %c0_44] : memref<9x128x128xbf16, #tpu.memory_space<vmem>>, vector<1x128x128xbf16>
    %42 = vector.shape_cast %41 : vector<1x128x128xbf16> to vector<128x128xbf16>
    %cst_45 = arith.constant dense<0.000000e+00> : vector<64x128xf32>
    %43 = tpu.matmul %40, %42, %cst_45 {dimension_numbers = #tpu.dot_dimension_numbers<[1], [0], [0], [1], [0, 0, 1, 1], [], []>} : vector<64x128xbf16>, vector<128x128xbf16>, vector<64x128xf32> -> vector<64x128xf32>
    %44 = arith.addf %38, %43 : vector<64x128xf32>
    %c1_46 = arith.constant 1 : index
    %c2_47 = arith.constant 2 : index
    %c0_48 = arith.constant 0 : index
    %45 = vector.load %arg7[%c1_46, %c2_47, %c0_48] : memref<10x10x128xbf16, #tpu.memory_space<vmem>>, vector<8x8x128xbf16>
    %46 = vector.shape_cast %45 : vector<8x8x128xbf16> to vector<64x128xbf16>
    %c5 = arith.constant 5 : index
    %c0_49 = arith.constant 0 : index
    %c0_50 = arith.constant 0 : index
    %47 = vector.load %arg4[%c5, %c0_49, %c0_50] : memref<9x128x128xbf16, #tpu.memory_space<vmem>>, vector<1x128x128xbf16>
    %48 = vector.shape_cast %47 : vector<1x128x128xbf16> to vector<128x128xbf16>
    %cst_51 = arith.constant dense<0.000000e+00> : vector<64x128xf32>
    %49 = tpu.matmul %46, %48, %cst_51 {dimension_numbers = #tpu.dot_dimension_numbers<[1], [0], [0], [1], [0, 0, 1, 1], [], []>} : vector<64x128xbf16>, vector<128x128xbf16>, vector<64x128xf32> -> vector<64x128xf32>
    %50 = arith.addf %44, %49 : vector<64x128xf32>
    %c2_52 = arith.constant 2 : index
    %c0_53 = arith.constant 0 : index
    %c0_54 = arith.constant 0 : index
    %51 = vector.load %arg7[%c2_52, %c0_53, %c0_54] : memref<10x10x128xbf16, #tpu.memory_space<vmem>>, vector<8x8x128xbf16>
    %52 = vector.shape_cast %51 : vector<8x8x128xbf16> to vector<64x128xbf16>
    %c6 = arith.constant 6 : index
    %c0_55 = arith.constant 0 : index
    %c0_56 = arith.constant 0 : index
    %53 = vector.load %arg4[%c6, %c0_55, %c0_56] : memref<9x128x128xbf16, #tpu.memory_space<vmem>>, vector<1x128x128xbf16>
    %54 = vector.shape_cast %53 : vector<1x128x128xbf16> to vector<128x128xbf16>
    %cst_57 = arith.constant dense<0.000000e+00> : vector<64x128xf32>
    %55 = tpu.matmul %52, %54, %cst_57 {dimension_numbers = #tpu.dot_dimension_numbers<[1], [0], [0], [1], [0, 0, 1, 1], [], []>} : vector<64x128xbf16>, vector<128x128xbf16>, vector<64x128xf32> -> vector<64x128xf32>
    %56 = arith.addf %50, %55 : vector<64x128xf32>
    %c2_58 = arith.constant 2 : index
    %c1_59 = arith.constant 1 : index
    %c0_60 = arith.constant 0 : index
    %57 = vector.load %arg7[%c2_58, %c1_59, %c0_60] : memref<10x10x128xbf16, #tpu.memory_space<vmem>>, vector<8x8x128xbf16>
    %58 = vector.shape_cast %57 : vector<8x8x128xbf16> to vector<64x128xbf16>
    %c7 = arith.constant 7 : index
    %c0_61 = arith.constant 0 : index
    %c0_62 = arith.constant 0 : index
    %59 = vector.load %arg4[%c7, %c0_61, %c0_62] : memref<9x128x128xbf16, #tpu.memory_space<vmem>>, vector<1x128x128xbf16>
    %60 = vector.shape_cast %59 : vector<1x128x128xbf16> to vector<128x128xbf16>
    %cst_63 = arith.constant dense<0.000000e+00> : vector<64x128xf32>
    %61 = tpu.matmul %58, %60, %cst_63 {dimension_numbers = #tpu.dot_dimension_numbers<[1], [0], [0], [1], [0, 0, 1, 1], [], []>} : vector<64x128xbf16>, vector<128x128xbf16>, vector<64x128xf32> -> vector<64x128xf32>
    %62 = arith.addf %56, %61 : vector<64x128xf32>
    %c2_64 = arith.constant 2 : index
    %c2_65 = arith.constant 2 : index
    %c0_66 = arith.constant 0 : index
    %63 = vector.load %arg7[%c2_64, %c2_65, %c0_66] : memref<10x10x128xbf16, #tpu.memory_space<vmem>>, vector<8x8x128xbf16>
    %64 = vector.shape_cast %63 : vector<8x8x128xbf16> to vector<64x128xbf16>
    %c8 = arith.constant 8 : index
    %c0_67 = arith.constant 0 : index
    %c0_68 = arith.constant 0 : index
    %65 = vector.load %arg4[%c8, %c0_67, %c0_68] : memref<9x128x128xbf16, #tpu.memory_space<vmem>>, vector<1x128x128xbf16>
    %66 = vector.shape_cast %65 : vector<1x128x128xbf16> to vector<128x128xbf16>
    %cst_69 = arith.constant dense<0.000000e+00> : vector<64x128xf32>
    %67 = tpu.matmul %64, %66, %cst_69 {dimension_numbers = #tpu.dot_dimension_numbers<[1], [0], [0], [1], [0, 0, 1, 1], [], []>} : vector<64x128xbf16>, vector<128x128xbf16>, vector<64x128xf32> -> vector<64x128xf32>
    %68 = arith.addf %62, %67 : vector<64x128xf32>
    %c0_70 = arith.constant 0 : index
    %c0_71 = arith.constant 0 : index
    %69 = vector.load %arg5[%c0_70, %c0_71] : memref<1x128xf32, #tpu.memory_space<vmem>>, vector<1x128xf32>
    %70 = vector.broadcast %69 : vector<1x128xf32> to vector<64x128xf32>
    %71 = arith.addf %68, %70 : vector<64x128xf32>
    %cst_72 = arith.constant 0.000000e+00 : f32
    %72 = vector.broadcast %cst_72 : f32 to vector<64x128xf32>
    %73 = arith.maximumf %71, %72 : vector<64x128xf32>
    %74 = arith.truncf %73 : vector<64x128xf32> to vector<64x128xbf16>
    %c0_73 = arith.constant 0 : index
    %c0_74 = arith.constant 0 : index
    %c0_75 = arith.constant 0 : index
    %75 = vector.load %arg6[%c0_73, %c0_74, %c0_75] : memref<1x64x128xbf16, #tpu.memory_space<vmem>>, vector<1x64x128xbf16>
    %76 = vector.shape_cast %75 : vector<1x64x128xbf16> to vector<64x128xbf16>
    %77 = vector.shape_cast %74 : vector<64x128xbf16> to vector<1x64x128xbf16>
    tpu.vector_store %arg6[%c0_73, %c0_74, %c0_75], %77 {strides = array<i32>} : memref<1x64x128xbf16, #tpu.memory_space<vmem>>, vector<1x64x128xbf16>,
    return
  }
  func.func @transform_0(%arg0: i32) -> (i32, i32) {
    %c0_i32 = arith.constant 0 : i32
    %c0_i32_0 = arith.constant 0 : i32
    %c0_i32_1 = arith.constant 0 : i32
    return %c0_i32, %c0_i32_0 : i32, i32
  }
  func.func @transform_1(%arg0: i32) -> (i32, i32, i32) {
    %c0_i32 = arith.constant 0 : i32
    %c0_i32_0 = arith.constant 0 : i32
    %c0_i32_1 = arith.constant 0 : i32
    return %arg0, %c0_i32, %c0_i32_0 : i32, i32, i32
  }
  func.func @transform_2(%arg0: i32) -> (i32, i32, i32) {
    %c0_i32 = arith.constant 0 : i32
    %c0_i32_0 = arith.constant 0 : i32
    %c0_i32_1 = arith.constant 0 : i32
    return %arg0, %c0_i32, %c0_i32_0 : i32, i32, i32
  }
  func.func @transform_3(%arg0: i32) -> (i32, i32, i32) {
    %c0_i32 = arith.constant 0 : i32
    %c0_i32_0 = arith.constant 0 : i32
    %c0_i32_1 = arith.constant 0 : i32
    %c0_i32_2 = arith.constant 0 : i32
    return %c0_i32, %c0_i32_0, %c0_i32_1 : i32, i32, i32
  }
  func.func @transform_4(%arg0: i32) -> (i32, i32) {
    %c0_i32 = arith.constant 0 : i32
    %c0_i32_0 = arith.constant 0 : i32
    %c0_i32_1 = arith.constant 0 : i32
    return %c0_i32, %c0_i32_0 : i32, i32
  }
  func.func @transform_5(%arg0: i32) -> (i32, i32, i32) {
    %c0_i32 = arith.constant 0 : i32
    %c0_i32_0 = arith.constant 0 : i32
    %c0_i32_1 = arith.constant 0 : i32
    return %arg0, %c0_i32, %c0_i32_0 : i32, i32, i32
  }
}

module attributes {stable_mosaic.version = 11 : i64} {
  func.func @_conv1x1_kernel(%arg0: i32, %arg1: memref<256x128xbf16, #tpu.memory_space<vmem>>, %arg2: memref<128x128xbf16, #tpu.memory_space<vmem>>, %arg3: memref<1x128xf32, #tpu.memory_space<vmem>>, %arg4: memref<256x128xbf16, #tpu.memory_space<vmem>>) attributes {dimension_semantics = [#tpu.dimension_semantics<parallel>], iteration_bounds = array<i64: 2>, scalar_prefetch = 0 : i64, scratch_operands = 0 : i64, tpu.core_type = #tpu.core_type<tc>, window_params = [{transform_indices = @transform_0, window_bounds = array<i64: 256, 128>}, {pipeline_mode = #tpu.pipeline_mode<synchronous>, transform_indices = @transform_1, window_bounds = array<i64: 128, 128>}, {pipeline_mode = #tpu.pipeline_mode<synchronous>, transform_indices = @transform_2, window_bounds = array<i64: 1, 128>}, {transform_indices = @transform_3, window_bounds = array<i64: 256, 128>}]} {
    %c0 = arith.constant 0 : index
    %c0_0 = arith.constant 0 : index
    %0 = vector.load %arg1[%c0, %c0_0] : memref<256x128xbf16, #tpu.memory_space<vmem>>, vector<256x128xbf16>
    %c0_1 = arith.constant 0 : index
    %c0_2 = arith.constant 0 : index
    %1 = vector.load %arg2[%c0_1, %c0_2] : memref<128x128xbf16, #tpu.memory_space<vmem>>, vector<128x128xbf16>
    %cst = arith.constant dense<0.000000e+00> : vector<256x128xf32>
    %2 = tpu.matmul %0, %1, %cst {dimension_numbers = #tpu.dot_dimension_numbers<[1], [0], [0], [1], [0, 0, 1, 1], [], []>} : vector<256x128xbf16>, vector<128x128xbf16>, vector<256x128xf32> -> vector<256x128xf32>
    %c0_3 = arith.constant 0 : index
    %c0_4 = arith.constant 0 : index
    %3 = vector.load %arg3[%c0_3, %c0_4] : memref<1x128xf32, #tpu.memory_space<vmem>>, vector<1x128xf32>
    %4 = vector.broadcast %3 : vector<1x128xf32> to vector<256x128xf32>
    %5 = arith.addf %2, %4 : vector<256x128xf32>
    %cst_5 = arith.constant 0.000000e+00 : f32
    %6 = vector.broadcast %cst_5 : f32 to vector<256x128xf32>
    %7 = arith.maximumf %5, %6 : vector<256x128xf32>
    %8 = arith.truncf %7 : vector<256x128xf32> to vector<256x128xbf16>
    %c0_6 = arith.constant 0 : index
    %c0_7 = arith.constant 0 : index
    %9 = vector.load %arg4[%c0_6, %c0_7] : memref<256x128xbf16, #tpu.memory_space<vmem>>, vector<256x128xbf16>
    tpu.vector_store %arg4[%c0_6, %c0_7], %8 {strides = array<i32>} : memref<256x128xbf16, #tpu.memory_space<vmem>>, vector<256x128xbf16>,
    return
  }
  func.func @transform_0(%arg0: i32) -> (i32, i32) {
    %c0_i32 = arith.constant 0 : i32
    %c0_i32_0 = arith.constant 0 : i32
    return %arg0, %c0_i32 : i32, i32
  }
  func.func @transform_1(%arg0: i32) -> (i32, i32) {
    %c0_i32 = arith.constant 0 : i32
    %c0_i32_0 = arith.constant 0 : i32
    %c0_i32_1 = arith.constant 0 : i32
    return %c0_i32, %c0_i32_0 : i32, i32
  }
  func.func @transform_2(%arg0: i32) -> (i32, i32) {
    %c0_i32 = arith.constant 0 : i32
    %c0_i32_0 = arith.constant 0 : i32
    %c0_i32_1 = arith.constant 0 : i32
    return %c0_i32, %c0_i32_0 : i32, i32
  }
  func.func @transform_3(%arg0: i32) -> (i32, i32) {
    %c0_i32 = arith.constant 0 : i32
    %c0_i32_0 = arith.constant 0 : i32
    return %arg0, %c0_i32 : i32, i32
  }
}

module attributes {stable_mosaic.version = 11 : i64} {
  func.func @_upadd_smooth_kernel(%arg0: i32, %arg1: memref<256x64xf32, #tpu.memory_space<vmem>>, %arg2: memref<1x64x128xbf16, #tpu.memory_space<vmem>>, %arg3: memref<1x256x128xbf16, #tpu.memory_space<vmem>>, %arg4: memref<9x128x128xbf16, #tpu.memory_space<vmem>>, %arg5: memref<1x128xf32, #tpu.memory_space<vmem>>, %arg6: memref<1x256x128xbf16, #tpu.memory_space<vmem>>, %arg7: memref<18x18x128xbf16, #tpu.memory_space<vmem>>) attributes {dimension_semantics = [#tpu.dimension_semantics<parallel>], iteration_bounds = array<i64: 2>, scalar_prefetch = 0 : i64, scratch_operands = 1 : i64, tpu.core_type = #tpu.core_type<tc>, window_params = [{pipeline_mode = #tpu.pipeline_mode<synchronous>, transform_indices = @transform_0, window_bounds = array<i64: 256, 64>}, {transform_indices = @transform_1, window_bounds = array<i64: 1, 64, 128>}, {transform_indices = @transform_2, window_bounds = array<i64: 1, 256, 128>}, {pipeline_mode = #tpu.pipeline_mode<synchronous>, transform_indices = @transform_3, window_bounds = array<i64: 9, 128, 128>}, {pipeline_mode = #tpu.pipeline_mode<synchronous>, transform_indices = @transform_4, window_bounds = array<i64: 1, 128>}, {transform_indices = @transform_5, window_bounds = array<i64: 1, 256, 128>}]} {
    %c0 = arith.constant 0 : index
    %c0_0 = arith.constant 0 : index
    %0 = vector.load %arg1[%c0, %c0_0] : memref<256x64xf32, #tpu.memory_space<vmem>>, vector<256x64xf32>
    %c0_1 = arith.constant 0 : index
    %c0_2 = arith.constant 0 : index
    %c0_3 = arith.constant 0 : index
    %1 = vector.load %arg2[%c0_1, %c0_2, %c0_3] : memref<1x64x128xbf16, #tpu.memory_space<vmem>>, vector<1x64x128xbf16>
    %2 = vector.shape_cast %1 : vector<1x64x128xbf16> to vector<64x128xbf16>
    %3 = arith.extf %2 : vector<64x128xbf16> to vector<64x128xf32>
    %cst = arith.constant dense<0.000000e+00> : vector<256x128xf32>
    %4 = tpu.matmul %0, %3, %cst {dimension_numbers = #tpu.dot_dimension_numbers<[1], [0], [0], [1], [0, 0, 1, 1], [], []>} : vector<256x64xf32>, vector<64x128xf32>, vector<256x128xf32> -> vector<256x128xf32>
    %c0_4 = arith.constant 0 : index
    %c0_5 = arith.constant 0 : index
    %c0_6 = arith.constant 0 : index
    %5 = vector.load %arg3[%c0_4, %c0_5, %c0_6] : memref<1x256x128xbf16, #tpu.memory_space<vmem>>, vector<1x256x128xbf16>
    %6 = vector.shape_cast %5 : vector<1x256x128xbf16> to vector<256x128xbf16>
    %7 = arith.extf %6 : vector<256x128xbf16> to vector<256x128xf32>
    %8 = arith.addf %4, %7 : vector<256x128xf32>
    %cst_7 = arith.constant 0.000000e+00 : bf16
    %9 = vector.broadcast %cst_7 : bf16 to vector<18x18x128xbf16>
    %c0_8 = arith.constant 0 : index
    %c0_9 = arith.constant 0 : index
    %c0_10 = arith.constant 0 : index
    %10 = vector.load %arg7[%c0_8, %c0_9, %c0_10] : memref<18x18x128xbf16, #tpu.memory_space<vmem>>, vector<18x18x128xbf16>
    tpu.vector_store %arg7[%c0_8, %c0_9, %c0_10], %9 {strides = array<i32>} : memref<18x18x128xbf16, #tpu.memory_space<vmem>>, vector<18x18x128xbf16>,
    %11 = vector.shape_cast %8 : vector<256x128xf32> to vector<16x16x128xf32>
    %12 = arith.truncf %11 : vector<16x16x128xf32> to vector<16x16x128xbf16>
    %c1 = arith.constant 1 : index
    %c1_11 = arith.constant 1 : index
    %c0_12 = arith.constant 0 : index
    %13 = vector.load %arg7[%c1, %c1_11, %c0_12] : memref<18x18x128xbf16, #tpu.memory_space<vmem>>, vector<16x16x128xbf16>
    tpu.vector_store %arg7[%c1, %c1_11, %c0_12], %12 {strides = array<i32>} : memref<18x18x128xbf16, #tpu.memory_space<vmem>>, vector<16x16x128xbf16>,
    %cst_13 = arith.constant 0.000000e+00 : f32
    %14 = vector.broadcast %cst_13 : f32 to vector<256x128xf32>
    %c0_14 = arith.constant 0 : index
    %c0_15 = arith.constant 0 : index
    %c0_16 = arith.constant 0 : index
    %15 = vector.load %arg7[%c0_14, %c0_15, %c0_16] : memref<18x18x128xbf16, #tpu.memory_space<vmem>>, vector<16x16x128xbf16>
    %16 = vector.shape_cast %15 : vector<16x16x128xbf16> to vector<256x128xbf16>
    %c0_17 = arith.constant 0 : index
    %c0_18 = arith.constant 0 : index
    %c0_19 = arith.constant 0 : index
    %17 = vector.load %arg4[%c0_17, %c0_18, %c0_19] : memref<9x128x128xbf16, #tpu.memory_space<vmem>>, vector<1x128x128xbf16>
    %18 = vector.shape_cast %17 : vector<1x128x128xbf16> to vector<128x128xbf16>
    %cst_20 = arith.constant dense<0.000000e+00> : vector<256x128xf32>
    %19 = tpu.matmul %16, %18, %cst_20 {dimension_numbers = #tpu.dot_dimension_numbers<[1], [0], [0], [1], [0, 0, 1, 1], [], []>} : vector<256x128xbf16>, vector<128x128xbf16>, vector<256x128xf32> -> vector<256x128xf32>
    %20 = arith.addf %14, %19 : vector<256x128xf32>
    %c0_21 = arith.constant 0 : index
    %c1_22 = arith.constant 1 : index
    %c0_23 = arith.constant 0 : index
    %21 = vector.load %arg7[%c0_21, %c1_22, %c0_23] : memref<18x18x128xbf16, #tpu.memory_space<vmem>>, vector<16x16x128xbf16>
    %22 = vector.shape_cast %21 : vector<16x16x128xbf16> to vector<256x128xbf16>
    %c1_24 = arith.constant 1 : index
    %c0_25 = arith.constant 0 : index
    %c0_26 = arith.constant 0 : index
    %23 = vector.load %arg4[%c1_24, %c0_25, %c0_26] : memref<9x128x128xbf16, #tpu.memory_space<vmem>>, vector<1x128x128xbf16>
    %24 = vector.shape_cast %23 : vector<1x128x128xbf16> to vector<128x128xbf16>
    %cst_27 = arith.constant dense<0.000000e+00> : vector<256x128xf32>
    %25 = tpu.matmul %22, %24, %cst_27 {dimension_numbers = #tpu.dot_dimension_numbers<[1], [0], [0], [1], [0, 0, 1, 1], [], []>} : vector<256x128xbf16>, vector<128x128xbf16>, vector<256x128xf32> -> vector<256x128xf32>
    %26 = arith.addf %20, %25 : vector<256x128xf32>
    %c0_28 = arith.constant 0 : index
    %c2 = arith.constant 2 : index
    %c0_29 = arith.constant 0 : index
    %27 = vector.load %arg7[%c0_28, %c2, %c0_29] : memref<18x18x128xbf16, #tpu.memory_space<vmem>>, vector<16x16x128xbf16>
    %28 = vector.shape_cast %27 : vector<16x16x128xbf16> to vector<256x128xbf16>
    %c2_30 = arith.constant 2 : index
    %c0_31 = arith.constant 0 : index
    %c0_32 = arith.constant 0 : index
    %29 = vector.load %arg4[%c2_30, %c0_31, %c0_32] : memref<9x128x128xbf16, #tpu.memory_space<vmem>>, vector<1x128x128xbf16>
    %30 = vector.shape_cast %29 : vector<1x128x128xbf16> to vector<128x128xbf16>
    %cst_33 = arith.constant dense<0.000000e+00> : vector<256x128xf32>
    %31 = tpu.matmul %28, %30, %cst_33 {dimension_numbers = #tpu.dot_dimension_numbers<[1], [0], [0], [1], [0, 0, 1, 1], [], []>} : vector<256x128xbf16>, vector<128x128xbf16>, vector<256x128xf32> -> vector<256x128xf32>
    %32 = arith.addf %26, %31 : vector<256x128xf32>
    %c1_34 = arith.constant 1 : index
    %c0_35 = arith.constant 0 : index
    %c0_36 = arith.constant 0 : index
    %33 = vector.load %arg7[%c1_34, %c0_35, %c0_36] : memref<18x18x128xbf16, #tpu.memory_space<vmem>>, vector<16x16x128xbf16>
    %34 = vector.shape_cast %33 : vector<16x16x128xbf16> to vector<256x128xbf16>
    %c3 = arith.constant 3 : index
    %c0_37 = arith.constant 0 : index
    %c0_38 = arith.constant 0 : index
    %35 = vector.load %arg4[%c3, %c0_37, %c0_38] : memref<9x128x128xbf16, #tpu.memory_space<vmem>>, vector<1x128x128xbf16>
    %36 = vector.shape_cast %35 : vector<1x128x128xbf16> to vector<128x128xbf16>
    %cst_39 = arith.constant dense<0.000000e+00> : vector<256x128xf32>
    %37 = tpu.matmul %34, %36, %cst_39 {dimension_numbers = #tpu.dot_dimension_numbers<[1], [0], [0], [1], [0, 0, 1, 1], [], []>} : vector<256x128xbf16>, vector<128x128xbf16>, vector<256x128xf32> -> vector<256x128xf32>
    %38 = arith.addf %32, %37 : vector<256x128xf32>
    %c1_40 = arith.constant 1 : index
    %c1_41 = arith.constant 1 : index
    %c0_42 = arith.constant 0 : index
    %39 = vector.load %arg7[%c1_40, %c1_41, %c0_42] : memref<18x18x128xbf16, #tpu.memory_space<vmem>>, vector<16x16x128xbf16>
    %40 = vector.shape_cast %39 : vector<16x16x128xbf16> to vector<256x128xbf16>
    %c4 = arith.constant 4 : index
    %c0_43 = arith.constant 0 : index
    %c0_44 = arith.constant 0 : index
    %41 = vector.load %arg4[%c4, %c0_43, %c0_44] : memref<9x128x128xbf16, #tpu.memory_space<vmem>>, vector<1x128x128xbf16>
    %42 = vector.shape_cast %41 : vector<1x128x128xbf16> to vector<128x128xbf16>
    %cst_45 = arith.constant dense<0.000000e+00> : vector<256x128xf32>
    %43 = tpu.matmul %40, %42, %cst_45 {dimension_numbers = #tpu.dot_dimension_numbers<[1], [0], [0], [1], [0, 0, 1, 1], [], []>} : vector<256x128xbf16>, vector<128x128xbf16>, vector<256x128xf32> -> vector<256x128xf32>
    %44 = arith.addf %38, %43 : vector<256x128xf32>
    %c1_46 = arith.constant 1 : index
    %c2_47 = arith.constant 2 : index
    %c0_48 = arith.constant 0 : index
    %45 = vector.load %arg7[%c1_46, %c2_47, %c0_48] : memref<18x18x128xbf16, #tpu.memory_space<vmem>>, vector<16x16x128xbf16>
    %46 = vector.shape_cast %45 : vector<16x16x128xbf16> to vector<256x128xbf16>
    %c5 = arith.constant 5 : index
    %c0_49 = arith.constant 0 : index
    %c0_50 = arith.constant 0 : index
    %47 = vector.load %arg4[%c5, %c0_49, %c0_50] : memref<9x128x128xbf16, #tpu.memory_space<vmem>>, vector<1x128x128xbf16>
    %48 = vector.shape_cast %47 : vector<1x128x128xbf16> to vector<128x128xbf16>
    %cst_51 = arith.constant dense<0.000000e+00> : vector<256x128xf32>
    %49 = tpu.matmul %46, %48, %cst_51 {dimension_numbers = #tpu.dot_dimension_numbers<[1], [0], [0], [1], [0, 0, 1, 1], [], []>} : vector<256x128xbf16>, vector<128x128xbf16>, vector<256x128xf32> -> vector<256x128xf32>
    %50 = arith.addf %44, %49 : vector<256x128xf32>
    %c2_52 = arith.constant 2 : index
    %c0_53 = arith.constant 0 : index
    %c0_54 = arith.constant 0 : index
    %51 = vector.load %arg7[%c2_52, %c0_53, %c0_54] : memref<18x18x128xbf16, #tpu.memory_space<vmem>>, vector<16x16x128xbf16>
    %52 = vector.shape_cast %51 : vector<16x16x128xbf16> to vector<256x128xbf16>
    %c6 = arith.constant 6 : index
    %c0_55 = arith.constant 0 : index
    %c0_56 = arith.constant 0 : index
    %53 = vector.load %arg4[%c6, %c0_55, %c0_56] : memref<9x128x128xbf16, #tpu.memory_space<vmem>>, vector<1x128x128xbf16>
    %54 = vector.shape_cast %53 : vector<1x128x128xbf16> to vector<128x128xbf16>
    %cst_57 = arith.constant dense<0.000000e+00> : vector<256x128xf32>
    %55 = tpu.matmul %52, %54, %cst_57 {dimension_numbers = #tpu.dot_dimension_numbers<[1], [0], [0], [1], [0, 0, 1, 1], [], []>} : vector<256x128xbf16>, vector<128x128xbf16>, vector<256x128xf32> -> vector<256x128xf32>
    %56 = arith.addf %50, %55 : vector<256x128xf32>
    %c2_58 = arith.constant 2 : index
    %c1_59 = arith.constant 1 : index
    %c0_60 = arith.constant 0 : index
    %57 = vector.load %arg7[%c2_58, %c1_59, %c0_60] : memref<18x18x128xbf16, #tpu.memory_space<vmem>>, vector<16x16x128xbf16>
    %58 = vector.shape_cast %57 : vector<16x16x128xbf16> to vector<256x128xbf16>
    %c7 = arith.constant 7 : index
    %c0_61 = arith.constant 0 : index
    %c0_62 = arith.constant 0 : index
    %59 = vector.load %arg4[%c7, %c0_61, %c0_62] : memref<9x128x128xbf16, #tpu.memory_space<vmem>>, vector<1x128x128xbf16>
    %60 = vector.shape_cast %59 : vector<1x128x128xbf16> to vector<128x128xbf16>
    %cst_63 = arith.constant dense<0.000000e+00> : vector<256x128xf32>
    %61 = tpu.matmul %58, %60, %cst_63 {dimension_numbers = #tpu.dot_dimension_numbers<[1], [0], [0], [1], [0, 0, 1, 1], [], []>} : vector<256x128xbf16>, vector<128x128xbf16>, vector<256x128xf32> -> vector<256x128xf32>
    %62 = arith.addf %56, %61 : vector<256x128xf32>
    %c2_64 = arith.constant 2 : index
    %c2_65 = arith.constant 2 : index
    %c0_66 = arith.constant 0 : index
    %63 = vector.load %arg7[%c2_64, %c2_65, %c0_66] : memref<18x18x128xbf16, #tpu.memory_space<vmem>>, vector<16x16x128xbf16>
    %64 = vector.shape_cast %63 : vector<16x16x128xbf16> to vector<256x128xbf16>
    %c8 = arith.constant 8 : index
    %c0_67 = arith.constant 0 : index
    %c0_68 = arith.constant 0 : index
    %65 = vector.load %arg4[%c8, %c0_67, %c0_68] : memref<9x128x128xbf16, #tpu.memory_space<vmem>>, vector<1x128x128xbf16>
    %66 = vector.shape_cast %65 : vector<1x128x128xbf16> to vector<128x128xbf16>
    %cst_69 = arith.constant dense<0.000000e+00> : vector<256x128xf32>
    %67 = tpu.matmul %64, %66, %cst_69 {dimension_numbers = #tpu.dot_dimension_numbers<[1], [0], [0], [1], [0, 0, 1, 1], [], []>} : vector<256x128xbf16>, vector<128x128xbf16>, vector<256x128xf32> -> vector<256x128xf32>
    %68 = arith.addf %62, %67 : vector<256x128xf32>
    %c0_70 = arith.constant 0 : index
    %c0_71 = arith.constant 0 : index
    %69 = vector.load %arg5[%c0_70, %c0_71] : memref<1x128xf32, #tpu.memory_space<vmem>>, vector<1x128xf32>
    %70 = vector.broadcast %69 : vector<1x128xf32> to vector<256x128xf32>
    %71 = arith.addf %68, %70 : vector<256x128xf32>
    %cst_72 = arith.constant 0.000000e+00 : f32
    %72 = vector.broadcast %cst_72 : f32 to vector<256x128xf32>
    %73 = arith.maximumf %71, %72 : vector<256x128xf32>
    %74 = arith.truncf %73 : vector<256x128xf32> to vector<256x128xbf16>
    %c0_73 = arith.constant 0 : index
    %c0_74 = arith.constant 0 : index
    %c0_75 = arith.constant 0 : index
    %75 = vector.load %arg6[%c0_73, %c0_74, %c0_75] : memref<1x256x128xbf16, #tpu.memory_space<vmem>>, vector<1x256x128xbf16>
    %76 = vector.shape_cast %75 : vector<1x256x128xbf16> to vector<256x128xbf16>
    %77 = vector.shape_cast %74 : vector<256x128xbf16> to vector<1x256x128xbf16>
    tpu.vector_store %arg6[%c0_73, %c0_74, %c0_75], %77 {strides = array<i32>} : memref<1x256x128xbf16, #tpu.memory_space<vmem>>, vector<1x256x128xbf16>,
    return
  }
  func.func @transform_0(%arg0: i32) -> (i32, i32) {
    %c0_i32 = arith.constant 0 : i32
    %c0_i32_0 = arith.constant 0 : i32
    %c0_i32_1 = arith.constant 0 : i32
    return %c0_i32, %c0_i32_0 : i32, i32
  }
  func.func @transform_1(%arg0: i32) -> (i32, i32, i32) {
    %c0_i32 = arith.constant 0 : i32
    %c0_i32_0 = arith.constant 0 : i32
    %c0_i32_1 = arith.constant 0 : i32
    return %arg0, %c0_i32, %c0_i32_0 : i32, i32, i32
  }
  func.func @transform_2(%arg0: i32) -> (i32, i32, i32) {
    %c0_i32 = arith.constant 0 : i32
    %c0_i32_0 = arith.constant 0 : i32
    %c0_i32_1 = arith.constant 0 : i32
    return %arg0, %c0_i32, %c0_i32_0 : i32, i32, i32
  }
  func.func @transform_3(%arg0: i32) -> (i32, i32, i32) {
    %c0_i32 = arith.constant 0 : i32
    %c0_i32_0 = arith.constant 0 : i32
    %c0_i32_1 = arith.constant 0 : i32
    %c0_i32_2 = arith.constant 0 : i32
    return %c0_i32, %c0_i32_0, %c0_i32_1 : i32, i32, i32
  }
  func.func @transform_4(%arg0: i32) -> (i32, i32) {
    %c0_i32 = arith.constant 0 : i32
    %c0_i32_0 = arith.constant 0 : i32
    %c0_i32_1 = arith.constant 0 : i32
    return %c0_i32, %c0_i32_0 : i32, i32
  }
  func.func @transform_5(%arg0: i32) -> (i32, i32, i32) {
    %c0_i32 = arith.constant 0 : i32
    %c0_i32_0 = arith.constant 0 : i32
    %c0_i32_1 = arith.constant 0 : i32
    return %arg0, %c0_i32, %c0_i32_0 : i32, i32, i32
  }
}

module attributes {stable_mosaic.version = 11 : i64} {
  func.func @_final_kernel(%arg0: i32, %arg1: memref<1x256x128xbf16, #tpu.memory_space<vmem>>, %arg2: memref<1x64x128xbf16, #tpu.memory_space<vmem>>, %arg3: memref<1x16x128xbf16, #tpu.memory_space<vmem>>, %arg4: memref<1x4x128xbf16, #tpu.memory_space<vmem>>, %arg5: memref<256x64xf32, #tpu.memory_space<vmem>>, %arg6: memref<256x16xf32, #tpu.memory_space<vmem>>, %arg7: memref<256x4xf32, #tpu.memory_space<vmem>>, %arg8: memref<1x512x256xf32, #tpu.memory_space<vmem>>) attributes {dimension_semantics = [#tpu.dimension_semantics<parallel>], iteration_bounds = array<i64: 2>, scalar_prefetch = 0 : i64, scratch_operands = 0 : i64, tpu.core_type = #tpu.core_type<tc>, window_params = [{transform_indices = @transform_0, window_bounds = array<i64: 1, 256, 128>}, {transform_indices = @transform_1, window_bounds = array<i64: 1, 64, 128>}, {transform_indices = @transform_2, window_bounds = array<i64: 1, 16, 128>}, {transform_indices = @transform_3, window_bounds = array<i64: 1, 4, 128>}, {pipeline_mode = #tpu.pipeline_mode<synchronous>, transform_indices = @transform_4, window_bounds = array<i64: 256, 64>}, {pipeline_mode = #tpu.pipeline_mode<synchronous>, transform_indices = @transform_5, window_bounds = array<i64: 256, 16>}, {pipeline_mode = #tpu.pipeline_mode<synchronous>, transform_indices = @transform_6, window_bounds = array<i64: 256, 4>}, {transform_indices = @transform_7, window_bounds = array<i64: 1, 512, 256>}]} {
    %c0 = arith.constant 0 : index
    %c0_0 = arith.constant 0 : index
    %c0_1 = arith.constant 0 : index
    %0 = vector.load %arg1[%c0, %c0_0, %c0_1] : memref<1x256x128xbf16, #tpu.memory_space<vmem>>, vector<1x256x128xbf16>
    %1 = vector.shape_cast %0 : vector<1x256x128xbf16> to vector<256x128xbf16>
    %2 = arith.extf %1 : vector<256x128xbf16> to vector<256x128xf32>
    %3 = tpu.transpose %2, [1, 0] : vector<256x128xf32> -> vector<128x256xf32>
    %c0_2 = arith.constant 0 : index
    %c0_3 = arith.constant 0 : index
    %c0_4 = arith.constant 0 : index
    %4 = vector.load %arg8[%c0_2, %c0_3, %c0_4] : memref<1x512x256xf32, #tpu.memory_space<vmem>>, vector<1x128x256xf32>
    %5 = vector.shape_cast %4 : vector<1x128x256xf32> to vector<128x256xf32>
    %6 = vector.shape_cast %3 : vector<128x256xf32> to vector<1x128x256xf32>
    tpu.vector_store %arg8[%c0_2, %c0_3, %c0_4], %6 {strides = array<i32>} : memref<1x512x256xf32, #tpu.memory_space<vmem>>, vector<1x128x256xf32>,
    %c0_5 = arith.constant 0 : index
    %c0_6 = arith.constant 0 : index
    %7 = vector.load %arg5[%c0_5, %c0_6] : memref<256x64xf32, #tpu.memory_space<vmem>>, vector<256x64xf32>
    %c0_7 = arith.constant 0 : index
    %c0_8 = arith.constant 0 : index
    %c0_9 = arith.constant 0 : index
    %8 = vector.load %arg2[%c0_7, %c0_8, %c0_9] : memref<1x64x128xbf16, #tpu.memory_space<vmem>>, vector<1x64x128xbf16>
    %9 = vector.shape_cast %8 : vector<1x64x128xbf16> to vector<64x128xbf16>
    %10 = arith.extf %9 : vector<64x128xbf16> to vector<64x128xf32>
    %cst = arith.constant dense<0.000000e+00> : vector<256x128xf32>
    %11 = tpu.matmul %7, %10, %cst {dimension_numbers = #tpu.dot_dimension_numbers<[1], [0], [0], [1], [0, 0, 1, 1], [], []>} : vector<256x64xf32>, vector<64x128xf32>, vector<256x128xf32> -> vector<256x128xf32>
    %12 = tpu.transpose %11, [1, 0] : vector<256x128xf32> -> vector<128x256xf32>
    %c0_10 = arith.constant 0 : index
    %c128 = arith.constant 128 : index
    %c0_11 = arith.constant 0 : index
    %13 = vector.load %arg8[%c0_10, %c128, %c0_11] : memref<1x512x256xf32, #tpu.memory_space<vmem>>, vector<1x128x256xf32>
    %14 = vector.shape_cast %13 : vector<1x128x256xf32> to vector<128x256xf32>
    %15 = vector.shape_cast %12 : vector<128x256xf32> to vector<1x128x256xf32>
    tpu.vector_store %arg8[%c0_10, %c128, %c0_11], %15 {strides = array<i32>} : memref<1x512x256xf32, #tpu.memory_space<vmem>>, vector<1x128x256xf32>,
    %c0_12 = arith.constant 0 : index
    %c0_13 = arith.constant 0 : index
    %16 = vector.load %arg6[%c0_12, %c0_13] : memref<256x16xf32, #tpu.memory_space<vmem>>, vector<256x16xf32>
    %c0_14 = arith.constant 0 : index
    %c0_15 = arith.constant 0 : index
    %c0_16 = arith.constant 0 : index
    %17 = vector.load %arg3[%c0_14, %c0_15, %c0_16] : memref<1x16x128xbf16, #tpu.memory_space<vmem>>, vector<1x16x128xbf16>
    %18 = vector.shape_cast %17 : vector<1x16x128xbf16> to vector<16x128xbf16>
    %19 = arith.extf %18 : vector<16x128xbf16> to vector<16x128xf32>
    %cst_17 = arith.constant dense<0.000000e+00> : vector<256x128xf32>
    %20 = tpu.matmul %16, %19, %cst_17 {dimension_numbers = #tpu.dot_dimension_numbers<[1], [0], [0], [1], [0, 0, 1, 1], [], []>} : vector<256x16xf32>, vector<16x128xf32>, vector<256x128xf32> -> vector<256x128xf32>
    %21 = tpu.transpose %20, [1, 0] : vector<256x128xf32> -> vector<128x256xf32>
    %c0_18 = arith.constant 0 : index
    %c256 = arith.constant 256 : index
    %c0_19 = arith.constant 0 : index
    %22 = vector.load %arg8[%c0_18, %c256, %c0_19] : memref<1x512x256xf32, #tpu.memory_space<vmem>>, vector<1x128x256xf32>
    %23 = vector.shape_cast %22 : vector<1x128x256xf32> to vector<128x256xf32>
    %24 = vector.shape_cast %21 : vector<128x256xf32> to vector<1x128x256xf32>
    tpu.vector_store %arg8[%c0_18, %c256, %c0_19], %24 {strides = array<i32>} : memref<1x512x256xf32, #tpu.memory_space<vmem>>, vector<1x128x256xf32>,
    %c0_20 = arith.constant 0 : index
    %c0_21 = arith.constant 0 : index
    %25 = vector.load %arg7[%c0_20, %c0_21] : memref<256x4xf32, #tpu.memory_space<vmem>>, vector<256x4xf32>
    %c0_22 = arith.constant 0 : index
    %c0_23 = arith.constant 0 : index
    %c0_24 = arith.constant 0 : index
    %26 = vector.load %arg4[%c0_22, %c0_23, %c0_24] : memref<1x4x128xbf16, #tpu.memory_space<vmem>>, vector<1x4x128xbf16>
    %27 = vector.shape_cast %26 : vector<1x4x128xbf16> to vector<4x128xbf16>
    %28 = arith.extf %27 : vector<4x128xbf16> to vector<4x128xf32>
    %cst_25 = arith.constant dense<0.000000e+00> : vector<256x128xf32>
    %29 = tpu.matmul %25, %28, %cst_25 {dimension_numbers = #tpu.dot_dimension_numbers<[1], [0], [0], [1], [0, 0, 1, 1], [], []>} : vector<256x4xf32>, vector<4x128xf32>, vector<256x128xf32> -> vector<256x128xf32>
    %30 = tpu.transpose %29, [1, 0] : vector<256x128xf32> -> vector<128x256xf32>
    %c0_26 = arith.constant 0 : index
    %c384 = arith.constant 384 : index
    %c0_27 = arith.constant 0 : index
    %31 = vector.load %arg8[%c0_26, %c384, %c0_27] : memref<1x512x256xf32, #tpu.memory_space<vmem>>, vector<1x128x256xf32>
    %32 = vector.shape_cast %31 : vector<1x128x256xf32> to vector<128x256xf32>
    %33 = vector.shape_cast %30 : vector<128x256xf32> to vector<1x128x256xf32>
    tpu.vector_store %arg8[%c0_26, %c384, %c0_27], %33 {strides = array<i32>} : memref<1x512x256xf32, #tpu.memory_space<vmem>>, vector<1x128x256xf32>,
    return
  }
  func.func @transform_0(%arg0: i32) -> (i32, i32, i32) {
    %c0_i32 = arith.constant 0 : i32
    %c0_i32_0 = arith.constant 0 : i32
    %c0_i32_1 = arith.constant 0 : i32
    return %arg0, %c0_i32, %c0_i32_0 : i32, i32, i32
  }
  func.func @transform_1(%arg0: i32) -> (i32, i32, i32) {
    %c0_i32 = arith.constant 0 : i32
    %c0_i32_0 = arith.constant 0 : i32
    %c0_i32_1 = arith.constant 0 : i32
    return %arg0, %c0_i32, %c0_i32_0 : i32, i32, i32
  }
  func.func @transform_2(%arg0: i32) -> (i32, i32, i32) {
    %c0_i32 = arith.constant 0 : i32
    %c0_i32_0 = arith.constant 0 : i32
    %c0_i32_1 = arith.constant 0 : i32
    return %arg0, %c0_i32, %c0_i32_0 : i32, i32, i32
  }
  func.func @transform_3(%arg0: i32) -> (i32, i32, i32) {
    %c0_i32 = arith.constant 0 : i32
    %c0_i32_0 = arith.constant 0 : i32
    %c0_i32_1 = arith.constant 0 : i32
    return %arg0, %c0_i32, %c0_i32_0 : i32, i32, i32
  }
  func.func @transform_4(%arg0: i32) -> (i32, i32) {
    %c0_i32 = arith.constant 0 : i32
    %c0_i32_0 = arith.constant 0 : i32
    %c0_i32_1 = arith.constant 0 : i32
    return %c0_i32, %c0_i32_0 : i32, i32
  }
  func.func @transform_5(%arg0: i32) -> (i32, i32) {
    %c0_i32 = arith.constant 0 : i32
    %c0_i32_0 = arith.constant 0 : i32
    %c0_i32_1 = arith.constant 0 : i32
    return %c0_i32, %c0_i32_0 : i32, i32
  }
  func.func @transform_6(%arg0: i32) -> (i32, i32) {
    %c0_i32 = arith.constant 0 : i32
    %c0_i32_0 = arith.constant 0 : i32
    %c0_i32_1 = arith.constant 0 : i32
    return %c0_i32, %c0_i32_0 : i32, i32
  }
  func.func @transform_7(%arg0: i32) -> (i32, i32, i32) {
    %c0_i32 = arith.constant 0 : i32
    %c0_i32_0 = arith.constant 0 : i32
    %c0_i32_1 = arith.constant 0 : i32
    return %arg0, %c0_i32, %c0_i32_0 : i32, i32, i32
  }
}

</mosaic_0001>

<bundles_post_ra>
// kernel: merge_forward.8
= control target key start
LH: loop header
LB: loop body
LE: loop exit
PB: predicated region body
PF: predicated region fallthrough
CT: control target
= control target key end

     0   :  { %8 = vsyncpa [#allocation3], 0  ;;  %s637_s0 = inlined_call_operand.vmem [shape: bf16[8,512], index: 0, kind: input, shape index: {}]   ;;  %s638_s1 = inlined_call_operand.hbm [shape: bf16[512,128], index: 1, kind: input, shape index: {}]   ;;  %s639_s2 = inlined_call_operand.hbm [shape: f32[1,128], index: 2, kind: input, shape index: {}]   ;;  %s640_s3 = inlined_call_operand.vmem [shape: bf16[8,128], index: 3, kind: output, shape index: {}]  }
   0x1   :  { %s16_s14 = sshll.u32 %s638_s1, 4  ;;  %s17_s14 = int_to_ptr.hbm [resolvable:$true] %s16_s14 }
   0x2   :  { %9 = vsyncpa [#allocation5], 0  ;;  %s598_s15 = smov [#allocation2]   ;;  %s30_s19 = sshll.u32 %s639_s2, 4  ;;  %s31_s19 = int_to_ptr.hbm [resolvable:$true] %s30_s19 }
   0x3   :  { %s18_s16 = sshll.u32 %s598_s15, 4  ;;  %s599_s20 = smov 64   ;;  %s19_s16 = int_to_ptr.vmem [resolvable:$true] %s18_s16 }
   0x4   :  { %s600_s21 = smov 4   ;;  %s601_s22 = smov [#allocation4]  }
   0x5   :  { %24 = dma.hbm_to_vmem [thread:$0]  %s17_s14, 4096, %s19_s16, [#allocation3], %s599_s20, %s599_s20, %s600_s21  }
   0x6   :  { %s32_s23 = sshll.u32 %s601_s22, 4  ;;  %s33_s23 = int_to_ptr.vmem [resolvable:$true] %s32_s23 }
   0x7   :  { %35 = dma.hbm_to_vmem [thread:$0]  %s31_s19, 16, %s33_s23, [#allocation5]  }
   0x8   :  { %594 = dma.done.wait [#allocation3], 4096  }
   0x9   :  { %595 = vsyncadd [#allocation3], 4294963200 }
   0xa   :  { %596 = dma.done.wait [#allocation5], 16  }
   0xb   :  { %597 = vsyncadd [#allocation5], 4294967280  ;;  %v516_v0 = vld [vmem:[#allocation2 + $0x38] sm:$0xff]  ;;  %v515_v4 = vld [vmem:[#allocation2 + $0x30] sm:$0xff] }
   0xc   :  { %v524_v1 = vld [vmem:[#allocation2 + $0x78] sm:$0xff]  ;;  %320 = vmatpush.bf16.msra.mxu0 %v516_v0  ;;  %v523_v5 = vld [vmem:[#allocation2 + $0x70] sm:$0xff]  ;;  %v514_v8 = vld [vmem:[#allocation2 + $0x28] sm:$0xff] }
   0xd   :  { %v532_v2 = vld [vmem:[#allocation2 + $0xb8] sm:$0xff]  ;;  %333 = vmatpush.bf16.msra.mxu1 %v524_v1  ;;  %v531_v6 = vld [vmem:[#allocation2 + $0xb0] sm:$0xff]  ;;  %v522_v9 = vld [vmem:[#allocation2 + $0x68] sm:$0xff] }
   0xe   :  { %v540_v3 = vld [vmem:[#allocation2 + $0xf8] sm:$0xff]  ;;  %346 = vmatpush.bf16.msra.mxu2 %v532_v2  ;;  %v539_v7 = vld [vmem:[#allocation2 + $0xf0] sm:$0xff]  ;;  %v530_v10 = vld [vmem:[#allocation2 + $0xa8] sm:$0xff] }
   0xf   :  { %359 = vmatpush.bf16.msra.mxu3 %v540_v3  ;;  %v538_v11 = vld [vmem:[#allocation2 + $0xe8] sm:$0xff]  ;;  %v513_v12 = vld [vmem:[#allocation2 + $0x20] sm:$0xff]  ;;  %v512_v16 = vld [vmem:[#allocation2 + $0x18] sm:$0xff] }
  0x10   :  { %321 = vmatpush.bf16.msra.mxu0 %v515_v4  ;;  %v521_v13 = vld [vmem:[#allocation2 + $0x60] sm:$0xff]  ;;  %v520_v17 = vld [vmem:[#allocation2 + $0x58] sm:$0xff]  ;;  %v511_v20 = vld [vmem:[#allocation2 + $0x10] sm:$0xff] }
  0x11   :  { %334 = vmatpush.bf16.msra.mxu1 %v523_v5  ;;  %v529_v14 = vld [vmem:[#allocation2 + $0xa0] sm:$0xff]  ;;  %v528_v18 = vld [vmem:[#allocation2 + $0x98] sm:$0xff]  ;;  %v519_v21 = vld [vmem:[#allocation2 + $0x50] sm:$0xff] }
  0x12   :  { %347 = vmatpush.bf16.msra.mxu2 %v531_v6  ;;  %v537_v15 = vld [vmem:[#allocation2 + $0xe0] sm:$0xff]  ;;  %v536_v19 = vld [vmem:[#allocation2 + $0xd8] sm:$0xff]  ;;  %v527_v22 = vld [vmem:[#allocation2 + $0x90] sm:$0xff] }
  0x13   :  { %360 = vmatpush.bf16.msra.mxu3 %v539_v7  ;;  %v535_v23 = vld [vmem:[#allocation2 + $0xd0] sm:$0xff]  ;;  %v510_v24 = vld [vmem:[#allocation2 + $0x8] sm:$0xff]  ;;  %v44_v26 = vld [vmem:[%s637_s0] sm:$0xff] }
  0x14   :  { %322 = vmatpush.bf16.msra.mxu0 %v514_v8  ;;  %v518_v25 = vld [vmem:[#allocation2 + $0x48] sm:$0xff]  ;;  %v116_v30 = vunpack.c.l.b16 %v44_v26  ;;  %v117_v31 = vunpack.c.h.b16 %v44_v26  ;;  %v509_v32 = vld [vmem:[#allocation2] sm:$0xff] }
  0x15   :  { %335 = vmatpush.bf16.msra.mxu1 %v522_v9  ;;  %v526_v27 = vld [vmem:[#allocation2 + $0x88] sm:$0xff]  ;;  %v517_v33 = vld [vmem:[#allocation2 + $0x40] sm:$0xff] }
  0x16   :  { %348 = vmatpush.bf16.msra.mxu2 %v530_v10  ;;  %v534_v28 = vld [vmem:[#allocation2 + $0xc8] sm:$0xff]  ;;  %v525_v36 = vld [vmem:[#allocation2 + $0x80] sm:$0xff]  ;;  %v120_v38 = vpack.c.b16 %v116_v30, %v116_v30  ;;  %v121_v39 = vpack.c.b16 %v117_v31, %v117_v31 }
  0x17   :  { %361 = vmatpush.bf16.msra.mxu3 %v538_v11  ;;  %v45_v29 = vld [vmem:[%s637_s0 + $0x8] sm:$0xff]  ;;  %v533_v37 = vld [vmem:[#allocation2 + $0xc0] sm:$0xff] }
  0x18   :  { %323 = vmatpush.bf16.msra.mxu0 %v513_v12  ;;  %v118_v34 = vunpack.c.l.b16 %v45_v29  ;;  %v119_v35 = vunpack.c.h.b16 %v45_v29  ;;  %v545_v42 = vld [vmem:[#allocation4] ss:$0 sm:$0xff] }
  0x19   :  { %336 = vmatpush.bf16.msra.mxu1 %v521_v13 }
  0x1a   :  { %349 = vmatpush.bf16.msra.mxu2 %v529_v14  ;;  %v122_v40 = vpack.c.b16 %v118_v34, %v118_v34  ;;  %v123_v41 = vpack.c.b16 %v119_v35, %v119_v35 }
  0x1b   :  { %362 = vmatpush.bf16.msra.mxu3 %v537_v15 }
  0x1c   :  { %324 = vmatpush.bf16.msra.mxu0 %v512_v16 }
  0x1d   :  { %337 = vmatpush.bf16.msra.mxu1 %v520_v17 }
  0x1e   :  { %350 = vmatpush.bf16.msra.mxu2 %v528_v18 }
  0x1f   :  { %363 = vmatpush.bf16.msra.mxu3 %v536_v19 }
  0x20   :  { %325 = vmatpush.bf16.msra.mxu0 %v511_v20 }
  0x21   :  { %338 = vmatpush.bf16.msra.mxu1 %v519_v21 }
  0x22   :  { %351 = vmatpush.bf16.msra.mxu2 %v527_v22 }
  0x23   :  { %364 = vmatpush.bf16.msra.mxu3 %v535_v23 }
  0x24   :  { %326 = vmatpush.bf16.msra.mxu0 %v510_v24 }
  0x25   :  { %339 = vmatpush.bf16.msra.mxu1 %v518_v25 }
  0x26   :  { %352 = vmatpush.bf16.msra.mxu2 %v526_v27 }
  0x27   :  { %365 = vmatpush.bf16.msra.mxu3 %v534_v28 }
  0x28   :  { %327 = vmatpush.bf16.msra.mxu0 %v509_v32 }
  0x29   :  { %340 = vmatpush.bf16.msra.mxu1 %v517_v33 }
  0x2a   :  { %353 = vmatpush.bf16.msra.mxu2 %v525_v36 }
  0x2b   :  { %366 = vmatpush.bf16.msra.mxu3 %v533_v37  ;;  %328 = vmatmul.bf16.vlgmr.msra.gmra.mxu0 %v120_v38 }
  0x2c   :  { %341 = vmatmul.bf16.vlgmr.msra.gmra.mxu1 %v121_v39 }
  0x2d   :  { %354 = vmatmul.bf16.vlgmr.msra.gmra.mxu2 %v122_v40 }
  0x2e   :  { %367 = vmatmul.bf16.vlgmr.msra.gmra.mxu3 %v123_v41 }
  0xa8   :  { %v329_v43 = vpop.f32.mrf.mxu0 }
  0xa9   :  { %v342_v44 = vpop.f32.mrf.mxu1  ;;  %v330_v45 = vadd.f32 %v545_v42, %v329_v43 }
  0xab   :  { %v343_v46 = vadd.f32 %v342_v44, %v330_v45 }
  0xb0   :  { %v355_v47 = vpop.f32.mrf.mxu2  ;;  %v331_v50 = vpop.f32.mrf.mxu0 }
  0xb1   :  { %v368_v48 = vpop.f32.mrf.mxu3  ;;  %v356_v49 = vadd.f32 %v355_v47, %v343_v46  ;;  %v344_v51 = vpop.f32.mrf.mxu1 }
  0xb3   :  { %v369_v52 = vadd.f32 %v368_v48, %v356_v49 }
  0xb5   :  { %v372_v53 = vmax.f32 %v369_v52, 0.0 }
  0xb7   :  { %v373_v54 = vpack.c.bf16 %v372_v53, %v372_v53 }
  0xb8   :  { %v357_v55 = vpop.f32.mrf.mxu2 }
  0xb9   :  { %v370_v56 = vpop.f32.mrf.mxu3  ;;  %374 = vst [vmem:[%s640_s3] sm:$0xf] %v373_v54 }
  0xba   :  { %379 = vsyncpa [#allocation3], 1 }
  0xbb   :  { %380 = vsyncpa [#allocation5], 1 }

// kernel: merge_forward.10
= control target key start
LH: loop header
LB: loop body
LE: loop exit
PB: predicated region body
PF: predicated region fallthrough
CT: control target
= control target key end

     0   :  { %8 = vsyncpa [#allocation3], 0  ;;  %s662_s15 = smov [#allocation2]   ;;  %s663_s17 = smov 64   ;;  %s829_s0 = inlined_call_operand.vmem [shape: bf16[128,256], index: 0, kind: input, shape index: {}]   ;;  %s830_s1 = inlined_call_operand.hbm [shape: bf16[256,128], index: 1, kind: input, shape index: {}]   ;;  %s831_s2 = inlined_call_operand.vmem [shape: f32[1,128], index: 2, kind: input, shape index: {}]   ;;  %s832_s3 = inlined_call_operand.vmem [shape: bf16[128,128], index: 3, kind: output, shape index: {}]  }
   0x1   :  { %s15_s14 = sshll.u32 %s830_s1, 4  ;;  %s17_s16 = sshll.u32 %s662_s15, 4  ;;  %s16_s14 = int_to_ptr.hbm [resolvable:$true] %s15_s14  ;;  %s18_s16 = int_to_ptr.vmem [resolvable:$true] %s17_s16 }
   0x2   :  { %s664_s18 = smov 4  }
   0x3   :  { %23 = dma.hbm_to_vmem [thread:$0]  %s16_s14, 2048, %s18_s16, [#allocation3], %s663_s17, %s663_s17, %s664_s18  }
   0x4   :  { %660 = dma.done.wait [#allocation3], 2048  }
   0x5   :  { %661 = vsyncadd [#allocation3], 4294965248  ;;  %v560_v0 = vld [vmem:[#allocation2 + $0x38] sm:$0xff]  ;;  %v559_v2 = vld [vmem:[#allocation2 + $0x30] sm:$0xff] }
   0x6   :  { %v568_v1 = vld [vmem:[#allocation2 + $0x78] sm:$0xff]  ;;  %258 = vmatpush.bf16.msra.mxu0 %v560_v0  ;;  %616 = vmatpush.bf16.msra.mxu2 %v560_v0  ;;  %v567_v3 = vld [vmem:[#allocation2 + $0x70] sm:$0xff]  ;;  %v558_v4 = vld [vmem:[#allocation2 + $0x28] sm:$0xff] }
   0x7   :  { %307 = vmatpush.bf16.msra.mxu1 %v568_v1  ;;  %624 = vmatpush.bf16.msra.mxu3 %v568_v1  ;;  %v566_v5 = vld [vmem:[#allocation2 + $0x68] sm:$0xff]  ;;  %v557_v6 = vld [vmem:[#allocation2 + $0x20] sm:$0xff]  ;;  %v556_v8 = vld [vmem:[#allocation2 + $0x18] sm:$0xff] }
   0x8   :  { %v565_v7 = vld [vmem:[#allocation2 + $0x60] sm:$0xff]  ;;  %v564_v9 = vld [vmem:[#allocation2 + $0x58] sm:$0xff]  ;;  %v555_v10 = vld [vmem:[#allocation2 + $0x10] sm:$0xff] }
   0x9   :  { %v563_v11 = vld [vmem:[#allocation2 + $0x50] sm:$0xff]  ;;  %v554_v12 = vld [vmem:[#allocation2 + $0x8] sm:$0xff]  ;;  %v553_v14 = vld [vmem:[#allocation2] sm:$0xff] }
   0xa   :  { %259 = vmatpush.bf16.msra.mxu0 %v559_v2  ;;  %617 = vmatpush.bf16.msra.mxu2 %v559_v2  ;;  %v562_v13 = vld [vmem:[#allocation2 + $0x48] sm:$0xff]  ;;  %v561_v15 = vld [vmem:[#allocation2 + $0x40] sm:$0xff]  ;;  %v419_v28 = vld [vmem:[%s829_s0 + $0x10] sm:$0xf] }
   0xb   :  { %308 = vmatpush.bf16.msra.mxu1 %v567_v3  ;;  %625 = vmatpush.bf16.msra.mxu3 %v567_v3  ;;  %v411_v16 = vld [vmem:[%s829_s0] sm:$0xf]  ;;  %v538_v17 = vld [vmem:[%s829_s0 + $0x4] sm:$0xf0]  ;;  %v537_v20 = vld [vmem:[%s829_s0 + $0x4] sm:$0xf] }
   0xc   :  { %v443_v18 = vld [vmem:[%s829_s0 + $0x40] sm:$0xf]  ;;  %v546_v19 = vld [vmem:[%s829_s0 + $0x44] sm:$0xf0]  ;;  %v413_v21 = vld [vmem:[%s829_s0 + $0x8] sm:$0xf0]  ;;  %v412_v24 = vor.u32 %v538_v17, %v411_v16 }
   0xd   :  { %v545_v22 = vld [vmem:[%s829_s0 + $0x44] sm:$0xf]  ;;  %v445_v23 = vld [vmem:[%s829_s0 + $0x48] sm:$0xf0]  ;;  %v444_v25 = vor.u32 %v546_v19, %v443_v18  ;;  %v416_v26 = vor.u32 %v537_v20, %v413_v21  ;;  %v540_v29 = vld [vmem:[%s829_s0 + $0x14] sm:$0xf0] }
   0xe   :  { %260 = vmatpush.bf16.msra.mxu0 %v558_v4  ;;  %618 = vmatpush.bf16.msra.mxu2 %v558_v4  ;;  %v448_v27 = vor.u32 %v545_v22, %v445_v23  ;;  %v451_v30 = vld [vmem:[%s829_s0 + $0x50] sm:$0xf]  ;;  %v548_v31 = vld [vmem:[%s829_s0 + $0x54] sm:$0xf0]  ;;  %v539_v32 = vld [vmem:[%s829_s0 + $0x14] sm:$0xf]  ;;  %v420_v36 = vor.u32 %v540_v29, %v419_v28 }
   0xf   :  { %309 = vmatpush.bf16.msra.mxu1 %v566_v5  ;;  %626 = vmatpush.bf16.msra.mxu3 %v566_v5  ;;  %v421_v33 = vld [vmem:[%s829_s0 + $0x18] sm:$0xf0]  ;;  %v547_v34 = vld [vmem:[%s829_s0 + $0x54] sm:$0xf]  ;;  %v452_v37 = vor.u32 %v548_v31, %v451_v30  ;;  %v427_v40 = vld [vmem:[%s829_s0 + $0x20] sm:$0xf] }
  0x10   :  { %v453_v35 = vld [vmem:[%s829_s0 + $0x58] sm:$0xf0]  ;;  %v424_v38 = vor.u32 %v539_v32, %v421_v33  ;;  %v542_v41 = vld [vmem:[%s829_s0 + $0x24] sm:$0xf0]  ;;  %v459_v42 = vld [vmem:[%s829_s0 + $0x60] sm:$0xf] }
  0x11   :  { %v456_v39 = vor.u32 %v547_v34, %v453_v35  ;;  %v550_v43 = vld [vmem:[%s829_s0 + $0x64] sm:$0xf0]  ;;  %v541_v44 = vld [vmem:[%s829_s0 + $0x24] sm:$0xf]  ;;  %v429_v45 = vld [vmem:[%s829_s0 + $0x28] sm:$0xf0]  ;;  %v428_v48 = vor.u32 %v542_v41, %v427_v40 }
  0x12   :  { %261 = vmatpush.bf16.msra.mxu0 %v557_v6  ;;  %619 = vmatpush.bf16.msra.mxu2 %v557_v6  ;;  %v549_v46 = vld [vmem:[%s829_s0 + $0x64] sm:$0xf]  ;;  %v461_v47 = vld [vmem:[%s829_s0 + $0x68] sm:$0xf0]  ;;  %v460_v49 = vor.u32 %v550_v43, %v459_v42  ;;  %v432_v50 = vor.u32 %v541_v44, %v429_v45  ;;  %v435_v52 = vld [vmem:[%s829_s0 + $0x30] sm:$0xf] }
  0x13   :  { %310 = vmatpush.bf16.msra.mxu1 %v565_v7  ;;  %627 = vmatpush.bf16.msra.mxu3 %v565_v7  ;;  %v464_v51 = vor.u32 %v549_v46, %v461_v47  ;;  %v544_v53 = vld [vmem:[%s829_s0 + $0x34] sm:$0xf0]  ;;  %v467_v54 = vld [vmem:[%s829_s0 + $0x70] sm:$0xf]  ;;  %v543_v56 = vld [vmem:[%s829_s0 + $0x34] sm:$0xf] }
  0x14   :  { %v552_v55 = vld [vmem:[%s829_s0 + $0x74] sm:$0xf0]  ;;  %v437_v57 = vld [vmem:[%s829_s0 + $0x38] sm:$0xf0]  ;;  %v551_v58 = vld [vmem:[%s829_s0 + $0x74] sm:$0xf]  ;;  %v436_v60 = vor.u32 %v544_v53, %v435_v52 }
  0x15   :  { %v469_v59 = vld [vmem:[%s829_s0 + $0x78] sm:$0xf0]  ;;  %v468_v61 = vor.u32 %v552_v55, %v467_v54  ;;  %v440_v62 = vor.u32 %v543_v56, %v437_v57  ;;  %v787_v1 = vld [vmem:[%s831_s2] ss:$0 sm:$0xff] }
  0x16   :  { %262 = vmatpush.bf16.msra.mxu0 %v556_v8  ;;  %620 = vmatpush.bf16.msra.mxu2 %v556_v8  ;;  %v472_v63 = vor.u32 %v551_v58, %v469_v59 }
  0x17   :  { %311 = vmatpush.bf16.msra.mxu1 %v564_v9  ;;  %628 = vmatpush.bf16.msra.mxu3 %v564_v9 }
  0x1a   :  { %263 = vmatpush.bf16.msra.mxu0 %v555_v10  ;;  %621 = vmatpush.bf16.msra.mxu2 %v555_v10 }
  0x1b   :  { %312 = vmatpush.bf16.msra.mxu1 %v563_v11  ;;  %629 = vmatpush.bf16.msra.mxu3 %v563_v11 }
  0x1e   :  { %264 = vmatpush.bf16.msra.mxu0 %v554_v12  ;;  %622 = vmatpush.bf16.msra.mxu2 %v554_v12 }
  0x1f   :  { %313 = vmatpush.bf16.msra.mxu1 %v562_v13  ;;  %630 = vmatpush.bf16.msra.mxu3 %v562_v13 }
  0x22   :  { %265 = vmatpush.bf16.msra.mxu0 %v553_v14  ;;  %623 = vmatpush.bf16.msra.mxu2 %v553_v14 }
  0x23   :  { %314 = vmatpush.bf16.msra.mxu1 %v561_v15  ;;  %631 = vmatpush.bf16.msra.mxu3 %v561_v15 }
  0x25   :  { %266 = vmatmul.bf16.vlgmr.msra.gmra.mxu0 %v412_v24  ;;  %286 = vmatmul.bf16.vlgmr.msra.gmra.mxu2 %v444_v25 }
  0x26   :  { %315 = vmatmul.bf16.vlgmr.msra.gmra.mxu1 %v416_v26  ;;  %335 = vmatmul.bf16.vlgmr.msra.gmra.mxu3 %v448_v27 }
  0x35   :  { %271 = vmatmul.bf16.gmra.mxu0 %v420_v36  ;;  %291 = vmatmul.bf16.gmra.mxu2 %v452_v37 }
  0x36   :  { %320 = vmatmul.bf16.gmra.mxu1 %v424_v38  ;;  %340 = vmatmul.bf16.gmra.mxu3 %v456_v39 }
  0x45   :  { %276 = vmatmul.bf16.gmra.mxu0 %v428_v48  ;;  %296 = vmatmul.bf16.gmra.mxu2 %v460_v49 }
  0x46   :  { %325 = vmatmul.bf16.gmra.mxu1 %v432_v50  ;;  %345 = vmatmul.bf16.gmra.mxu3 %v464_v51 }
  0x55   :  { %281 = vmatmul.bf16.gmra.mxu0 %v436_v60  ;;  %301 = vmatmul.bf16.gmra.mxu2 %v468_v61 }
  0x56   :  { %330 = vmatmul.bf16.gmra.mxu1 %v440_v62  ;;  %350 = vmatmul.bf16.gmra.mxu3 %v472_v63 }
  0xa2   :  { %v267_v0 = vpop.f32.mrf.mxu0 }
  0xa3   :  { %v316_v2 = vpop.f32.mrf.mxu1  ;;  %v268_v3 = vadd.f32 %v787_v1, %v267_v0 }
  0xa5   :  { %v317_v7 = vadd.f32 %v316_v2, %v268_v3 }
  0xa7   :  { %v356_v12 = vmax.f32 %v317_v7, 0.0 }
  0xa8   :  { %v287_v4 = vpop.f32.mrf.mxu2 }
  0xa9   :  { %v336_v5 = vpop.f32.mrf.mxu3  ;;  %v288_v10 = vadd.f32 %v787_v1, %v287_v4 }
  0xaa   :  { %v269_v6 = vpop.f32.mrf.mxu0 }
  0xab   :  { %v270_v8 = vadd.f32 %v787_v1, %v269_v6  ;;  %v318_v9 = vpop.f32.mrf.mxu1  ;;  %v337_v15 = vadd.f32 %v336_v5, %v288_v10 }
  0xad   :  { %v319_v11 = vadd.f32 %v318_v9, %v270_v8  ;;  %v364_v22 = vmax.f32 %v337_v15, 0.0 }
  0xaf   :  { %v357_v13 = vmax.f32 %v319_v11, 0.0 }
  0xb0   :  { %v289_v14 = vpop.f32.mrf.mxu2 }
  0xb1   :  { %v572_v16 = vpack.c.bf16 %v357_v13, %v356_v12  ;;  %v290_v17 = vadd.f32 %v787_v1, %v289_v14  ;;  %v338_v18 = vpop.f32.mrf.mxu3 }
  0xb2   :  { %v272_v19 = vpop.f32.mrf.mxu0 }
  0xb3   :  { %573 = vst [vmem:[%s832_s3] sm:$0xff] %v572_v16   ;;  %v339_v20 = vadd.f32 %v338_v18, %v290_v17  ;;  %v321_v21 = vpop.f32.mrf.mxu1  ;;  %v273_v25 = vadd.f32 %v787_v1, %v272_v19 }
  0xb5   :  { %v365_v23 = vmax.f32 %v339_v20, 0.0  ;;  %v322_v29 = vadd.f32 %v321_v21, %v273_v25 }
  0xb7   :  { %v592_v24 = vpack.c.bf16 %v365_v23, %v364_v22  ;;  %v358_v34 = vmax.f32 %v322_v29, 0.0 }
  0xb8   :  { %v292_v26 = vpop.f32.mrf.mxu2 }
  0xb9   :  { %612 = vst [vmem:[%s832_s3 + $0x20] sm:$0xff] %v592_v24   ;;  %v341_v27 = vpop.f32.mrf.mxu3  ;;  %v293_v32 = vadd.f32 %v787_v1, %v292_v26 }
  0xba   :  { %v274_v28 = vpop.f32.mrf.mxu0 }
  0xbb   :  { %v275_v30 = vadd.f32 %v787_v1, %v274_v28  ;;  %v323_v31 = vpop.f32.mrf.mxu1  ;;  %v342_v37 = vadd.f32 %v341_v27, %v293_v32 }
  0xbd   :  { %v324_v33 = vadd.f32 %v323_v31, %v275_v30  ;;  %v366_v44 = vmax.f32 %v342_v37, 0.0 }
  0xbf   :  { %v359_v35 = vmax.f32 %v324_v33, 0.0 }
  0xc0   :  { %v294_v36 = vpop.f32.mrf.mxu2 }
  0xc1   :  { %v577_v38 = vpack.c.bf16 %v359_v35, %v358_v34  ;;  %v295_v39 = vadd.f32 %v787_v1, %v294_v36  ;;  %v343_v40 = vpop.f32.mrf.mxu3 }
  0xc2   :  { %v277_v41 = vpop.f32.mrf.mxu0 }
  0xc3   :  { %609 = vst [vmem:[%s832_s3 + $0x8] sm:$0xff] %v577_v38   ;;  %v344_v42 = vadd.f32 %v343_v40, %v295_v39  ;;  %v326_v43 = vpop.f32.mrf.mxu1  ;;  %v278_v47 = vadd.f32 %v787_v1, %v277_v41 }
  0xc5   :  { %v367_v45 = vmax.f32 %v344_v42, 0.0  ;;  %v327_v51 = vadd.f32 %v326_v43, %v278_v47 }
  0xc7   :  { %v597_v46 = vpack.c.bf16 %v367_v45, %v366_v44  ;;  %v360_v56 = vmax.f32 %v327_v51, 0.0 }
  0xc8   :  { %v297_v48 = vpop.f32.mrf.mxu2 }
  0xc9   :  { %613 = vst [vmem:[%s832_s3 + $0x28] sm:$0xff] %v597_v46   ;;  %v346_v49 = vpop.f32.mrf.mxu3  ;;  %v298_v54 = vadd.f32 %v787_v1, %v297_v48 }
  0xca   :  { %v279_v50 = vpop.f32.mrf.mxu0 }
  0xcb   :  { %v280_v52 = vadd.f32 %v787_v1, %v279_v50  ;;  %v328_v53 = vpop.f32.mrf.mxu1  ;;  %v347_v59 = vadd.f32 %v346_v49, %v298_v54 }
  0xcd   :  { %v329_v55 = vadd.f32 %v328_v53, %v280_v52  ;;  %v368_v3 = vmax.f32 %v347_v59, 0.0 }
  0xcf   :  { %v361_v57 = vmax.f32 %v329_v55, 0.0 }
  0xd0   :  { %v299_v58 = vpop.f32.mrf.mxu2 }
  0xd1   :  { %v582_v60 = vpack.c.bf16 %v361_v57, %v360_v56  ;;  %v300_v61 = vadd.f32 %v787_v1, %v299_v58  ;;  %v348_v62 = vpop.f32.mrf.mxu3 }
  0xd2   :  { %v282_v63 = vpop.f32.mrf.mxu0 }
  0xd3   :  { %610 = vst [vmem:[%s832_s3 + $0x10] sm:$0xff] %v582_v60   ;;  %v349_v0 = vadd.f32 %v348_v62, %v300_v61  ;;  %v331_v2 = vpop.f32.mrf.mxu1  ;;  %v283_v6 = vadd.f32 %v787_v1, %v282_v63 }
  0xd5   :  { %v369_v4 = vmax.f32 %v349_v0, 0.0  ;;  %v332_v10 = vadd.f32 %v331_v2, %v283_v6 }
  0xd7   :  { %v602_v5 = vpack.c.bf16 %v369_v4, %v368_v3  ;;  %v362_v15 = vmax.f32 %v332_v10, 0.0 }
  0xd8   :  { %v302_v7 = vpop.f32.mrf.mxu2 }
  0xd9   :  { %614 = vst [vmem:[%s832_s3 + $0x30] sm:$0xff] %v602_v5   ;;  %v351_v8 = vpop.f32.mrf.mxu3  ;;  %v303_v13 = vadd.f32 %v787_v1, %v302_v7 }
  0xda   :  { %v284_v9 = vpop.f32.mrf.mxu0 }
  0xdb   :  { %v285_v11 = vadd.f32 %v787_v1, %v284_v9  ;;  %v333_v12 = vpop.f32.mrf.mxu1  ;;  %v352_v18 = vadd.f32 %v351_v8, %v303_v13 }
  0xdd   :  { %v334_v14 = vadd.f32 %v333_v12, %v285_v11  ;;  %v370_v23 = vmax.f32 %v352_v18, 0.0 }
  0xdf   :  { %v363_v16 = vmax.f32 %v334_v14, 0.0 }
  0xe0   :  { %v304_v17 = vpop.f32.mrf.mxu2 }
  0xe1   :  { %v587_v19 = vpack.c.bf16 %v363_v16, %v362_v15  ;;  %v305_v20 = vadd.f32 %v787_v1, %v304_v17  ;;  %v353_v21 = vpop.f32.mrf.mxu3 }
  0xe3   :  { %611 = vst [vmem:[%s832_s3 + $0x18] sm:$0xff] %v587_v19   ;;  %v354_v22 = vadd.f32 %v353_v21, %v305_v20 }
  0xe5   :  { %v371_v24 = vmax.f32 %v354_v22, 0.0 }
  0xe7   :  { %v607_v25 = vpack.c.bf16 %v371_v24, %v370_v23 }
  0xe9   :  { %615 = vst [vmem:[%s832_s3 + $0x38] sm:$0xff] %v607_v25  }
  0xea   :  { %408 = vsyncpa [#allocation3], 1 }

// kernel: merge_forward.9
= control target key start
LH: loop header
LB: loop body
LE: loop exit
PB: predicated region body
PF: predicated region fallthrough
CT: control target
= control target key end

     0   :  { %8 = vsyncpa [#allocation3], 0  ;;  %s798_s0 = inlined_call_operand.vmem [shape: bf16[32,512], index: 0, kind: input, shape index: {}]   ;;  %s799_s1 = inlined_call_operand.hbm [shape: bf16[512,128], index: 1, kind: input, shape index: {}]   ;;  %s800_s2 = inlined_call_operand.hbm [shape: f32[1,128], index: 2, kind: input, shape index: {}]   ;;  %s801_s3 = inlined_call_operand.vmem [shape: bf16[32,128], index: 3, kind: output, shape index: {}]  }
   0x1   :  { %s16_s14 = sshll.u32 %s799_s1, 4  ;;  %s17_s14 = int_to_ptr.hbm [resolvable:$true] %s16_s14 }
   0x2   :  { %9 = vsyncpa [#allocation5], 0  ;;  %s714_s15 = smov [#allocation2]   ;;  %s30_s19 = sshll.u32 %s800_s2, 4  ;;  %s31_s19 = int_to_ptr.hbm [resolvable:$true] %s30_s19 }
   0x3   :  { %s18_s16 = sshll.u32 %s714_s15, 4  ;;  %s715_s20 = smov 64   ;;  %s19_s16 = int_to_ptr.vmem [resolvable:$true] %s18_s16 }
   0x4   :  { %s716_s21 = smov 4   ;;  %s717_s22 = smov [#allocation4]  }
   0x5   :  { %24 = dma.hbm_to_vmem [thread:$0]  %s17_s14, 4096, %s19_s16, [#allocation3], %s715_s20, %s715_s20, %s716_s21  }
   0x6   :  { %s32_s23 = sshll.u32 %s717_s22, 4  ;;  %s33_s23 = int_to_ptr.vmem [resolvable:$true] %s32_s23 }
   0x7   :  { %35 = dma.hbm_to_vmem [thread:$0]  %s31_s19, 16, %s33_s23, [#allocation5]  }
   0x8   :  { %710 = dma.done.wait [#allocation3], 4096  }
   0x9   :  { %711 = vsyncadd [#allocation3], 4294963200 }
   0xa   :  { %712 = dma.done.wait [#allocation5], 16  }
   0xb   :  { %713 = vsyncadd [#allocation5], 4294967280  ;;  %v621_v0 = vld [vmem:[#allocation2 + $0x38] sm:$0xff]  ;;  %v620_v4 = vld [vmem:[#allocation2 + $0x30] sm:$0xff] }
   0xc   :  { %v629_v1 = vld [vmem:[#allocation2 + $0x78] sm:$0xff]  ;;  %352 = vmatpush.bf16.msra.mxu0 %v621_v0  ;;  %v628_v5 = vld [vmem:[#allocation2 + $0x70] sm:$0xff]  ;;  %v619_v8 = vld [vmem:[#allocation2 + $0x28] sm:$0xff] }
   0xd   :  { %v637_v2 = vld [vmem:[#allocation2 + $0xb8] sm:$0xff]  ;;  %371 = vmatpush.bf16.msra.mxu1 %v629_v1  ;;  %v636_v6 = vld [vmem:[#allocation2 + $0xb0] sm:$0xff]  ;;  %v627_v9 = vld [vmem:[#allocation2 + $0x68] sm:$0xff] }
   0xe   :  { %v645_v3 = vld [vmem:[#allocation2 + $0xf8] sm:$0xff]  ;;  %390 = vmatpush.bf16.msra.mxu2 %v637_v2  ;;  %v644_v7 = vld [vmem:[#allocation2 + $0xf0] sm:$0xff]  ;;  %v635_v10 = vld [vmem:[#allocation2 + $0xa8] sm:$0xff] }
   0xf   :  { %409 = vmatpush.bf16.msra.mxu3 %v645_v3  ;;  %v643_v11 = vld [vmem:[#allocation2 + $0xe8] sm:$0xff]  ;;  %v618_v12 = vld [vmem:[#allocation2 + $0x20] sm:$0xff]  ;;  %v617_v16 = vld [vmem:[#allocation2 + $0x18] sm:$0xff] }
  0x10   :  { %353 = vmatpush.bf16.msra.mxu0 %v620_v4  ;;  %v626_v13 = vld [vmem:[#allocation2 + $0x60] sm:$0xff]  ;;  %v625_v17 = vld [vmem:[#allocation2 + $0x58] sm:$0xff]  ;;  %v616_v20 = vld [vmem:[#allocation2 + $0x10] sm:$0xff] }
  0x11   :  { %372 = vmatpush.bf16.msra.mxu1 %v628_v5  ;;  %v634_v14 = vld [vmem:[#allocation2 + $0xa0] sm:$0xff]  ;;  %v633_v18 = vld [vmem:[#allocation2 + $0x98] sm:$0xff]  ;;  %v624_v21 = vld [vmem:[#allocation2 + $0x50] sm:$0xff] }
  0x12   :  { %391 = vmatpush.bf16.msra.mxu2 %v636_v6  ;;  %v642_v15 = vld [vmem:[#allocation2 + $0xe0] sm:$0xff]  ;;  %v641_v19 = vld [vmem:[#allocation2 + $0xd8] sm:$0xff]  ;;  %v632_v22 = vld [vmem:[#allocation2 + $0x90] sm:$0xff] }
  0x13   :  { %410 = vmatpush.bf16.msra.mxu3 %v644_v7  ;;  %v640_v23 = vld [vmem:[#allocation2 + $0xd0] sm:$0xff]  ;;  %v615_v24 = vld [vmem:[#allocation2 + $0x8] sm:$0xff]  ;;  %v614_v28 = vld [vmem:[#allocation2] sm:$0xff] }
  0x14   :  { %354 = vmatpush.bf16.msra.mxu0 %v619_v8  ;;  %v623_v25 = vld [vmem:[#allocation2 + $0x48] sm:$0xff]  ;;  %v622_v29 = vld [vmem:[#allocation2 + $0x40] sm:$0xff]  ;;  %v608_v33 = vld [vmem:[%s798_s0 + $0xc] sm:$0xf0] }
  0x15   :  { %373 = vmatpush.bf16.msra.mxu1 %v627_v9  ;;  %v631_v26 = vld [vmem:[#allocation2 + $0x88] sm:$0xff]  ;;  %v630_v30 = vld [vmem:[#allocation2 + $0x80] sm:$0xff]  ;;  %v450_v35 = vld [vmem:[%s798_s0 + $0x10] sm:$0xf0] }
  0x16   :  { %392 = vmatpush.bf16.msra.mxu2 %v635_v10  ;;  %v639_v27 = vld [vmem:[#allocation2 + $0xc8] sm:$0xff]  ;;  %v638_v31 = vld [vmem:[#allocation2 + $0xc0] sm:$0xff]  ;;  %v609_v37 = vld [vmem:[%s798_s0 + $0x14] sm:$0xf0] }
  0x17   :  { %411 = vmatpush.bf16.msra.mxu3 %v643_v11  ;;  %v448_v32 = vld [vmem:[%s798_s0] sm:$0xf]  ;;  %v606_v34 = vld [vmem:[%s798_s0 + $0x4] sm:$0xf]  ;;  %v456_v36 = vld [vmem:[%s798_s0 + $0x8] sm:$0xf] }
  0x18   :  { %355 = vmatpush.bf16.msra.mxu0 %v618_v12  ;;  %v607_v38 = vld [vmem:[%s798_s0 + $0xc] sm:$0xf]  ;;  %v458_v39 = vld [vmem:[%s798_s0 + $0x18] sm:$0xf0]  ;;  %v449_v40 = vor.u32 %v608_v33, %v448_v32  ;;  %v453_v41 = vor.u32 %v606_v34, %v450_v35  ;;  %v457_v42 = vor.u32 %v609_v37, %v456_v36  ;;  %v464_v44 = vld [vmem:[%s798_s0 + $0x20] sm:$0xf] }
  0x19   :  { %374 = vmatpush.bf16.msra.mxu1 %v626_v13  ;;  %v461_v43 = vor.u32 %v607_v38, %v458_v39  ;;  %v612_v45 = vld [vmem:[%s798_s0 + $0x2c] sm:$0xf0]  ;;  %v610_v46 = vld [vmem:[%s798_s0 + $0x24] sm:$0xf]  ;;  %v466_v47 = vld [vmem:[%s798_s0 + $0x30] sm:$0xf0] }
  0x1a   :  { %393 = vmatpush.bf16.msra.mxu2 %v634_v14  ;;  %v472_v48 = vld [vmem:[%s798_s0 + $0x28] sm:$0xf]  ;;  %v613_v49 = vld [vmem:[%s798_s0 + $0x34] sm:$0xf0]  ;;  %v611_v50 = vld [vmem:[%s798_s0 + $0x2c] sm:$0xf]  ;;  %v465_v52 = vor.u32 %v612_v45, %v464_v44  ;;  %v469_v53 = vor.u32 %v610_v46, %v466_v47 }
  0x1b   :  { %412 = vmatpush.bf16.msra.mxu3 %v642_v15  ;;  %v474_v51 = vld [vmem:[%s798_s0 + $0x38] sm:$0xf0]  ;;  %v473_v54 = vor.u32 %v613_v49, %v472_v48  ;;  %v661_v56 = vld [vmem:[#allocation4] ss:$0 sm:$0xff] }
  0x1c   :  { %356 = vmatpush.bf16.msra.mxu0 %v617_v16  ;;  %v477_v55 = vor.u32 %v611_v50, %v474_v51 }
  0x1d   :  { %375 = vmatpush.bf16.msra.mxu1 %v625_v17 }
  0x1e   :  { %394 = vmatpush.bf16.msra.mxu2 %v633_v18 }
  0x1f   :  { %413 = vmatpush.bf16.msra.mxu3 %v641_v19 }
  0x20   :  { %357 = vmatpush.bf16.msra.mxu0 %v616_v20 }
  0x21   :  { %376 = vmatpush.bf16.msra.mxu1 %v624_v21 }
  0x22   :  { %395 = vmatpush.bf16.msra.mxu2 %v632_v22 }
  0x23   :  { %414 = vmatpush.bf16.msra.mxu3 %v640_v23 }
  0x24   :  { %358 = vmatpush.bf16.msra.mxu0 %v615_v24 }
  0x25   :  { %377 = vmatpush.bf16.msra.mxu1 %v623_v25 }
  0x26   :  { %396 = vmatpush.bf16.msra.mxu2 %v631_v26 }
  0x27   :  { %415 = vmatpush.bf16.msra.mxu3 %v639_v27 }
  0x28   :  { %359 = vmatpush.bf16.msra.mxu0 %v614_v28 }
  0x29   :  { %378 = vmatpush.bf16.msra.mxu1 %v622_v29 }
  0x2a   :  { %397 = vmatpush.bf16.msra.mxu2 %v630_v30 }
  0x2b   :  { %416 = vmatpush.bf16.msra.mxu3 %v638_v31  ;;  %360 = vmatmul.bf16.vlgmr.msra.gmra.mxu0 %v449_v40 }
  0x2c   :  { %379 = vmatmul.bf16.vlgmr.msra.gmra.mxu1 %v453_v41 }
  0x2d   :  { %398 = vmatmul.bf16.vlgmr.msra.gmra.mxu2 %v457_v42 }
  0x2e   :  { %417 = vmatmul.bf16.vlgmr.msra.gmra.mxu3 %v461_v43 }
  0x3b   :  { %365 = vmatmul.bf16.gmra.mxu0 %v465_v52 }
  0x3c   :  { %384 = vmatmul.bf16.gmra.mxu1 %v469_v53 }
  0x3d   :  { %403 = vmatmul.bf16.gmra.mxu2 %v473_v54 }
  0x3e   :  { %422 = vmatmul.bf16.gmra.mxu3 %v477_v55 }
  0xa8   :  { %v361_v57 = vpop.f32.mrf.mxu0 }
  0xa9   :  { %v380_v58 = vpop.f32.mrf.mxu1  ;;  %v362_v59 = vadd.f32 %v661_v56, %v361_v57 }
  0xab   :  { %v381_v62 = vadd.f32 %v380_v58, %v362_v59 }
  0xb0   :  { %v399_v60 = vpop.f32.mrf.mxu2  ;;  %v363_v63 = vpop.f32.mrf.mxu0 }
  0xb1   :  { %v418_v61 = vpop.f32.mrf.mxu3  ;;  %v382_v0 = vpop.f32.mrf.mxu1  ;;  %v364_v1 = vadd.f32 %v661_v56, %v363_v63  ;;  %v400_v2 = vadd.f32 %v399_v60, %v381_v62 }
  0xb3   :  { %v383_v3 = vadd.f32 %v382_v0, %v364_v1  ;;  %v419_v6 = vadd.f32 %v418_v61, %v400_v2 }
  0xb5   :  { %v428_v11 = vmax.f32 %v419_v6, 0.0 }
  0xb8   :  { %v401_v4 = vpop.f32.mrf.mxu2  ;;  %v366_v8 = vpop.f32.mrf.mxu0 }
  0xb9   :  { %v420_v5 = vpop.f32.mrf.mxu3  ;;  %v402_v7 = vadd.f32 %v401_v4, %v383_v3  ;;  %v385_v10 = vpop.f32.mrf.mxu1  ;;  %v367_v13 = vadd.f32 %v661_v56, %v366_v8 }
  0xbb   :  { %v421_v9 = vadd.f32 %v420_v5, %v402_v7  ;;  %v386_v17 = vadd.f32 %v385_v10, %v367_v13 }
  0xbd   :  { %v429_v12 = vmax.f32 %v421_v9, 0.0 }
  0xbf   :  { %v649_v14 = vpack.c.bf16 %v429_v12, %v428_v11 }
  0xc0   :  { %v404_v15 = vpop.f32.mrf.mxu2  ;;  %v368_v18 = vpop.f32.mrf.mxu0 }
  0xc1   :  { %v423_v16 = vpop.f32.mrf.mxu3  ;;  %650 = vst [vmem:[%s801_s3] sm:$0xff] %v649_v14   ;;  %v369_v19 = vadd.f32 %v661_v56, %v368_v18  ;;  %v405_v20 = vadd.f32 %v404_v15, %v386_v17  ;;  %v387_v21 = vpop.f32.mrf.mxu1 }
  0xc3   :  { %v388_v22 = vadd.f32 %v387_v21, %v369_v19  ;;  %v424_v24 = vadd.f32 %v423_v16, %v405_v20 }
  0xc5   :  { %v430_v28 = vmax.f32 %v424_v24, 0.0 }
  0xc8   :  { %v406_v23 = vpop.f32.mrf.mxu2 }
  0xc9   :  { %v407_v25 = vadd.f32 %v406_v23, %v388_v22  ;;  %v425_v26 = vpop.f32.mrf.mxu3 }
  0xcb   :  { %v426_v27 = vadd.f32 %v425_v26, %v407_v25 }
  0xcd   :  { %v431_v29 = vmax.f32 %v426_v27, 0.0 }
  0xcf   :  { %v654_v30 = vpack.c.bf16 %v431_v29, %v430_v28 }
  0xd1   :  { %656 = vst [vmem:[%s801_s3 + $0x8] sm:$0xff] %v654_v30  }
  0xd2   :  { %444 = vsyncpa [#allocation3], 1 }
  0xd3   :  { %445 = vsyncpa [#allocation5], 1 }

// kernel: merge_forward.12
= control target key start
LH: loop header
LB: loop body
LE: loop exit
PB: predicated region body
PF: predicated region fallthrough
CT: control target
= control target key end

     0   :  { %10 = vsyncpa [#allocation4], 0  ;;  %s2536_s0 = inlined_call_operand.vmem [shape: f32[16,4], index: 0, kind: input, shape index: {}]   ;;  %s2537_s1 = inlined_call_operand.vmem [shape: bf16[2,4,128], index: 1, kind: input, shape index: {}]   ;;  %s2538_s2 = inlined_call_operand.vmem [shape: bf16[2,16,128], index: 2, kind: input, shape index: {}]   ;;  %s2539_s3 = inlined_call_operand.hbm [shape: bf16[9,128,128], index: 3, kind: input, shape index: {}]   ;;  %s2540_s4 = inlined_call_operand.hbm [shape: f32[1,128], index: 4, kind: input, shape index: {}]   ;;  %s2541_s5 = inlined_call_operand.vmem [shape: bf16[2,16,128], index: 5, kind: output, shape index: {}]  }
   0x1   :  { %11 = vsyncpa [#allocation6], 0  ;;  %s2342_s18 = smov 0  }
   0x2 LB: > { %s177_s21 = sshll.u32 %s2539_s3, 4  ;;  %s1784_s22 = sadd.s32 4294967295, %s2305_s18   ;;  %s2305_s18 = sphi %s2342_s18, %s17_s18   ;;  %s178_s21 = int_to_ptr.hbm [resolvable:$true] %s177_s21 }
   0x3   : > { %p1786_p0 = scmp.ge.s32.totalorder %s2305_s18, 1  ;;  %p163_p1 = scmp.lt.s32.totalorder %s2305_s18, 3 }
   0x4   : > { %p2213_p2 = scmp.eq.s32.totalorder %s1784_s22, 0  ;;  %s2307_s24 = smov [#allocation3]  }
   0x5   : > { %p2353_p3 = pnand %p1786_p0, %p163_p1  ;;  %s179_s25 = sshll.u32 %s2307_s24, 4  ;;  %s180_s25 = int_to_ptr.vmem [resolvable:$true] %s179_s25 }
   0x6   : > { %s192_s28 = sshll.u32 %s2540_s4, 4  ;;  %s2308_s29 = smov [#allocation5]   ;;  %s193_s28 = int_to_ptr.hbm [resolvable:$true] %s192_s28 }
   0x7   : > { %p2206_p4 = pneg %p2353_p3  ;;  %s194_s30 = sshll.u32 %s2308_s29, 4  ;;  %s195_s30 = int_to_ptr.vmem [resolvable:$true] %s194_s30 }
   0x8   : > { %s2309_s6 = smov 64   ;;  %s2310_s7 = smov 4  }
   0x9   : > { %p2207_p5 = pnand %p2213_p2, %p2206_p4  ;;  %222 = sbr.rel (%p2353_p3) target bundleno = 430 (0x1ae), region = 40 }
   0xb   : > { %2209 = dma.hbm_to_vmem [thread:$0]  (!%p2207_p5), %s178_s21, 9216, %s180_s25, [#allocation4], %s2309_s6, %s2309_s6, %s2310_s7  }
   0xc   : > { %2212 = dma.hbm_to_vmem [thread:$0]  (!%p2207_p5), %s193_s28, 16, %s195_s30, [#allocation6]  }
   0xe   : > { %2296 = dma.done.wait (%p2213_p2), [#allocation4], 9216  }
   0xf   : > { %2298 = vsyncadd (%p2213_p2), [#allocation4], 4294958080 }
  0x10   : > { %2300 = dma.done.wait (%p2213_p2), [#allocation6], 16  }
  0x11   : > { %2302 = vsyncadd (%p2213_p2), [#allocation6], 4294967280  ;;  %p260_p6 = scmp.lt.s32.totalorder %s1784_s22, 1  ;;  %vm290_vm0 = vcmask 1043456   ;;  %v275_v2 = vld [vmem:[%s2536_s0] sm:$0xff]  ;;  %vm283_vm1 = vcmask 31744  }
  0x12   : > { %v276_v3 = vld [vmem:[%s2536_s0 + $0x8] sm:$0xff]  ;;  %v2311_v4 = vmov 0   ;;  %vm413_vm2 = vcmask 1041408   ;;  %vm417_vm3 = vcmask 1043458   ;;  %vm439_vm4 = vsmask.f32 1280 }
  0x13   : > { %s2552_s22 = smov (!%p260_p6, %s1784_s22), 1  ;;  %317 = vst [vmem:[#allocation2] sm:$0x7] %v2311_v4  ;;  %vm440_vm5 = vsmask.f32 3336  ;;  %vm366_vm11 = vcmask 1042432  }
  0x14   : > { %s1793_s8 = sshll.u32 %s2552_s22, 1  ;;  %318 = vst [vmem:[#allocation2 + $0x4] sm:$0x7] %v2311_v4  ;;  %s2115_s16 = sshll.u32 %s2552_s22, 3  ;;  %vm441_vm6 = vmor %vm439_vm4, %vm440_vm5  ;;  %vm442_vm7 = vsmask.f32 5392 }
  0x15   : > { %s263_s11 = scalar_lea.vmem %s2537_s1, %s1793_s8  ;;  %319 = vst [vmem:[#allocation2 + $0x8] sm:$0x7] %v2311_v4  ;;  %s268_s20 = scalar_lea.vmem %s2538_s2, %s2115_s16  ;;  %vm443_vm8 = vmor %vm441_vm6, %vm442_vm7  ;;  %vm444_vm9 = vsmask.f32 7448  ;;  %vm367_vm12 = vsmask.f32 2306 }
  0x16   : > { %v277_v0 = vld [vmem:[%s263_s11] sm:$0x3]  ;;  %322 = vst [vmem:[#allocation2 + $0x14] sm:$0x7] %v2311_v4  ;;  %vm2389_vm10 = vmor %vm443_vm8, %vm444_vm9  ;;  %v2122_v32 = vld [vmem:[#allocation3 + $0x28] sm:$0xff]  ;;  %vm705_vm14 = vcmask 1040384   ;;  %s273_s24 = scalar_lea.vmem %s2541_s5, %s2115_s16 }
  0x17   : > { %v278_v1 = vunpack.c.l.bf16 %v277_v0  ;;  %320 = vst [vmem:[#allocation2 + $0xc] sm:$0x7] %v2311_v4  ;;  %v2190_v11 = vld [vmem:[%s268_s20] sm:$0xff]   ;;  %vm2395_vm13 = vmand %vm366_vm11, %vm367_vm12  ;;  %vm706_vm15 = vcmask 1042434   ;;  %vm710_vm4 = vcmask 1046534  }
  0x18   : > { %321 = vst [vmem:[#allocation2 + $0x10] sm:$0x7] %v2311_v4  ;;  %v2191_v16 = vunpack.c.l.bf16 %v2190_v11  ;;  %v2192_v28 = vunpack.c.h.bf16 %v2190_v11 }
  0x19   : > { %1798 = vmatpush.msk.msra.mxu0 %vm290_vm0, %v278_v1  ;;  %vm2423_vm0 = vmor %vm705_vm14, %vm706_vm15 }
  0x1a   : > { %1799 = vmatmul.msk.f32.vlgmr.msra.gmra.mxu0 %vm283_vm1, %v275_v2  ;;  %v401_v5 = vld [vmem:[#allocation2] sm:$0x7]  ;;  %v2132_v2 = vld [vmem:[#allocation3 + $0x78] sm:$0xff] }
  0x1b   : > { %v409_v6 = vrot.slane %v401_v5, 2  ;;  %v369_v33 = vld [vmem:[#allocation2 + $0x4] sm:$0x7]  ;;  %576 = vmatpush.bf16.msra.mxu1 %v2132_v2  ;;  %v381_v2 = vld [vmem:[#allocation2] sm:$0x3] }
  0x1c   : > { %v372_v39 = vld [vmem:[#allocation2 + $0x8] sm:$0x7] }
  0x1d   : > { %v416_v7 = vsel %vm413_vm2, %v401_v5, %v409_v6  ;;  %v418_v8 = vsel %vm417_vm3, %v401_v5, %v409_v6 }
  0x1e   : > { %v420_v9 = vrot.slane %v418_v8, 2  ;;  %v446_v10 = vshrl.u32 %v416_v7, 16  ;;  %v449_v12 = vshll.u32 %v416_v7, 16  ;;  %v375_v56 = vld [vmem:[#allocation2 + $0xc] sm:$0x7] }
  0x1f   : > { %v378_v58 = vld [vmem:[#allocation2 + $0x10] sm:$0x7] }
  0x20   : > { %v448_v13 = vrot.slane %v446_v10, 6  ;;  %v455_v14 = vshll.u32 %v420_v9, 16  ;;  %v451_v15 = vrot.slane %v449_v12, 7  ;;  %v2131_v12 = vld [vmem:[#allocation3 + $0x70] sm:$0xff] }
  0x21   : > { %577 = vmatpush.bf16.msra.mxu1 %v2131_v12 }
  0x22   : > { %1800 = vmatmul.msk.f32.gmra.mxu0 %vm283_vm1, %v276_v3  ;;  %v452_v17 = vor.u32 %v451_v15, %v448_v13  ;;  %v457_v18 = vrot.slane %v455_v14, 7  ;;  %vm708_vm1 = vcmask 1044484  }
  0x23   : > { %vm709_vm5 = vmor %vm2423_vm0, %vm708_vm1 }
  0x24   : > { %v453_v20 = vrot.slane %v452_v17, 2  ;;  %v2124_v17 = vld [vmem:[#allocation3 + $0x38] sm:$0xff]  ;;  %vm2439_vm6 = vmor %vm709_vm5, %vm710_vm4 }
  0x25   : > { %651 = vmatpush.bf16.msra.mxu2 %v2124_v17 }
  0x26   : > { %v458_v23 = vsel %vm2389_vm10, %v453_v20, %v457_v18  ;;  %v2130_v20 = vld [vmem:[#allocation3 + $0x68] sm:$0xff] }
  0x27   : > { %516 = vst [vmem:[#allocation1] ss:$4 sm:$0xff] %v458_v23  ;;  %578 = vmatpush.bf16.msra.mxu1 %v2130_v20 }
  0x97   : > { %v311_v19 = vpop.f32.mrf.mxu0 }
  0x98   : > { %v312_v21 = vadd.f32 %v2191_v16, %v311_v19 }
  0x9a   : > { %v325_v24 = vrot.slane %v312_v21, 4  ;;  %v329_v25 = vpack.c.bf16 %v312_v21, %v312_v21 }
  0x9c   : > { %v330_v26 = vpack.c.bf16 %v325_v24, %v325_v24  ;;  %v334_v27 = vshrl.u32 %v329_v25, 16  ;;  %v337_v30 = vshll.u32 %v329_v25, 16  ;;  %v2123_v24 = vld [vmem:[#allocation3 + $0x30] sm:$0xff] }
  0x9d   : > { %652 = vmatpush.bf16.msra.mxu2 %v2123_v24  ;;  %v2153_v24 = vld [vmem:[#allocation3 + $0x120] sm:$0xff] }
  0x9e   : > { %v336_v29 = vrot.slane %v334_v27, 7  ;;  %v341_v31 = vshrl.u32 %v330_v26, 16  ;;  %v344_v37 = vshll.u32 %v330_v26, 16  ;;  %v2129_v27 = vld [vmem:[#allocation3 + $0x60] sm:$0xff] }
  0x9f   : > { %v314_v34 = vpop.f32.mrf.mxu0  ;;  %579 = vmatpush.bf16.msra.mxu1 %v2129_v27 }
  0xa0   : > { %v339_v35 = vor.u32 %v337_v30, %v336_v29  ;;  %v343_v36 = vrot.slane %v341_v31, 7  ;;  %v315_v38 = vadd.f32 %v2192_v28, %v314_v34  ;;  %v2128_v30 = vld [vmem:[#allocation3 + $0x58] sm:$0xff] }
  0xa1   : > { %653 = vmatpush.bf16.msra.mxu2 %v2122_v32 }
  0xa2   : > { %v346_v40 = vor.u32 %v344_v37, %v343_v36  ;;  %v370_v41 = vsel %vm2395_vm13, %v339_v35, %v369_v33  ;;  %v326_v42 = vrot.slane %v315_v38, 4  ;;  %v331_v43 = vpack.c.bf16 %v315_v38, %v315_v38  ;;  %v2140_v35 = vld [vmem:[#allocation3 + $0xb8] sm:$0xff]  ;;  %v2127_v36 = vld [vmem:[#allocation3 + $0x50] sm:$0xff]  ;;  %v2121_v37 = vld [vmem:[#allocation3 + $0x20] sm:$0xff] }
  0xa3   : > { %371 = vst [vmem:[#allocation2 + $0x4] sm:$0x7] %v370_v41  ;;  %580 = vmatpush.bf16.msra.mxu1 %v2128_v30  ;;  %806 = vmatpush.bf16.msra.mxu3 %v2140_v35  ;;  %v2139_v41 = vld [vmem:[#allocation3 + $0xb0] sm:$0xff] }
  0xa4   : > { %v373_v44 = vsel %vm2395_vm13, %v346_v40, %v372_v39  ;;  %v332_v45 = vpack.c.bf16 %v326_v42, %v326_v42  ;;  %v348_v46 = vshrl.u32 %v331_v43, 16  ;;  %v351_v49 = vshll.u32 %v331_v43, 16  ;;  %v2126_v42 = vld [vmem:[#allocation3 + $0x48] sm:$0xff]  ;;  %v2148_v43 = vld [vmem:[#allocation3 + $0xf8] sm:$0xff]  ;;  %v2163_v30 = vld [vmem:[#allocation3 + $0x170] sm:$0xff] }
  0xa5   : > { %374 = vst [vmem:[#allocation2 + $0x8] sm:$0x7] %v373_v44  ;;  %654 = vmatpush.bf16.msra.mxu2 %v2121_v37  ;;  %904 = vmatpush.bf16.msrb.mxu0 %v2148_v43 }
  0xa6   : > { %v355_v47 = vshrl.u32 %v332_v45, 16  ;;  %v350_v48 = vrot.slane %v348_v46, 7  ;;  %v358_v51 = vshll.u32 %v332_v45, 16 }
  0xa7   : > { %581 = vmatpush.bf16.msra.mxu1 %v2127_v36  ;;  %807 = vmatpush.bf16.msra.mxu3 %v2139_v41  ;;  %v2142_v36 = vld [vmem:[#allocation3 + $0xc8] sm:$0xff] }
  0xa8   : > { %v357_v50 = vrot.slane %v355_v47, 7  ;;  %v353_v53 = vor.u32 %v351_v49, %v350_v48  ;;  %v2120_v47 = vld [vmem:[#allocation3 + $0x18] sm:$0xff]  ;;  %v2147_v48 = vld [vmem:[#allocation3 + $0xf0] sm:$0xff] }
  0xa9   : > { %655 = vmatpush.bf16.msra.mxu2 %v2120_v47  ;;  %905 = vmatpush.bf16.msrb.mxu0 %v2147_v48  ;;  %v2162_v47 = vld [vmem:[#allocation3 + $0x168] sm:$0xff] }
  0xaa   : > { %v402_v52 = vld [vmem:[#allocation2 + $0x4] sm:$0x7]  ;;  %v360_v55 = vor.u32 %v358_v51, %v357_v50  ;;  %v376_v1 = vsel %vm2395_vm13, %v353_v53, %v375_v56  ;;  %v2125_v51 = vld [vmem:[#allocation3 + $0x40] sm:$0xff]  ;;  %v2156_v56 = vld [vmem:[#allocation3 + $0x138] sm:$0xff] }
  0xab   : > { %v410_v54 = vrot.slane %v402_v52, 2  ;;  %377 = vst [vmem:[#allocation2 + $0xc] sm:$0x7] %v376_v1  ;;  %582 = vmatpush.bf16.msra.mxu1 %v2126_v42  ;;  %v2138_v50 = vld [vmem:[#allocation3 + $0xa8] sm:$0xff] }
  0xac   : > { %v403_v57 = vld [vmem:[#allocation2 + $0x8] sm:$0x7]  ;;  %v379_v5 = vsel %vm2395_vm13, %v360_v55, %v378_v58  ;;  %v2146_v55 = vld [vmem:[#allocation3 + $0xe8] sm:$0xff]  ;;  %808 = vmatpush.bf16.msra.mxu3 %v2138_v50  ;;  %v2137_v58 = vld [vmem:[#allocation3 + $0xa0] sm:$0xff] }
  0xad   : > { %v411_v59 = vrot.slane %v403_v57, 2  ;;  %v423_v60 = vsel %vm413_vm2, %v402_v52, %v410_v54  ;;  %v424_v61 = vsel %vm417_vm3, %v402_v52, %v410_v54  ;;  %380 = vst [vmem:[#allocation2 + $0x10] sm:$0x7] %v379_v5  ;;  %v2119_v54 = vld [vmem:[#allocation3 + $0x10] sm:$0xff]  ;;  %906 = vmatpush.bf16.msrb.mxu0 %v2146_v55  ;;  %v382_v5 = vld [vmem:[#allocation2 + $0x4] sm:$0x3] }
  0xae   : > { %v426_v62 = vrot.slane %v424_v61, 2  ;;  %v459_v63 = vshrl.u32 %v423_v60, 16  ;;  %v462_v0 = vshll.u32 %v423_v60, 16  ;;  %656 = vmatpush.bf16.msra.mxu2 %v2119_v54  ;;  %v2118_v60 = vld [vmem:[#allocation3 + $0x8] sm:$0xff]  ;;  %v2145_v61 = vld [vmem:[#allocation3 + $0xe0] sm:$0xff] }
  0xaf   : > { %v429_v3 = vsel %vm413_vm2, %v403_v57, %v411_v59  ;;  %v430_v4 = vsel %vm417_vm3, %v403_v57, %v411_v59  ;;  %583 = vmatpush.bf16.msra.mxu1 %v2125_v51  ;;  %v665_v59 = vld [vmem:[#allocation2] sm:$0x6]  ;;  %v2434_v32 = vld [vmem:[#allocation2 + $0x8] sm:$0x7]  ;;  %v2172_v51 = vld [vmem:[#allocation3 + $0x1b8] sm:$0xff] }
  0xb0   : > { %v432_v6 = vrot.slane %v430_v4, 2  ;;  %v461_v7 = vrot.slane %v459_v63, 6  ;;  %v464_v8 = vrot.slane %v462_v0, 7  ;;  %v468_v9 = vshll.u32 %v426_v62, 16  ;;  %v2155_v62 = vld [vmem:[#allocation3 + $0x130] sm:$0xff]  ;;  %809 = vmatpush.bf16.msra.mxu3 %v2137_v58  ;;  %v2136_v63 = vld [vmem:[#allocation3 + $0x98] sm:$0xff] }
  0xb1   : > { %v472_v10 = vshrl.u32 %v429_v3, 16  ;;  %v475_v11 = vshll.u32 %v429_v3, 16  ;;  %v666_v0 = vld [vmem:[#allocation2 + $0x4] sm:$0x6]  ;;  %v673_v1 = vrot.slane %v665_v59, 2  ;;  %907 = vmatpush.bf16.msrb.mxu0 %v2145_v61  ;;  %v2141_v54 = vld [vmem:[#allocation3 + $0xc0] sm:$0xff] }
  0xb2   : > { %v465_v13 = vor.u32 %v464_v8, %v461_v7  ;;  %v481_v16 = vshll.u32 %v432_v6, 16  ;;  %v470_v19 = vrot.slane %v468_v9, 7  ;;  %v404_v29 = vld [vmem:[#allocation2 + $0xc] sm:$0x7]  ;;  %v667_v3 = vld [vmem:[#allocation2 + $0x8] sm:$0x6]  ;;  %657 = vmatpush.bf16.msra.mxu2 %v2118_v60 }
  0xb3   : > { %v474_v14 = vrot.slane %v472_v10, 6  ;;  %v477_v15 = vrot.slane %v475_v11, 7  ;;  %v412_v31 = vrot.slane %v404_v29, 2  ;;  %1086 = vmatpush.bf16.msrb.mxu1 %v2156_v56  ;;  %v2154_v4 = vld [vmem:[#allocation3 + $0x128] sm:$0xff]  ;;  %v2117_v6 = vld [vmem:[#allocation3] sm:$0xff]  ;;  %v2144_v7 = vld [vmem:[#allocation3 + $0xd8] sm:$0xff]  ;;  %v679_v12 = vsel %vm413_vm2, %v665_v59, %v673_v1 }
  0xb4   : > { %v466_v18 = vrot.slane %v465_v13, 2  ;;  %v483_v26 = vrot.slane %v481_v16, 7  ;;  %v674_v8 = vrot.slane %v666_v0, 2  ;;  %v668_v10 = vld [vmem:[#allocation2 + $0xc] sm:$0x6]  ;;  %810 = vmatpush.bf16.msra.mxu3 %v2136_v63  ;;  %v675_v11 = vrot.slane %v667_v3, 2 }
  0xb5   : > { %v478_v21 = vor.u32 %v477_v15, %v474_v14  ;;  %v435_v33 = vsel %vm413_vm2, %v404_v29, %v412_v31  ;;  %v436_v34 = vsel %vm417_vm3, %v404_v29, %v412_v31  ;;  %v2135_v13 = vld [vmem:[#allocation3 + $0x90] sm:$0xff]  ;;  %v2164_v14 = vld [vmem:[#allocation3 + $0x178] sm:$0xff]  ;;  %v681_v16 = vsel %vm417_vm3, %v665_v59, %v673_v1  ;;  %908 = vmatpush.bf16.msrb.mxu0 %v2144_v7  ;;  %v2134_v29 = vld [vmem:[#allocation3 + $0x88] sm:$0xff] }
  0xb6   : > { %v471_v23 = vsel %vm2389_vm10, %v466_v18, %v470_v19  ;;  %v438_v38 = vrot.slane %v436_v34, 2  ;;  %v485_v39 = vshrl.u32 %v435_v33, 16  ;;  %v488_v40 = vshll.u32 %v435_v33, 16  ;;  %v383_v15 = vld [vmem:[#allocation2 + $0x8] sm:$0x3]  ;;  %658 = vmatpush.bf16.msra.mxu2 %v2117_v6  ;;  %v2152_v33 = vld [vmem:[#allocation3 + $0x118] sm:$0xff] }
  0xb7   : > { %v479_v25 = vrot.slane %v478_v21, 2  ;;  %519 = vst [vmem:[#allocation1 + $0x1] ss:$4 sm:$0xff] %v471_v23  ;;  %1087 = vmatpush.bf16.msrb.mxu1 %v2155_v62  ;;  %v384_v18 = vld [vmem:[#allocation2 + $0xc] sm:$0x3]  ;;  %v676_v19 = vrot.slane %v668_v10, 2  ;;  %v686_v20 = vsel %vm413_vm2, %v666_v0, %v674_v8  ;;  %v695_v27 = vsel %vm417_vm3, %v667_v3, %v675_v11 }
  0xb8   : > { %v487_v44 = vrot.slane %v485_v39, 6  ;;  %v490_v45 = vrot.slane %v488_v40, 7  ;;  %v494_v46 = vshll.u32 %v438_v38, 16  ;;  %v1865_v21 = vrot.slane %v679_v12, 9  ;;  %v2143_v23 = vld [vmem:[#allocation3 + $0xd0] sm:$0xff]  ;;  %811 = vmatpush.bf16.msra.mxu3 %v2135_v13  ;;  %v2161_v60 = vld [vmem:[#allocation3 + $0x160] sm:$0xff] }
  0xb9   : > { %v484_v28 = vsel %vm2389_vm10, %v479_v25, %v483_v26  ;;  %v688_v25 = vsel %vm417_vm3, %v666_v0, %v674_v8  ;;  %v693_v26 = vsel %vm413_vm2, %v667_v3, %v675_v11  ;;  %v920_v31 = vld [vmem:[#allocation2 + $0x4] sm:$0x7]  ;;  %v700_v34 = vsel %vm413_vm2, %v668_v10, %v676_v19  ;;  %909 = vmatpush.bf16.msrb.mxu0 %v2143_v23  ;;  %v2448_v50 = vld [vmem:[#allocation2 + $0x10] sm:$0x7]  ;;  %v2171_v63 = vld [vmem:[#allocation3 + $0x1b0] sm:$0xff] }
  0xba   : > { %522 = vst [vmem:[#allocation1 + $0x2] ss:$4 sm:$0xff] %v484_v28  ;;  %v491_v49 = vor.u32 %v490_v45, %v487_v44  ;;  %v496_v53 = vrot.slane %v494_v46, 7  ;;  %v1866_v28 = vrot.slane %v681_v16, 9  ;;  %1236 = vmatpush.bf16.msrb.mxu2 %v2164_v14  ;;  %v702_v35 = vsel %vm417_vm3, %v668_v10, %v676_v19  ;;  %v2446_v45 = vld [vmem:[#allocation2 + $0xc] sm:$0x7] }
  0xbb   : > { %1088 = vmatpush.bf16.msrb.mxu1 %v2154_v4  ;;  %v1867_v38 = vrot.slane %v686_v20, 9  ;;  %v1868_v39 = vrot.slane %v688_v25, 9  ;;  %v1869_v40 = vrot.slane %v693_v26, 9  ;;  %v1870_v41 = vrot.slane %v695_v27, 9  ;;  %v2133_v46 = vld [vmem:[#allocation3 + $0x80] sm:$0xff]  ;;  %v2150_v0 = vld [vmem:[#allocation3 + $0x108] sm:$0xff] }
  0xbc   : > { %v492_v52 = vrot.slane %v491_v49, 2  ;;  %v715_v42 = vsel %vm2439_vm6, %v1865_v21, %v1866_v28  ;;  %v928_v43 = vrot.slane %v920_v31, 2  ;;  %v929_v44 = vrot.slane %v2434_v32, 2  ;;  %812 = vmatpush.bf16.msra.mxu3 %v2134_v29  ;;  %v2180_v1 = vld [vmem:[#allocation3 + $0x1f8] sm:$0xff]  ;;  %v2179_v10 = vld [vmem:[#allocation3 + $0x1f0] sm:$0xff]  ;;  %v2170_v11 = vld [vmem:[#allocation3 + $0x1a8] sm:$0xff] }
  0xbd   : > { %v1871_v48 = vrot.slane %v700_v34, 9  ;;  %v1872_v49 = vrot.slane %v702_v35, 9  ;;  %910 = vmatpush.bf16.msrb.mxu0 %v2142_v36  ;;  %v719_v55 = vsel %vm2439_vm6, %v1867_v38, %v1868_v39  ;;  %v930_v56 = vrot.slane %v2446_v45, 2  ;;  %v2149_v12 = vld [vmem:[#allocation3 + $0x100] sm:$0xff]  ;;  %v822_v16 = vld [vmem:[#allocation2 + $0x4] sm:$0x3] }
  0xbe   : > { %v497_v57 = vsel %vm2389_vm10, %v492_v52, %v496_v53  ;;  %1237 = vmatpush.bf16.msrb.mxu2 %v2163_v30  ;;  %v2151_v52 = vld [vmem:[#allocation3 + $0x110] sm:$0xff]  ;;  %v934_v58 = vsel %vm413_vm2, %v920_v31, %v928_v43  ;;  %v931_v59 = vrot.slane %v2448_v50, 2  ;;  %v940_v61 = vsel %vm413_vm2, %v2434_v32, %v929_v44  ;;  %v2178_v28 = vld [vmem:[#allocation3 + $0x1e8] sm:$0xff]  ;;  %v825_v39 = vld [vmem:[#allocation2 + $0x10] sm:$0x3] }
  0xbf   : > { %525 = vst [vmem:[#allocation1 + $0x3] ss:$4 sm:$0xff] %v497_v57  ;;  %1089 = vmatpush.bf16.msrb.mxu1 %v2153_v24  ;;  %v723_v57 = vsel %vm2439_vm6, %v1869_v40, %v1870_v41  ;;  %v727_v62 = vsel %vm2439_vm6, %v1871_v48, %v1872_v49  ;;  %v956_v3 = vshrl.u32 %v934_v58, 16  ;;  %v946_v4 = vsel %vm413_vm2, %v2446_v45, %v930_v56  ;;  %v823_v21 = vld [vmem:[#allocation2 + $0x8] sm:$0x3]  ;;  %v2168_v48 = vld [vmem:[#allocation3 + $0x198] sm:$0xff] }
  0xc0   : > { %813 = vmatpush.bf16.msra.mxu3 %v2133_v46  ;;  %v969_v6 = vshrl.u32 %v940_v61, 16  ;;  %v972_v7 = vshll.u32 %v940_v61, 16  ;;  %v952_v8 = vsel %vm413_vm2, %v2448_v50, %v931_v59  ;;  %v982_v13 = vshrl.u32 %v946_v4, 16  ;;  %v2159_v27 = vld [vmem:[#allocation3 + $0x150] sm:$0xff] }
  0xc1   : > { %911 = vmatpush.bf16.msrb.mxu0 %v2141_v54  ;;  %v985_v14 = vshll.u32 %v946_v4, 16  ;;  %v995_v19 = vshrl.u32 %v952_v8, 16  ;;  %v998_v20 = vshll.u32 %v952_v8, 16  ;;  %v958_v23 = vrot.slane %v956_v3, 6  ;;  %v824_v30 = vld [vmem:[#allocation2 + $0xc] sm:$0x3] }
  0xc2   : > { %1238 = vmatpush.bf16.msrb.mxu2 %v2162_v47  ;;  %v971_v25 = vrot.slane %v969_v6, 6  ;;  %v974_v26 = vrot.slane %v972_v7, 7  ;;  %v953_v34 = vsel %vm417_vm3, %v2448_v50, %v931_v59  ;;  %v984_v35 = vrot.slane %v982_v13, 6  ;;  %v2187_v38 = vld [vmem:[#allocation3 + $0x230] sm:$0xff]  ;;  %v1102_v3 = vld [vmem:[#allocation2 + $0x4] sm:$0x6] }
  0xc3   : > { %1090 = vmatpush.bf16.msrb.mxu1 %v2152_v33  ;;  %v2169_v33 = vld [vmem:[#allocation3 + $0x1a0] sm:$0xff]  ;;  %v987_v36 = vrot.slane %v985_v14, 7  ;;  %v997_v40 = vrot.slane %v995_v19, 6  ;;  %v1000_v41 = vrot.slane %v998_v20, 7  ;;  %v955_v47 = vrot.slane %v953_v34, 2  ;;  %v2167_v61 = vld [vmem:[#allocation3 + $0x190] sm:$0xff] }
  0xc4   : > { %1335 = vmatpush.bf16.msrb.mxu3 %v2172_v51  ;;  %v975_v46 = vor.u32 %v974_v26, %v971_v25  ;;  %v2186_v51 = vld [vmem:[#allocation3 + $0x228] sm:$0xff]  ;;  %v1103_v4 = vld [vmem:[#allocation2 + $0x8] sm:$0x6]  ;;  %v2165_v26 = vld [vmem:[#allocation3 + $0x180] sm:$0xff] }
  0xc5   : > { %1517 = vmatpush.bf16.msra.mxu0 %v2180_v1  ;;  %v988_v50 = vor.u32 %v987_v36, %v984_v35  ;;  %v1004_v59 = vshll.u32 %v955_v47, 16  ;;  %v2185_v1 = vld [vmem:[#allocation3 + $0x220] sm:$0xff]  ;;  %v2166_v14 = vld [vmem:[#allocation3 + $0x188] sm:$0xff]  ;;  %v1352_v35 = vld [vmem:[#allocation2 + $0xc] sm:$0x7] }
  0xc6   : > { %v526_v9 = vld.sshfl [vmem:[#allocation1] sm:$0xff pattern:$0x73625140]  ;;  %1239 = vmatpush.bf16.msrb.mxu2 %v2161_v60  ;;  %v1104_v60 = vld [vmem:[#allocation2 + $0xc] sm:$0x6]  ;;  %v1360_v47 = vrot.slane %v1352_v35, 2 }
  0xc7   : > { %591 = vst [vmem:[#allocation1] ss:$4 sm:$0xff] %v381_v2  ;;  %584 = vmatmul.bf16.vlgmr.msra.gmra.mxu1 %v526_v9  ;;  %v935_v2 = vsel %vm417_vm3, %v920_v31, %v928_v43  ;;  %v2160_v9 = vld [vmem:[#allocation3 + $0x158] sm:$0xff]  ;;  %v947_v31 = vsel %vm417_vm3, %v2446_v45, %v930_v56  ;;  %v2177_v45 = vld [vmem:[#allocation3 + $0x1e0] sm:$0xff] }
  0xc8   : > { %594 = vst [vmem:[#allocation1 + $0x1] ss:$4 sm:$0xff] %v382_v5  ;;  %1091 = vmatpush.bf16.msrb.mxu1 %v2151_v52  ;;  %v959_v5 = vshll.u32 %v934_v58, 16  ;;  %1336 = vmatpush.bf16.msrb.mxu3 %v2171_v63  ;;  %v937_v17 = vrot.slane %v935_v2, 2  ;;  %v949_v43 = vrot.slane %v947_v31, 2  ;;  %v2157_v56 = vld [vmem:[#allocation3 + $0x140] sm:$0xff] }
  0xc9   : > { %597 = vst [vmem:[#allocation1 + $0x2] ss:$4 sm:$0xff] %v383_v15  ;;  %v2188_v15 = vld [vmem:[#allocation3 + $0x238] sm:$0xff]  ;;  %1518 = vmatpush.bf16.msra.mxu0 %v2179_v10  ;;  %v976_v58 = vrot.slane %v975_v46, 2  ;;  %v989_v63 = vrot.slane %v988_v50, 2  ;;  %v2175_v10 = vld [vmem:[#allocation3 + $0x1d0] sm:$0xff] }
  0xca   : > { %600 = vst [vmem:[#allocation1 + $0x3] ss:$4 sm:$0xff] %v384_v18  ;;  %v941_v18 = vsel %vm417_vm3, %v2434_v32, %v929_v44  ;;  %v961_v24 = vrot.slane %v959_v5, 7  ;;  %1240 = vmatpush.bf16.msrb.mxu2 %v2160_v9  ;;  %v2158_v44 = vld [vmem:[#allocation3 + $0x148] sm:$0xff]  ;;  %v965_v49 = vshll.u32 %v937_v17, 16  ;;  %v1112_v9 = vrot.slane %v1104_v60, 2 }
  0xcb   : > { %v943_v32 = vrot.slane %v941_v18, 2  ;;  %v1111_v17 = vrot.slane %v1103_v4, 2  ;;  %v1354_v36 = vld [vmem:[#allocation2 + $0x14] sm:$0x7] }
  0xcc   : > { %1092 = vmatpush.bf16.msrb.mxu1 %v2150_v0  ;;  %1337 = vmatpush.bf16.msrb.mxu3 %v2170_v11  ;;  %v1105_v0 = vld [vmem:[#allocation2 + $0x10] sm:$0x6]  ;;  %v1130_v19 = vsel %vm413_vm2, %v1104_v60, %v1112_v9  ;;  %v1132_v20 = vsel %vm417_vm3, %v1104_v60, %v1112_v9  ;;  %v1256_v9 = vld [vmem:[#allocation2 + $0x14] sm:$0x3] }
  0xcd   : > { %1519 = vmatpush.bf16.msra.mxu0 %v2178_v28  ;;  %v978_v52 = vshll.u32 %v943_v32, 16  ;;  %v1113_v13 = vrot.slane %v1105_v0, 2  ;;  %v1123_v31 = vsel %vm413_vm2, %v1103_v4, %v1111_v17  ;;  %v1973_v32 = vrot.slane %v1130_v19, 9 }
  0xce   : > { %1241 = vmatpush.bf16.msrb.mxu2 %v2159_v27  ;;  %v1974_v34 = vrot.slane %v1132_v20, 9 }
  0xcf   : > { %v980_v2 = vrot.slane %v978_v52, 7  ;;  %v1139_v25 = vsel %vm417_vm3, %v1105_v0, %v1113_v13 }
  0xd0   : > { %1093 = vmatpush.bf16.msrb.mxu1 %v2149_v12  ;;  %1338 = vmatpush.bf16.msrb.mxu3 %v2169_v33  ;;  %v1006_v12 = vrot.slane %v1004_v59, 7  ;;  %v1125_v33 = vsel %vm417_vm3, %v1103_v4, %v1111_v17  ;;  %v1153_v50 = vsel %vm2439_vm6, %v1973_v32, %v1974_v34 }
  0xd1   : > { %v601_v53 = vld.sshfl [vmem:[#allocation1] sm:$0xff pattern:$0x73625140]  ;;  %1520 = vmatpush.bf16.msra.mxu0 %v2177_v45  ;;  %v981_v11 = vsel %vm2389_vm10, %v976_v58, %v980_v2  ;;  %v1971_v45 = vrot.slane %v1123_v31, 9  ;;  %v1972_v46 = vrot.slane %v1125_v33, 9 }
  0xd2   : > { %746 = vst [vmem:[#allocation1] ss:$4 sm:$0xff] %v715_v42  ;;  %659 = vmatmul.bf16.vlgmr.msra.gmra.mxu2 %v601_v53  ;;  %v962_v42 = vor.u32 %v961_v24, %v958_v23  ;;  %v1001_v53 = vor.u32 %v1000_v41, %v997_v40  ;;  %v2184_v23 = vld [vmem:[#allocation3 + $0x218] sm:$0xff]  ;;  %v1137_v24 = vsel %vm413_vm2, %v1105_v0, %v1113_v13  ;;  %v2173_v40 = vld [vmem:[#allocation3 + $0x1c0] sm:$0xff] }
  0xd3   : > { %749 = vst [vmem:[#allocation1 + $0x1] ss:$4 sm:$0xff] %v719_v55  ;;  %v991_v55 = vshll.u32 %v949_v43, 16  ;;  %1242 = vmatpush.bf16.msrb.mxu2 %v2158_v44  ;;  %v1353_v44 = vld [vmem:[#allocation2 + $0x10] sm:$0x7] }
  0xd4   : > { %752 = vst [vmem:[#allocation1 + $0x2] ss:$4 sm:$0xff] %v723_v57  ;;  %1667 = vmatpush.bf16.msra.mxu1 %v2188_v15  ;;  %v963_v54 = vrot.slane %v962_v42, 2  ;;  %v2176_v57 = vld [vmem:[#allocation3 + $0x1d8] sm:$0xff]  ;;  %1339 = vmatpush.bf16.msrb.mxu3 %v2168_v48  ;;  %v1002_v5 = vrot.slane %v1001_v53, 2  ;;  %v1110_v15 = vrot.slane %v1102_v3, 2 }
  0xd5   : > { %755 = vst [vmem:[#allocation1 + $0x3] ss:$4 sm:$0xff] %v727_v62  ;;  %v967_v62 = vrot.slane %v965_v49, 7  ;;  %v993_v8 = vrot.slane %v991_v55, 7  ;;  %1521 = vmatpush.bf16.msra.mxu0 %v2176_v57  ;;  %v1362_v48 = vrot.slane %v1354_v36, 2  ;;  %v1361_v52 = vrot.slane %v1353_v44, 2 }
  0xd6   : > { %v1007_v18 = vsel %vm2389_vm10, %v1002_v5, %v1006_v12  ;;  %v1116_v27 = vsel %vm413_vm2, %v1102_v3, %v1110_v15  ;;  %v1118_v28 = vsel %vm417_vm3, %v1102_v3, %v1110_v15  ;;  %v1149_v55 = vsel %vm2439_vm6, %v1971_v45, %v1972_v46  ;;  %v2182_v57 = vld [vmem:[#allocation3 + $0x208] sm:$0xff]  ;;  %v1535_v46 = vld [vmem:[#allocation2 + $0x10] sm:$0x6] }
  0xd7   : > { %v968_v6 = vsel %vm2389_vm10, %v963_v54, %v967_v62  ;;  %1243 = vmatpush.bf16.msrb.mxu2 %v2157_v56  ;;  %v1969_v41 = vrot.slane %v1116_v27, 9  ;;  %v1970_v42 = vrot.slane %v1118_v28, 9  ;;  %v1371_v56 = vsel %vm413_vm2, %v1352_v35, %v1360_v47 }
  0xd8   : > { %1668 = vmatpush.bf16.msra.mxu1 %v2187_v38  ;;  %1340 = vmatpush.bf16.msrb.mxu3 %v2167_v61  ;;  %v1975_v38 = vrot.slane %v1137_v24, 9  ;;  %v1383_v58 = vsel %vm413_vm2, %v1354_v36, %v1362_v48  ;;  %v1377_v60 = vsel %vm413_vm2, %v1353_v44, %v1361_v52  ;;  %v2181_v61 = vld [vmem:[#allocation3 + $0x200] sm:$0xff]  ;;  %v1403_v0 = vshll.u32 %v1371_v56, 16  ;;  %v1255_v24 = vld [vmem:[#allocation2 + $0x10] sm:$0x3] }
  0xd9   : > { %1522 = vmatpush.bf16.msra.mxu0 %v2175_v10  ;;  %v1145_v53 = vsel %vm2439_vm6, %v1969_v41, %v1970_v42  ;;  %v1429_v2 = vshll.u32 %v1383_v58, 16  ;;  %v1413_v3 = vshrl.u32 %v1377_v60, 16  ;;  %v1416_v4 = vshll.u32 %v1377_v60, 16  ;;  %v1536_v42 = vld [vmem:[#allocation2 + $0x14] sm:$0x6] }
  0xda   : > { %v1384_v5 = vsel %vm417_vm3, %v1354_v36, %v1362_v48  ;;  %v1372_v12 = vsel %vm417_vm3, %v1352_v35, %v1360_v47  ;;  %v1378_v15 = vsel %vm417_vm3, %v1353_v44, %v1361_v52  ;;  %v1533_v36 = vld [vmem:[#allocation2 + $0x8] sm:$0x6]  ;;  %v1534_v44 = vld [vmem:[#allocation2 + $0xc] sm:$0x6] }
  0xdb   : > { %v1386_v17 = vrot.slane %v1384_v5, 2  ;;  %v1431_v19 = vrot.slane %v1429_v2, 7  ;;  %v1380_v27 = vrot.slane %v1378_v15, 2  ;;  %v1541_v48 = vrot.slane %v1533_v36, 2 }
  0xdc   : > { %v756_v29 = vld.sshfl [vmem:[#allocation1] sm:$0xff pattern:$0x73625140]  ;;  %1669 = vmatpush.bf16.msra.mxu1 %v2186_v51  ;;  %1341 = vmatpush.bf16.msrb.mxu3 %v2166_v14  ;;  %v1405_v14 = vrot.slane %v1403_v0, 7 }
  0xdd   : > { %844 = vst [vmem:[#allocation1] ss:$4 sm:$0xff] %v822_v16  ;;  %814 = vmatmul.bf16.vlgmr.msra.gmra.mxu3 %v756_v29  ;;  %v994_v16 = vsel %vm2389_vm10, %v989_v63, %v993_v8  ;;  %v1351_v29 = vld [vmem:[#allocation2 + $0x8] sm:$0x7]  ;;  %v1400_v63 = vshrl.u32 %v1371_v56, 16  ;;  %v1422_v35 = vshll.u32 %v1380_v27, 16 }
  0xde   : > { %847 = vst [vmem:[#allocation1 + $0x1] ss:$4 sm:$0xff] %v823_v21  ;;  %v2174_v21 = vld [vmem:[#allocation3 + $0x1c8] sm:$0xff]  ;;  %v1359_v43 = vrot.slane %v1351_v29, 2  ;;  %v1543_v56 = vrot.slane %v1535_v46, 2 }
  0xdf   : > { %850 = vst [vmem:[#allocation1 + $0x2] ss:$4 sm:$0xff] %v824_v30  ;;  %v2183_v30 = vld [vmem:[#allocation3 + $0x210] sm:$0xff]  ;;  %1523 = vmatpush.bf16.msra.mxu0 %v2174_v21  ;;  %v1402_v13 = vrot.slane %v1400_v63, 6  ;;  %v1415_v21 = vrot.slane %v1413_v3, 6 }
  0xe0   : > { %853 = vst [vmem:[#allocation1 + $0x3] ss:$4 sm:$0xff] %v825_v39  ;;  %1670 = vmatpush.bf16.msra.mxu1 %v2185_v1  ;;  %v1976_v39 = vrot.slane %v1139_v25, 9  ;;  %1342 = vmatpush.bf16.msrb.mxu3 %v2165_v26  ;;  %v1365_v54 = vsel %vm413_vm2, %v1351_v29, %v1359_v43  ;;  %v1426_v1 = vshrl.u32 %v1383_v58, 16  ;;  %v1374_v25 = vrot.slane %v1372_v12, 2 }
  0xe1   : > { %v1387_v59 = vshrl.u32 %v1365_v54, 16  ;;  %v1390_v62 = vshll.u32 %v1365_v54, 16  ;;  %v1406_v28 = vor.u32 %v1405_v14, %v1402_v13  ;;  %v1549_v58 = vsel %vm417_vm3, %v1533_v36, %v1541_v48 }
  0xe2   : > { %v1157_v51 = vsel %vm2439_vm6, %v1975_v38, %v1976_v39  ;;  %v1409_v32 = vshll.u32 %v1374_v25, 16  ;;  %v1561_v63 = vsel %vm413_vm2, %v1535_v46, %v1543_v56  ;;  %v1563_v22 = vsel %vm417_vm3, %v1535_v46, %v1543_v56  ;;  %v2230_v46 = vld [vmem:[#allocation5] ss:$0 sm:$0xff] }
  0xe3   : > { %1524 = vmatpush.bf16.msra.mxu0 %v2173_v40  ;;  %v1389_v8 = vrot.slane %v1387_v59, 6  ;;  %v1392_v10 = vrot.slane %v1390_v62, 7  ;;  %v1407_v38 = vrot.slane %v1406_v28, 2 }
  0xe4   : > { %1671 = vmatpush.bf16.msra.mxu1 %v2184_v23  ;;  %v1418_v23 = vrot.slane %v1416_v4, 7  ;;  %v1411_v45 = vrot.slane %v1409_v32, 7 }
  0xe5   : > { %v1393_v26 = vor.u32 %v1392_v10, %v1389_v8 }
  0xe6   : > { %v1419_v33 = vor.u32 %v1418_v23, %v1415_v21  ;;  %v1412_v52 = vsel %vm2389_vm10, %v1407_v38, %v1411_v45 }
  0xe7   : > { %v854_v7 = vld.sshfl [vmem:[#allocation1] sm:$0xff pattern:$0x73625140]  ;;  %v1394_v34 = vrot.slane %v1393_v26, 2 }
  0xe8   : > { %1026 = vst [vmem:[#allocation1] ss:$4 sm:$0xff] %v968_v6  ;;  %912 = vmatmul.bf16.vlgmr.msrb.gmra.mxu0 %v854_v7  ;;  %1672 = vmatpush.bf16.msra.mxu1 %v2183_v30  ;;  %v1253_v6 = vld [vmem:[#allocation2 + $0x8] sm:$0x3]  ;;  %v1366_v7 = vsel %vm417_vm3, %v1351_v29, %v1359_v43  ;;  %v1435_v30 = vshll.u32 %v1386_v17, 16  ;;  %v1420_v43 = vrot.slane %v1419_v33, 2 }
  0xe9   : > { %1029 = vst [vmem:[#allocation1 + $0x1] ss:$4 sm:$0xff] %v981_v11  ;;  %v1254_v11 = vld [vmem:[#allocation2 + $0xc] sm:$0x3]  ;;  %v1368_v20 = vrot.slane %v1366_v7, 2  ;;  %v2078_v7 = vrot.slane %v1563_v22, 9 }
  0xea   : > { %1032 = vst [vmem:[#allocation1 + $0x2] ss:$4 sm:$0xff] %v994_v16  ;;  %v1437_v40 = vrot.slane %v1435_v30, 7 }
  0xeb   : > { %1035 = vst [vmem:[#allocation1 + $0x3] ss:$4 sm:$0xff] %v1007_v18  ;;  %v1428_v18 = vrot.slane %v1426_v1, 6  ;;  %v1396_v31 = vshll.u32 %v1368_v20, 16  ;;  %v2074_v1 = vrot.slane %v1549_v58, 9 }
  0xec   : > { %1673 = vmatpush.bf16.msra.mxu1 %v2182_v57  ;;  %v1547_v57 = vsel %vm413_vm2, %v1533_v36, %v1541_v48 }
  0xed   : > { %v1432_v29 = vor.u32 %v1431_v19, %v1428_v18  ;;  %v1398_v41 = vrot.slane %v1396_v31, 7  ;;  %v2073_v0 = vrot.slane %v1547_v57, 9 }
  0xef   : > { %v1433_v39 = vrot.slane %v1432_v29, 2  ;;  %v1399_v47 = vsel %vm2389_vm10, %v1394_v34, %v1398_v41  ;;  %v1576_v8 = vsel %vm2439_vm6, %v2073_v0, %v2074_v1 }
  0xf0   : > { %1674 = vmatpush.bf16.msra.mxu1 %v2181_v61 }
  0xf1   : > { %v1438_v54 = vsel %vm2389_vm10, %v1433_v39, %v1437_v40 }
  0xf2   : > { %v1036_v49 = vld.sshfl [vmem:[#allocation1] sm:$0xff pattern:$0x73625140] }
  0xf3   : > { %1182 = vst [vmem:[#allocation1 + $0x2] ss:$4 sm:$0xff] %v1153_v50  ;;  %1094 = vmatmul.bf16.vlgmr.msrb.gmra.mxu1 %v1036_v49  ;;  %v1424_v49 = vrot.slane %v1422_v35, 7 }
  0xf4   : > { %1185 = vst [vmem:[#allocation1 + $0x3] ss:$4 sm:$0xff] %v1157_v51  ;;  %v1544_v51 = vrot.slane %v1536_v42, 2 }
  0xf5   : > { %1176 = vst [vmem:[#allocation1] ss:$4 sm:$0xff] %v1145_v53  ;;  %v1542_v53 = vrot.slane %v1534_v44, 2 }
  0xf6   : > { %1179 = vst [vmem:[#allocation1 + $0x1] ss:$4 sm:$0xff] %v1149_v55  ;;  %v1425_v55 = vsel %vm2389_vm10, %v1420_v43, %v1424_v49  ;;  %v1568_v61 = vsel %vm413_vm2, %v1536_v42, %v1544_v51  ;;  %v1570_v62 = vsel %vm417_vm3, %v1536_v42, %v1544_v51 }
  0xf7   : > { %v1554_v59 = vsel %vm413_vm2, %v1534_v44, %v1542_v53  ;;  %v1556_v60 = vsel %vm417_vm3, %v1534_v44, %v1542_v53  ;;  %v2079_v4 = vrot.slane %v1568_v61, 9  ;;  %v2080_v5 = vrot.slane %v1570_v62, 9 }
  0xf8   : > { %v2075_v2 = vrot.slane %v1554_v59, 9  ;;  %v2076_v3 = vrot.slane %v1556_v60, 9 }
  0xfa   : > { %v1580_v10 = vsel %vm2439_vm6, %v2075_v2, %v2076_v3 }
  0xfd   : > { %v1186_v16 = vld.sshfl [vmem:[#allocation1] sm:$0xff pattern:$0x73625140] }
  0xfe   : > { %1244 = vmatmul.bf16.vlgmr.msrb.gmra.mxu2 %v1186_v16  ;;  %1275 = vst [vmem:[#allocation1] ss:$4 sm:$0xff] %v1253_v6  ;;  %v2077_v6 = vrot.slane %v1561_v63, 9 }
  0xff   : > { %1278 = vst [vmem:[#allocation1 + $0x1] ss:$4 sm:$0xff] %v1254_v11  ;;  %v1588_v11 = vsel %vm2439_vm6, %v2079_v4, %v2080_v5 }
 0x100   : > { %1281 = vst [vmem:[#allocation1 + $0x2] ss:$4 sm:$0xff] %v1255_v24  ;;  %v1584_v12 = vsel %vm2439_vm6, %v2077_v6, %v2078_v7 }
 0x101   : > { %1284 = vst [vmem:[#allocation1 + $0x3] ss:$4 sm:$0xff] %v1256_v9 }
 0x108   : > { %v1285_v50 = vld.sshfl [vmem:[#allocation1] sm:$0xff pattern:$0x73625140] }
 0x109   : > { %1343 = vmatmul.bf16.vlgmr.msrb.gmra.mxu3 %v1285_v50  ;;  %1457 = vst [vmem:[#allocation1] ss:$4 sm:$0xff] %v1399_v47 }
 0x10a   : > { %1460 = vst [vmem:[#allocation1 + $0x1] ss:$4 sm:$0xff] %v1412_v52 }
 0x10b   : > { %1463 = vst [vmem:[#allocation1 + $0x2] ss:$4 sm:$0xff] %v1425_v55 }
 0x10c   : > { %1466 = vst [vmem:[#allocation1 + $0x3] ss:$4 sm:$0xff] %v1438_v54 }
 0x113   : > { %v1467_v9 = vld.sshfl [vmem:[#allocation1] sm:$0xff pattern:$0x73625140] }
 0x114   : > { %1525 = vmatmul.bf16.vlgmr.msra.gmra.mxu0 %v1467_v9  ;;  %1607 = vst [vmem:[#allocation1] ss:$4 sm:$0xff] %v1576_v8 }
 0x115   : > { %1610 = vst [vmem:[#allocation1 + $0x1] ss:$4 sm:$0xff] %v1580_v10 }
 0x116   : > { %1613 = vst [vmem:[#allocation1 + $0x2] ss:$4 sm:$0xff] %v1584_v12 }
 0x117   : > { %1616 = vst [vmem:[#allocation1 + $0x3] ss:$4 sm:$0xff] %v1588_v11 }
 0x11e   : > { %v1617_v13 = vld.sshfl [vmem:[#allocation1] sm:$0xff pattern:$0x73625140] }
 0x11f   : > { %1675 = vmatmul.bf16.vlgmr.msra.gmra.mxu1 %v1617_v13 }
 0x144   : > { %v585_v14 = vpop.f32.mrf.mxu1 }
 0x14c   : > { %v587_v17 = vpop.f32.mrf.mxu1 }
 0x155   : > { %v660_v15 = vpop.f32.mrf.mxu2 }
 0x156   : > { %v661_v24 = vadd.f32 %v660_v15, %v585_v14 }
 0x15d   : > { %v662_v19 = vpop.f32.mrf.mxu2 }
 0x15e   : > { %v663_v37 = vadd.f32 %v662_v19, %v587_v17 }
 0x160   : > { %v815_v16 = vpop.f32.mrf.mxu3 }
 0x161   : > { %v820_v26 = vadd.f32 %v815_v16, %v661_v24 }
 0x165   : > { %v913_v18 = vpop.f32.mrf.mxu0 }
 0x166   : > { %v918_v29 = vadd.f32 %v913_v18, %v820_v26 }
 0x168   : > { %v817_v20 = vpop.f32.mrf.mxu3 }
 0x169   : > { %v821_v30 = vadd.f32 %v817_v20, %v663_v37 }
 0x16d   : > { %v915_v23 = vpop.f32.mrf.mxu0 }
 0x16e   : > { %v919_v32 = vadd.f32 %v915_v23, %v821_v30 }
 0x170   : > { %v1095_v21 = vpop.f32.mrf.mxu1 }
 0x171   : > { %v1100_v33 = vadd.f32 %v1095_v21, %v918_v29 }
 0x178   : > { %v1097_v28 = vpop.f32.mrf.mxu1 }
 0x179   : > { %v1101_v36 = vadd.f32 %v1097_v28, %v919_v32 }
 0x181   : > { %v1245_v25 = vpop.f32.mrf.mxu2 }
 0x182   : > { %v1250_v34 = vadd.f32 %v1245_v25, %v1100_v33 }
 0x189   : > { %v1247_v35 = vpop.f32.mrf.mxu2 }
 0x18a   : > { %v1251_v41 = vadd.f32 %v1247_v35, %v1101_v36 }
 0x18c   : > { %v1344_v27 = vpop.f32.mrf.mxu3 }
 0x18d   : > { %v1349_v38 = vadd.f32 %v1344_v27, %v1250_v34 }
 0x191   : > { %v1526_v31 = vpop.f32.mrf.mxu0 }
 0x192   : > { %v1531_v42 = vadd.f32 %v1526_v31, %v1349_v38 }
 0x194   : > { %v1346_v39 = vpop.f32.mrf.mxu3 }
 0x195   : > { %v1350_v43 = vadd.f32 %v1346_v39, %v1251_v41 }
 0x199   : > { %v1528_v44 = vpop.f32.mrf.mxu0 }
 0x19a   : > { %v1532_v47 = vadd.f32 %v1528_v44, %v1350_v43 }
 0x19c   : > { %v1676_v40 = vpop.f32.mrf.mxu1 }
 0x19d   : > { %v1681_v45 = vadd.f32 %v1676_v40, %v1531_v42 }
 0x19f   : > { %v1687_v49 = vadd.f32 %v2230_v46, %v1681_v45 }
 0x1a1   : > { %v1689_v52 = vmax.f32 %v1687_v49, 0.0 }
 0x1a4   : > { %v1678_v48 = vpop.f32.mrf.mxu1 }
 0x1a5   : > { %v1682_v50 = vadd.f32 %v1678_v48, %v1532_v47 }
 0x1a7   : > { %v1688_v51 = vadd.f32 %v2230_v46, %v1682_v50 }
 0x1a9   : > { %v1690_v53 = vmax.f32 %v1688_v51, 0.0 }
 0x1ab   : > { %v2196_v54 = vpack.c.bf16 %v1690_v53, %v1689_v52 }
 0x1ad   : > { %2197 = vst [vmem:[%s273_s24] sm:$0xff] %v2196_v54  }
 0x1ae PF: > { %s17_s18 = sadd.s32 1, %s2305_s18  }
 0x1af   : > { %p14_p7 = scmp.ge.s32.totalorder %s17_s18, 4  }
 0x1b1   :  { %16 = sbr.rel (!%p14_p7) target bundleno = 2 (0x2), region = 119 }
 0x1b6   :  { %1716 = vsyncpa [#allocation4], 1 }
 0x1b7   :  { %1718 = vsyncpa [#allocation4 + $0x1], 1 }
 0x1b8   :  { %1719 = vsyncpa [#allocation6], 1 }

// kernel: merge_forward.11
= control target key start
LH: loop header
LB: loop body
LE: loop exit
PB: predicated region body
PF: predicated region fallthrough
CT: control target
= control target key end

     0   :  { %s898_s12 = smov 0   ;;  %s1019_s0 = inlined_call_operand.vmem [shape: bf16[512,128], index: 0, kind: input, shape index: {}]   ;;  %s1020_s1 = inlined_call_operand.vmem [shape: bf16[128,128], index: 1, kind: input, shape index: {}]   ;;  %s1021_s2 = inlined_call_operand.vmem [shape: f32[1,128], index: 2, kind: input, shape index: {}]   ;;  %s1022_s3 = inlined_call_operand.vmem [shape: bf16[512,128], index: 3, kind: output, shape index: {}]  }
   0x1 LB: > { %s611_s13 = sadd.s32 4294967295, %s876_s12   ;;  %p615_p0 = scmp.ge.s32.totalorder %s876_s12, 1  ;;  %s876_s12 = sphi %s898_s12, %s13_s12  }
   0x2   : > { %p138_p1 = scmp.lt.s32.totalorder %s876_s12, 3 }
   0x4   : > { %p139_p2 = pnand %p615_p0, %p138_p1 }
   0x5   : > { %s616_s22 = sshll.u32 (!%p139_p2), %s611_s13, 5 }
   0x6   : > { %142 = sbr.rel (%p139_p2) target bundleno = 240 (0xf0), region = 32  ;;  %p163_p3 = scmp.lt.s32.totalorder (!%p139_p2), %s616_s22, 63 }
   0xb   : > { %v741_v0 = vld [vmem:[%s1020_s1 + $0x38] sm:$0xff]  ;;  %v740_v1 = vld [vmem:[%s1020_s1 + $0x30] sm:$0xff]  ;;  %v739_v2 = vld [vmem:[%s1020_s1 + $0x28] sm:$0xff]  ;;  %s1024_s22 = smov (!%p163_p3, %s616_s22), 63 }
   0xc   : > { %370 = vmatpush.bf16.msra.mxu0 %v741_v0  ;;  %837 = vmatpush.bf16.msra.mxu1 %v741_v0  ;;  %v738_v3 = vld [vmem:[%s1020_s1 + $0x20] sm:$0xff]  ;;  %v737_v4 = vld [vmem:[%s1020_s1 + $0x18] sm:$0xff]  ;;  %v736_v5 = vld [vmem:[%s1020_s1 + $0x10] sm:$0xff]  ;;  %s617_s29 = sshll.u32 %s1024_s22, 2 }
   0xd   : > { %838 = vmatpush.bf16.msra.mxu2 %v741_v0  ;;  %839 = vmatpush.bf16.msra.mxu3 %v741_v0  ;;  %v735_v6 = vld [vmem:[%s1020_s1 + $0x8] sm:$0xff]  ;;  %v734_v7 = vld [vmem:[%s1020_s1] sm:$0xff]  ;;  %s938_s7 = scalar_lea.vmem %s1019_s0, %s617_s29  ;;  %s970_s13 = scalar_lea.vmem %s1022_s3, %s617_s29 }
   0xe   : > { %v718_v8 = vld [vmem:[%s938_s7] sm:$0xff]  ;;  %v719_v12 = vld [vmem:[%s938_s7 + $0x8] sm:$0xff]  ;;  %v720_v16 = vld [vmem:[%s938_s7 + $0x10] sm:$0xff] }
   0xf   : > { %v722_v9 = vld [vmem:[%s938_s7 + $0x20] sm:$0xff]  ;;  %v723_v13 = vld [vmem:[%s938_s7 + $0x28] sm:$0xff]  ;;  %v724_v17 = vld [vmem:[%s938_s7 + $0x30] sm:$0xff] }
  0x10   : > { %371 = vmatpush.bf16.msra.mxu0 %v740_v1  ;;  %840 = vmatpush.bf16.msra.mxu1 %v740_v1  ;;  %v726_v10 = vld [vmem:[%s938_s7 + $0x40] sm:$0xff]  ;;  %v727_v14 = vld [vmem:[%s938_s7 + $0x48] sm:$0xff]  ;;  %v728_v18 = vld [vmem:[%s938_s7 + $0x50] sm:$0xff] }
  0x11   : > { %841 = vmatpush.bf16.msra.mxu2 %v740_v1  ;;  %842 = vmatpush.bf16.msra.mxu3 %v740_v1  ;;  %v730_v11 = vld [vmem:[%s938_s7 + $0x60] sm:$0xff]  ;;  %v731_v15 = vld [vmem:[%s938_s7 + $0x68] sm:$0xff]  ;;  %v732_v19 = vld [vmem:[%s938_s7 + $0x70] sm:$0xff] }
  0x12   : > { %v721_v20 = vld [vmem:[%s938_s7 + $0x18] sm:$0xff]  ;;  %v959_v26 = vld [vmem:[%s1021_s2] ss:$0 sm:$0xff] }
  0x13   : > { %v725_v21 = vld [vmem:[%s938_s7 + $0x38] sm:$0xff] }
  0x14   : > { %372 = vmatpush.bf16.msra.mxu0 %v739_v2  ;;  %843 = vmatpush.bf16.msra.mxu1 %v739_v2  ;;  %v729_v22 = vld [vmem:[%s938_s7 + $0x58] sm:$0xff] }
  0x15   : > { %844 = vmatpush.bf16.msra.mxu2 %v739_v2  ;;  %845 = vmatpush.bf16.msra.mxu3 %v739_v2  ;;  %v733_v23 = vld [vmem:[%s938_s7 + $0x78] sm:$0xff] }
  0x18   : > { %373 = vmatpush.bf16.msra.mxu0 %v738_v3  ;;  %846 = vmatpush.bf16.msra.mxu1 %v738_v3 }
  0x19   : > { %847 = vmatpush.bf16.msra.mxu2 %v738_v3  ;;  %848 = vmatpush.bf16.msra.mxu3 %v738_v3 }
  0x1c   : > { %374 = vmatpush.bf16.msra.mxu0 %v737_v4  ;;  %849 = vmatpush.bf16.msra.mxu1 %v737_v4 }
  0x1d   : > { %850 = vmatpush.bf16.msra.mxu2 %v737_v4  ;;  %851 = vmatpush.bf16.msra.mxu3 %v737_v4 }
  0x20   : > { %375 = vmatpush.bf16.msra.mxu0 %v736_v5  ;;  %852 = vmatpush.bf16.msra.mxu1 %v736_v5 }
  0x21   : > { %853 = vmatpush.bf16.msra.mxu2 %v736_v5  ;;  %854 = vmatpush.bf16.msra.mxu3 %v736_v5 }
  0x24   : > { %376 = vmatpush.bf16.msra.mxu0 %v735_v6  ;;  %855 = vmatpush.bf16.msra.mxu1 %v735_v6 }
  0x25   : > { %856 = vmatpush.bf16.msra.mxu2 %v735_v6  ;;  %857 = vmatpush.bf16.msra.mxu3 %v735_v6 }
  0x28   : > { %377 = vmatpush.bf16.msra.mxu0 %v734_v7  ;;  %858 = vmatpush.bf16.msra.mxu1 %v734_v7 }
  0x29   : > { %859 = vmatpush.bf16.msra.mxu2 %v734_v7  ;;  %860 = vmatpush.bf16.msra.mxu3 %v734_v7 }
  0x2b   : > { %378 = vmatmul.bf16.vlgmr.msra.gmra.mxu0 %v718_v8  ;;  %398 = vmatmul.bf16.vlgmr.msra.gmra.mxu1 %v722_v9 }
  0x2c   : > { %418 = vmatmul.bf16.vlgmr.msra.gmra.mxu2 %v726_v10  ;;  %438 = vmatmul.bf16.vlgmr.msra.gmra.mxu3 %v730_v11 }
  0x3b   : > { %383 = vmatmul.bf16.gmra.mxu0 %v719_v12  ;;  %403 = vmatmul.bf16.gmra.mxu1 %v723_v13 }
  0x3c   : > { %423 = vmatmul.bf16.gmra.mxu2 %v727_v14  ;;  %443 = vmatmul.bf16.gmra.mxu3 %v731_v15 }
  0x4b   : > { %388 = vmatmul.bf16.gmra.mxu0 %v720_v16  ;;  %408 = vmatmul.bf16.gmra.mxu1 %v724_v17 }
  0x4c   : > { %428 = vmatmul.bf16.gmra.mxu2 %v728_v18  ;;  %448 = vmatmul.bf16.gmra.mxu3 %v732_v19 }
  0x5b   : > { %393 = vmatmul.bf16.gmra.mxu0 %v721_v20  ;;  %413 = vmatmul.bf16.gmra.mxu1 %v725_v21 }
  0x5c   : > { %433 = vmatmul.bf16.gmra.mxu2 %v729_v22  ;;  %453 = vmatmul.bf16.gmra.mxu3 %v733_v23 }
  0xa8   : > { %v379_v24 = vpop.f32.mrf.mxu0  ;;  %v399_v25 = vpop.f32.mrf.mxu1 }
  0xa9   : > { %v380_v27 = vadd.f32 %v959_v26, %v379_v24  ;;  %v400_v28 = vadd.f32 %v959_v26, %v399_v25 }
  0xab   : > { %v459_v35 = vmax.f32 %v380_v27, 0.0  ;;  %v467_v36 = vmax.f32 %v400_v28, 0.0 }
  0xaf   : > { %v419_v29 = vpop.f32.mrf.mxu2  ;;  %v439_v30 = vpop.f32.mrf.mxu3 }
  0xb0   : > { %v381_v31 = vpop.f32.mrf.mxu0  ;;  %v401_v32 = vpop.f32.mrf.mxu1  ;;  %v420_v41 = vadd.f32 %v959_v26, %v419_v29  ;;  %v440_v42 = vadd.f32 %v959_v26, %v439_v30 }
  0xb1   : > { %v382_v33 = vadd.f32 %v959_v26, %v381_v31  ;;  %v402_v34 = vadd.f32 %v959_v26, %v401_v32 }
  0xb2   : > { %v475_v49 = vmax.f32 %v420_v41, 0.0  ;;  %v483_v50 = vmax.f32 %v440_v42, 0.0 }
  0xb3   : > { %v460_v37 = vmax.f32 %v382_v33, 0.0  ;;  %v468_v38 = vmax.f32 %v402_v34, 0.0 }
  0xb5   : > { %v745_v39 = vpack.c.bf16 %v460_v37, %v459_v35  ;;  %v765_v40 = vpack.c.bf16 %v468_v38, %v467_v36 }
  0xb7   : > { %746 = vst [vmem:[%s970_s13] sm:$0xff] %v745_v39   ;;  %v421_v43 = vpop.f32.mrf.mxu2  ;;  %v441_v44 = vpop.f32.mrf.mxu3 }
  0xb8   : > { %825 = vst [vmem:[%s970_s13 + $0x20] sm:$0xff] %v765_v40   ;;  %v422_v45 = vadd.f32 %v959_v26, %v421_v43  ;;  %v442_v46 = vadd.f32 %v959_v26, %v441_v44  ;;  %v384_v47 = vpop.f32.mrf.mxu0  ;;  %v404_v48 = vpop.f32.mrf.mxu1 }
  0xb9   : > { %v385_v55 = vadd.f32 %v959_v26, %v384_v47  ;;  %v405_v56 = vadd.f32 %v959_v26, %v404_v48 }
  0xba   : > { %v476_v51 = vmax.f32 %v422_v45, 0.0  ;;  %v484_v52 = vmax.f32 %v442_v46, 0.0 }
  0xbb   : > { %v461_v63 = vmax.f32 %v385_v55, 0.0  ;;  %v469_v0 = vmax.f32 %v405_v56, 0.0 }
  0xbc   : > { %v785_v53 = vpack.c.bf16 %v476_v51, %v475_v49  ;;  %v805_v54 = vpack.c.bf16 %v484_v52, %v483_v50 }
  0xbe   : > { %829 = vst [vmem:[%s970_s13 + $0x40] sm:$0xff] %v785_v53  }
  0xbf   : > { %833 = vst [vmem:[%s970_s13 + $0x60] sm:$0xff] %v805_v54   ;;  %v424_v57 = vpop.f32.mrf.mxu2  ;;  %v444_v58 = vpop.f32.mrf.mxu3 }
  0xc0   : > { %v386_v59 = vpop.f32.mrf.mxu0  ;;  %v406_v60 = vpop.f32.mrf.mxu1  ;;  %v425_v5 = vadd.f32 %v959_v26, %v424_v57  ;;  %v445_v6 = vadd.f32 %v959_v26, %v444_v58 }
  0xc1   : > { %v387_v61 = vadd.f32 %v959_v26, %v386_v59  ;;  %v407_v62 = vadd.f32 %v959_v26, %v406_v60 }
  0xc2   : > { %v477_v13 = vmax.f32 %v425_v5, 0.0  ;;  %v485_v14 = vmax.f32 %v445_v6, 0.0 }
  0xc3   : > { %v462_v1 = vmax.f32 %v387_v61, 0.0  ;;  %v470_v2 = vmax.f32 %v407_v62, 0.0 }
  0xc5   : > { %v750_v3 = vpack.c.bf16 %v462_v1, %v461_v63  ;;  %v770_v4 = vpack.c.bf16 %v470_v2, %v469_v0 }
  0xc7   : > { %822 = vst [vmem:[%s970_s13 + $0x8] sm:$0xff] %v750_v3   ;;  %v426_v7 = vpop.f32.mrf.mxu2  ;;  %v446_v8 = vpop.f32.mrf.mxu3 }
  0xc8   : > { %826 = vst [vmem:[%s970_s13 + $0x28] sm:$0xff] %v770_v4   ;;  %v427_v9 = vadd.f32 %v959_v26, %v426_v7  ;;  %v447_v10 = vadd.f32 %v959_v26, %v446_v8  ;;  %v389_v11 = vpop.f32.mrf.mxu0  ;;  %v409_v12 = vpop.f32.mrf.mxu1 }
  0xc9   : > { %v390_v19 = vadd.f32 %v959_v26, %v389_v11  ;;  %v410_v20 = vadd.f32 %v959_v26, %v409_v12 }
  0xca   : > { %v478_v15 = vmax.f32 %v427_v9, 0.0  ;;  %v486_v16 = vmax.f32 %v447_v10, 0.0 }
  0xcb   : > { %v463_v28 = vmax.f32 %v390_v19, 0.0  ;;  %v471_v29 = vmax.f32 %v410_v20, 0.0 }
  0xcc   : > { %v790_v17 = vpack.c.bf16 %v478_v15, %v477_v13  ;;  %v810_v18 = vpack.c.bf16 %v486_v16, %v485_v14 }
  0xce   : > { %830 = vst [vmem:[%s970_s13 + $0x48] sm:$0xff] %v790_v17  }
  0xcf   : > { %834 = vst [vmem:[%s970_s13 + $0x68] sm:$0xff] %v810_v18   ;;  %v429_v21 = vpop.f32.mrf.mxu2  ;;  %v449_v22 = vpop.f32.mrf.mxu3 }
  0xd0   : > { %v391_v23 = vpop.f32.mrf.mxu0  ;;  %v411_v24 = vpop.f32.mrf.mxu1  ;;  %v430_v34 = vadd.f32 %v959_v26, %v429_v21  ;;  %v450_v35 = vadd.f32 %v959_v26, %v449_v22 }
  0xd1   : > { %v392_v25 = vadd.f32 %v959_v26, %v391_v23  ;;  %v412_v27 = vadd.f32 %v959_v26, %v411_v24 }
  0xd2   : > { %v479_v42 = vmax.f32 %v430_v34, 0.0  ;;  %v487_v43 = vmax.f32 %v450_v35, 0.0 }
  0xd3   : > { %v464_v30 = vmax.f32 %v392_v25, 0.0  ;;  %v472_v31 = vmax.f32 %v412_v27, 0.0 }
  0xd5   : > { %v755_v32 = vpack.c.bf16 %v464_v30, %v463_v28  ;;  %v775_v33 = vpack.c.bf16 %v472_v31, %v471_v29 }
  0xd7   : > { %823 = vst [vmem:[%s970_s13 + $0x10] sm:$0xff] %v755_v32   ;;  %v431_v36 = vpop.f32.mrf.mxu2  ;;  %v451_v37 = vpop.f32.mrf.mxu3 }
  0xd8   : > { %827 = vst [vmem:[%s970_s13 + $0x30] sm:$0xff] %v775_v33   ;;  %v432_v38 = vadd.f32 %v959_v26, %v431_v36  ;;  %v452_v39 = vadd.f32 %v959_v26, %v451_v37  ;;  %v394_v40 = vpop.f32.mrf.mxu0  ;;  %v414_v41 = vpop.f32.mrf.mxu1 }
  0xd9   : > { %v395_v48 = vadd.f32 %v959_v26, %v394_v40  ;;  %v415_v49 = vadd.f32 %v959_v26, %v414_v41 }
  0xda   : > { %v480_v44 = vmax.f32 %v432_v38, 0.0  ;;  %v488_v45 = vmax.f32 %v452_v39, 0.0 }
  0xdb   : > { %v465_v56 = vmax.f32 %v395_v48, 0.0  ;;  %v473_v57 = vmax.f32 %v415_v49, 0.0 }
  0xdc   : > { %v795_v46 = vpack.c.bf16 %v480_v44, %v479_v42  ;;  %v815_v47 = vpack.c.bf16 %v488_v45, %v487_v43 }
  0xde   : > { %831 = vst [vmem:[%s970_s13 + $0x50] sm:$0xff] %v795_v46  }
  0xdf   : > { %835 = vst [vmem:[%s970_s13 + $0x70] sm:$0xff] %v815_v47   ;;  %v434_v50 = vpop.f32.mrf.mxu2  ;;  %v454_v51 = vpop.f32.mrf.mxu3 }
  0xe0   : > { %v396_v52 = vpop.f32.mrf.mxu0  ;;  %v416_v53 = vpop.f32.mrf.mxu1  ;;  %v435_v62 = vadd.f32 %v959_v26, %v434_v50  ;;  %v455_v63 = vadd.f32 %v959_v26, %v454_v51 }
  0xe1   : > { %v397_v54 = vadd.f32 %v959_v26, %v396_v52  ;;  %v417_v55 = vadd.f32 %v959_v26, %v416_v53 }
  0xe2   : > { %v481_v4 = vmax.f32 %v435_v62, 0.0  ;;  %v489_v5 = vmax.f32 %v455_v63, 0.0 }
  0xe3   : > { %v466_v58 = vmax.f32 %v397_v54, 0.0  ;;  %v474_v59 = vmax.f32 %v417_v55, 0.0 }
  0xe5   : > { %v760_v60 = vpack.c.bf16 %v466_v58, %v465_v56  ;;  %v780_v61 = vpack.c.bf16 %v474_v59, %v473_v57 }
  0xe7   : > { %824 = vst [vmem:[%s970_s13 + $0x18] sm:$0xff] %v760_v60   ;;  %v436_v0 = vpop.f32.mrf.mxu2  ;;  %v456_v1 = vpop.f32.mrf.mxu3 }
  0xe8   : > { %828 = vst [vmem:[%s970_s13 + $0x38] sm:$0xff] %v780_v61   ;;  %v437_v2 = vadd.f32 %v959_v26, %v436_v0  ;;  %v457_v3 = vadd.f32 %v959_v26, %v456_v1 }
  0xea   : > { %v482_v6 = vmax.f32 %v437_v2, 0.0  ;;  %v490_v7 = vmax.f32 %v457_v3, 0.0 }
  0xec   : > { %v800_v8 = vpack.c.bf16 %v482_v6, %v481_v4  ;;  %v820_v9 = vpack.c.bf16 %v490_v7, %v489_v5 }
  0xee   : > { %832 = vst [vmem:[%s970_s13 + $0x58] sm:$0xff] %v800_v8  }
  0xef   : > { %836 = vst [vmem:[%s970_s13 + $0x78] sm:$0xff] %v820_v9  }
  0xf0 PF: > { %s13_s12 = sadd.s32 1, %s876_s12  }
  0xf1   : > { %p10_p4 = scmp.ge.s32.totalorder %s13_s12, 4  }
  0xf3   :  { %12 = sbr.rel (!%p10_p4) target bundleno = 1 (0x1), region = 62 }

// kernel: merge_forward.13
= control target key start
LH: loop header
LB: loop body
LE: loop exit
PB: predicated region body
PF: predicated region fallthrough
CT: control target
= control target key end

     0   :  { %10 = vsyncpa [#allocation4], 0  ;;  %s3361_s0 = inlined_call_operand.hbm [shape: f32[64,16], index: 0, kind: input, shape index: {}]   ;;  %s3362_s1 = inlined_call_operand.vmem [shape: bf16[2,16,128], index: 1, kind: input, shape index: {}]   ;;  %s3363_s2 = inlined_call_operand.vmem [shape: bf16[2,64,128], index: 2, kind: input, shape index: {}]   ;;  %s3364_s3 = inlined_call_operand.hbm [shape: bf16[9,128,128], index: 3, kind: input, shape index: {}]   ;;  %s3365_s4 = inlined_call_operand.vmem [shape: f32[1,128], index: 4, kind: input, shape index: {}]   ;;  %s3366_s5 = inlined_call_operand.vmem [shape: bf16[2,64,128], index: 5, kind: output, shape index: {}]  }
   0x1   :  { %11 = vsyncpa [#allocation6], 0  ;;  %s2982_s18 = smov 0  }
   0x2 LB: > { %s174_s21 = sshll.u32 %s3361_s0, 4  ;;  %s2306_s22 = sadd.s32 4294967295, %s2943_s18   ;;  %s2943_s18 = sphi %s2982_s18, %s17_s18   ;;  %s175_s21 = int_to_ptr.hbm [resolvable:$true] %s174_s21 }
   0x3   : > { %p2308_p0 = scmp.ge.s32.totalorder %s2943_s18, 1  ;;  %p163_p1 = scmp.lt.s32.totalorder %s2943_s18, 3 }
   0x4   : > { %p2849_p2 = scmp.eq.s32.totalorder %s2306_s22, 0  ;;  %s2945_s24 = smov [#allocation3]  }
   0x5   : > { %p2993_p3 = pnand %p2308_p0, %p163_p1  ;;  %s176_s25 = sshll.u32 %s2945_s24, 4  ;;  %s177_s25 = int_to_ptr.vmem [resolvable:$true] %s176_s25 }
   0x6   : > { %s188_s28 = sshll.u32 %s3364_s3, 4  ;;  %s2946_s29 = smov [#allocation5]   ;;  %s189_s28 = int_to_ptr.hbm [resolvable:$true] %s188_s28 }
   0x7   : > { %p2842_p4 = pneg %p2993_p3  ;;  %s190_s30 = sshll.u32 %s2946_s29, 4  ;;  %s191_s30 = int_to_ptr.vmem [resolvable:$true] %s190_s30 }
   0x8   : > { %s2947_s6 = smov 128   ;;  %s2948_s7 = smov 8  }
   0x9   : > { %p2843_p5 = pnand %p2849_p2, %p2842_p4  ;;  %s2949_s8 = smov 64  }
   0xa   : > { %s2950_s9 = smov 4   ;;  %225 = sbr.rel (%p2993_p3) target bundleno = 511 (0x1ff), region = 40 }
   0xb   : > { %2845 = dma.hbm_to_vmem [thread:$0]  (!%p2843_p5), %s175_s21, 1024, %s177_s25, [#allocation4], %s2947_s6, %s2947_s6, %s2948_s7  }
   0xc   : > { %2848 = dma.hbm_to_vmem [thread:$0]  (!%p2843_p5), %s189_s28, 9216, %s191_s30, [#allocation6], %s2949_s8, %s2949_s8, %s2950_s9  }
   0xf   : > { %2934 = dma.done.wait (%p2849_p2), [#allocation4], 1024  }
  0x10   : > { %2936 = vsyncadd (%p2849_p2), [#allocation4], 4294966272 }
  0x11   : > { %2938 = dma.done.wait (%p2849_p2), [#allocation6], 9216  }
  0x12   : > { %2940 = vsyncadd (%p2849_p2), [#allocation6], 4294958080  ;;  %p264_p6 = scmp.lt.s32.totalorder %s2306_s22, 1  ;;  %v280_v3 = vld [vmem:[#allocation3] sm:$0xff]  ;;  %vm308_vm0 = vcmask 130048   ;;  %v2721_v5 = vld [vmem:[#allocation5 + $0xb8] sm:$0xff] }
  0x13   : > { %v284_v4 = vld [vmem:[#allocation3 + $0x20] sm:$0xff]  ;;  %v2733_v6 = vld [vmem:[#allocation5 + $0xf8] sm:$0xff]  ;;  %v281_v7 = vld [vmem:[#allocation3 + $0x8] sm:$0xff]  ;;  %v2951_v15 = vmov 0   ;;  %vm483_vm1 = vcmask 1043456   ;;  %vm489_vm3 = vcmask 1040384  }
  0x14   : > { %s3377_s22 = smov (!%p264_p6, %s2306_s22), 1  ;;  %v285_v8 = vld [vmem:[#allocation3 + $0x28] sm:$0xff]  ;;  %v282_v9 = vld [vmem:[#allocation3 + $0x10] sm:$0xff]  ;;  %v283_v11 = vld [vmem:[#allocation3 + $0x18] sm:$0xff]  ;;  %376 = vst [vmem:[#allocation2 + $0x8] sm:$0xf] %v2951_v15 }
  0x15   : > { %s2691_s10 = sshll.u32 %s3377_s22, 3  ;;  %v286_v10 = vld [vmem:[#allocation3 + $0x30] sm:$0xff]  ;;  %v287_v12 = vld [vmem:[#allocation3 + $0x38] sm:$0xff]  ;;  %377 = vst [vmem:[#allocation2 + $0xc] sm:$0x1] %v2951_v15  ;;  %v2719_v17 = vld [vmem:[#allocation5 + $0xa8] sm:$0xff] }
  0x16   : > { %s268_s13 = scalar_lea.vmem %s3362_s1, %s2691_s10  ;;  %v2720_v13 = vld [vmem:[#allocation5 + $0xb0] sm:$0xff]  ;;  %v2713_v14 = vld [vmem:[#allocation5 + $0x78] sm:$0xff]  ;;  %374 = vst [vmem:[#allocation2] sm:$0xf] %v2951_v15  ;;  %v2731_v19 = vld [vmem:[#allocation5 + $0xe8] sm:$0xff]  ;;  %s2692_s14 = sshll.u32 %s3377_s22, 5 }
  0x17   : > { %v2779_v0 = vld [vmem:[%s268_s13] sm:$0xff]   ;;  %765 = vmatpush.bf16.msra.mxu1 %v2713_v14  ;;  %2826 = vmatpush.bf16.msra.mxu2 %v2713_v14  ;;  %375 = vst [vmem:[#allocation2 + $0x4] sm:$0x1] %v2951_v15  ;;  %v2718_v20 = vld [vmem:[#allocation5 + $0xa0] sm:$0xff]  ;;  %v2711_v21 = vld [vmem:[#allocation5 + $0x68] sm:$0xff]  ;;  %s3029_s17 = scalar_lea.vmem %s3363_s2, %s2692_s14  ;;  %vm919_vm7 = vcmask 1042432   ;;  %s3336_s24 = scalar_lea.vmem %s3366_s5, %s2692_s14 }
  0x18   : > { %v2781_v1 = vunpack.c.h.bf16 %v2779_v0  ;;  %v2780_v2 = vunpack.c.l.bf16 %v2779_v0  ;;  %v2732_v16 = vld [vmem:[#allocation5 + $0xf0] sm:$0xff]  ;;  %378 = vst [vmem:[#allocation2 + $0x10] sm:$0xf] %v2951_v15  ;;  %v2730_v22 = vld [vmem:[#allocation5 + $0xe0] sm:$0xff]  ;;  %v2717_v23 = vld [vmem:[#allocation5 + $0x98] sm:$0xff]  ;;  %vm920_vm8 = vcmask 1046532  }
  0x19   : > { %v2712_v18 = vld [vmem:[#allocation5 + $0x70] sm:$0xff]  ;;  %379 = vst [vmem:[#allocation2 + $0x14] sm:$0x1] %v2951_v15  ;;  %v2710_v24 = vld [vmem:[#allocation5 + $0x60] sm:$0xff]  ;;  %v2729_v25 = vld [vmem:[#allocation5 + $0xd8] sm:$0xff] }
  0x1a   : > { %347 = vmatpush.msra.mxu0 %v2781_v1  ;;  %2824 = vmatpush.msra.mxu3 %v2781_v1  ;;  %380 = vst [vmem:[#allocation2 + $0x18] sm:$0xf] %v2951_v15  ;;  %v2716_v26 = vld [vmem:[#allocation5 + $0x90] sm:$0xff]  ;;  %v2709_v27 = vld [vmem:[#allocation5 + $0x58] sm:$0xff]  ;;  %v2715_v29 = vld [vmem:[#allocation5 + $0x88] sm:$0xff] }
  0x1b   : > { %766 = vmatpush.bf16.msra.mxu1 %v2712_v18  ;;  %2827 = vmatpush.bf16.msra.mxu2 %v2712_v18  ;;  %381 = vst [vmem:[#allocation2 + $0x1c] sm:$0x1] %v2951_v15  ;;  %v2728_v28 = vld [vmem:[#allocation5 + $0xd0] sm:$0xff]  ;;  %v2727_v31 = vld [vmem:[#allocation5 + $0xc8] sm:$0xff]  ;;  %v2714_v32 = vld [vmem:[#allocation5 + $0x80] sm:$0xff] }
  0x1c   : > { %348 = vmatpush.msra.mxu0 %v2780_v2  ;;  %2825 = vmatpush.msra.mxu3 %v2780_v2  ;;  %382 = vst [vmem:[#allocation2 + $0x20] sm:$0xf] %v2951_v15  ;;  %v2708_v30 = vld [vmem:[#allocation5 + $0x50] sm:$0xff]  ;;  %v2707_v34 = vld [vmem:[#allocation5 + $0x48] sm:$0xff]  ;;  %v2726_v35 = vld [vmem:[#allocation5 + $0xc0] sm:$0xff] }
  0x1d   : > { %2321 = vmatmul.msk.f32.vlgmr.msra.gmra.mxu0 %vm308_vm0, %v280_v3  ;;  %2325 = vmatmul.msk.f32.vlgmr.msra.gmra.mxu3 %vm308_vm0, %v284_v4  ;;  %383 = vst [vmem:[#allocation2 + $0x24] sm:$0x1] %v2951_v15  ;;  %v2783_v33 = vld [vmem:[%s3029_s17] sm:$0xff]   ;;  %v2706_v37 = vld [vmem:[#allocation5 + $0x40] sm:$0xff]  ;;  %vm484_vm2 = vsmask.f32 7938  ;;  %vm3054_vm9 = vmor %vm919_vm7, %vm920_vm8 }
  0x1e   : > { %1035 = vmatpush.bf16.msrb.mxu3 %v2721_v5  ;;  %1169 = vmatpush.bf16.msrb.mxu0 %v2733_v6  ;;  %384 = vst [vmem:[#allocation2 + $0x28] sm:$0xf] %v2951_v15  ;;  %v2784_v36 = vunpack.c.l.bf16 %v2783_v33  ;;  %v3033_v39 = vld [vmem:[%s3029_s17 + $0x10] sm:$0xff]   ;;  %v537_v41 = vld [vmem:[#allocation2] sm:$0xf]  ;;  %v2785_v47 = vunpack.c.h.bf16 %v2783_v33  ;;  %v2741_v49 = vld [vmem:[#allocation5 + $0x138] sm:$0xff] }
  0x1f   : > { %767 = vmatpush.bf16.msra.mxu1 %v2711_v21  ;;  %385 = vst [vmem:[#allocation2 + $0x2c] sm:$0x1] %v2951_v15  ;;  %2828 = vmatpush.bf16.msra.mxu2 %v2711_v21  ;;  %v2792_v43 = vunpack.c.l.bf16 %v3033_v39  ;;  %v573_v44 = vshrl.u32 %v537_v41, 16  ;;  %v576_v45 = vshll.u32 %v537_v41, 16  ;;  %vm490_vm4 = vsmask.f32 256  ;;  %vm3036_vm5 = vmand %vm483_vm1, %vm484_vm2 }
  0x20   : > { %386 = vst [vmem:[#allocation2 + $0x30] sm:$0xf] %v2951_v15  ;;  %v561_v54 = vld [vmem:[#allocation2 + $0x4] sm:$0x1]  ;;  %v486_v55 = vld [vmem:[#allocation2 + $0x8] sm:$0xf]  ;;  %vm3040_vm6 = vmand %vm489_vm3, %vm490_vm4  ;;  %v2793_v2 = vunpack.c.h.bf16 %v3033_v39 }
  0x21   : > { %387 = vst [vmem:[#allocation2 + $0x34] sm:$0x1] %v2951_v15  ;;  %v492_v57 = vld [vmem:[#allocation2 + $0xc] sm:$0x1]  ;;  %v575_v59 = vrot.slane %v573_v44, 4  ;;  %v578_v60 = vrot.slane %v576_v45, 5 }
  0x22   : > { %1036 = vmatpush.bf16.msrb.mxu3 %v2720_v13  ;;  %1170 = vmatpush.bf16.msrb.mxu0 %v2732_v16  ;;  %388 = vst [vmem:[#allocation2 + $0x38] sm:$0xf] %v2951_v15  ;;  %v895_v1 = vld [vmem:[#allocation2] sm:$0xe]  ;;  %v924_v3 = vrot.slane %v561_v54, 5 }
  0x23   : > { %768 = vmatpush.bf16.msra.mxu1 %v2710_v24  ;;  %389 = vst [vmem:[#allocation2 + $0x3c] sm:$0x1] %v2951_v15  ;;  %2829 = vmatpush.bf16.msra.mxu2 %v2710_v24  ;;  %v2409_v13 = vrot.slane %v895_v1, 9  ;;  %v579_v14 = vor.u32 %v578_v60, %v575_v59  ;;  %vm569_vm10 = vsmask.f32 3328 }
  0x24   : > { %390 = vst [vmem:[#allocation2 + $0x40] sm:$0xf] %v2951_v15  ;;  %vm570_vm11 = vsmask.f32 7440  ;;  %v495_v24 = vld [vmem:[#allocation2 + $0x10] sm:$0xf] }
  0x25   : > { %2322 = vmatmul.msk.f32.gmra.mxu0 %vm308_vm0, %v281_v7  ;;  %2326 = vmatmul.msk.f32.gmra.mxu3 %vm308_vm0, %v285_v8  ;;  %391 = vst [vmem:[#allocation2 + $0x44] sm:$0x1] %v2951_v15  ;;  %v3050_v8 = vld [vmem:[%s3029_s17 + $0x8] sm:$0xff]   ;;  %vm3076_vm12 = vmor %vm569_vm10, %vm570_vm11 }
  0x26   : > { %1037 = vmatpush.bf16.msrb.mxu3 %v2719_v17  ;;  %1171 = vmatpush.bf16.msrb.mxu0 %v2731_v19  ;;  %392 = vst [vmem:[#allocation2 + $0x48] sm:$0xf] %v2951_v15  ;;  %v2739_v19 = vld [vmem:[#allocation5 + $0x128] sm:$0xff]  ;;  %v2788_v21 = vunpack.c.l.bf16 %v3050_v8  ;;  %v2789_v44 = vunpack.c.h.bf16 %v3050_v8 }
  0x27   : > { %769 = vmatpush.bf16.msra.mxu1 %v2709_v27  ;;  %393 = vst [vmem:[#allocation2 + $0x4c] sm:$0x1] %v2951_v15  ;;  %2830 = vmatpush.bf16.msra.mxu2 %v2709_v27  ;;  %v582_v15 = vshll.u32 %v561_v54, 16  ;;  %v519_v1 = vld [vmem:[#allocation2 + $0x30] sm:$0xf] }
  0x28   : > { %v501_v8 = vld [vmem:[#allocation2 + $0x18] sm:$0xf] }
  0x29   : > { %v3068_v33 = vrot.slane %v582_v15, 5 }
  0x2a   : > { %1038 = vmatpush.bf16.msrb.mxu3 %v2718_v20  ;;  %1172 = vmatpush.bf16.msrb.mxu0 %v2730_v22 }
  0x2b   : > { %770 = vmatpush.bf16.msra.mxu1 %v2708_v30  ;;  %2831 = vmatpush.bf16.msra.mxu2 %v2708_v30  ;;  %v3061_v30 = vsel %vm3054_vm9, %v2409_v13, %v924_v3  ;;  %v504_v13 = vld [vmem:[#allocation2 + $0x1c] sm:$0x1] }
  0x2d   : > { %2323 = vmatmul.msk.f32.gmra.mxu0 %vm308_vm0, %v282_v9  ;;  %2327 = vmatmul.msk.f32.gmra.mxu3 %vm308_vm0, %v286_v10  ;;  %v2740_v9 = vld [vmem:[#allocation5 + $0x130] sm:$0xff] }
  0x2e   : > { %1039 = vmatpush.bf16.msrb.mxu3 %v2717_v23  ;;  %1173 = vmatpush.bf16.msrb.mxu0 %v2729_v25 }
  0x2f   : > { %771 = vmatpush.bf16.msra.mxu1 %v2707_v34  ;;  %2832 = vmatpush.bf16.msra.mxu2 %v2707_v34 }
  0x32   : > { %1040 = vmatpush.bf16.msrb.mxu3 %v2716_v26  ;;  %1174 = vmatpush.bf16.msrb.mxu0 %v2728_v28  ;;  %v498_v28 = vld [vmem:[#allocation2 + $0x14] sm:$0x1] }
  0x33   : > { %772 = vmatpush.bf16.msra.mxu1 %v2706_v37  ;;  %2833 = vmatpush.bf16.msra.mxu2 %v2706_v37 }
  0x35   : > { %2324 = vmatmul.msk.f32.gmra.mxu0 %vm308_vm0, %v283_v11  ;;  %2328 = vmatmul.msk.f32.gmra.mxu3 %vm308_vm0, %v287_v12  ;;  %v513_v11 = vld [vmem:[#allocation2 + $0x28] sm:$0xf]  ;;  %v516_v12 = vld [vmem:[#allocation2 + $0x2c] sm:$0x1] }
  0x36   : > { %1041 = vmatpush.bf16.msrb.mxu3 %v2715_v29  ;;  %1175 = vmatpush.bf16.msrb.mxu0 %v2727_v31  ;;  %v3064_v31 = vld [vmem:[%s3029_s17 + $0x18] sm:$0xff]  }
  0x37   : > { %1415 = vmatpush.bf16.msrb.mxu1 %v2741_v49 }
  0x3a   : > { %1042 = vmatpush.bf16.msrb.mxu3 %v2714_v32  ;;  %1176 = vmatpush.bf16.msrb.mxu0 %v2726_v35  ;;  %v3066_v32 = vrot.slane %v579_v14, 4 }
  0x3b   : > { %1416 = vmatpush.bf16.msrb.mxu1 %v2740_v9 }
  0x3f   : > { %1417 = vmatpush.bf16.msrb.mxu1 %v2739_v19  ;;  %v2736_v19 = vld [vmem:[#allocation5 + $0x110] sm:$0xff] }
  0x9a   : > { %v350_v38 = vpop.f32.mrf.mxu0 }
  0x9b   : > { %v351_v40 = vadd.f32 %v2784_v36, %v350_v38  ;;  %v2738_v38 = vld [vmem:[#allocation5 + $0x120] sm:$0xff] }
  0x9c   : > { %1418 = vmatpush.bf16.msrb.mxu1 %v2738_v38 }
  0x9d   : > { %v394_v42 = vpack.c.bf16 %v351_v40, %v351_v40 }
  0x9f   : > { %v403_v46 = vshrl.u32 %v394_v42, 16  ;;  %v406_v51 = vshll.u32 %v394_v42, 16 }
  0xa0   : > { %v362_v48 = vpop.f32.mrf.mxu3 }
  0xa1   : > { %v405_v50 = vrot.slane %v403_v46, 7  ;;  %v363_v53 = vadd.f32 %v2792_v43, %v362_v48  ;;  %v2796_v46 = vunpack.c.l.bf16 %v3064_v31 }
  0xa2   : > { %v353_v58 = vpop.f32.mrf.mxu0 }
  0xa3   : > { %v408_v61 = vor.u32 %v406_v51, %v405_v50  ;;  %v409_v62 = vrot.slane %v405_v50, 4  ;;  %v354_v63 = vadd.f32 %v2785_v47, %v353_v58  ;;  %v398_v0 = vpack.c.bf16 %v363_v53, %v363_v53 }
  0xa4   : > { %v971_v51 = vunpack.c.l.b16 %v3061_v30  ;;  %v2797_v58 = vunpack.c.h.bf16 %v3064_v31 }
  0xa5   : > { %v487_v4 = vsel %vm3036_vm5, %v408_v61, %v486_v55  ;;  %v493_v5 = vsel %vm3040_vm6, %v409_v62, %v492_v57  ;;  %v395_v6 = vpack.c.bf16 %v354_v63, %v354_v63  ;;  %v435_v7 = vshrl.u32 %v398_v0, 16 }
  0xa6   : > { %488 = vst [vmem:[#allocation2 + $0x8] sm:$0xf] %v487_v4  ;;  %v438_v10 = vshll.u32 %v398_v0, 16  ;;  %v585_v57 = vsel %vm3076_vm12, %v3066_v32, %v3068_v33  ;;  %v2737_v0 = vld [vmem:[#allocation5 + $0x118] sm:$0xff] }
  0xa7   : > { %494 = vst [vmem:[#allocation2 + $0xc] sm:$0x1] %v493_v5  ;;  %v411_v16 = vshrl.u32 %v395_v6, 16  ;;  %v437_v17 = vrot.slane %v435_v7, 7  ;;  %v414_v20 = vshll.u32 %v395_v6, 16  ;;  %1419 = vmatpush.bf16.msrb.mxu1 %v2737_v0 }
  0xa8   : > { %v365_v22 = vpop.f32.mrf.mxu3 }
  0xa9   : > { %v413_v23 = vrot.slane %v411_v16, 7  ;;  %v440_v25 = vor.u32 %v438_v10, %v437_v17  ;;  %v441_v26 = vrot.slane %v437_v17, 4  ;;  %v366_v27 = vadd.f32 %v2793_v2, %v365_v22  ;;  %v522_v2 = vld [vmem:[#allocation2 + $0x34] sm:$0x1] }
  0xaa   : > { %v356_v29 = vpop.f32.mrf.mxu0 }
  0xab   : > { %v416_v34 = vor.u32 %v414_v20, %v413_v23  ;;  %v417_v35 = vrot.slane %v413_v23, 4  ;;  %v514_v36 = vsel %vm3036_vm5, %v440_v25, %v513_v11  ;;  %v517_v37 = vsel %vm3040_vm6, %v441_v26, %v516_v12  ;;  %v2705_v25 = vld [vmem:[#allocation5 + $0x38] sm:$0xff]  ;;  %1420 = vmatpush.bf16.msrb.mxu1 %v2736_v19 }
  0xac   : > { %515 = vst [vmem:[#allocation2 + $0x28] sm:$0xf] %v514_v36  ;;  %v357_v39 = vadd.f32 %v2788_v21, %v356_v29  ;;  %v399_v40 = vpack.c.bf16 %v366_v27, %v366_v27  ;;  %866 = vmatpush.bf16.msrb.mxu2 %v2705_v25 }
  0xad   : > { %v496_v42 = vsel %vm3036_vm5, %v416_v34, %v495_v24  ;;  %v499_v43 = vsel %vm3040_vm6, %v417_v35, %v498_v28  ;;  %518 = vst [vmem:[#allocation2 + $0x2c] sm:$0x1] %v517_v37  ;;  %v896_v45 = vld [vmem:[#allocation2 + $0x8] sm:$0xe]  ;;  %v525_v34 = vld [vmem:[#allocation2 + $0x38] sm:$0xf] }
  0xae   : > { %497 = vst [vmem:[#allocation2 + $0x10] sm:$0xf] %v496_v42  ;;  %v396_v47 = vpack.c.bf16 %v357_v39, %v357_v39  ;;  %v443_v48 = vshrl.u32 %v399_v40, 16  ;;  %v446_v49 = vshll.u32 %v399_v40, 16  ;;  %v3086_v50 = vld [vmem:[#allocation2 + $0xc] sm:$0x1] }
  0xaf   : > { %500 = vst [vmem:[#allocation2 + $0x14] sm:$0x1] %v499_v43  ;;  %v2410_v53 = vrot.slane %v896_v45, 9  ;;  %v928_v54 = vrot.slane %v3086_v50, 5  ;;  %v538_v55 = vld [vmem:[#allocation2 + $0x8] sm:$0xf]  ;;  %v701_v43 = vunpack.c.l.b16 %v585_v57 }
  0xb0   : > { %v419_v59 = vshrl.u32 %v396_v47, 16  ;;  %v422_v60 = vshll.u32 %v396_v47, 16  ;;  %v445_v61 = vrot.slane %v443_v48, 7  ;;  %v368_v62 = vpop.f32.mrf.mxu3  ;;  %v587_v63 = vshrl.u32 %v538_v55, 16  ;;  %v2451_v24 = vld [vmem:[#allocation2 + $0x8] sm:$0xf] }
  0xb1   : > { %v929_v3 = vsel %vm3054_vm9, %v2410_v53, %v928_v54  ;;  %v369_v4 = vadd.f32 %v2796_v46, %v368_v62  ;;  %v590_v5 = vshll.u32 %v538_v55, 16  ;;  %v596_v6 = vshll.u32 %v3086_v50, 16  ;;  %v528_v35 = vld [vmem:[#allocation2 + $0x3c] sm:$0x1]  ;;  %v507_v46 = vld [vmem:[#allocation2 + $0x20] sm:$0xf] }
  0xb2   : > { %v421_v7 = vrot.slane %v419_v59, 7  ;;  %v448_v9 = vor.u32 %v446_v49, %v445_v61  ;;  %v449_v10 = vrot.slane %v445_v61, 4  ;;  %v359_v11 = vpop.f32.mrf.mxu0  ;;  %v972_v12 = vunpack.c.l.b16 %v929_v3  ;;  %v2735_v39 = vld [vmem:[#allocation5 + $0x108] sm:$0xff]  ;;  %v2761_v57 = vld [vmem:[#allocation5 + $0x1b8] sm:$0xff]  ;;  %v510_v61 = vld [vmem:[#allocation2 + $0x24] sm:$0x1] }
  0xb3   : > { %v360_v14 = vadd.f32 %v2789_v44, %v359_v11  ;;  %v400_v15 = vpack.c.bf16 %v369_v4, %v369_v4  ;;  %v589_v16 = vrot.slane %v587_v63, 4  ;;  %v592_v17 = vrot.slane %v590_v5, 5  ;;  %1421 = vmatpush.bf16.msrb.mxu1 %v2735_v39  ;;  %1724 = vmatpush.bf16.msra.mxu3 %v2761_v57 }
  0xb4   : > { %v424_v20 = vor.u32 %v422_v60, %v421_v7  ;;  %v425_v21 = vrot.slane %v421_v7, 4  ;;  %v520_v22 = vsel %vm3036_vm5, %v448_v9, %v519_v1  ;;  %v523_v23 = vsel %vm3040_vm6, %v449_v10, %v522_v2  ;;  %v2704_v60 = vld [vmem:[#allocation5 + $0x30] sm:$0xff]  ;;  %v2769_v2 = vld [vmem:[#allocation5 + $0x1f8] sm:$0xff]  ;;  %v2703_v10 = vld [vmem:[#allocation5 + $0x28] sm:$0xff] }
  0xb5   : > { %521 = vst [vmem:[#allocation2 + $0x30] sm:$0xf] %v520_v22  ;;  %v397_v26 = vpack.c.bf16 %v360_v14, %v360_v14  ;;  %v979_v27 = vpack.c.b16 %v972_v12, %v971_v51  ;;  %v451_v28 = vshrl.u32 %v400_v15, 16  ;;  %v454_v29 = vshll.u32 %v400_v15, 16  ;;  %v2722_v30 = vld [vmem:[#allocation2 + $0xc] sm:$0xf0]  ;;  %867 = vmatpush.bf16.msrb.mxu2 %v2704_v60  ;;  %1970 = vmatpush.bf16.msra.mxu0 %v2769_v2 }
  0xb6   : > { %v502_v32 = vsel %vm3036_vm5, %v424_v20, %v501_v8  ;;  %v505_v33 = vsel %vm3040_vm6, %v425_v21, %v504_v13  ;;  %524 = vst [vmem:[#allocation2 + $0x34] sm:$0x1] %v523_v23  ;;  %v2452_v36 = vor.u32 %v2722_v30, %v2451_v24  ;;  %v593_v37 = vor.u32 %v592_v17, %v589_v16  ;;  %v897_v38 = vld [vmem:[#allocation2 + $0x10] sm:$0xe]  ;;  %v3106_v44 = vld [vmem:[#allocation2 + $0x14] sm:$0x1] }
  0xb7   : > { %503 = vst [vmem:[#allocation2 + $0x18] sm:$0xf] %v502_v32  ;;  %v427_v40 = vshrl.u32 %v397_v26, 16  ;;  %1043 = vmatmul.bf16.vlgmr.msrb.gmra.mxu3 %v979_v27  ;;  %v453_v42 = vrot.slane %v451_v28, 7  ;;  %v430_v45 = vshll.u32 %v397_v26, 16  ;;  %v598_v48 = vrot.slane %v596_v6, 5 }
  0xb8   : > { %506 = vst [vmem:[#allocation2 + $0x1c] sm:$0x1] %v505_v33  ;;  %1177 = vmatmul.bf16.vlgmr.msrb.gmra.mxu0 %v2452_v36  ;;  %v594_v47 = vrot.slane %v593_v37, 4  ;;  %v371_v49 = vpop.f32.mrf.mxu3  ;;  %v2411_v50 = vrot.slane %v897_v38, 9  ;;  %v539_v59 = vld [vmem:[#allocation2 + $0x10] sm:$0xf] }
  0xb9   : > { %v429_v51 = vrot.slane %v427_v40, 7  ;;  %v456_v53 = vor.u32 %v454_v29, %v453_v42  ;;  %v457_v54 = vrot.slane %v453_v42, 4  ;;  %v372_v55 = vadd.f32 %v2797_v58, %v371_v49  ;;  %v2734_v58 = vld [vmem:[#allocation5 + $0x100] sm:$0xff]  ;;  %v2760_v6 = vld [vmem:[#allocation5 + $0x1b0] sm:$0xff]  ;;  %v3121_v14 = vld [vmem:[#allocation2 + $0x28] sm:$0xf]  ;;  %868 = vmatpush.bf16.msrb.mxu2 %v2703_v10 }
  0xba   : > { %v599_v62 = vsel %vm3076_vm12, %v594_v47, %v598_v48  ;;  %v932_v63 = vrot.slane %v3106_v44, 5  ;;  %v601_v0 = vshrl.u32 %v539_v59, 16  ;;  %v604_v1 = vshll.u32 %v539_v59, 16  ;;  %v531_v21 = vld [vmem:[#allocation2 + $0x40] sm:$0xf]  ;;  %1422 = vmatpush.bf16.msrb.mxu1 %v2734_v58  ;;  %1725 = vmatpush.bf16.msra.mxu3 %v2760_v6  ;;  %v2759_v36 = vld [vmem:[#allocation5 + $0x1a8] sm:$0xff] }
  0xbb   : > { %v432_v3 = vor.u32 %v430_v45, %v429_v51  ;;  %v433_v4 = vrot.slane %v429_v51, 4  ;;  %v526_v5 = vsel %vm3036_vm5, %v456_v53, %v525_v34  ;;  %v529_v31 = vsel %vm3040_vm6, %v457_v54, %v528_v35  ;;  %v534_v30 = vld [vmem:[#allocation2 + $0x44] sm:$0x1]  ;;  %v2702_v42 = vld [vmem:[#allocation5 + $0x20] sm:$0xff]  ;;  %v2767_v47 = vld [vmem:[#allocation5 + $0x1e8] sm:$0xff] }
  0xbc   : > { %527 = vst [vmem:[#allocation2 + $0x38] sm:$0xf] %v526_v5  ;;  %v702_v7 = vunpack.c.l.b16 %v599_v62  ;;  %v401_v8 = vpack.c.bf16 %v372_v55, %v372_v55  ;;  %v603_v9 = vrot.slane %v601_v0, 4  ;;  %v606_v13 = vrot.slane %v604_v1, 5  ;;  %v2768_v35 = vld [vmem:[#allocation5 + $0x1f0] sm:$0xff]  ;;  %v2758_v55 = vld [vmem:[#allocation5 + $0x1a0] sm:$0xff] }
  0xbd   : > { %v508_v11 = vsel %vm3036_vm5, %v432_v3, %v507_v46  ;;  %v511_v12 = vsel %vm3040_vm6, %v433_v4, %v510_v61  ;;  %530 = vst [vmem:[#allocation2 + $0x3c] sm:$0x1] %v529_v31  ;;  %v933_v20 = vsel %vm3054_vm9, %v2411_v50, %v932_v63  ;;  %v610_v28 = vshll.u32 %v3106_v44, 16  ;;  %1971 = vmatpush.bf16.msra.mxu0 %v2768_v35  ;;  %v3133_v53 = vld [vmem:[#allocation2 + $0x2c] sm:$0x1] }
  0xbe   : > { %509 = vst [vmem:[#allocation2 + $0x20] sm:$0xf] %v508_v11  ;;  %v709_v15 = vpack.c.b16 %v702_v7, %v701_v43  ;;  %v459_v16 = vshrl.u32 %v401_v8, 16  ;;  %v462_v17 = vshll.u32 %v401_v8, 16  ;;  %v898_v19 = vld [vmem:[#allocation2 + $0x18] sm:$0xe]  ;;  %v607_v24 = vor.u32 %v606_v13, %v603_v9  ;;  %1726 = vmatpush.bf16.msra.mxu3 %v2759_v36  ;;  %869 = vmatpush.bf16.msrb.mxu2 %v2702_v42 }
  0xbf   : > { %512 = vst [vmem:[#allocation2 + $0x24] sm:$0x1] %v511_v12  ;;  %v564_v22 = vld [vmem:[#allocation2 + $0x1c] sm:$0x1]  ;;  %v2412_v23 = vrot.slane %v898_v19, 9  ;;  %v643_v29 = vshrl.u32 %v3121_v14, 16  ;;  %v973_v32 = vunpack.c.l.b16 %v933_v20 }
  0xc0   : > { %773 = vmatmul.bf16.vlgmr.msra.gmra.mxu1 %v709_v15  ;;  %v461_v25 = vrot.slane %v459_v16, 7  ;;  %v936_v26 = vrot.slane %v564_v22, 5  ;;  %v540_v27 = vld [vmem:[#allocation2 + $0x18] sm:$0xf]  ;;  %v608_v40 = vrot.slane %v607_v24, 4  ;;  %v624_v44 = vshll.u32 %v564_v22, 16 }
  0xc1   : > { %v615_v33 = vshrl.u32 %v540_v27, 16  ;;  %v618_v34 = vshll.u32 %v540_v27, 16  ;;  %v2455_v50 = vld [vmem:[#allocation2 + $0x18] sm:$0xf]  ;;  %v612_v51 = vrot.slane %v610_v28, 5  ;;  %v645_v54 = vrot.slane %v643_v29, 4  ;;  %1972 = vmatpush.bf16.msra.mxu0 %v2767_v47 }
  0xc2   : > { %v464_v37 = vor.u32 %v462_v17, %v461_v25  ;;  %v465_v38 = vrot.slane %v461_v25, 4  ;;  %v937_v39 = vsel %vm3054_vm9, %v2412_v23, %v936_v26  ;;  %v2701_v59 = vld [vmem:[#allocation5 + $0x18] sm:$0xff]  ;;  %v626_v4 = vrot.slane %v624_v44, 5  ;;  %1727 = vmatpush.bf16.msra.mxu3 %v2758_v55  ;;  %v2766_v15 = vld [vmem:[#allocation5 + $0x1e0] sm:$0xff]  ;;  %v2700_v22 = vld [vmem:[#allocation5 + $0x10] sm:$0xff] }
  0xc3   : > { %v974_v43 = vunpack.c.l.b16 %v937_v39  ;;  %v617_v45 = vrot.slane %v615_v33, 4  ;;  %v620_v46 = vrot.slane %v618_v34, 5  ;;  %v900_v63 = vld [vmem:[#allocation2 + $0x28] sm:$0xe]  ;;  %v613_v56 = vsel %vm3076_vm12, %v608_v40, %v612_v51  ;;  %870 = vmatpush.bf16.msrb.mxu2 %v2701_v59  ;;  %v1208_v20 = vld [vmem:[#allocation2 + $0x10] sm:$0xf] }
  0xc4   : > { %v532_v48 = vsel %vm3036_vm5, %v464_v37, %v531_v21  ;;  %v535_v49 = vsel %vm3040_vm6, %v465_v38, %v534_v30  ;;  %v646_v5 = vshll.u32 %v3121_v14, 16  ;;  %v652_v31 = vshll.u32 %v3133_v53, 16  ;;  %v1206_v9 = vld [vmem:[#allocation2 + $0x8] sm:$0xf]  ;;  %v2756_v33 = vld [vmem:[#allocation5 + $0x190] sm:$0xff]  ;;  %v2699_v38 = vld [vmem:[#allocation5 + $0x8] sm:$0xff] }
  0xc5   : > { %533 = vst [vmem:[#allocation2 + $0x40] sm:$0xf] %v532_v48  ;;  %v980_v57 = vpack.c.b16 %v974_v43, %v973_v32  ;;  %v2723_v60 = vld [vmem:[#allocation2 + $0x1c] sm:$0xf0]  ;;  %v621_v61 = vor.u32 %v620_v46, %v617_v45  ;;  %v703_v11 = vunpack.c.l.b16 %v613_v56  ;;  %v2414_v19 = vrot.slane %v900_v63, 9  ;;  %v2757_v21 = vld [vmem:[#allocation5 + $0x198] sm:$0xff]  ;;  %1973 = vmatpush.bf16.msra.mxu0 %v2766_v15 }
  0xc6   : > { %v541_v62 = vld [vmem:[#allocation2 + $0x20] sm:$0xf]  ;;  %536 = vst [vmem:[#allocation2 + $0x44] sm:$0x1] %v535_v49  ;;  %v2456_v52 = vor.u32 %v2723_v60, %v2455_v50  ;;  %v565_v0 = vld [vmem:[#allocation2 + $0x24] sm:$0x1]  ;;  %1728 = vmatpush.bf16.msra.mxu3 %v2757_v21 }
  0xc7   : > { %v629_v1 = vshrl.u32 %v541_v62, 16  ;;  %v632_v2 = vshll.u32 %v541_v62, 16  ;;  %1048 = vmatmul.bf16.gmra.mxu3 %v980_v57  ;;  %v622_v3 = vrot.slane %v621_v61, 4  ;;  %v899_v58 = vld [vmem:[#allocation2 + $0x20] sm:$0xe]  ;;  %v638_v8 = vshll.u32 %v565_v0, 16  ;;  %871 = vmatpush.bf16.msrb.mxu2 %v2700_v22 }
  0xc8   : > { %1182 = vmatmul.bf16.gmra.mxu0 %v2456_v52  ;;  %v648_v12 = vrot.slane %v646_v5, 5  ;;  %v2413_v13 = vrot.slane %v899_v58, 9  ;;  %v940_v17 = vrot.slane %v565_v0, 5  ;;  %v654_v24 = vrot.slane %v652_v31, 5  ;;  %v2765_v27 = vld [vmem:[#allocation5 + $0x1d8] sm:$0xff]  ;;  %v2764_v55 = vld [vmem:[#allocation5 + $0x1d0] sm:$0xff] }
  0xc9   : > { %v631_v6 = vrot.slane %v629_v1, 4  ;;  %v634_v7 = vrot.slane %v632_v2, 5  ;;  %v627_v10 = vsel %vm3076_vm12, %v622_v3, %v626_v4  ;;  %v944_v25 = vrot.slane %v3133_v53, 5  ;;  %v3142_v35 = vld [vmem:[#allocation2 + $0xc] sm:$0x1]  ;;  %1974 = vmatpush.bf16.msra.mxu0 %v2765_v27  ;;  %v2755_v59 = vld [vmem:[#allocation5 + $0x188] sm:$0xff] }
  0xca   : > { %v704_v16 = vunpack.c.l.b16 %v627_v10  ;;  %v649_v23 = vor.u32 %v648_v12, %v645_v54  ;;  %v1223_v26 = vshrl.u32 %v1206_v9, 16  ;;  %v640_v30 = vrot.slane %v638_v8, 5  ;;  %v3150_v43 = vld [vmem:[#allocation2 + $0x14] sm:$0x1]  ;;  %v543_v46 = vld [vmem:[#allocation2 + $0x30] sm:$0xf]  ;;  %1729 = vmatpush.bf16.msra.mxu3 %v2756_v33 }
  0xcb   : > { %v635_v14 = vor.u32 %v634_v7, %v631_v6  ;;  %v1226_v32 = vshll.u32 %v1206_v9, 16  ;;  %v1237_v37 = vshrl.u32 %v1208_v20, 16  ;;  %v941_v40 = vsel %vm3054_vm9, %v2413_v13, %v940_v17  ;;  %v544_v54 = vld [vmem:[#allocation2 + $0x38] sm:$0xf]  ;;  %v2459_v60 = vld [vmem:[#allocation2 + $0x28] sm:$0xf]  ;;  %872 = vmatpush.bf16.msrb.mxu2 %v2699_v38 }
  0xcc   : > { %v710_v28 = vpack.c.b16 %v704_v16, %v703_v11  ;;  %v650_v34 = vrot.slane %v649_v23, 4  ;;  %v1225_v36 = vrot.slane %v1223_v26, 4  ;;  %v945_v42 = vsel %vm3054_vm9, %v2414_v19, %v944_v25  ;;  %v2724_v61 = vld [vmem:[#allocation2 + $0x2c] sm:$0xf0]  ;;  %v567_v3 = vld [vmem:[#allocation2 + $0x34] sm:$0x1] }
  0xcd   : > { %v636_v29 = vrot.slane %v635_v14, 4  ;;  %v1228_v45 = vrot.slane %v1226_v32, 5  ;;  %v1239_v48 = vrot.slane %v1237_v37, 4  ;;  %v1240_v49 = vshll.u32 %v1208_v20, 16  ;;  %v2698_v56 = vld [vmem:[#allocation5] sm:$0xff]  ;;  %1975 = vmatpush.bf16.msra.mxu0 %v2764_v55  ;;  %v2763_v9 = vld [vmem:[#allocation5 + $0x1c8] sm:$0xff] }
  0xce   : > { %v655_v44 = vsel %vm3076_vm12, %v650_v34, %v654_v24  ;;  %v1232_v53 = vshll.u32 %v3142_v35, 16  ;;  %v975_v57 = vunpack.c.l.b16 %v941_v40  ;;  %v1246_v63 = vshll.u32 %v3150_v43, 16  ;;  %v568_v4 = vld [vmem:[#allocation2 + $0x3c] sm:$0x1]  ;;  %v901_v8 = vld [vmem:[#allocation2 + $0x30] sm:$0xe]  ;;  %1730 = vmatpush.bf16.msra.mxu3 %v2755_v59 }
  0xcf   : > { %v641_v39 = vsel %vm3076_vm12, %v636_v29, %v640_v30  ;;  %v706_v50 = vunpack.c.l.b16 %v655_v44  ;;  %v1229_v51 = vor.u32 %v1228_v45, %v1225_v36  ;;  %v1242_v62 = vrot.slane %v1240_v49, 5  ;;  %v2754_v15 = vld [vmem:[#allocation5 + $0x180] sm:$0xff]  ;;  %v2749_v16 = vld [vmem:[#allocation5 + $0x178] sm:$0xff]  ;;  %v902_v21 = vld [vmem:[#allocation2 + $0x38] sm:$0xe]  ;;  %873 = vmatpush.bf16.msrb.mxu2 %v2698_v56 }
  0xd0   : > { %v705_v47 = vunpack.c.l.b16 %v641_v39  ;;  %778 = vmatmul.bf16.gmra.mxu1 %v710_v28  ;;  %v657_v52 = vshrl.u32 %v543_v46, 16  ;;  %v976_v1 = vunpack.c.l.b16 %v945_v42  ;;  %v660_v5 = vshll.u32 %v543_v46, 16  ;;  %v1210_v26 = vld [vmem:[#allocation2 + $0x18] sm:$0xf]  ;;  %v2762_v32 = vld [vmem:[#allocation5 + $0x1c0] sm:$0xff] }
  0xd1   : > { %v1230_v2 = vrot.slane %v1229_v51, 4  ;;  %v1243_v31 = vor.u32 %v1242_v62, %v1239_v48  ;;  %v666_v6 = vshll.u32 %v567_v3, 16  ;;  %v671_v7 = vshrl.u32 %v544_v54, 16  ;;  %1976 = vmatpush.bf16.msra.mxu0 %v2763_v9  ;;  %v1212_v40 = vld [vmem:[#allocation2 + $0x20] sm:$0xf] }
  0xd2   : > { %v711_v0 = vpack.c.b16 %v706_v50, %v705_v47  ;;  %v659_v58 = vrot.slane %v657_v52, 4  ;;  %v1234_v10 = vrot.slane %v1232_v53, 5  ;;  %v662_v11 = vrot.slane %v660_v5, 5  ;;  %1731 = vmatpush.bf16.msra.mxu3 %v2754_v15  ;;  %v1761_v53 = vld [vmem:[#allocation2 + $0x10] sm:$0xf] }
  0xd3   : > { %v674_v12 = vshll.u32 %v544_v54, 16  ;;  %v680_v13 = vshll.u32 %v568_v4, 16  ;;  %v981_v14 = vpack.c.b16 %v976_v1, %v975_v57  ;;  %v1244_v17 = vrot.slane %v1243_v31, 4  ;;  %v3168_v59 = vld [vmem:[#allocation2 + $0x24] sm:$0x1] }
  0xd4   : > { %783 = vmatmul.bf16.vlgmr.msra.gmra.mxu2 %v711_v0  ;;  %v1248_v19 = vrot.slane %v1246_v63, 5  ;;  %v673_v20 = vrot.slane %v671_v7, 4  ;;  %v2460_v22 = vor.u32 %v2724_v61, %v2459_v60  ;;  %v1235_v23 = vsel %vm3076_vm12, %v1230_v2, %v1234_v10  ;;  %v1763_v61 = vld [vmem:[#allocation2 + $0x18] sm:$0xf]  ;;  %v3170_v52 = vld [vmem:[#allocation2 + $0x1c] sm:$0x1] }
  0xd5   : > { %v663_v24 = vor.u32 %v662_v11, %v659_v58  ;;  %v676_v25 = vrot.slane %v674_v12, 5  ;;  %1589 = vmatpush.bf16.msra.mxu2 %v2749_v16  ;;  %v668_v28 = vrot.slane %v666_v6, 5  ;;  %v682_v29 = vrot.slane %v680_v13, 5  ;;  %1977 = vmatpush.bf16.msra.mxu0 %v2762_v32  ;;  %v2748_v58 = vld [vmem:[#allocation5 + $0x170] sm:$0xff]  ;;  %v2777_v6 = vld [vmem:[#allocation5 + $0x238] sm:$0xff] }
  0xd6   : > { %v1249_v27 = vsel %vm3076_vm12, %v1244_v17, %v1248_v19  ;;  %v2415_v30 = vrot.slane %v901_v8, 9  ;;  %v948_v36 = vrot.slane %v567_v3, 5  ;;  %v2416_v37 = vrot.slane %v902_v21, 9  ;;  %v2463_v8 = vld [vmem:[#allocation2 + $0x38] sm:$0xf]  ;;  %2144 = vmatpush.bf16.msra.mxu1 %v2777_v6  ;;  %v2776_v17 = vld [vmem:[#allocation5 + $0x230] sm:$0xff] }
  0xd7   : > { %1053 = vmatmul.bf16.gmra.mxu3 %v981_v14  ;;  %v664_v33 = vrot.slane %v663_v24, 4  ;;  %v677_v34 = vor.u32 %v676_v25, %v673_v20  ;;  %v1352_v38 = vunpack.c.l.b16 %v1249_v27  ;;  %v952_v39 = vrot.slane %v568_v4, 5  ;;  %v2725_v13 = vld [vmem:[#allocation2 + $0x3c] sm:$0xf0]  ;;  %v1214_v21 = vld [vmem:[#allocation2 + $0x28] sm:$0xf] }
  0xd8   : > { %1187 = vmatmul.bf16.gmra.mxu0 %v2460_v22  ;;  %v1251_v42 = vshrl.u32 %v1210_v26, 16  ;;  %v1254_v45 = vshll.u32 %v1210_v26, 16  ;;  %v1351_v44 = vunpack.c.l.b16 %v1235_v23  ;;  %v949_v49 = vsel %vm3054_vm9, %v2415_v30, %v948_v36  ;;  %v1216_v23 = vld [vmem:[#allocation2 + $0x30] sm:$0xf]  ;;  %v2747_v24 = vld [vmem:[#allocation5 + $0x168] sm:$0xff] }
  0xd9   : > { %v678_v46 = vrot.slane %v677_v34, 4  ;;  %v669_v47 = vsel %vm3076_vm12, %v664_v33, %v668_v28  ;;  %v1265_v50 = vshrl.u32 %v1212_v40, 16  ;;  %v1268_v51 = vshll.u32 %v1212_v40, 16  ;;  %1590 = vmatpush.bf16.msra.mxu2 %v2748_v58  ;;  %v3174_v28 = vld [vmem:[#allocation2 + $0x14] sm:$0x1]  ;;  %v2775_v36 = vld [vmem:[#allocation5 + $0x228] sm:$0xff] }
  0xda   : > { %v1359_v54 = vpack.c.b16 %v1352_v38, %v1351_v44  ;;  %v953_v55 = vsel %vm3054_vm9, %v2416_v37, %v952_v39  ;;  %v1253_v57 = vrot.slane %v1251_v42, 4  ;;  %v1256_v60 = vrot.slane %v1254_v45, 5  ;;  %v3178_v32 = vld [vmem:[#allocation2 + $0x1c] sm:$0x1]  ;;  %2145 = vmatpush.bf16.msra.mxu1 %v2776_v17 }
  0xdb   : > { %v683_v48 = vsel %vm3076_vm12, %v678_v46, %v682_v29  ;;  %v707_v62 = vunpack.c.l.b16 %v669_v47  ;;  %v1267_v56 = vrot.slane %v1265_v50, 4  ;;  %v1270_v0 = vrot.slane %v1268_v51, 5  ;;  %v2774_v50 = vld [vmem:[#allocation5 + $0x220] sm:$0xff] }
  0xdc   : > { %v708_v63 = vunpack.c.l.b16 %v683_v48  ;;  %v977_v1 = vunpack.c.l.b16 %v949_v49  ;;  %v1778_v2 = vshrl.u32 %v1761_v53, 16  ;;  %v1274_v4 = vshll.u32 %v3168_v59, 16  ;;  %v1765_v49 = vld [vmem:[#allocation2 + $0x20] sm:$0xf] }
  0xdd   : > { %v1271_v3 = vor.u32 %v1270_v0, %v1267_v56  ;;  %v1781_v5 = vshll.u32 %v1761_v53, 16  ;;  %v1792_v31 = vshrl.u32 %v1763_v61, 16  ;;  %v978_v7 = vunpack.c.l.b16 %v953_v55  ;;  %1591 = vmatpush.bf16.msra.mxu2 %v2747_v24 }
  0xde   : > { %v1257_v9 = vor.u32 %v1256_v60, %v1253_v57  ;;  %v1260_v10 = vshll.u32 %v3170_v52, 16  ;;  %v1795_v11 = vshll.u32 %v1763_v61, 16  ;;  %v712_v12 = vpack.c.b16 %v708_v63, %v707_v62  ;;  %2146 = vmatpush.bf16.msra.mxu1 %v2775_v36  ;;  %v3184_v60 = vld [vmem:[#allocation2 + $0x2c] sm:$0x1]  ;;  %v3186_v61 = vld [vmem:[#allocation2 + $0x34] sm:$0x1] }
  0xdf   : > { %v1272_v15 = vrot.slane %v1271_v3, 4  ;;  %v1780_v16 = vrot.slane %v1778_v2, 4  ;;  %v1783_v14 = vrot.slane %v1781_v5, 5  ;;  %v1794_v19 = vrot.slane %v1792_v31, 4  ;;  %v1767_v62 = vld [vmem:[#allocation2 + $0x28] sm:$0xf] }
  0xe0   : > { %1423 = vmatmul.bf16.vlgmr.msrb.gmra.mxu1 %v1359_v54  ;;  %v1797_v20 = vrot.slane %v1795_v11, 5  ;;  %v1276_v22 = vrot.slane %v1274_v4, 5  ;;  %v982_v25 = vpack.c.b16 %v978_v7, %v977_v1  ;;  %v2464_v26 = vor.u32 %v2725_v13, %v2463_v8  ;;  %v1218_v2 = vld [vmem:[#allocation2 + $0x38] sm:$0xf]  ;;  %v2363_v4 = vld [vmem:[#allocation2] sm:$0xf] }
  0xe1   : > { %v1258_v27 = vrot.slane %v1257_v9, 4  ;;  %v1262_v29 = vrot.slane %v1260_v10, 5  ;;  %v1784_v33 = vor.u32 %v1783_v14, %v1780_v16  ;;  %v1279_v34 = vshrl.u32 %v1214_v21, 16  ;;  %v2694_v5 = vld [vmem:[#allocation2 + $0x4] sm:$0xf0]  ;;  %v2746_v16 = vld [vmem:[#allocation5 + $0x160] sm:$0xff] }
  0xe2   : > { %v1277_v30 = vsel %vm3076_vm12, %v1272_v15, %v1276_v22  ;;  %v1798_v37 = vor.u32 %v1797_v20, %v1794_v19  ;;  %v1282_v38 = vshll.u32 %v1214_v21, 16  ;;  %v1293_v39 = vshrl.u32 %v1216_v23, 16  ;;  %2147 = vmatpush.bf16.msra.mxu1 %v2774_v50  ;;  %v1220_v10 = vld [vmem:[#allocation2 + $0x40] sm:$0xf]  ;;  %v2773_v14 = vld [vmem:[#allocation5 + $0x218] sm:$0xff]  ;;  %1592 = vmatpush.bf16.msra.mxu2 %v2746_v16 }
  0xe3   : > { %v1296_v40 = vshll.u32 %v1216_v23, 16  ;;  %v1263_v42 = vsel %vm3076_vm12, %v1258_v27, %v1262_v29  ;;  %v1787_v45 = vshll.u32 %v3174_v28, 16  ;;  %v1801_v46 = vshll.u32 %v3178_v32, 16  ;;  %v2571_v21 = vld [vmem:[#allocation2 + $0x10] sm:$0xf]  ;;  %v2772_v27 = vld [vmem:[#allocation5 + $0x210] sm:$0xff] }
  0xe4   : > { %788 = vmatmul.bf16.gmra.mxu2 %v712_v12  ;;  %v1354_v44 = vunpack.c.l.b16 %v1277_v30  ;;  %v1785_v47 = vrot.slane %v1784_v33, 4  ;;  %v1281_v48 = vrot.slane %v1279_v34, 4  ;;  %v1799_v51 = vrot.slane %v1798_v37, 4  ;;  %v2750_v22 = vld [vmem:[#allocation2 + $0x14] sm:$0xf0] }
  0xe5   : > { %v1284_v53 = vrot.slane %v1282_v38, 5  ;;  %v1295_v54 = vrot.slane %v1293_v39, 4  ;;  %v1298_v55 = vrot.slane %v1296_v40, 5  ;;  %v1353_v57 = vunpack.c.l.b16 %v1263_v42  ;;  %v3194_v33 = vld [vmem:[#allocation2 + $0x24] sm:$0x1]  ;;  %v2745_v42 = vld [vmem:[#allocation5 + $0x158] sm:$0xff] }
  0xe6   : > { %v1789_v63 = vrot.slane %v1787_v45, 5  ;;  %v1803_v56 = vrot.slane %v1801_v46, 5  ;;  %v1806_v0 = vshrl.u32 %v1765_v49, 16  ;;  %v1809_v1 = vshll.u32 %v1765_v49, 16  ;;  %2148 = vmatpush.bf16.msra.mxu1 %v2773_v14  ;;  %1593 = vmatpush.bf16.msra.mxu2 %v2745_v42  ;;  %v1453_v16 = vld [vmem:[#allocation2 + $0x10] sm:$0xe] }
  0xe7   : > { %1058 = vmatmul.bf16.gmra.mxu3 %v982_v25  ;;  %v1360_v3 = vpack.c.b16 %v1354_v44, %v1353_v57  ;;  %v1288_v31 = vshll.u32 %v3184_v60, 16  ;;  %v1302_v58 = vshll.u32 %v3186_v61, 16  ;;  %v1285_v8 = vor.u32 %v1284_v53, %v1281_v48  ;;  %v2771_v48 = vld [vmem:[#allocation5 + $0x208] sm:$0xff] }
  0xe8   : > { %1192 = vmatmul.bf16.gmra.mxu0 %v2464_v26  ;;  %v1790_v6 = vsel %vm3076_vm12, %v1785_v47, %v1789_v63  ;;  %v1804_v7 = vsel %vm3076_vm12, %v1799_v51, %v1803_v56  ;;  %v1299_v9 = vor.u32 %v1298_v55, %v1295_v54  ;;  %v1820_v11 = vshrl.u32 %v1767_v62, 16  ;;  %v3201_v51 = vld [vmem:[#allocation2 + $0x2c] sm:$0x1]  ;;  %v3203_v53 = vld [vmem:[#allocation2 + $0x3c] sm:$0x1] }
  0xe9   : > { %v1823_v12 = vshll.u32 %v1767_v62, 16  ;;  %v1307_v13 = vshrl.u32 %v1218_v2, 16  ;;  %v1310_v15 = vshll.u32 %v1218_v2, 16  ;;  %v2364_v17 = vor.u32 %v2694_v5, %v2363_v4  ;;  %v3208_v5 = vld [vmem:[#allocation2 + $0x44] sm:$0x1] }
  0xea   : > { %v1808_v19 = vrot.slane %v1806_v0, 4  ;;  %v1811_v20 = vrot.slane %v1809_v1, 5  ;;  %v1906_v23 = vunpack.c.l.b16 %v1790_v6  ;;  %v1907_v24 = vunpack.c.l.b16 %v1804_v7  ;;  %2149 = vmatpush.bf16.msra.mxu1 %v2772_v27  ;;  %v2744_v0 = vld [vmem:[#allocation5 + $0x150] sm:$0xff]  ;;  %v2695_v14 = vld [vmem:[#allocation2 + $0x14] sm:$0xf0] }
  0xeb   : > { %v1290_v25 = vrot.slane %v1288_v31, 5  ;;  %v1304_v26 = vrot.slane %v1302_v58, 5  ;;  %v1286_v29 = vrot.slane %v1285_v8, 4  ;;  %v1300_v30 = vrot.slane %v1299_v9, 4  ;;  %v1769_v31 = vld [vmem:[#allocation2 + $0x30] sm:$0xf]  ;;  %1594 = vmatpush.bf16.msra.mxu2 %v2744_v0 }
  0xec   : > { %v1321_v34 = vshrl.u32 %v1220_v10, 16  ;;  %v1324_v36 = vshll.u32 %v1220_v10, 16  ;;  %v1822_v37 = vrot.slane %v1820_v11, 4  ;;  %v1825_v38 = vrot.slane %v1823_v12, 5  ;;  %v2770_v58 = vld [vmem:[#allocation5 + $0x200] sm:$0xff]  ;;  %v2743_v0 = vld [vmem:[#allocation5 + $0x148] sm:$0xff] }
  0xed   : > { %v1309_v39 = vrot.slane %v1307_v13, 4  ;;  %v1312_v40 = vrot.slane %v1310_v15, 5  ;;  %v2572_v45 = vor.u32 %v2750_v22, %v2571_v21  ;;  %v1812_v46 = vor.u32 %v1811_v20, %v1808_v19  ;;  %v1771_v9 = vld [vmem:[#allocation2 + $0x38] sm:$0xf]  ;;  %v1452_v10 = vld [vmem:[#allocation2 + $0x8] sm:$0xe] }
  0xee   : > { %v1914_v44 = vpack.c.b16 %v1907_v24, %v1906_v23  ;;  %v1815_v47 = vshll.u32 %v3194_v33, 16  ;;  %v1291_v49 = vsel %vm3076_vm12, %v1286_v29, %v1290_v25  ;;  %v1305_v50 = vsel %vm3076_vm12, %v1300_v30, %v1304_v26  ;;  %2150 = vmatpush.bf16.msra.mxu1 %v2771_v48  ;;  %v2367_v24 = vld [vmem:[#allocation2 + $0x10] sm:$0xf] }
  0xef   : > { %v1323_v54 = vrot.slane %v1321_v34, 4  ;;  %v1326_v55 = vrot.slane %v1324_v36, 5  ;;  %v1826_v57 = vor.u32 %v1825_v38, %v1822_v37  ;;  %v1829_v62 = vshll.u32 %v3201_v51, 16  ;;  %v1454_v37 = vld [vmem:[#allocation2 + $0x18] sm:$0xe]  ;;  %1595 = vmatpush.bf16.msra.mxu2 %v2743_v0 }
  0xf0   : > { %1428 = vmatmul.bf16.gmra.mxu1 %v1360_v3  ;;  %v1313_v63 = vor.u32 %v1312_v40, %v1309_v39  ;;  %v1316_v56 = vshll.u32 %v3203_v53, 16  ;;  %v1813_v1 = vrot.slane %v1812_v46, 4  ;;  %v1478_v2 = vrot.slane %v3142_v35, 5  ;;  %v2575_v38 = vld [vmem:[#allocation2 + $0x20] sm:$0xf] }
  0xf1   : > { %v1355_v3 = vunpack.c.l.b16 %v1291_v49  ;;  %v1356_v4 = vunpack.c.l.b16 %v1305_v50  ;;  %v1817_v6 = vrot.slane %v1815_v47, 5  ;;  %v1327_v7 = vor.u32 %v1326_v55, %v1323_v54  ;;  %v1455_v49 = vld [vmem:[#allocation2 + $0x20] sm:$0xe]  ;;  %v2751_v50 = vld [vmem:[#allocation2 + $0x24] sm:$0xf0] }
  0xf2   : > { %v1330_v8 = vshll.u32 %v3208_v5, 16  ;;  %v1827_v11 = vrot.slane %v1826_v57, 4  ;;  %v1831_v12 = vrot.slane %v1829_v62, 5  ;;  %v1314_v13 = vrot.slane %v1313_v63, 4  ;;  %2151 = vmatpush.bf16.msra.mxu1 %v2770_v58  ;;  %v3224_v57 = vld [vmem:[#allocation2 + $0x34] sm:$0x1] }
  0xf3   : > { %v1318_v15 = vrot.slane %v1316_v56, 5  ;;  %v1482_v35 = vrot.slane %v3150_v43, 5  ;;  %v1834_v19 = vshrl.u32 %v1769_v31, 16  ;;  %v1837_v20 = vshll.u32 %v1769_v31, 16  ;;  %v3230_v31 = vld [vmem:[#allocation2 + $0x3c] sm:$0x1] }
  0xf4   : > { %874 = vmatmul.bf16.vlgmr.msrb.gmra.mxu2 %v2364_v17  ;;  %v1818_v17 = vsel %vm3076_vm12, %v1813_v1, %v1817_v6  ;;  %v1361_v21 = vpack.c.b16 %v1356_v4, %v1355_v3  ;;  %v1848_v22 = vshrl.u32 %v1771_v9, 16  ;;  %v1851_v23 = vshll.u32 %v1771_v9, 16  ;;  %v3254_v0 = vld [vmem:[#allocation2 + $0x44] sm:$0x1] }
  0xf5   : > { %v1328_v25 = vrot.slane %v1327_v7, 4  ;;  %v1332_v26 = vrot.slane %v1330_v8, 5  ;;  %v2529_v27 = vrot.slane %v1452_v10, 9  ;;  %v2530_v29 = vrot.slane %v1453_v16, 9 }
  0xf6   : > { %v2368_v30 = vor.u32 %v2695_v14, %v2367_v24  ;;  %v1832_v43 = vsel %vm3076_vm12, %v1827_v11, %v1831_v12  ;;  %v1908_v34 = vunpack.c.l.b16 %v1818_v17  ;;  %v1319_v36 = vsel %vm3076_vm12, %v1314_v13, %v1318_v15  ;;  %v1773_v12 = vld [vmem:[#allocation2 + $0x40] sm:$0xf]  ;;  %v1457_v13 = vld [vmem:[#allocation2 + $0x30] sm:$0xe] }
  0xf7   : > { %1732 = vmatmul.bf16.vlgmr.msra.gmra.mxu3 %v2572_v45  ;;  %v1836_v39 = vrot.slane %v1834_v19, 4  ;;  %v1839_v40 = vrot.slane %v1837_v20, 5  ;;  %v1479_v42 = vsel %vm3054_vm9, %v2529_v27, %v1478_v2  ;;  %v1483_v45 = vsel %vm3054_vm9, %v2530_v29, %v1482_v35  ;;  %v1775_v35 = vld [vmem:[#allocation2 + $0x48] sm:$0xf]  ;;  %v2742_v14 = vld [vmem:[#allocation5 + $0x140] sm:$0xff] }
  0xf8   : > { %1978 = vmatmul.bf16.vlgmr.msra.gmra.mxu0 %v1914_v44  ;;  %v1850_v46 = vrot.slane %v1848_v22, 4  ;;  %v1853_v44 = vrot.slane %v1851_v23, 5  ;;  %v1525_v47 = vunpack.c.l.b16 %v1479_v42  ;;  %v1526_v48 = vunpack.c.l.b16 %v1483_v45  ;;  %1596 = vmatpush.bf16.msra.mxu2 %v2742_v14  ;;  %v1459_v27 = vld [vmem:[#allocation2 + $0x40] sm:$0xe] }
  0xf9   : > { %v1909_v54 = vunpack.c.l.b16 %v1832_v43  ;;  %v1333_v55 = vsel %vm3076_vm12, %v1328_v25, %v1332_v26  ;;  %v2531_v62 = vrot.slane %v1454_v37, 9  ;;  %v2576_v63 = vor.u32 %v2751_v50, %v2575_v38 }
  0xfa   : > { %v1843_v56 = vshll.u32 %v3224_v57, 16  ;;  %v3227_v1 = vpack.c.b16 %v1526_v48, %v1525_v47  ;;  %v1486_v2 = vrot.slane %v3170_v52, 5  ;;  %v1357_v4 = vunpack.c.l.b16 %v1319_v36  ;;  %v1456_v52 = vld [vmem:[#allocation2 + $0x28] sm:$0xe]  ;;  %v2579_v47 = vld [vmem:[#allocation2 + $0x30] sm:$0xf] }
  0xfb   : > { %v1915_v3 = vpack.c.b16 %v1909_v54, %v1908_v34  ;;  %v1840_v58 = vor.u32 %v1839_v40, %v1836_v39  ;;  %v2532_v6 = vrot.slane %v1455_v49, 9  ;;  %v1358_v7 = vunpack.c.l.b16 %v1333_v55  ;;  %v2371_v40 = vld [vmem:[#allocation2 + $0x20] sm:$0xf]  ;;  %v2008_v54 = vld [vmem:[#allocation2 + $0x18] sm:$0xe] }
  0xfc   : > { %v1854_v8 = vor.u32 %v1853_v44, %v1850_v46  ;;  %v1857_v9 = vshll.u32 %v3230_v31, 16  ;;  %v1490_v10 = vrot.slane %v3168_v59, 5  ;;  %v1487_v11 = vsel %vm3054_vm9, %v2531_v62, %v1486_v2  ;;  %v1458_v59 = vld [vmem:[#allocation2 + $0x38] sm:$0xe]  ;;  %v2696_v44 = vld [vmem:[#allocation2 + $0x24] sm:$0xf0] }
  0xfd   : > { %v1841_v15 = vrot.slane %v1840_v58, 4  ;;  %v1845_v16 = vrot.slane %v1843_v56, 5  ;;  %v1362_v19 = vpack.c.b16 %v1358_v7, %v1357_v4  ;;  %v1527_v22 = vunpack.c.l.b16 %v1487_v11  ;;  %v2007_v56 = vld [vmem:[#allocation2 + $0x10] sm:$0xe] }
  0xfe   : > { %v1491_v17 = vsel %vm3054_vm9, %v2532_v6, %v1490_v10  ;;  %v1855_v20 = vrot.slane %v1854_v8, 4  ;;  %v1862_v23 = vshrl.u32 %v1773_v12, 16  ;;  %v1865_v24 = vshll.u32 %v1773_v12, 16 }
  0xff   : > { %v1528_v25 = vunpack.c.l.b16 %v1491_v17  ;;  %v2533_v26 = vrot.slane %v1456_v52, 9  ;;  %v1876_v29 = vshrl.u32 %v1775_v35, 16  ;;  %v2534_v43 = vrot.slane %v1457_v13, 9 }
 0x100   : > { %1433 = vmatmul.bf16.gmra.mxu1 %v1361_v21  ;;  %v1859_v21 = vrot.slane %v1857_v9, 5  ;;  %v1498_v34 = vrot.slane %v3186_v61, 5  ;;  %v1879_v36 = vshll.u32 %v1775_v35, 16  ;;  %v2535_v38 = vrot.slane %v1458_v59, 9  ;;  %v2752_v61 = vld [vmem:[#allocation2 + $0x34] sm:$0xf0] }
 0x101   : > { %v3240_v37 = vpack.c.b16 %v1528_v25, %v1527_v22  ;;  %v1502_v39 = vrot.slane %v3203_v53, 5  ;;  %v1846_v42 = vsel %vm3076_vm12, %v1841_v15, %v1845_v16  ;;  %v1864_v55 = vrot.slane %v1862_v23, 4  ;;  %v3258_v9 = vld [vmem:[#allocation2 + $0x4c] sm:$0x1] }
 0x102   : > { %v1499_v46 = vsel %vm3054_vm9, %v2534_v43, %v1498_v34  ;;  %v1860_v48 = vsel %vm3076_vm12, %v1855_v20, %v1859_v21  ;;  %v1867_v62 = vrot.slane %v1865_v24, 5  ;;  %v1878_v2 = vrot.slane %v1876_v29, 4  ;;  %v2697_v43 = vld [vmem:[#allocation2 + $0x34] sm:$0xf0] }
 0x103   : > { %v1530_v50 = vunpack.c.l.b16 %v1499_v46  ;;  %v1503_v53 = vsel %vm3054_vm9, %v2535_v38, %v1502_v39  ;;  %v2372_v6 = vor.u32 %v2696_v44, %v2371_v40  ;;  %v1910_v7 = vunpack.c.l.b16 %v1846_v42  ;;  %v2009_v38 = vld [vmem:[#allocation2 + $0x20] sm:$0xe]  ;;  %v2753_v42 = vld [vmem:[#allocation2 + $0x44] sm:$0xf0] }
 0x104   : > { %879 = vmatmul.bf16.gmra.mxu2 %v2368_v30  ;;  %v1494_v30 = vrot.slane %v3184_v60, 5  ;;  %v2536_v60 = vrot.slane %v1459_v27, 9  ;;  %v1531_v58 = vunpack.c.l.b16 %v1503_v53  ;;  %v1911_v8 = vunpack.c.l.b16 %v1860_v48  ;;  %v2583_v40 = vld [vmem:[#allocation2 + $0x40] sm:$0xf] }
 0x105   : > { %v2650_v11 = vrot.slane %v2008_v54, 9  ;;  %v2037_v12 = vrot.slane %v3178_v32, 5  ;;  %v2580_v52 = vor.u32 %v2752_v61, %v2579_v47  ;;  %v2649_v13 = vrot.slane %v2007_v56, 9 }
 0x106   : > { %v1495_v45 = vsel %vm3054_vm9, %v2533_v26, %v1494_v30  ;;  %v2033_v15 = vrot.slane %v3174_v28, 5  ;;  %v1871_v16 = vshll.u32 %v3254_v0, 16  ;;  %v1868_v35 = vor.u32 %v1867_v62, %v1864_v55  ;;  %v2375_v30 = vld [vmem:[#allocation2 + $0x30] sm:$0xf] }
 0x107   : > { %1737 = vmatmul.bf16.gmra.mxu3 %v2576_v63  ;;  %v1529_v49 = vunpack.c.l.b16 %v1495_v45  ;;  %v1506_v63 = vrot.slane %v3208_v5, 5  ;;  %v1885_v17 = vshll.u32 %v3258_v9, 16  ;;  %v1916_v20 = vpack.c.b16 %v1911_v8, %v1910_v7  ;;  %v2010_v45 = vld [vmem:[#allocation2 + $0x28] sm:$0xe]  ;;  %v2011_v55 = vld [vmem:[#allocation2 + $0x30] sm:$0xe] }
 0x108   : > { %1983 = vmatmul.bf16.gmra.mxu0 %v1915_v3  ;;  %v1881_v3 = vrot.slane %v1879_v36, 5  ;;  %v2038_v21 = vsel %vm3054_vm9, %v2650_v11, %v2037_v12  ;;  %v2034_v32 = vsel %vm3054_vm9, %v2649_v13, %v2033_v15  ;;  %v1869_v22 = vrot.slane %v1868_v35, 4  ;;  %v2014_v11 = vld [vmem:[#allocation2 + $0x48] sm:$0xe] }
 0x109   : > { %v3256_v4 = vpack.c.b16 %v1530_v50, %v1529_v49  ;;  %v1507_v10 = vsel %vm3054_vm9, %v2536_v60, %v1506_v63  ;;  %v1873_v59 = vrot.slane %v1871_v16, 5  ;;  %v1887_v23 = vrot.slane %v1885_v17, 5 }
 0x10a   : > { %v1532_v5 = vunpack.c.l.b16 %v1507_v10  ;;  %v1882_v14 = vor.u32 %v1881_v3, %v1878_v2  ;;  %v2081_v24 = vunpack.c.l.b16 %v2038_v21  ;;  %v2080_v25 = vunpack.c.l.b16 %v2034_v32  ;;  %v2013_v10 = vld [vmem:[#allocation2 + $0x40] sm:$0xe] }
 0x10b   : > { %v1874_v26 = vsel %vm3076_vm12, %v1869_v22, %v1873_v59  ;;  %v2376_v39 = vor.u32 %v2697_v43, %v2375_v30  ;;  %v2651_v46 = vrot.slane %v2009_v38, 9  ;;  %v2041_v60 = vrot.slane %v3194_v33, 5  ;;  %v2012_v33 = vld [vmem:[#allocation2 + $0x38] sm:$0xe] }
 0x10c   : > { %v1883_v28 = vrot.slane %v1882_v14, 4  ;;  %v2088_v29 = vpack.c.b16 %v2081_v24, %v2080_v25  ;;  %v1912_v34 = vunpack.c.l.b16 %v1874_v26  ;;  %v2584_v47 = vor.u32 %v2753_v42, %v2583_v40 }
 0x10d   : > { %v2652_v61 = vrot.slane %v2010_v45, 9  ;;  %v2045_v41 = vrot.slane %v3201_v51, 5  ;;  %v2042_v48 = vsel %vm3054_vm9, %v2651_v46, %v2041_v60  ;;  %v2653_v62 = vrot.slane %v2011_v55, 9 }
 0x10e   : > { %v1888_v27 = vsel %vm3076_vm12, %v1883_v28, %v1887_v23  ;;  %v2082_v50 = vunpack.c.l.b16 %v2042_v48  ;;  %v2049_v63 = vrot.slane %v3224_v57, 5  ;;  %v2654_v56 = vrot.slane %v2012_v33, 9 }
 0x10f   : > { %v1913_v36 = vunpack.c.l.b16 %v1888_v27  ;;  %v2046_v49 = vsel %vm3054_vm9, %v2652_v61, %v2045_v41  ;;  %v2053_v51 = vrot.slane %v3230_v31, 5  ;;  %v2655_v12 = vrot.slane %v2013_v10, 9 }
 0x110   : > { %1438 = vmatmul.bf16.gmra.mxu1 %v1362_v19  ;;  %v3266_v19 = vpack.c.b16 %v1532_v5, %v1531_v58  ;;  %v2083_v53 = vunpack.c.l.b16 %v2046_v49  ;;  %v2050_v2 = vsel %vm3054_vm9, %v2653_v62, %v2049_v63  ;;  %v2057_v57 = vrot.slane %v3254_v0, 5 }
 0x111   : > { %v1917_v44 = vpack.c.b16 %v1913_v36, %v1912_v34  ;;  %v2054_v3 = vsel %vm3054_vm9, %v2654_v56, %v2053_v51  ;;  %v2084_v58 = vunpack.c.l.b16 %v2050_v2  ;;  %v2656_v5 = vrot.slane %v2014_v11, 9 }
 0x112   : > { %v2089_v54 = vpack.c.b16 %v2083_v53, %v2082_v50  ;;  %v2061_v31 = vrot.slane %v3258_v9, 5 }
 0x114   : > { %884 = vmatmul.bf16.gmra.mxu2 %v2372_v6  ;;  %v2085_v6 = vunpack.c.l.b16 %v2054_v3  ;;  %v2062_v13 = vsel %vm3054_vm9, %v2656_v5, %v2061_v31 }
 0x115   : > { %v2087_v16 = vunpack.c.l.b16 %v2062_v13 }
 0x116   : > { %v2090_v8 = vpack.c.b16 %v2085_v6, %v2084_v58 }
 0x117   : > { %1742 = vmatmul.bf16.gmra.mxu3 %v2580_v52  ;;  %v2058_v52 = vsel %vm3054_vm9, %v2655_v12, %v2057_v57 }
 0x118   : > { %1988 = vmatmul.bf16.gmra.mxu0 %v1916_v20  ;;  %v2086_v15 = vunpack.c.l.b16 %v2058_v52 }
 0x11a   : > { %v2091_v14 = vpack.c.b16 %v2087_v16, %v2086_v15 }
 0x120   : > { %2152 = vmatmul.bf16.vlgmr.msra.gmra.mxu1 %v2088_v29 }
 0x124   : > { %889 = vmatmul.bf16.gmra.mxu2 %v2376_v39 }
 0x127   : > { %1747 = vmatmul.bf16.gmra.mxu3 %v2584_v47 }
 0x128   : > { %1993 = vmatmul.bf16.gmra.mxu0 %v1917_v44 }
 0x130   : > { %2157 = vmatmul.bf16.gmra.mxu1 %v2089_v54 }
 0x134   : > { %1597 = vmatmul.bf16.vlgmr.msra.gmra.mxu2 %v3227_v1 }
 0x135   : > { %v1178_v20 = vpop.f32.mrf.mxu0 }
 0x13a   : > { %v1044_v9 = vpop.f32.mrf.mxu3 }
 0x13d   : > { %v774_v7 = vpop.f32.mrf.mxu1  ;;  %v1180_v18 = vpop.f32.mrf.mxu0 }
 0x140   : > { %2162 = vmatmul.bf16.gmra.mxu1 %v2090_v8 }
 0x142   : > { %v1046_v32 = vpop.f32.mrf.mxu3 }
 0x144   : > { %1602 = vmatmul.bf16.gmra.mxu2 %v3240_v37 }
 0x145   : > { %v776_v1 = vpop.f32.mrf.mxu1  ;;  %v1183_v24 = vpop.f32.mrf.mxu0 }
 0x14a   : > { %v1049_v28 = vpop.f32.mrf.mxu3 }
 0x14d   : > { %v779_v35 = vpop.f32.mrf.mxu1  ;;  %v3304_v30 = vpop.f32.mrf.mxu0 }
 0x150   : > { %2167 = vmatmul.bf16.gmra.mxu1 %v2091_v14 }
 0x152   : > { %v1051_v27 = vpop.f32.mrf.mxu3 }
 0x154   : > { %1607 = vmatmul.bf16.gmra.mxu2 %v3256_v4 }
 0x155   : > { %v3297_v0 = vpop.f32.mrf.mxu1 }
 0x157   : > { %v784_v17 = vpop.f32.mrf.mxu2 }
 0x15a   : > { %v1054_v36 = vpop.f32.mrf.mxu3 }
 0x15d   : > { %v1424_v37 = vpop.f32.mrf.mxu1 }
 0x15f   : > { %v3299_v21 = vpop.f32.mrf.mxu2 }
 0x162   : > { %v3308_v45 = vpop.f32.mrf.mxu3 }
 0x164   : > { %1612 = vmatmul.bf16.gmra.mxu2 %v3266_v19  ;;  %v1188_v19 = vpop.f32.mrf.mxu0 }
 0x165   : > { %v1426_v59 = vpop.f32.mrf.mxu1 }
 0x167   : > { %v789_v22 = vpop.f32.mrf.mxu2 }
 0x16a   : > { %v1059_v61 = vpop.f32.mrf.mxu3 }
 0x16c   : > { %v3310_v46 = vpop.f32.mrf.mxu0 }
 0x16d   : > { %v1429_v25 = vpop.f32.mrf.mxu1 }
 0x16f   : > { %v3302_v23 = vpop.f32.mrf.mxu2 }
 0x172   : > { %v3314_v33 = vpop.f32.mrf.mxu3 }
 0x174   : > { %v1193_v50 = vpop.f32.mrf.mxu0 }
 0x175   : > { %v3306_v43 = vpop.f32.mrf.mxu1 }
 0x177   : > { %v875_v4 = vpop.f32.mrf.mxu2 }
 0x178   : > { %v876_v26 = vadd.f32 %v875_v4, %v774_v7 }
 0x17a   : > { %v1064_v29 = vadd.f32 %v1044_v9, %v876_v26  ;;  %v1733_v3 = vpop.f32.mrf.mxu3 }
 0x17c   : > { %v1198_v47 = vadd.f32 %v1178_v20, %v1064_v29  ;;  %v3316_v62 = vpop.f32.mrf.mxu0 }
 0x17d   : > { %v1434_v38 = vpop.f32.mrf.mxu1 }
 0x17e   : > { %v1444_v48 = vadd.f32 %v1424_v37, %v1198_v47 }
 0x17f   : > { %v877_v34 = vpop.f32.mrf.mxu2 }
 0x180   : > { %v878_v11 = vadd.f32 %v877_v34, %v776_v1  ;;  %v3326_v1 = vld [vmem:[%s3365_s4] ss:$0 sm:$0xff] }
 0x182   : > { %v1735_v12 = vpop.f32.mrf.mxu3  ;;  %v1065_v57 = vadd.f32 %v1046_v32, %v878_v11 }
 0x184   : > { %v1979_v58 = vpop.f32.mrf.mxu0  ;;  %v1199_v16 = vadd.f32 %v1180_v18, %v1065_v57 }
 0x185   : > { %v3312_v44 = vpop.f32.mrf.mxu1 }
 0x186   : > { %v1445_v14 = vadd.f32 %v1426_v59, %v1199_v16 }
 0x187   : > { %v880_v39 = vpop.f32.mrf.mxu2 }
 0x188   : > { %v881_v40 = vadd.f32 %v880_v39, %v779_v35 }
 0x18a   : > { %v1066_v42 = vadd.f32 %v1049_v28, %v881_v40  ;;  %v1738_v9 = vpop.f32.mrf.mxu3 }
 0x18c   : > { %v1200_v6 = vadd.f32 %v1183_v24, %v1066_v42  ;;  %v1981_v5 = vpop.f32.mrf.mxu0 }
 0x18d   : > { %v1439_v54 = vpop.f32.mrf.mxu1 }
 0x18e   : > { %v1446_v10 = vadd.f32 %v1429_v25, %v1200_v6 }
 0x18f   : > { %v882_v60 = vpop.f32.mrf.mxu2 }
 0x190   : > { %v883_v24 = vadd.f32 %v882_v60, %v3297_v0 }
 0x192   : > { %v1067_v26 = vadd.f32 %v1051_v27, %v883_v24 }
 0x194   : > { %v1984_v28 = vpop.f32.mrf.mxu0  ;;  %v1201_v42 = vadd.f32 %v3304_v30, %v1067_v26 }
 0x195   : > { %v3318_v63 = vpop.f32.mrf.mxu1 }
 0x197   : > { %v885_v41 = vpop.f32.mrf.mxu2 }
 0x198   : > { %v886_v49 = vadd.f32 %v885_v41, %v784_v17  ;;  %v1447_v41 = vadd.f32 %v3306_v43, %v1201_v42 }
 0x19a   : > { %v1068_v53 = vadd.f32 %v1054_v36, %v886_v49 }
 0x19c   : > { %v1202_v17 = vadd.f32 %v1188_v19, %v1068_v53  ;;  %v1986_v27 = vpop.f32.mrf.mxu0 }
 0x19d   : > { %v2153_v7 = vpop.f32.mrf.mxu1 }
 0x19f   : > { %v887_v55 = vpop.f32.mrf.mxu2 }
 0x1a0   : > { %v888_v30 = vadd.f32 %v887_v55, %v3299_v21 }
 0x1a5   : > { %v2155_v13 = vpop.f32.mrf.mxu1 }
 0x1a7   : > { %v890_v56 = vpop.f32.mrf.mxu2 }
 0x1a8   : > { %v891_v51 = vadd.f32 %v890_v56, %v789_v22  ;;  %v1448_v22 = vadd.f32 %v1434_v38, %v1202_v17  ;;  %v1740_v38 = vpop.f32.mrf.mxu3 }
 0x1aa   : > { %v1070_v2 = vadd.f32 %v1059_v61, %v891_v51 }
 0x1ad   : > { %v2158_v4 = vpop.f32.mrf.mxu1 }
 0x1af   : > { %v3320_v8 = vpop.f32.mrf.mxu2 }
 0x1b0   : > { %v893_v17 = vadd.f32 %v3320_v8, %v3302_v23 }
 0x1b5   : > { %v2160_v47 = vpop.f32.mrf.mxu1 }
 0x1b7   : > { %v1598_v31 = vpop.f32.mrf.mxu2 }
 0x1b8   : > { %v1618_v52 = vadd.f32 %v1598_v31, %v1444_v48  ;;  %v1204_v48 = vadd.f32 %v1193_v50, %v1070_v2 }
 0x1ba   : > { %v1753_v15 = vadd.f32 %v1733_v3, %v1618_v52  ;;  %v1450_v56 = vadd.f32 %v1439_v54, %v1204_v48 }
 0x1bc   : > { %v1999_v35 = vadd.f32 %v1979_v58, %v1753_v15  ;;  %v1743_v58 = vpop.f32.mrf.mxu3 }
 0x1bd   : > { %v2163_v57 = vpop.f32.mrf.mxu1 }
 0x1be   : > { %v2173_v25 = vadd.f32 %v2153_v7, %v1999_v35  ;;  %v1989_v7 = vpop.f32.mrf.mxu0 }
 0x1bf   : > { %v1600_v20 = vpop.f32.mrf.mxu2 }
 0x1c0   : > { %v1619_v37 = vadd.f32 %v1600_v20, %v1445_v14  ;;  %v2185_v59 = vadd.f32 %v3326_v1, %v2173_v25 }
 0x1c2   : > { %v1754_v32 = vadd.f32 %v1735_v12, %v1619_v37  ;;  %v2193_v0 = vmax.f32 %v2185_v59, 0.0 }
 0x1c4   : > { %v2000_v18 = vadd.f32 %v1981_v5, %v1754_v32  ;;  %v1745_v52 = vpop.f32.mrf.mxu3 }
 0x1c5   : > { %v2165_v14 = vpop.f32.mrf.mxu1 }
 0x1c6   : > { %v2174_v29 = vadd.f32 %v2155_v13, %v2000_v18 }
 0x1c7   : > { %v1603_v34 = vpop.f32.mrf.mxu2 }
 0x1c8   : > { %v2186_v36 = vadd.f32 %v3326_v1, %v2174_v29  ;;  %v1620_v19 = vadd.f32 %v1603_v34, %v1446_v10  ;;  %v1069_v10 = vadd.f32 %v3308_v45, %v888_v30  ;;  %v1991_v45 = vpop.f32.mrf.mxu0 }
 0x1ca   : > { %v2194_v39 = vmax.f32 %v2186_v36, 0.0  ;;  %v1755_v40 = vadd.f32 %v1738_v9, %v1620_v19  ;;  %v1203_v21 = vadd.f32 %v3310_v46, %v1069_v10 }
 0x1cc   : > { %v2801_v60 = vpack.c.bf16 %v2194_v39, %v2193_v0  ;;  %v2001_v61 = vadd.f32 %v1984_v28, %v1755_v40  ;;  %v1449_v15 = vadd.f32 %v3312_v44, %v1203_v21  ;;  %v1748_v24 = vpop.f32.mrf.mxu3 }
 0x1cd   : > { %v2168_v8 = vpop.f32.mrf.mxu1 }
 0x1ce   : > { %2802 = vst [vmem:[%s3336_s24] sm:$0xff] %v2801_v60   ;;  %v2175_v51 = vadd.f32 %v2158_v4, %v2001_v61 }
 0x1cf   : > { %v1605_v49 = vpop.f32.mrf.mxu2 }
 0x1d0   : > { %v1621_v53 = vadd.f32 %v1605_v49, %v1447_v41  ;;  %v2187_v11 = vadd.f32 %v3326_v1, %v2175_v51  ;;  %v1994_v4 = vpop.f32.mrf.mxu0 }
 0x1d2   : > { %v1756_v3 = vadd.f32 %v1740_v38, %v1621_v53  ;;  %v2195_v2 = vmax.f32 %v2187_v11, 0.0 }
 0x1d4   : > { %v2002_v6 = vadd.f32 %v1986_v27, %v1756_v3  ;;  %v1750_v38 = vpop.f32.mrf.mxu3 }
 0x1d5   : > { %v2170_v27 = vpop.f32.mrf.mxu1 }
 0x1d6   : > { %v2176_v12 = vadd.f32 %v2160_v47, %v2002_v6 }
 0x1d7   : > { %v1608_v5 = vpop.f32.mrf.mxu2 }
 0x1d8   : > { %v2188_v43 = vadd.f32 %v3326_v1, %v2176_v12  ;;  %v1622_v50 = vadd.f32 %v1608_v5, %v1448_v22  ;;  %v1071_v22 = vadd.f32 %v3314_v33, %v893_v17  ;;  %v1996_v40 = vpop.f32.mrf.mxu0 }
 0x1da   : > { %v2196_v54 = vmax.f32 %v2188_v43, 0.0  ;;  %v1757_v31 = vadd.f32 %v1743_v58, %v1622_v50  ;;  %v1205_v23 = vadd.f32 %v3316_v62, %v1071_v22 }
 0x1dc   : > { %v2806_v55 = vpack.c.bf16 %v2196_v54, %v2195_v2  ;;  %v2003_v13 = vadd.f32 %v1989_v7, %v1757_v31  ;;  %v1451_v33 = vadd.f32 %v3318_v63, %v1205_v23 }
 0x1de   : > { %2821 = vst [vmem:[%s3336_s24 + $0x8] sm:$0xff] %v2806_v55   ;;  %v2177_v9 = vadd.f32 %v2163_v57, %v2003_v13 }
 0x1df   : > { %v1610_v16 = vpop.f32.mrf.mxu2 }
 0x1e0   : > { %v1623_v35 = vadd.f32 %v1610_v16, %v1449_v15  ;;  %v2189_v46 = vadd.f32 %v3326_v1, %v2177_v9 }
 0x1e2   : > { %v1758_v20 = vadd.f32 %v1745_v52, %v1623_v35  ;;  %v2197_v18 = vmax.f32 %v2189_v46, 0.0 }
 0x1e4   : > { %v2004_v37 = vadd.f32 %v1991_v45, %v1758_v20 }
 0x1e6   : > { %v2178_v28 = vadd.f32 %v2165_v14, %v2004_v37 }
 0x1e7   : > { %v1613_v25 = vpop.f32.mrf.mxu2 }
 0x1e8   : > { %v2190_v44 = vadd.f32 %v3326_v1, %v2178_v28  ;;  %v1624_v32 = vadd.f32 %v1613_v25, %v1450_v56 }
 0x1ea   : > { %v2198_v26 = vmax.f32 %v2190_v44, 0.0  ;;  %v1759_v59 = vadd.f32 %v1748_v24, %v1624_v32 }
 0x1ec   : > { %v2811_v29 = vpack.c.bf16 %v2198_v26, %v2197_v18  ;;  %v2005_v34 = vadd.f32 %v1994_v4, %v1759_v59 }
 0x1ee   : > { %2822 = vst [vmem:[%s3336_s24 + $0x10] sm:$0xff] %v2811_v29   ;;  %v2179_v0 = vadd.f32 %v2168_v8, %v2005_v34 }
 0x1ef   : > { %v1615_v36 = vpop.f32.mrf.mxu2 }
 0x1f0   : > { %v1625_v19 = vadd.f32 %v1615_v36, %v1451_v33  ;;  %v2191_v60 = vadd.f32 %v3326_v1, %v2179_v0 }
 0x1f2   : > { %v1760_v39 = vadd.f32 %v1750_v38, %v1625_v19  ;;  %v2199_v61 = vmax.f32 %v2191_v60, 0.0 }
 0x1f4   : > { %v2006_v42 = vadd.f32 %v1996_v40, %v1760_v39 }
 0x1f6   : > { %v2180_v47 = vadd.f32 %v2170_v27, %v2006_v42 }
 0x1f8   : > { %v2192_v62 = vadd.f32 %v3326_v1, %v2180_v47 }
 0x1fa   : > { %v2200_v41 = vmax.f32 %v2192_v62, 0.0 }
 0x1fc   : > { %v2816_v48 = vpack.c.bf16 %v2200_v41, %v2199_v61 }
 0x1fe   : > { %2823 = vst [vmem:[%s3336_s24 + $0x18] sm:$0xff] %v2816_v48  }
 0x1ff PF: > { %s17_s18 = sadd.s32 1, %s2943_s18  }
 0x200   : > { %p14_p7 = scmp.ge.s32.totalorder %s17_s18, 4  }
 0x202   :  { %16 = sbr.rel (!%p14_p7) target bundleno = 2 (0x2), region = 92 }
 0x207   :  { %2238 = vsyncpa [#allocation4], 1 }
 0x208   :  { %2240 = vsyncpa [#allocation4 + $0x1], 1 }
 0x209   :  { %2241 = vsyncpa [#allocation6], 1 }

// kernel: merge_forward.15
= control target key start
LH: loop header
LB: loop body
LE: loop exit
PB: predicated region body
PF: predicated region fallthrough
CT: control target
= control target key end

     0   :  { %12 = vsyncpa [#allocation3], 0  ;;  %s2600_s0 = inlined_call_operand.vmem [shape: bf16[2,256,128], index: 0, kind: input, shape index: {}]   ;;  %s2601_s1 = inlined_call_operand.vmem [shape: bf16[2,64,128], index: 1, kind: input, shape index: {}]   ;;  %s2602_s2 = inlined_call_operand.vmem [shape: bf16[2,16,128], index: 2, kind: input, shape index: {}]   ;;  %s2603_s3 = inlined_call_operand.vmem [shape: bf16[2,4,128], index: 3, kind: input, shape index: {}]   ;;  %s2604_s4 = inlined_call_operand.hbm [shape: f32[256,64], index: 4, kind: input, shape index: {}]   ;;  %s2605_s5 = inlined_call_operand.hbm [shape: f32[256,16], index: 5, kind: input, shape index: {}]   ;;  %s2606_s6 = inlined_call_operand.hbm [shape: f32[256,4], index: 6, kind: input, shape index: {}]   ;;  %s2607_s7 = inlined_call_operand.vmem [shape: f32[2,512,256], index: 7, kind: output, shape index: {}]  }
   0x1   :  { %13 = vsyncpa [#allocation5], 0  ;;  %s2192_s24 = smov 0  }
   0x2 LB: > { %s2198_s25 = sadd.s32 4294967295, %s2145_s24   ;;  %p1710_p0 = scmp.ge.s32.totalorder %s2145_s24, 1  ;;  %s2145_s24 = sphi %s2192_s24, %s19_s24  }
   0x3   : > { %p217_p1 = scmp.lt.s32.totalorder %s2145_s24, 3  ;;  %p1966_p2 = scmp.eq.s32.totalorder %s2198_s25, 0 }
   0x4   : > { %s242_s28 = sshll.u32 %s2605_s5, 4  ;;  %s228_s9 = sshll.u32 %s2604_s4, 4  ;;  %s243_s28 = int_to_ptr.hbm [resolvable:$true] %s242_s28  ;;  %s229_s9 = int_to_ptr.hbm [resolvable:$true] %s228_s9 }
   0x5   : > { %p2206_p3 = pnand %p1710_p0, %p217_p1  ;;  %s2147_s10 = smov [#allocation4]  }
   0x6   : > { %s244_s11 = sshll.u32 %s2147_s10, 4  ;;  %s2148_s12 = smov [#allocation2]   ;;  %s245_s11 = int_to_ptr.vmem [resolvable:$true] %s244_s11 }
   0x7   : > { %p1956_p4 = pneg %p2206_p3  ;;  %s230_s13 = sshll.u32 %s2148_s12, 4  ;;  %s231_s13 = int_to_ptr.vmem [resolvable:$true] %s230_s13 }
   0x8   : > { %s256_s16 = sshll.u32 %s2606_s6, 4  ;;  %s2149_s17 = smov 128   ;;  %s257_s16 = int_to_ptr.hbm [resolvable:$true] %s256_s16 }
   0x9   : > { %p1957_p5 = pnand %p1966_p2, %p1956_p4  ;;  %s2150_s18 = smov 8  }
   0xa   : > { %s2151_s19 = smov [#allocation6]   ;;  %305 = sbr.rel (%p2206_p3) target bundleno = 698 (0x2ba), region = 48 }
   0xb   : > { %1962 = dma.hbm_to_vmem [thread:$0]  (!%p1957_p5), %s243_s28, 4096, %s245_s11, [#allocation5], %s2149_s17, %s2149_s17, %s2150_s18  }
   0xc   : > { %1959 = dma.hbm_to_vmem [thread:$0]  (!%p1957_p5), %s229_s9, 4096, %s231_s13, [#allocation3], %s2149_s17, %s2149_s17, %s2150_s18  }
   0xd   : > { %s258_s20 = sshll.u32 %s2151_s19, 4  ;;  %s259_s20 = int_to_ptr.vmem [resolvable:$true] %s258_s20 }
   0xe   : > { %1965 = dma.hbm_to_vmem [thread:$0]  (!%p1957_p5), %s257_s16, 4096, %s259_s20, [#allocation5], %s2149_s17, %s2149_s17, %s2150_s18  }
   0xf   : > { %2136 = dma.done.wait (%p1966_p2), [#allocation3], 4096  }
  0x10   : > { %2138 = vsyncadd (%p1966_p2), [#allocation3], 4294963200 }
  0x11   : > { %2140 = dma.done.wait (%p1966_p2), [#allocation5], 8192  }
  0x12   : > { %2142 = vsyncadd (%p1966_p2), [#allocation5], 4294959104  ;;  %p362_p6 = scmp.lt.s32.totalorder %s2198_s25, 1  ;;  %v546_v12 = vld [vmem:[#allocation2] sm:$0xff]  ;;  %vm594_vm0 = vcmask 523264   ;;  %v547_v13 = vld [vmem:[#allocation2 + $0x8] sm:$0xff] }
  0x13   : > { %v548_v14 = vld [vmem:[#allocation2 + $0x10] sm:$0xff]  ;;  %v549_v15 = vld [vmem:[#allocation2 + $0x18] sm:$0xff]  ;;  %v900_v19 = vld [vmem:[#allocation4] sm:$0xff]  ;;  %vm936_vm1 = vcmask 130048   ;;  %vm1373_vm2 = vcmask 1043456   ;;  %vm1276_vm3 = vcmask 31744  }
  0x14   : > { %s2610_s25 = smov (!%p362_p6, %s2198_s25), 1  ;;  %v550_v20 = vld [vmem:[#allocation2 + $0x20] sm:$0xff]  ;;  %v901_v21 = vld [vmem:[#allocation4 + $0x8] sm:$0xff]  ;;  %v902_v23 = vld [vmem:[#allocation4 + $0x10] sm:$0xff] }
  0x15   : > { %s1828_s21 = sshll.u32 %s2610_s25, 5  ;;  %s1829_s27 = sshll.u32 %s2610_s25, 3  ;;  %v551_v22 = vld [vmem:[#allocation2 + $0x28] sm:$0xff]  ;;  %v552_v24 = vld [vmem:[#allocation2 + $0x30] sm:$0xff]  ;;  %v903_v25 = vld [vmem:[#allocation4 + $0x18] sm:$0xff] }
  0x16   : > { %s371_s26 = scalar_lea.vmem %s2601_s1, %s1828_s21  ;;  %s376_s30 = scalar_lea.vmem %s2602_s2, %s1829_s27  ;;  %v553_v26 = vld [vmem:[#allocation2 + $0x38] sm:$0xff]  ;;  %v904_v27 = vld [vmem:[#allocation4 + $0x20] sm:$0xff]  ;;  %v905_v29 = vld [vmem:[#allocation4 + $0x28] sm:$0xff] }
  0x17   : > { %v1932_v0 = vld [vmem:[%s371_s26 + $0x18] sm:$0xff]   ;;  %v1931_v1 = vld [vmem:[%s371_s26 + $0x10] sm:$0xff]   ;;  %v1930_v5 = vld [vmem:[%s371_s26 + $0x8] sm:$0xff]   ;;  %s1827_s8 = sshll.u32 %s2610_s25, 7  ;;  %s1725_s9 = sshll.u32 %s2610_s25, 1 }
  0x18   : > { %v1910_v2 = vunpack.c.h.bf16 %v1932_v0  ;;  %v1909_v3 = vunpack.c.l.bf16 %v1932_v0  ;;  %v1906_v4 = vunpack.c.h.bf16 %v1931_v1  ;;  %v1905_v6 = vunpack.c.l.bf16 %v1931_v1  ;;  %v1896_v8 = vld [vmem:[%s371_s26] sm:$0xff]   ;;  %v555_v30 = vld [vmem:[#allocation2 + $0x48] sm:$0xff]  ;;  %s2262_s12 = scalar_lea.vmem %s2600_s0, %s1827_s8  ;;  %s380_s15 = scalar_lea.vmem %s2603_s3, %s1725_s9  ;;  %v906_v34 = vld [vmem:[#allocation4 + $0x30] sm:$0xff] }
  0x19   : > { %v1902_v7 = vunpack.c.h.bf16 %v1930_v5  ;;  %v1901_v9 = vunpack.c.l.bf16 %v1930_v5  ;;  %v1898_v10 = vunpack.c.h.bf16 %v1896_v8  ;;  %v1897_v11 = vunpack.c.l.bf16 %v1896_v8  ;;  %v1912_v16 = vld [vmem:[%s376_s30] sm:$0xff]   ;;  %v556_v37 = vld [vmem:[#allocation2 + $0x50] sm:$0xff]  ;;  %v907_v38 = vld [vmem:[#allocation4 + $0x38] sm:$0xff]  ;;  %s1830_s16 = sshll.u32 %s2610_s25, 10 }
  0x1a   : > { %699 = vmatpush.msra.mxu0 %v1910_v2  ;;  %1933 = vmatpush.msra.mxu3 %v1910_v2  ;;  %v1914_v17 = vunpack.c.h.bf16 %v1912_v16  ;;  %v1913_v18 = vunpack.c.l.bf16 %v1912_v16  ;;  %v554_v28 = vld [vmem:[#allocation2 + $0x40] sm:$0xff]  ;;  %v1243_v39 = vld [vmem:[#allocation6 + $0x8] sm:$0xff]  ;;  %v557_v40 = vld [vmem:[#allocation2 + $0x58] sm:$0xff]  ;;  %s2396_s19 = scalar_lea.vmem %s2607_s7, %s1830_s16 }
  0x1b   : > { %v1832_v31 = vld [vmem:[%s2262_s12] sm:$0xff]   ;;  %v1915_v41 = vld [vmem:[%s2262_s12 + $0x8] sm:$0xff]   ;;  %v1244_v45 = vld [vmem:[#allocation6 + $0x10] sm:$0xff] }
  0x1c   : > { %700 = vmatpush.msra.mxu0 %v1909_v3  ;;  %1934 = vmatpush.msra.mxu3 %v1909_v3  ;;  %v1922_v32 = vld [vmem:[%s2262_s12 + $0x40] sm:$0xff]   ;;  %v1923_v42 = vld [vmem:[%s2262_s12 + $0x48] sm:$0xff]   ;;  %v1245_v48 = vld [vmem:[#allocation6 + $0x18] sm:$0xff] }
  0x1d   : > { %1047 = vmatpush.msra.mxu1 %v1914_v17  ;;  %v2270_v33 = vld [vmem:[%s380_s15] sm:$0x3]  ;;  %v909_v46 = vld [vmem:[#allocation4 + $0x48] sm:$0xff]  ;;  %v1916_v49 = vld [vmem:[%s2262_s12 + $0x10] sm:$0xff]  }
  0x1e   : > { %701 = vmatpush.msra.mxu0 %v1906_v4  ;;  %1935 = vmatpush.msra.mxu3 %v1906_v4  ;;  %v1275_v35 = vunpack.c.l.bf16 %v2270_v33  ;;  %v1242_v36 = vld [vmem:[#allocation6] sm:$0xff]  ;;  %v559_v47 = vld [vmem:[#allocation2 + $0x68] sm:$0xff]  ;;  %v1924_v50 = vld [vmem:[%s2262_s12 + $0x50] sm:$0xff]  }
  0x1f   : > { %1048 = vmatpush.msra.mxu1 %v1913_v18  ;;  %v908_v43 = vld [vmem:[#allocation4 + $0x40] sm:$0xff]  ;;  %v910_v51 = vld [vmem:[#allocation4 + $0x50] sm:$0xff]  ;;  %v911_v54 = vld [vmem:[#allocation4 + $0x58] sm:$0xff] }
  0x20   : > { %702 = vmatpush.msra.mxu0 %v1905_v6  ;;  %1936 = vmatpush.msra.mxu3 %v1905_v6  ;;  %v558_v44 = vld [vmem:[#allocation2 + $0x60] sm:$0xff]  ;;  %v560_v52 = vld [vmem:[#allocation2 + $0x70] sm:$0xff]  ;;  %v561_v55 = vld [vmem:[#allocation2 + $0x78] sm:$0xff] }
  0x21   : > { %1760 = vmatmul.msk.f32.vlgmr.msra.gmra.mxu1 %vm936_vm1, %v900_v19  ;;  %1792 = vmatpush.msk.msra.mxu2 %vm1373_vm2, %v1275_v35  ;;  %v1246_v53 = vld [vmem:[#allocation6 + $0x20] sm:$0xff]  ;;  %v1247_v56 = vld [vmem:[#allocation6 + $0x28] sm:$0xff]  ;;  %v1917_v57 = vld [vmem:[%s2262_s12 + $0x18] sm:$0xff]  }
  0x22   : > { %703 = vmatpush.msra.mxu0 %v1902_v7  ;;  %1937 = vmatpush.msra.mxu3 %v1902_v7  ;;  %v1925_v58 = vld [vmem:[%s2262_s12 + $0x58] sm:$0xff]   ;;  %v912_v59 = vld [vmem:[#allocation4 + $0x60] sm:$0xff]  ;;  %v1248_v62 = vld [vmem:[#allocation6 + $0x30] sm:$0xff] }
  0x23   : > { %1985 = vxpose.binary.xlu0.c.b16.start [1/16] %v1922_v32, %v1832_v31, 128  ;;  %v562_v61 = vld [vmem:[#allocation2 + $0x80] sm:$0xff]  ;;  %v913_v63 = vld [vmem:[#allocation4 + $0x68] sm:$0xff]  ;;  %v1249_v2 = vld [vmem:[#allocation6 + $0x38] sm:$0xff] }
  0x24   : > { %704 = vmatpush.msra.mxu0 %v1901_v9  ;;  %1938 = vmatpush.msra.mxu3 %v1901_v9  ;;  %v563_v1 = vld [vmem:[#allocation2 + $0x88] sm:$0xff]  ;;  %v1918_v3 = vld [vmem:[%s2262_s12 + $0x20] sm:$0xff]   ;;  %v914_v5 = vld [vmem:[#allocation4 + $0x70] sm:$0xff] }
  0x25   : > { %1793 = vmatmul.msk.f32.vlgmr.msra.gmra.mxu2 %vm1276_vm3, %v1242_v36  ;;  %v1926_v4 = vld [vmem:[%s2262_s12 + $0x60] sm:$0xff]   ;;  %v564_v7 = vld [vmem:[#allocation2 + $0x90] sm:$0xff]  ;;  %v915_v9 = vld [vmem:[#allocation4 + $0x78] sm:$0xff] }
  0x26   : > { %705 = vmatpush.msra.mxu0 %v1898_v10  ;;  %1939 = vmatpush.msra.mxu3 %v1898_v10  ;;  %v1250_v8 = vld [vmem:[#allocation6 + $0x40] sm:$0xff]  ;;  %v918_v31 = vld [vmem:[#allocation4 + $0x90] sm:$0xff] }
  0x27   : > { %v566_v19 = vld [vmem:[#allocation2 + $0xa0] sm:$0xff]  ;;  %v568_v33 = vld [vmem:[#allocation2 + $0xb0] sm:$0xff] }
  0x28   : > { %706 = vmatpush.msra.mxu0 %v1897_v11  ;;  %1940 = vmatpush.msra.mxu3 %v1897_v11  ;;  %v565_v11 = vld [vmem:[#allocation2 + $0x98] sm:$0xff] }
  0x29   : > { %1728 = vmatmul.msk.f32.vlgmr.msra.gmra.mxu0 %vm594_vm0, %v546_v12  ;;  %1761 = vmatmul.msk.f32.gmra.mxu1 %vm936_vm1, %v901_v21  ;;  %v1251_v12 = vld [vmem:[#allocation6 + $0x48] sm:$0xff] }
  0x2a   : > { %1941 = vmatpush.msrb.mxu3 %v1914_v17  ;;  %v916_v17 = vld [vmem:[#allocation4 + $0x80] sm:$0xff]  ;;  %v571_v21 = vld [vmem:[#allocation2 + $0xc8] sm:$0xff] }
  0x2c   : > { %1942 = vmatpush.msrb.mxu3 %v1913_v18 }
  0x2d   : > { %1794 = vmatmul.msk.f32.gmra.mxu2 %vm1276_vm3, %v1243_v39  ;;  %v569_v39 = vld [vmem:[#allocation2 + $0xb8] sm:$0xff] }
  0x31   : > { %1729 = vmatmul.msk.f32.gmra.mxu0 %vm594_vm0, %v547_v13  ;;  %1762 = vmatmul.msk.f32.gmra.mxu1 %vm936_vm1, %v902_v23  ;;  %v570_v13 = vld [vmem:[#allocation2 + $0xc0] sm:$0xff]  ;;  %v917_v23 = vld [vmem:[#allocation4 + $0x88] sm:$0xff] }
  0x32   : > { %1752 = vmatmul.msk.f32.vlgmr.msra.gmra.mxu3 %vm594_vm0, %v570_v13 }
  0x33   : > { %1986 = vxpose.binary.xlu0.c.b16.cont [2/16] %v1923_v42, %v1915_v41, 128  ;;  %v574_v41 = vld [vmem:[#allocation2 + $0xe0] sm:$0xff]  ;;  %v1921_v42 = vld [vmem:[%s2262_s12 + $0x38] sm:$0xff]  }
  0x34   : > { %1943 = vmatpush.msk.msra.mxu3 %vm1373_vm2, %v1275_v35  ;;  %v573_v35 = vld [vmem:[#allocation2 + $0xd8] sm:$0xff] }
  0x35   : > { %1795 = vmatmul.msk.f32.gmra.mxu2 %vm1276_vm3, %v1244_v45  ;;  %v920_v45 = vld [vmem:[#allocation4 + $0xa0] sm:$0xff] }
  0x39   : > { %1730 = vmatmul.msk.f32.gmra.mxu0 %vm594_vm0, %v548_v14  ;;  %1763 = vmatmul.msk.f32.gmra.mxu1 %vm936_vm1, %v903_v25  ;;  %v1919_v14 = vld [vmem:[%s2262_s12 + $0x28] sm:$0xff]  }
  0x3a   : > { %1753 = vmatmul.msk.f32.gmra.mxu3 %vm594_vm0, %v571_v21  ;;  %v567_v25 = vld [vmem:[#allocation2 + $0xa8] sm:$0xff] }
  0x3d   : > { %1796 = vmatmul.msk.f32.gmra.mxu2 %vm1276_vm3, %v1245_v48  ;;  %v575_v48 = vld [vmem:[#allocation2 + $0xe8] sm:$0xff] }
  0x41   : > { %1731 = vmatmul.msk.f32.gmra.mxu0 %vm594_vm0, %v549_v15  ;;  %1764 = vmatmul.msk.f32.gmra.mxu1 %vm936_vm1, %v904_v27  ;;  %v1927_v15 = vld [vmem:[%s2262_s12 + $0x68] sm:$0xff]   ;;  %v572_v27 = vld [vmem:[#allocation2 + $0xd0] sm:$0xff] }
  0x42   : > { %1754 = vmatmul.msk.f32.gmra.mxu3 %vm594_vm0, %v572_v27  ;;  %v929_v27 = vld [vmem:[#allocation4 + $0xe8] sm:$0xff] }
  0x43   : > { %1987 = vxpose.binary.xlu0.c.b16.cont [3/16] %v1924_v50, %v1916_v49, 128  ;;  %v921_v50 = vld [vmem:[#allocation4 + $0xa8] sm:$0xff] }
  0x45   : > { %1797 = vmatmul.msk.f32.gmra.mxu2 %vm1276_vm3, %v1246_v53  ;;  %v576_v53 = vld [vmem:[#allocation2 + $0xf0] sm:$0xff] }
  0x49   : > { %1732 = vmatmul.msk.f32.gmra.mxu0 %vm594_vm0, %v550_v20  ;;  %1765 = vmatmul.msk.f32.gmra.mxu1 %vm936_vm1, %v905_v29  ;;  %v1252_v20 = vld [vmem:[#allocation6 + $0x50] sm:$0xff] }
  0x4a   : > { %v1928_v29 = vld [vmem:[%s2262_s12 + $0x70] sm:$0xff]   ;;  %1755 = vmatmul.msk.f32.gmra.mxu3 %vm594_vm0, %v573_v35 }
  0x4b   : > { %v930_v35 = vld [vmem:[#allocation4 + $0xf0] sm:$0xff] }
  0x4d   : > { %1798 = vmatmul.msk.f32.gmra.mxu2 %vm1276_vm3, %v1247_v56 }
  0x51   : > { %1733 = vmatmul.msk.f32.gmra.mxu0 %vm594_vm0, %v551_v22  ;;  %1766 = vmatmul.msk.f32.gmra.mxu1 %vm936_vm1, %v906_v34  ;;  %v1254_v34 = vld [vmem:[#allocation6 + $0x60] sm:$0xff] }
  0x52   : > { %1756 = vmatmul.msk.f32.gmra.mxu3 %vm594_vm0, %v574_v41 }
  0x53   : > { %1988 = vxpose.binary.xlu0.c.b16.cont [4/16] %v1925_v58, %v1917_v57, 128  ;;  %v1258_v57 = vld [vmem:[#allocation6 + $0x80] sm:$0xff]  ;;  %v577_v58 = vld [vmem:[#allocation2 + $0xf8] sm:$0xff] }
  0x55   : > { %1799 = vmatmul.msk.f32.gmra.mxu2 %vm1276_vm3, %v1248_v62 }
  0x59   : > { %1734 = vmatmul.msk.f32.gmra.mxu0 %vm594_vm0, %v552_v24  ;;  %1767 = vmatmul.msk.f32.gmra.mxu1 %vm936_vm1, %v907_v38 }
  0x5a   : > { %1757 = vmatmul.msk.f32.gmra.mxu3 %vm594_vm0, %v575_v48 }
  0x5d   : > { %1800 = vmatmul.msk.f32.gmra.mxu2 %vm1276_vm3, %v1249_v2  ;;  %v924_v2 = vld [vmem:[#allocation4 + $0xc0] sm:$0xff] }
  0x61   : > { %1735 = vmatmul.msk.f32.gmra.mxu0 %vm594_vm0, %v553_v26  ;;  %1768 = vmatmul.msk.f32.gmra.mxu1 %vm936_vm1, %v908_v43  ;;  %v1253_v26 = vld [vmem:[#allocation6 + $0x58] sm:$0xff] }
  0x62   : > { %v1929_v43 = vld [vmem:[%s2262_s12 + $0x78] sm:$0xff]   ;;  %1758 = vmatmul.msk.f32.gmra.mxu3 %vm594_vm0, %v576_v53 }
  0x63   : > { %1989 = vxpose.binary.xlu0.c.b16.cont [5/16] %v1926_v4, %v1918_v3, 128  ;;  %v925_v4 = vld [vmem:[#allocation4 + $0xc8] sm:$0xff] }
  0x65   : > { %1801 = vmatmul.msk.f32.gmra.mxu2 %vm1276_vm3, %v1250_v8 }
  0x69   : > { %1736 = vmatmul.msk.f32.gmra.mxu0 %vm594_vm0, %v554_v28  ;;  %1769 = vmatmul.msk.f32.gmra.mxu1 %vm936_vm1, %v909_v46  ;;  %v1920_v28 = vld [vmem:[%s2262_s12 + $0x30] sm:$0xff]  }
  0x6a   : > { %1759 = vmatmul.msk.f32.gmra.mxu3 %vm594_vm0, %v577_v58 }
  0x6d   : > { %1802 = vmatmul.msk.f32.gmra.mxu2 %vm1276_vm3, %v1251_v12 }
  0x71   : > { %1737 = vmatmul.msk.f32.gmra.mxu0 %vm594_vm0, %v555_v30  ;;  %1770 = vmatmul.msk.f32.gmra.mxu1 %vm936_vm1, %v910_v51 }
  0x72   : > { %1785 = vmatmul.msk.f32.vlgmr.msrb.gmra.mxu3 %vm936_vm1, %v925_v4 }
  0x73   : > { %1990 = vxpose.binary.xlu0.c.b16.cont [6/16] %v1927_v15, %v1919_v14, 128  ;;  %v927_v14 = vld [vmem:[#allocation4 + $0xd8] sm:$0xff]  ;;  %v1262_v15 = vld [vmem:[#allocation6 + $0xa0] sm:$0xff] }
  0x75   : > { %1803 = vmatmul.msk.f32.gmra.mxu2 %vm1276_vm3, %v1252_v20  ;;  %v1263_v20 = vld [vmem:[#allocation6 + $0xa8] sm:$0xff] }
  0x79   : > { %1738 = vmatmul.msk.f32.gmra.mxu0 %vm594_vm0, %v556_v37  ;;  %1771 = vmatmul.msk.f32.gmra.mxu1 %vm936_vm1, %v911_v54  ;;  %v919_v37 = vld [vmem:[#allocation4 + $0x98] sm:$0xff] }
  0x7d   : > { %1804 = vmatmul.msk.f32.gmra.mxu2 %vm1276_vm3, %v1253_v26 }
  0x81   : > { %1739 = vmatmul.msk.f32.gmra.mxu0 %vm594_vm0, %v557_v40  ;;  %1772 = vmatmul.msk.f32.gmra.mxu1 %vm936_vm1, %v912_v59  ;;  %v1255_v40 = vld [vmem:[#allocation6 + $0x68] sm:$0xff] }
  0x83   : > { %1991 = vxpose.binary.xlu0.c.b16.cont [7/16] %v1928_v29, %v1920_v28, 128  ;;  %v1264_v28 = vld [vmem:[#allocation6 + $0xb0] sm:$0xff] }
  0x85   : > { %1805 = vmatmul.msk.f32.gmra.mxu2 %vm1276_vm3, %v1254_v34 }
  0x89   : > { %1740 = vmatmul.msk.f32.gmra.mxu0 %vm594_vm0, %v558_v44  ;;  %1773 = vmatmul.msk.f32.gmra.mxu1 %vm936_vm1, %v913_v63  ;;  %v1259_v63 = vld [vmem:[#allocation6 + $0x88] sm:$0xff] }
  0x8d   : > { %1806 = vmatmul.msk.f32.gmra.mxu2 %vm1276_vm3, %v1255_v40 }
  0x91   : > { %1741 = vmatmul.msk.f32.gmra.mxu0 %vm594_vm0, %v559_v47  ;;  %1774 = vmatmul.msk.f32.gmra.mxu1 %vm936_vm1, %v914_v5  ;;  %v1256_v47 = vld [vmem:[#allocation6 + $0x70] sm:$0xff] }
  0x92   : > { %v1260_v5 = vld [vmem:[#allocation6 + $0x90] sm:$0xff] }
  0x93   : > { %1992 = vxpose.binary.xlu0.c.b16.end [8/16] %v1929_v43, %v1921_v42, 128  ;;  %v931_v43 = vld [vmem:[#allocation4 + $0xf8] sm:$0xff] }
  0x95   : > { %1807 = vmatmul.msk.f32.gmra.mxu2 %vm1276_vm3, %v1256_v47 }
  0x99   : > { %1742 = vmatmul.msk.f32.gmra.mxu0 %vm594_vm0, %v560_v52  ;;  %1775 = vmatmul.msk.f32.gmra.mxu1 %vm936_vm1, %v915_v9  ;;  %v1257_v52 = vld [vmem:[#allocation6 + $0x78] sm:$0xff]  ;;  %v926_v9 = vld [vmem:[#allocation4 + $0xd0] sm:$0xff] }
  0x9a   : > { %1786 = vmatmul.msk.f32.gmra.mxu3 %vm936_vm1, %v926_v9 }
  0x9d   : > { %1808 = vmatmul.msk.f32.gmra.mxu2 %vm1276_vm3, %v1257_v52 }
  0x9e   : > { %v2317_v16 = vpop.f32.mrf.mxu1 }
  0xa1   : > { %1743 = vmatmul.msk.f32.gmra.mxu0 %vm594_vm0, %v561_v55  ;;  %1776 = vmatmul.msk.f32.gmra.mxu1 %vm936_vm1, %v916_v17  ;;  %v922_v55 = vld [vmem:[#allocation4 + $0xb0] sm:$0xff] }
  0xa2   : > { %1787 = vmatmul.msk.f32.gmra.mxu3 %vm936_vm1, %v927_v14 }
  0xa3   : > { %1146 = vxpose.xlu0.b32.start [1/16] %v2317_v16, 128 }
  0xa5   : > { %1809 = vmatmul.msk.f32.gmra.mxu2 %vm1276_vm3, %v1258_v57 }
  0xa6   : > { %v708_v60 = vpop.f32.mrf.mxu0  ;;  %v2326_v22 = vpop.f32.mrf.mxu1 }
  0xa7   : > { %804 = vxpose.xlu1.b32.start [1/16] %v708_v60, 128 }
  0xa8   : > { %v2359_v59 = vpop.f32.mrf.mxu2 }
  0xa9   : > { %1744 = vmatmul.msk.f32.gmra.mxu0 %vm594_vm0, %v562_v61  ;;  %1777 = vmatmul.msk.f32.gmra.mxu1 %vm936_vm1, %v917_v23  ;;  %v923_v61 = vld [vmem:[#allocation4 + $0xb8] sm:$0xff] }
  0xab   : > { %1147 = vxpose.xlu0.b32.cont [2/16] %v2326_v22, 128 }
  0xad   : > { %1810 = vmatmul.msk.f32.gmra.mxu2 %vm1276_vm3, %v1259_v63 }
  0xae   : > { %v711_v0 = vpop.f32.mrf.mxu0  ;;  %v2334_v30 = vpop.f32.mrf.mxu1 }
  0xaf   : > { %805 = vxpose.xlu1.b32.cont [2/16] %v711_v0, 128 }
  0xb0   : > { %v2367_v0 = vpop.f32.mrf.mxu2 }
  0xb1   : > { %1745 = vmatmul.msk.f32.gmra.mxu0 %vm594_vm0, %v563_v1  ;;  %1778 = vmatmul.msk.f32.gmra.mxu1 %vm936_vm1, %v918_v31 }
  0xb3   : > { %1148 = vxpose.xlu0.b32.cont [3/16] %v2334_v30, 128 }
  0xb5   : > { %1811 = vmatmul.msk.f32.gmra.mxu2 %vm1276_vm3, %v1260_v5  ;;  %v780_v57 = vpop.f32.mrf.mxu3  ;;  %v1269_v5 = vld [vmem:[#allocation6 + $0xd8] sm:$0xff] }
  0xb6   : > { %v714_v6 = vpop.f32.mrf.mxu0  ;;  %v2340_v36 = vpop.f32.mrf.mxu1 }
  0xb7   : > { %806 = vxpose.xlu1.b32.cont [3/16] %v714_v6, 128 }
  0xb9   : > { %1746 = vmatmul.msk.f32.gmra.mxu0 %vm594_vm0, %v564_v7  ;;  %1779 = vmatmul.msk.f32.gmra.mxu1 %vm936_vm1, %v919_v37  ;;  %v2377_v7 = vpop.f32.mrf.mxu2 }
  0xbb   : > { %1149 = vxpose.xlu0.b32.cont [4/16] %v2340_v36, 128  ;;  %v1265_v36 = vld [vmem:[#allocation6 + $0xb8] sm:$0xff] }
  0xbe   : > { %v717_v10 = vpop.f32.mrf.mxu0  ;;  %v1062_v44 = vpop.f32.mrf.mxu1 }
  0xbf   : > { %807 = vxpose.xlu1.b32.cont [4/16] %v717_v10, 128  ;;  %v1261_v10 = vld [vmem:[#allocation6 + $0x98] sm:$0xff] }
  0xc0   : > { %1812 = vmatmul.msk.f32.gmra.mxu2 %vm1276_vm3, %v1261_v10 }
  0xc1   : > { %1747 = vmatmul.msk.f32.gmra.mxu0 %vm594_vm0, %v565_v11  ;;  %1780 = vmatmul.msk.f32.gmra.mxu1 %vm936_vm1, %v920_v45  ;;  %v2384_v12 = vpop.f32.mrf.mxu2 }
  0xc3   : > { %1150 = vxpose.xlu0.b32.cont [5/16] %v1062_v44, 128  ;;  %v1266_v44 = vld [vmem:[#allocation6 + $0xc0] sm:$0xff] }
  0xc6   : > { %v720_v18 = vpop.f32.mrf.mxu0  ;;  %v1065_v49 = vpop.f32.mrf.mxu1 }
  0xc7   : > { %808 = vxpose.xlu1.b32.cont [5/16] %v720_v18, 128 }
  0xc8   : > { %1813 = vmatmul.msk.f32.gmra.mxu2 %vm1276_vm3, %v1262_v15  ;;  %v1270_v15 = vld [vmem:[#allocation6 + $0xe0] sm:$0xff] }
  0xc9   : > { %1748 = vmatmul.msk.f32.gmra.mxu0 %vm594_vm0, %v566_v19  ;;  %1781 = vmatmul.msk.f32.gmra.mxu1 %vm936_vm1, %v921_v50  ;;  %v2390_v17 = vpop.f32.mrf.mxu2  ;;  %v928_v19 = vld [vmem:[#allocation4 + $0xe0] sm:$0xff] }
  0xca   : > { %1788 = vmatmul.msk.f32.gmra.mxu3 %vm936_vm1, %v928_v19 }
  0xcb   : > { %1151 = vxpose.xlu0.b32.cont [6/16] %v1065_v49, 128 }
  0xce   : > { %v723_v24 = vpop.f32.mrf.mxu0  ;;  %v2354_v54 = vpop.f32.mrf.mxu1 }
  0xcf   : > { %809 = vxpose.xlu1.b32.cont [6/16] %v723_v24, 128  ;;  %v1993_v21 = vpop.trf.xlu0 }
  0xd0   : > { %1814 = vmatmul.msk.f32.gmra.mxu2 %vm1276_vm3, %v1263_v20  ;;  %v1997_v22 = vunpack.c.h.bf16 %v1993_v21  ;;  %v1995_v23 = vunpack.c.l.bf16 %v1993_v21 }
  0xd1   : > { %1749 = vmatmul.msk.f32.gmra.mxu0 %vm594_vm0, %v567_v25  ;;  %1782 = vmatmul.msk.f32.gmra.mxu1 %vm936_vm1, %v922_v55  ;;  %v2404_v25 = vpop.f32.mrf.mxu2 }
  0xd2   : > { %516 = vst [vmem:[%s2396_s19 + $0x10] sm:$0xff] %v1997_v22  ;;  %1789 = vmatmul.msk.f32.gmra.mxu3 %vm936_vm1, %v929_v27 }
  0xd3   : > { %514 = vst [vmem:[%s2396_s19] sm:$0xff] %v1995_v23  ;;  %1152 = vxpose.xlu0.b32.cont [7/16] %v2354_v54, 128 }
  0xd6   : > { %v726_v32 = vpop.f32.mrf.mxu0  ;;  %v2362_v60 = vpop.f32.mrf.mxu1 }
  0xd7   : > { %810 = vxpose.xlu1.b32.cont [7/16] %v726_v32, 128  ;;  %v1994_v29 = vpop.trf.xlu0 }
  0xd8   : > { %1815 = vmatmul.msk.f32.gmra.mxu2 %vm1276_vm3, %v1264_v28  ;;  %v1998_v30 = vunpack.c.h.bf16 %v1994_v29  ;;  %v1996_v31 = vunpack.c.l.bf16 %v1994_v29 }
  0xd9   : > { %1750 = vmatmul.msk.f32.gmra.mxu0 %vm594_vm0, %v568_v33  ;;  %1783 = vmatmul.msk.f32.gmra.mxu1 %vm936_vm1, %v923_v61  ;;  %v2413_v33 = vpop.f32.mrf.mxu2 }
  0xda   : > { %517 = vst [vmem:[%s2396_s19 + $0x18] sm:$0xff] %v1998_v30  ;;  %1790 = vmatmul.msk.f32.gmra.mxu3 %vm936_vm1, %v930_v35 }
  0xdb   : > { %515 = vst [vmem:[%s2396_s19 + $0x8] sm:$0xff] %v1996_v31  ;;  %1153 = vxpose.xlu0.b32.cont [8/16] %v2362_v60, 128  ;;  %v1268_v60 = vld [vmem:[#allocation6 + $0xd0] sm:$0xff] }
  0xde   : > { %v729_v38 = vpop.f32.mrf.mxu0  ;;  %v2369_v1 = vpop.f32.mrf.mxu1 }
  0xdf   : > { %811 = vxpose.xlu1.b32.cont [8/16] %v729_v38, 128  ;;  %v1999_v37 = vpop.trf.xlu0 }
  0xe0   : > { %1816 = vmatmul.msk.f32.gmra.mxu2 %vm1276_vm3, %v1265_v36  ;;  %v2003_v38 = vunpack.c.h.bf16 %v1999_v37 }
  0xe1   : > { %1751 = vmatmul.msk.f32.gmra.mxu0 %vm594_vm0, %v569_v39  ;;  %1784 = vmatmul.msk.f32.gmra.mxu1 %vm936_vm1, %v924_v2  ;;  %v2001_v39 = vunpack.c.l.bf16 %v1999_v37  ;;  %v2422_v41 = vpop.f32.mrf.mxu2 }
  0xe2   : > { %520 = vst [vmem:[%s2396_s19 + $0x30] sm:$0xff] %v2003_v38  ;;  %1791 = vmatmul.msk.f32.gmra.mxu3 %vm936_vm1, %v931_v43 }
  0xe3   : > { %518 = vst [vmem:[%s2396_s19 + $0x20] sm:$0xff] %v2001_v39  ;;  %1154 = vxpose.xlu0.b32.cont [9/16] %v2369_v1, 128 }
  0xe6   : > { %v732_v46 = vpop.f32.mrf.mxu0  ;;  %v2375_v6 = vpop.f32.mrf.mxu1 }
  0xe7   : > { %812 = vxpose.xlu1.b32.cont [9/16] %v732_v46, 128  ;;  %v2000_v45 = vpop.trf.xlu0 }
  0xe8   : > { %1817 = vmatmul.msk.f32.gmra.mxu2 %vm1276_vm3, %v1266_v44  ;;  %v2004_v46 = vunpack.c.h.bf16 %v2000_v45  ;;  %v2002_v47 = vunpack.c.l.bf16 %v2000_v45 }
  0xe9   : > { %v2431_v49 = vpop.f32.mrf.mxu2 }
  0xea   : > { %521 = vst [vmem:[%s2396_s19 + $0x38] sm:$0xff] %v2004_v46 }
  0xeb   : > { %519 = vst [vmem:[%s2396_s19 + $0x28] sm:$0xff] %v2002_v47  ;;  %1155 = vxpose.xlu0.b32.cont [10/16] %v2375_v6, 128 }
  0xee   : > { %v735_v51 = vpop.f32.mrf.mxu0  ;;  %v2382_v11 = vpop.f32.mrf.mxu1 }
  0xef   : > { %813 = vxpose.xlu1.b32.cont [10/16] %v735_v51, 128  ;;  %v1267_v51 = vld [vmem:[#allocation6 + $0xc8] sm:$0xff]  ;;  %v2005_v52 = vpop.trf.xlu0 }
  0xf0   : > { %1818 = vmatmul.msk.f32.vlgmr.msra.gmra.mxu3 %vm1276_vm3, %v1267_v51  ;;  %v2009_v53 = vunpack.c.h.bf16 %v2005_v52  ;;  %v2007_v54 = vunpack.c.l.bf16 %v2005_v52 }
  0xf2   : > { %524 = vst [vmem:[%s2396_s19 + $0x50] sm:$0xff] %v2009_v53 }
  0xf3   : > { %522 = vst [vmem:[%s2396_s19 + $0x40] sm:$0xff] %v2007_v54  ;;  %1156 = vxpose.xlu0.b32.cont [11/16] %v2382_v11, 128 }
  0xf6   : > { %v738_v56 = vpop.f32.mrf.mxu0  ;;  %v2388_v16 = vpop.f32.mrf.mxu1 }
  0xf7   : > { %814 = vxpose.xlu1.b32.cont [11/16] %v738_v56, 128  ;;  %v2437_v56 = vpop.f32.mrf.mxu2  ;;  %v2006_v61 = vpop.trf.xlu0 }
  0xf8   : > { %1819 = vmatmul.msk.f32.gmra.mxu3 %vm1276_vm3, %v1268_v60  ;;  %v2008_v63 = vunpack.c.l.bf16 %v2006_v61 }
  0xfa   : > { %523 = vst [vmem:[%s2396_s19 + $0x48] sm:$0xff] %v2008_v63 }
  0xfb   : > { %1157 = vxpose.xlu0.b32.cont [12/16] %v2388_v16, 128 }
  0xfe   : > { %v741_v62 = vpop.f32.mrf.mxu0  ;;  %v2402_v24 = vpop.f32.mrf.mxu1 }
  0xff   : > { %815 = vxpose.xlu1.b32.cont [12/16] %v741_v62, 128  ;;  %v2010_v62 = vunpack.c.h.bf16 %v2006_v61  ;;  %v2443_v2 = vpop.f32.mrf.mxu2  ;;  %v2011_v6 = vpop.trf.xlu0 }
 0x100   : > { %1820 = vmatmul.msk.f32.gmra.mxu3 %vm1276_vm3, %v1269_v5  ;;  %v2013_v9 = vunpack.c.l.bf16 %v2011_v6 }
 0x101   : > { %525 = vst [vmem:[%s2396_s19 + $0x58] sm:$0xff] %v2010_v62 }
 0x102   : > { %526 = vst [vmem:[%s2396_s19 + $0x60] sm:$0xff] %v2013_v9 }
 0x103   : > { %1158 = vxpose.xlu0.b32.cont [13/16] %v2402_v24, 128  ;;  %v1271_v24 = vld [vmem:[#allocation6 + $0xe8] sm:$0xff] }
 0x106   : > { %v744_v3 = vpop.f32.mrf.mxu0  ;;  %v2411_v32 = vpop.f32.mrf.mxu1 }
 0x107   : > { %816 = vxpose.xlu1.b32.cont [13/16] %v744_v3, 128  ;;  %v783_v3 = vpop.f32.mrf.mxu3  ;;  %v2449_v11 = vpop.f32.mrf.mxu2 }
 0x108   : > { %v2012_v16 = vpop.trf.xlu0  ;;  %1821 = vmatmul.msk.f32.gmra.mxu3 %vm1276_vm3, %v1270_v15 }
 0x109   : > { %v2014_v19 = vunpack.c.l.bf16 %v2012_v16 }
 0x10b   : > { %527 = vst [vmem:[%s2396_s19 + $0x68] sm:$0xff] %v2014_v19  ;;  %1159 = vxpose.xlu0.b32.cont [14/16] %v2411_v32, 128  ;;  %v1272_v32 = vld [vmem:[#allocation6 + $0xf0] sm:$0xff] }
 0x10e   : > { %v747_v8 = vpop.f32.mrf.mxu0  ;;  %v2420_v40 = vpop.f32.mrf.mxu1 }
 0x10f   : > { %817 = vxpose.xlu1.b32.cont [14/16] %v747_v8, 128  ;;  %v2015_v8 = vunpack.c.h.bf16 %v2011_v6  ;;  %v2455_v21 = vpop.f32.mrf.mxu2 }
 0x110   : > { %1822 = vmatmul.msk.f32.gmra.mxu3 %vm1276_vm3, %v1271_v24 }
 0x111   : > { %528 = vst [vmem:[%s2396_s19 + $0x70] sm:$0xff] %v2015_v8 }
 0x113   : > { %1160 = vxpose.xlu0.b32.cont [15/16] %v2420_v40, 128  ;;  %v1273_v40 = vld [vmem:[#allocation6 + $0xf8] sm:$0xff] }
 0x116   : > { %v750_v13 = vpop.f32.mrf.mxu0  ;;  %v2429_v48 = vpop.f32.mrf.mxu1 }
 0x117   : > { %818 = vxpose.xlu1.b32.cont [15/16] %v750_v13, 128  ;;  %v786_v13 = vpop.f32.mrf.mxu3  ;;  %v2461_v30 = vpop.f32.mrf.mxu2 }
 0x118   : > { %1823 = vmatmul.msk.f32.gmra.mxu3 %vm1276_vm3, %v1272_v32 }
 0x11b   : > { %1161 = vxpose.xlu0.b32.end [16/16] %v2429_v48, 128 }
 0x11e   : > { %v753_v18 = vpop.f32.mrf.mxu0  ;;  %v1098_v55 = vpop.f32.mrf.mxu1 }
 0x11f   : > { %819 = vxpose.xlu1.b32.end [16/16] %v753_v18, 128  ;;  %v2016_v18 = vunpack.c.h.bf16 %v2012_v16  ;;  %v789_v22 = vpop.f32.mrf.mxu3  ;;  %v2467_v38 = vpop.f32.mrf.mxu2 }
 0x120   : > { %1824 = vmatmul.msk.f32.gmra.mxu3 %vm1276_vm3, %v1273_v40 }
 0x121   : > { %529 = vst [vmem:[%s2396_s19 + $0x78] sm:$0xff] %v2016_v18 }
 0x126   : > { %v756_v26 = vpop.f32.mrf.mxu0  ;;  %v1101_v1 = vpop.f32.mrf.mxu1 }
 0x127   : > { %836 = vxpose.xlu2.b32.start [1/16] %v756_v26, 128  ;;  %1178 = vxpose.xlu1.b32.start [1/16] %v1098_v55, 128  ;;  %v2017_v26 = vpop.trf.xlu0  ;;  %v792_v31 = vpop.f32.mrf.mxu3 }
 0x128   : > { %v2021_v27 = vunpack.c.h.bf16 %v2017_v26  ;;  %v2019_v28 = vunpack.c.l.bf16 %v2017_v26  ;;  %v2473_v46 = vpop.f32.mrf.mxu2 }
 0x12a   : > { %532 = vst [vmem:[%s2396_s19 + $0x90] sm:$0xff] %v2021_v27 }
 0x12b   : > { %530 = vst [vmem:[%s2396_s19 + $0x80] sm:$0xff] %v2019_v28 }
 0x12e   : > { %v759_v34 = vpop.f32.mrf.mxu0  ;;  %v1104_v10 = vpop.f32.mrf.mxu1 }
 0x12f   : > { %837 = vxpose.xlu2.b32.cont [2/16] %v759_v34, 128  ;;  %1179 = vxpose.xlu1.b32.cont [2/16] %v1101_v1, 128  ;;  %v2018_v34 = vpop.trf.xlu0  ;;  %v795_v39 = vpop.f32.mrf.mxu3 }
 0x130   : > { %v2022_v35 = vunpack.c.h.bf16 %v2018_v34  ;;  %v2020_v36 = vunpack.c.l.bf16 %v2018_v34  ;;  %v1442_v53 = vpop.f32.mrf.mxu2 }
 0x131   : > { %1522 = vxpose.xlu0.b32.start [1/16] %v1442_v53, 128 }
 0x132   : > { %533 = vst [vmem:[%s2396_s19 + $0x98] sm:$0xff] %v2022_v35 }
 0x133   : > { %531 = vst [vmem:[%s2396_s19 + $0x88] sm:$0xff] %v2020_v36 }
 0x136   : > { %v762_v42 = vpop.f32.mrf.mxu0  ;;  %v1107_v20 = vpop.f32.mrf.mxu1 }
 0x137   : > { %838 = vxpose.xlu2.b32.cont [3/16] %v762_v42, 128  ;;  %1180 = vxpose.xlu1.b32.cont [3/16] %v1104_v10, 128  ;;  %v2023_v42 = vpop.trf.xlu0  ;;  %v798_v48 = vpop.f32.mrf.mxu3 }
 0x138   : > { %v2027_v43 = vunpack.c.h.bf16 %v2023_v42  ;;  %v2025_v44 = vunpack.c.l.bf16 %v2023_v42  ;;  %v1445_v61 = vpop.f32.mrf.mxu2 }
 0x139   : > { %1523 = vxpose.xlu0.b32.cont [2/16] %v1445_v61, 128 }
 0x13a   : > { %536 = vst [vmem:[%s2396_s19 + $0xb0] sm:$0xff] %v2027_v43 }
 0x13b   : > { %534 = vst [vmem:[%s2396_s19 + $0xa0] sm:$0xff] %v2025_v44 }
 0x13e   : > { %v765_v50 = vpop.f32.mrf.mxu0  ;;  %v1110_v29 = vpop.f32.mrf.mxu1 }
 0x13f   : > { %839 = vxpose.xlu2.b32.cont [4/16] %v765_v50, 128  ;;  %1181 = vxpose.xlu1.b32.cont [4/16] %v1107_v20, 128  ;;  %v2024_v47 = vpop.trf.xlu0 }
 0x140   : > { %v2028_v50 = vunpack.c.h.bf16 %v2024_v47  ;;  %v2026_v51 = vunpack.c.l.bf16 %v2024_v47 }
 0x142   : > { %537 = vst [vmem:[%s2396_s19 + $0xb8] sm:$0xff] %v2028_v50 }
 0x143   : > { %535 = vst [vmem:[%s2396_s19 + $0xa8] sm:$0xff] %v2026_v51 }
 0x146   : > { %v768_v58 = vpop.f32.mrf.mxu0  ;;  %v1113_v37 = vpop.f32.mrf.mxu1 }
 0x147   : > { %840 = vxpose.xlu2.b32.cont [5/16] %v768_v58, 128  ;;  %1182 = vxpose.xlu1.b32.cont [5/16] %v1110_v29, 128  ;;  %v2029_v54 = vpop.trf.xlu0  ;;  %v801_v58 = vpop.f32.mrf.mxu3 }
 0x148   : > { %v2033_v55 = vunpack.c.h.bf16 %v2029_v54 }
 0x14a   : > { %540 = vst [vmem:[%s2396_s19 + $0xd0] sm:$0xff] %v2033_v55 }
 0x14b   : > { %v820_v19 = vpop.trf.xlu1 }
 0x14c   : > { %868 = vst [vmem:[%s2396_s19 + $0x100] sm:$0xff] %v820_v19 }
 0x14e   : > { %v771_v4 = vpop.f32.mrf.mxu0  ;;  %v1116_v45 = vpop.f32.mrf.mxu1 }
 0x14f   : > { %841 = vxpose.xlu2.b32.cont [6/16] %v771_v4, 128  ;;  %1183 = vxpose.xlu1.b32.cont [6/16] %v1113_v37, 128  ;;  %v2030_v62 = vpop.trf.xlu0  ;;  %v1448_v4 = vpop.f32.mrf.mxu2 }
 0x150   : > { %v2034_v63 = vunpack.c.h.bf16 %v2030_v62  ;;  %v2032_v1 = vunpack.c.l.bf16 %v2030_v62  ;;  %1524 = vxpose.xlu0.b32.cont [3/16] %v1448_v4, 128 }
 0x152   : > { %541 = vst [vmem:[%s2396_s19 + $0xd8] sm:$0xff] %v2034_v63 }
 0x153   : > { %539 = vst [vmem:[%s2396_s19 + $0xc8] sm:$0xff] %v2032_v1  ;;  %v821_v24 = vpop.trf.xlu1 }
 0x154   : > { %870 = vst [vmem:[%s2396_s19 + $0x110] sm:$0xff] %v821_v24 }
 0x156   : > { %v774_v14 = vpop.f32.mrf.mxu0  ;;  %v1119_v52 = vpop.f32.mrf.mxu1 }
 0x157   : > { %842 = vxpose.xlu2.b32.cont [7/16] %v774_v14, 128  ;;  %1184 = vxpose.xlu1.b32.cont [7/16] %v1116_v45, 128  ;;  %v2035_v5 = vpop.trf.xlu0  ;;  %v1451_v10 = vpop.f32.mrf.mxu2 }
 0x158   : > { %v2039_v6 = vunpack.c.h.bf16 %v2035_v5  ;;  %v2037_v8 = vunpack.c.l.bf16 %v2035_v5  ;;  %1525 = vxpose.xlu0.b32.cont [4/16] %v1451_v10, 128 }
 0x15a   : > { %544 = vst [vmem:[%s2396_s19 + $0xf0] sm:$0xff] %v2039_v6 }
 0x15b   : > { %542 = vst [vmem:[%s2396_s19 + $0xe0] sm:$0xff] %v2037_v8  ;;  %v822_v29 = vpop.trf.xlu1 }
 0x15c   : > { %872 = vst [vmem:[%s2396_s19 + $0x120] sm:$0xff] %v822_v29 }
 0x15e   : > { %v777_v23 = vpop.f32.mrf.mxu0  ;;  %v1122_v60 = vpop.f32.mrf.mxu1 }
 0x15f   : > { %843 = vxpose.xlu2.b32.cont [8/16] %v777_v23, 128  ;;  %1185 = vxpose.xlu1.b32.cont [8/16] %v1119_v52, 128  ;;  %v1454_v18 = vpop.f32.mrf.mxu2 }
 0x160   : > { %1526 = vxpose.xlu0.b32.cont [5/16] %v1454_v18, 128 }
 0x167   : > { %844 = vxpose.xlu2.b32.cont [9/16] %v780_v57, 128  ;;  %v2031_v57 = vunpack.c.l.bf16 %v2029_v54  ;;  %1186 = vxpose.xlu1.b32.cont [9/16] %v1122_v60, 128  ;;  %v1457_v23 = vpop.f32.mrf.mxu2 }
 0x168   : > { %1527 = vxpose.xlu0.b32.cont [6/16] %v1457_v23, 128 }
 0x169   : > { %538 = vst [vmem:[%s2396_s19 + $0xc0] sm:$0xff] %v2031_v57 }
 0x16f   : > { %845 = vxpose.xlu2.b32.cont [10/16] %v783_v3, 128  ;;  %v1125_v3 = vpop.f32.mrf.mxu3  ;;  %v1460_v28 = vpop.f32.mrf.mxu2 }
 0x170   : > { %1187 = vxpose.xlu1.b32.cont [10/16] %v1125_v3, 128  ;;  %1528 = vxpose.xlu0.b32.cont [7/16] %v1460_v28, 128 }
 0x177   : > { %846 = vxpose.xlu2.b32.cont [11/16] %v786_v13, 128  ;;  %v1128_v9 = vpop.f32.mrf.mxu3  ;;  %v2036_v13 = vpop.trf.xlu0 }
 0x178   : > { %1188 = vxpose.xlu1.b32.cont [11/16] %v1128_v9, 128  ;;  %v2040_v14 = vunpack.c.h.bf16 %v2036_v13  ;;  %v2038_v15 = vunpack.c.l.bf16 %v2036_v13  ;;  %v1463_v34 = vpop.f32.mrf.mxu2 }
 0x179   : > { %1529 = vxpose.xlu0.b32.cont [8/16] %v1463_v34, 128 }
 0x17a   : > { %545 = vst [vmem:[%s2396_s19 + $0xf8] sm:$0xff] %v2040_v14 }
 0x17b   : > { %543 = vst [vmem:[%s2396_s19 + $0xe8] sm:$0xff] %v2038_v15 }
 0x17f   : > { %847 = vxpose.xlu2.b32.cont [12/16] %v789_v22, 128  ;;  %v1131_v16 = vpop.f32.mrf.mxu3  ;;  %v1162_v20 = vpop.trf.xlu0 }
 0x180   : > { %1189 = vxpose.xlu1.b32.cont [12/16] %v1131_v16, 128  ;;  %1210 = vst [vmem:[%s2396_s19 + $0x200] sm:$0xff] %v1162_v20 }
 0x187   : > { %848 = vxpose.xlu2.b32.cont [13/16] %v792_v31, 128  ;;  %v1134_v22 = vpop.f32.mrf.mxu3  ;;  %v1163_v26 = vpop.trf.xlu0 }
 0x188   : > { %1190 = vxpose.xlu1.b32.cont [13/16] %v1134_v22, 128  ;;  %1212 = vst [vmem:[%s2396_s19 + $0x210] sm:$0xff] %v1163_v26 }
 0x18f   : > { %849 = vxpose.xlu2.b32.cont [14/16] %v795_v39, 128  ;;  %v1137_v27 = vpop.f32.mrf.mxu3  ;;  %v1164_v31 = vpop.trf.xlu0 }
 0x190   : > { %1191 = vxpose.xlu1.b32.cont [14/16] %v1137_v27, 128  ;;  %1214 = vst [vmem:[%s2396_s19 + $0x220] sm:$0xff] %v1164_v31 }
 0x197   : > { %850 = vxpose.xlu2.b32.cont [15/16] %v798_v48, 128  ;;  %v1140_v32 = vpop.f32.mrf.mxu3  ;;  %v1165_v35 = vpop.trf.xlu0 }
 0x198   : > { %1192 = vxpose.xlu1.b32.cont [15/16] %v1140_v32, 128  ;;  %1216 = vst [vmem:[%s2396_s19 + $0x230] sm:$0xff] %v1165_v35 }
 0x19f   : > { %851 = vxpose.xlu2.b32.end [16/16] %v801_v58, 128  ;;  %v1143_v36 = vpop.f32.mrf.mxu3  ;;  %v1166_v40 = vpop.trf.xlu0 }
 0x1a0   : > { %1193 = vxpose.xlu1.b32.end [16/16] %v1143_v36, 128  ;;  %1218 = vst [vmem:[%s2396_s19 + $0x240] sm:$0xff] %v1166_v40 }
 0x1a7   : > { %1490 = vxpose.xlu2.b32.start [1/16] %v2359_v59, 128  ;;  %v823_v59 = vpop.trf.xlu1  ;;  %v1167_v44 = vpop.trf.xlu0 }
 0x1a8   : > { %874 = vst [vmem:[%s2396_s19 + $0x130] sm:$0xff] %v823_v59 }
 0x1a9   : > { %1220 = vst [vmem:[%s2396_s19 + $0x250] sm:$0xff] %v1167_v44 }
 0x1af   : > { %1491 = vxpose.xlu2.b32.cont [2/16] %v2367_v0, 128  ;;  %v1466_v0 = vpop.f32.mrf.mxu2  ;;  %v824_v37 = vpop.trf.xlu1 }
 0x1b0   : > { %1530 = vxpose.xlu0.b32.cont [9/16] %v1466_v0, 128  ;;  %876 = vst [vmem:[%s2396_s19 + $0x140] sm:$0xff] %v824_v37  ;;  %v1168_v48 = vpop.trf.xlu0 }
 0x1b1   : > { %1222 = vst [vmem:[%s2396_s19 + $0x260] sm:$0xff] %v1168_v48 }
 0x1b7   : > { %1492 = vxpose.xlu2.b32.cont [3/16] %v2377_v7, 128  ;;  %v1469_v7 = vpop.f32.mrf.mxu3  ;;  %v825_v42 = vpop.trf.xlu1 }
 0x1b8   : > { %1531 = vxpose.xlu0.b32.cont [10/16] %v1469_v7, 128  ;;  %878 = vst [vmem:[%s2396_s19 + $0x150] sm:$0xff] %v825_v42  ;;  %v1169_v52 = vpop.trf.xlu0 }
 0x1b9   : > { %1224 = vst [vmem:[%s2396_s19 + $0x270] sm:$0xff] %v1169_v52 }
 0x1bf   : > { %1493 = vxpose.xlu2.b32.cont [4/16] %v2384_v12, 128  ;;  %v1472_v12 = vpop.f32.mrf.mxu3  ;;  %v826_v45 = vpop.trf.xlu1 }
 0x1c0   : > { %v852_v39 = vpop.trf.xlu2  ;;  %1532 = vxpose.xlu0.b32.cont [11/16] %v1472_v12, 128  ;;  %880 = vst [vmem:[%s2396_s19 + $0x160] sm:$0xff] %v826_v45  ;;  %v1170_v55 = vpop.trf.xlu0 }
 0x1c1   : > { %869 = vst [vmem:[%s2396_s19 + $0x108] sm:$0xff] %v852_v39 }
 0x1c2   : > { %1226 = vst [vmem:[%s2396_s19 + $0x280] sm:$0xff] %v1170_v55 }
 0x1c7   : > { %1494 = vxpose.xlu2.b32.cont [5/16] %v2390_v17, 128  ;;  %v1475_v17 = vpop.f32.mrf.mxu3  ;;  %v827_v50 = vpop.trf.xlu1 }
 0x1c8   : > { %v853_v43 = vpop.trf.xlu2  ;;  %1533 = vxpose.xlu0.b32.cont [12/16] %v1475_v17, 128  ;;  %882 = vst [vmem:[%s2396_s19 + $0x170] sm:$0xff] %v827_v50  ;;  %v1171_v60 = vpop.trf.xlu0 }
 0x1c9   : > { %871 = vst [vmem:[%s2396_s19 + $0x118] sm:$0xff] %v853_v43 }
 0x1ca   : > { %1228 = vst [vmem:[%s2396_s19 + $0x290] sm:$0xff] %v1171_v60 }
 0x1cf   : > { %1495 = vxpose.xlu2.b32.cont [6/16] %v2404_v25, 128  ;;  %v1478_v25 = vpop.f32.mrf.mxu3  ;;  %v828_v53 = vpop.trf.xlu1 }
 0x1d0   : > { %v854_v47 = vpop.trf.xlu2  ;;  %1534 = vxpose.xlu0.b32.cont [13/16] %v1478_v25, 128  ;;  %884 = vst [vmem:[%s2396_s19 + $0x180] sm:$0xff] %v828_v53  ;;  %v1172_v63 = vpop.trf.xlu0 }
 0x1d1   : > { %873 = vst [vmem:[%s2396_s19 + $0x128] sm:$0xff] %v854_v47 }
 0x1d2   : > { %1230 = vst [vmem:[%s2396_s19 + $0x2a0] sm:$0xff] %v1172_v63 }
 0x1d7   : > { %1496 = vxpose.xlu2.b32.cont [7/16] %v2413_v33, 128  ;;  %v1481_v33 = vpop.f32.mrf.mxu3  ;;  %v829_v57 = vpop.trf.xlu1 }
 0x1d8   : > { %v855_v51 = vpop.trf.xlu2  ;;  %1535 = vxpose.xlu0.b32.cont [14/16] %v1481_v33, 128  ;;  %886 = vst [vmem:[%s2396_s19 + $0x190] sm:$0xff] %v829_v57  ;;  %v1173_v4 = vpop.trf.xlu0 }
 0x1d9   : > { %875 = vst [vmem:[%s2396_s19 + $0x138] sm:$0xff] %v855_v51 }
 0x1da   : > { %1232 = vst [vmem:[%s2396_s19 + $0x2b0] sm:$0xff] %v1173_v4 }
 0x1df   : > { %1497 = vxpose.xlu2.b32.cont [8/16] %v2422_v41, 128  ;;  %v1484_v41 = vpop.f32.mrf.mxu3  ;;  %v830_v61 = vpop.trf.xlu1 }
 0x1e0   : > { %v856_v54 = vpop.trf.xlu2  ;;  %1536 = vxpose.xlu0.b32.cont [15/16] %v1484_v41, 128  ;;  %888 = vst [vmem:[%s2396_s19 + $0x1a0] sm:$0xff] %v830_v61  ;;  %v1174_v6 = vpop.trf.xlu0 }
 0x1e1   : > { %877 = vst [vmem:[%s2396_s19 + $0x148] sm:$0xff] %v856_v54 }
 0x1e2   : > { %1234 = vst [vmem:[%s2396_s19 + $0x2c0] sm:$0xff] %v1174_v6 }
 0x1e7   : > { %1498 = vxpose.xlu2.b32.cont [9/16] %v2431_v49, 128  ;;  %v1487_v49 = vpop.f32.mrf.mxu3  ;;  %v831_v1 = vpop.trf.xlu1 }
 0x1e8   : > { %v857_v58 = vpop.trf.xlu2  ;;  %1537 = vxpose.xlu0.b32.end [16/16] %v1487_v49, 128  ;;  %890 = vst [vmem:[%s2396_s19 + $0x1b0] sm:$0xff] %v831_v1  ;;  %v1175_v9 = vpop.trf.xlu0 }
 0x1e9   : > { %879 = vst [vmem:[%s2396_s19 + $0x158] sm:$0xff] %v857_v58 }
 0x1ea   : > { %1236 = vst [vmem:[%s2396_s19 + $0x2d0] sm:$0xff] %v1175_v9 }
 0x1ef   : > { %1499 = vxpose.xlu2.b32.cont [10/16] %v2437_v56, 128  ;;  %v832_v56 = vpop.trf.xlu1 }
 0x1f0   : > { %v858_v62 = vpop.trf.xlu2  ;;  %892 = vst [vmem:[%s2396_s19 + $0x1c0] sm:$0xff] %v832_v56  ;;  %v1176_v13 = vpop.trf.xlu0 }
 0x1f1   : > { %881 = vst [vmem:[%s2396_s19 + $0x168] sm:$0xff] %v858_v62 }
 0x1f2   : > { %1238 = vst [vmem:[%s2396_s19 + $0x2e0] sm:$0xff] %v1176_v13 }
 0x1f7   : > { %1500 = vxpose.xlu2.b32.cont [11/16] %v2443_v2, 128  ;;  %v833_v2 = vpop.trf.xlu1 }
 0x1f8   : > { %v859_v3 = vpop.trf.xlu2  ;;  %894 = vst [vmem:[%s2396_s19 + $0x1d0] sm:$0xff] %v833_v2  ;;  %v1177_v15 = vpop.trf.xlu0 }
 0x1f9   : > { %883 = vst [vmem:[%s2396_s19 + $0x178] sm:$0xff] %v859_v3 }
 0x1fa   : > { %1240 = vst [vmem:[%s2396_s19 + $0x2f0] sm:$0xff] %v1177_v15 }
 0x1ff   : > { %1501 = vxpose.xlu2.b32.cont [12/16] %v2449_v11, 128  ;;  %v834_v11 = vpop.trf.xlu1 }
 0x200   : > { %v860_v5 = vpop.trf.xlu2  ;;  %896 = vst [vmem:[%s2396_s19 + $0x1e0] sm:$0xff] %v834_v11 }
 0x201   : > { %885 = vst [vmem:[%s2396_s19 + $0x188] sm:$0xff] %v860_v5 }
 0x207   : > { %1502 = vxpose.xlu2.b32.cont [13/16] %v2455_v21, 128  ;;  %v835_v21 = vpop.trf.xlu1 }
 0x208   : > { %v861_v8 = vpop.trf.xlu2  ;;  %898 = vst [vmem:[%s2396_s19 + $0x1f0] sm:$0xff] %v835_v21 }
 0x209   : > { %887 = vst [vmem:[%s2396_s19 + $0x198] sm:$0xff] %v861_v8 }
 0x20f   : > { %1503 = vxpose.xlu2.b32.cont [14/16] %v2461_v30, 128  ;;  %v1194_v30 = vpop.trf.xlu1 }
 0x210   : > { %v862_v10 = vpop.trf.xlu2  ;;  %1211 = vst [vmem:[%s2396_s19 + $0x208] sm:$0xff] %v1194_v30 }
 0x211   : > { %889 = vst [vmem:[%s2396_s19 + $0x1a8] sm:$0xff] %v862_v10 }
 0x214   : > { %v1538_v18 = vpop.trf.xlu0 }
 0x215   : > { %1555 = vst [vmem:[%s2396_s19 + $0x308] sm:$0xff] %v1538_v18 }
 0x217   : > { %1504 = vxpose.xlu2.b32.cont [15/16] %v2467_v38, 128  ;;  %v1195_v38 = vpop.trf.xlu1 }
 0x218   : > { %v863_v14 = vpop.trf.xlu2  ;;  %1213 = vst [vmem:[%s2396_s19 + $0x218] sm:$0xff] %v1195_v38 }
 0x219   : > { %891 = vst [vmem:[%s2396_s19 + $0x1b8] sm:$0xff] %v863_v14 }
 0x21c   : > { %v1539_v20 = vpop.trf.xlu0 }
 0x21d   : > { %1557 = vst [vmem:[%s2396_s19 + $0x318] sm:$0xff] %v1539_v20 }
 0x21f   : > { %1505 = vxpose.xlu2.b32.end [16/16] %v2473_v46, 128  ;;  %v1196_v22 = vpop.trf.xlu1 }
 0x220   : > { %v864_v16 = vpop.trf.xlu2  ;;  %1215 = vst [vmem:[%s2396_s19 + $0x228] sm:$0xff] %v1196_v22 }
 0x221   : > { %893 = vst [vmem:[%s2396_s19 + $0x1c8] sm:$0xff] %v864_v16 }
 0x224   : > { %v1540_v23 = vpop.trf.xlu0 }
 0x225   : > { %1559 = vst [vmem:[%s2396_s19 + $0x328] sm:$0xff] %v1540_v23 }
 0x227   : > { %v1197_v24 = vpop.trf.xlu1 }
 0x228   : > { %v865_v19 = vpop.trf.xlu2  ;;  %1217 = vst [vmem:[%s2396_s19 + $0x238] sm:$0xff] %v1197_v24 }
 0x229   : > { %895 = vst [vmem:[%s2396_s19 + $0x1d8] sm:$0xff] %v865_v19 }
 0x22c   : > { %v1541_v27 = vpop.trf.xlu0 }
 0x22d   : > { %1561 = vst [vmem:[%s2396_s19 + $0x338] sm:$0xff] %v1541_v27 }
 0x22f   : > { %v1198_v28 = vpop.trf.xlu1 }
 0x230   : > { %v866_v46 = vpop.trf.xlu2  ;;  %1219 = vst [vmem:[%s2396_s19 + $0x248] sm:$0xff] %v1198_v28 }
 0x231   : > { %897 = vst [vmem:[%s2396_s19 + $0x1e8] sm:$0xff] %v866_v46 }
 0x234   : > { %v1542_v31 = vpop.trf.xlu0 }
 0x235   : > { %1563 = vst [vmem:[%s2396_s19 + $0x348] sm:$0xff] %v1542_v31 }
 0x237   : > { %v1199_v32 = vpop.trf.xlu1 }
 0x238   : > { %v867_v26 = vpop.trf.xlu2  ;;  %1221 = vst [vmem:[%s2396_s19 + $0x258] sm:$0xff] %v1199_v32 }
 0x239   : > { %899 = vst [vmem:[%s2396_s19 + $0x1f8] sm:$0xff] %v867_v26 }
 0x23c   : > { %v1543_v59 = vpop.trf.xlu0 }
 0x23d   : > { %1565 = vst [vmem:[%s2396_s19 + $0x358] sm:$0xff] %v1543_v59 }
 0x23f   : > { %v1200_v35 = vpop.trf.xlu1 }
 0x240   : > { %v1506_v29 = vpop.trf.xlu2  ;;  %1223 = vst [vmem:[%s2396_s19 + $0x268] sm:$0xff] %v1200_v35 }
 0x241   : > { %1554 = vst [vmem:[%s2396_s19 + $0x300] sm:$0xff] %v1506_v29 }
 0x244   : > { %v1544_v0 = vpop.trf.xlu0 }
 0x245   : > { %1567 = vst [vmem:[%s2396_s19 + $0x368] sm:$0xff] %v1544_v0 }
 0x247   : > { %v1201_v37 = vpop.trf.xlu1 }
 0x248   : > { %v1507_v34 = vpop.trf.xlu2  ;;  %1225 = vst [vmem:[%s2396_s19 + $0x278] sm:$0xff] %v1201_v37 }
 0x249   : > { %1556 = vst [vmem:[%s2396_s19 + $0x310] sm:$0xff] %v1507_v34 }
 0x24c   : > { %v1545_v40 = vpop.trf.xlu0 }
 0x24d   : > { %1569 = vst [vmem:[%s2396_s19 + $0x378] sm:$0xff] %v1545_v40 }
 0x24f   : > { %v1202_v7 = vpop.trf.xlu1 }
 0x250   : > { %v1508_v36 = vpop.trf.xlu2  ;;  %1227 = vst [vmem:[%s2396_s19 + $0x288] sm:$0xff] %v1202_v7 }
 0x251   : > { %1558 = vst [vmem:[%s2396_s19 + $0x320] sm:$0xff] %v1508_v36 }
 0x254   : > { %v1546_v43 = vpop.trf.xlu0 }
 0x255   : > { %1571 = vst [vmem:[%s2396_s19 + $0x388] sm:$0xff] %v1546_v43 }
 0x257   : > { %v1203_v44 = vpop.trf.xlu1 }
 0x258   : > { %v1509_v39 = vpop.trf.xlu2  ;;  %1229 = vst [vmem:[%s2396_s19 + $0x298] sm:$0xff] %v1203_v44 }
 0x259   : > { %1560 = vst [vmem:[%s2396_s19 + $0x330] sm:$0xff] %v1509_v39 }
 0x25c   : > { %v1547_v45 = vpop.trf.xlu0 }
 0x25d   : > { %1573 = vst [vmem:[%s2396_s19 + $0x398] sm:$0xff] %v1547_v45 }
 0x25f   : > { %v1204_v47 = vpop.trf.xlu1 }
 0x260   : > { %v1510_v42 = vpop.trf.xlu2  ;;  %1231 = vst [vmem:[%s2396_s19 + $0x2a8] sm:$0xff] %v1204_v47 }
 0x261   : > { %1562 = vst [vmem:[%s2396_s19 + $0x340] sm:$0xff] %v1510_v42 }
 0x264   : > { %v1548_v17 = vpop.trf.xlu0 }
 0x265   : > { %1575 = vst [vmem:[%s2396_s19 + $0x3a8] sm:$0xff] %v1548_v17 }
 0x267   : > { %v1205_v50 = vpop.trf.xlu1 }
 0x268   : > { %v1511_v12 = vpop.trf.xlu2  ;;  %1233 = vst [vmem:[%s2396_s19 + $0x2b8] sm:$0xff] %v1205_v50 }
 0x269   : > { %1564 = vst [vmem:[%s2396_s19 + $0x350] sm:$0xff] %v1511_v12 }
 0x26c   : > { %v1549_v52 = vpop.trf.xlu0 }
 0x26d   : > { %1577 = vst [vmem:[%s2396_s19 + $0x3b8] sm:$0xff] %v1549_v52 }
 0x26f   : > { %v1206_v25 = vpop.trf.xlu1 }
 0x270   : > { %v1512_v48 = vpop.trf.xlu2  ;;  %1235 = vst [vmem:[%s2396_s19 + $0x2c8] sm:$0xff] %v1206_v25 }
 0x271   : > { %1566 = vst [vmem:[%s2396_s19 + $0x360] sm:$0xff] %v1512_v48 }
 0x274   : > { %v1550_v54 = vpop.trf.xlu0 }
 0x275   : > { %1579 = vst [vmem:[%s2396_s19 + $0x3c8] sm:$0xff] %v1550_v54 }
 0x277   : > { %v1207_v55 = vpop.trf.xlu1 }
 0x278   : > { %v1513_v51 = vpop.trf.xlu2  ;;  %1237 = vst [vmem:[%s2396_s19 + $0x2d8] sm:$0xff] %v1207_v55 }
 0x279   : > { %1568 = vst [vmem:[%s2396_s19 + $0x370] sm:$0xff] %v1513_v51 }
 0x27c   : > { %v1551_v57 = vpop.trf.xlu0 }
 0x27d   : > { %1581 = vst [vmem:[%s2396_s19 + $0x3d8] sm:$0xff] %v1551_v57 }
 0x27f   : > { %v1208_v58 = vpop.trf.xlu1 }
 0x280   : > { %v1514_v53 = vpop.trf.xlu2  ;;  %1239 = vst [vmem:[%s2396_s19 + $0x2e8] sm:$0xff] %v1208_v58 }
 0x281   : > { %1570 = vst [vmem:[%s2396_s19 + $0x380] sm:$0xff] %v1514_v53 }
 0x284   : > { %v1552_v41 = vpop.trf.xlu0 }
 0x285   : > { %1583 = vst [vmem:[%s2396_s19 + $0x3e8] sm:$0xff] %v1552_v41 }
 0x287   : > { %v1209_v61 = vpop.trf.xlu1 }
 0x288   : > { %v1515_v33 = vpop.trf.xlu2  ;;  %1241 = vst [vmem:[%s2396_s19 + $0x2f8] sm:$0xff] %v1209_v61 }
 0x289   : > { %1572 = vst [vmem:[%s2396_s19 + $0x390] sm:$0xff] %v1515_v33 }
 0x28c   : > { %v1553_v63 = vpop.trf.xlu0 }
 0x28d   : > { %1585 = vst [vmem:[%s2396_s19 + $0x3f8] sm:$0xff] %v1553_v63 }
 0x290   : > { %v1516_v60 = vpop.trf.xlu2 }
 0x291   : > { %1574 = vst [vmem:[%s2396_s19 + $0x3a0] sm:$0xff] %v1516_v60 }
 0x298   : > { %v1517_v62 = vpop.trf.xlu2 }
 0x299   : > { %1576 = vst [vmem:[%s2396_s19 + $0x3b0] sm:$0xff] %v1517_v62 }
 0x2a0   : > { %v1518_v49 = vpop.trf.xlu2 }
 0x2a1   : > { %1578 = vst [vmem:[%s2396_s19 + $0x3c0] sm:$0xff] %v1518_v49 }
 0x2a8   : > { %v1519_v1 = vpop.trf.xlu2 }
 0x2a9   : > { %1580 = vst [vmem:[%s2396_s19 + $0x3d0] sm:$0xff] %v1519_v1 }
 0x2b0   : > { %v1520_v3 = vpop.trf.xlu2 }
 0x2b1   : > { %1582 = vst [vmem:[%s2396_s19 + $0x3e0] sm:$0xff] %v1520_v3 }
 0x2b8   : > { %v1521_v4 = vpop.trf.xlu2 }
 0x2b9   : > { %1584 = vst [vmem:[%s2396_s19 + $0x3f0] sm:$0xff] %v1521_v4 }
 0x2ba PF: > { %s19_s24 = sadd.s32 1, %s2145_s24  }
 0x2bb   : > { %p16_p7 = scmp.ge.s32.totalorder %s19_s24, 4  }
 0x2bd   :  { %18 = sbr.rel (!%p16_p7) target bundleno = 2 (0x2), region = 100 }
 0x2c2   :  { %1607 = vsyncpa [#allocation3], 1 }
 0x2c3   :  { %1609 = vsyncpa [#allocation3 + $0x1], 1 }
 0x2c4   :  { %1610 = vsyncpa [#allocation5], 1 }

// kernel: merge_forward.14
= control target key start
LH: loop header
LB: loop body
LE: loop exit
PB: predicated region body
PF: predicated region fallthrough
CT: control target
= control target key end

     0   :  { %10 = vsyncpa [#allocation4], 0  ;;  %s6650_s18 = smov 0   ;;  %s8636_s0 = inlined_call_operand.hbm [shape: f32[256,64], index: 0, kind: input, shape index: {}]   ;;  %s8637_s1 = inlined_call_operand.vmem [shape: bf16[2,64,128], index: 1, kind: input, shape index: {}]   ;;  %s8638_s2 = inlined_call_operand.vmem [shape: bf16[2,256,128], index: 2, kind: input, shape index: {}]   ;;  %s8639_s3 = inlined_call_operand.vmem [shape: bf16[9,128,128], index: 3, kind: input, shape index: {}]   ;;  %s8640_s4 = inlined_call_operand.vmem [shape: f32[1,128], index: 4, kind: input, shape index: {}]   ;;  %s8641_s5 = inlined_call_operand.vmem [shape: bf16[2,256,128], index: 5, kind: output, shape index: {}]  }
   0x1 LB: > { %s173_s21 = sshll.u32 %s8636_s0, 4  ;;  %s5483_s22 = sadd.s32 4294967295, %s6614_s18   ;;  %s6614_s18 = sphi %s6650_s18, %s16_s18   ;;  %s174_s21 = int_to_ptr.hbm [resolvable:$true] %s173_s21 }
   0x2   : > { %p5485_p0 = scmp.ge.s32.totalorder %s6614_s18, 1  ;;  %p162_p1 = scmp.lt.s32.totalorder %s6614_s18, 3 }
   0x3   : > { %p6526_p2 = scmp.eq.s32.totalorder %s5483_s22, 0  ;;  %s6616_s23 = smov [#allocation3]  }
   0x4   : > { %p163_p3 = pnand %p5485_p0, %p162_p1  ;;  %s175_s24 = sshll.u32 %s6616_s23, 4  ;;  %s176_s24 = int_to_ptr.vmem [resolvable:$true] %s175_s24 }
   0x5   : > { %s6617_s25 = smov 128   ;;  %s6618_s26 = smov 8  }
   0x6   : > { %p6522_p4 = pneg %p163_p3  ;;  %213 = sbr.rel (%p163_p3) target bundleno = 1096 (0x448), region = 40 }
   0x8   : > { %p6523_p5 = pnand %p6526_p2, %p6522_p4 }
   0xa   : > { %6525 = dma.hbm_to_vmem [thread:$0]  (!%p6523_p5), %s174_s21, 4096, %s176_s24, [#allocation4], %s6617_s25, %s6617_s25, %s6618_s26  }
   0xb   : > { %6609 = dma.done.wait (%p6526_p2), [#allocation4], 4096  }
   0xc   : > { %6611 = vsyncadd (%p6526_p2), [#allocation4], 4294963200  ;;  %p247_p6 = scmp.lt.s32.totalorder %s5483_s22, 1  ;;  %v263_v12 = vld [vmem:[#allocation3] sm:$0xff]  ;;  %vm375_vm0 = vcmask 523264   ;;  %v280_v13 = vld [vmem:[#allocation3 + $0x88] sm:$0xff] }
   0xd   : > { %v264_v14 = vld [vmem:[#allocation3 + $0x8] sm:$0xff]  ;;  %v281_v15 = vld [vmem:[#allocation3 + $0x90] sm:$0xff]  ;;  %v282_v17 = vld [vmem:[#allocation3 + $0x98] sm:$0xff]  ;;  %v6619_v47 = vmov 0   ;;  %vm2062_vm1 = vcmask 1042432   ;;  %vm2063_vm2 = vcmask 1046532  }
   0xe   : > { %s8920_s22 = smov (!%p247_p6, %s5483_s22), 1  ;;  %v265_v16 = vld [vmem:[#allocation3 + $0x10] sm:$0xff]  ;;  %v266_v18 = vld [vmem:[#allocation3 + $0x18] sm:$0xff]  ;;  %v283_v19 = vld [vmem:[#allocation3 + $0xa0] sm:$0xff]  ;;  %588 = vst [vmem:[#allocation2 + $0xc] sm:$0xf] %v6619_v47 }
   0xf   : > { %s6186_s27 = sshll.u32 %s8920_s22, 5  ;;  %v267_v20 = vld [vmem:[#allocation3 + $0x20] sm:$0xff]  ;;  %v284_v21 = vld [vmem:[#allocation3 + $0xa8] sm:$0xff]  ;;  %v285_v23 = vld [vmem:[#allocation3 + $0xb0] sm:$0xff]  ;;  %585 = vst [vmem:[#allocation2] sm:$0xf] %v6619_v47 }
  0x10   : > { %s251_s30 = scalar_lea.vmem %s8637_s1, %s6186_s27  ;;  %v268_v22 = vld [vmem:[#allocation3 + $0x28] sm:$0xff]  ;;  %v269_v24 = vld [vmem:[#allocation3 + $0x30] sm:$0xff]  ;;  %v286_v25 = vld [vmem:[#allocation3 + $0xb8] sm:$0xff]  ;;  %586 = vst [vmem:[#allocation2 + $0x4] sm:$0xf] %v6619_v47  ;;  %s6187_s17 = sshll.u32 %s8920_s22, 7 }
  0x11   : > { %v6471_v0 = vld [vmem:[%s251_s30 + $0x18] sm:$0xff]   ;;  %v6470_v1 = vld [vmem:[%s251_s30 + $0x10] sm:$0xff]   ;;  %v6469_v5 = vld [vmem:[%s251_s30 + $0x8] sm:$0xff]   ;;  %587 = vst [vmem:[#allocation2 + $0x8] sm:$0x1] %v6619_v47  ;;  %s6782_s24 = scalar_lea.vmem %s8638_s2, %s6187_s17  ;;  %vm995_vm7 = vcmask 1043456  }
  0x12   : > { %v6324_v2 = vunpack.c.h.bf16 %v6471_v0  ;;  %v6323_v3 = vunpack.c.l.bf16 %v6471_v0  ;;  %v6320_v4 = vunpack.c.h.bf16 %v6470_v1  ;;  %v6319_v6 = vunpack.c.l.bf16 %v6470_v1  ;;  %v6310_v8 = vld [vmem:[%s251_s30] sm:$0xff]   ;;  %v270_v26 = vld [vmem:[#allocation3 + $0x38] sm:$0xff]  ;;  %v287_v27 = vld [vmem:[#allocation3 + $0xc0] sm:$0xff]  ;;  %589 = vst [vmem:[#allocation2 + $0x10] sm:$0xf] %v6619_v47 }
  0x13   : > { %v6316_v7 = vunpack.c.h.bf16 %v6469_v5  ;;  %v6315_v9 = vunpack.c.l.bf16 %v6469_v5  ;;  %v6312_v10 = vunpack.c.h.bf16 %v6310_v8  ;;  %v6311_v11 = vunpack.c.l.bf16 %v6310_v8  ;;  %v271_v28 = vld [vmem:[#allocation3 + $0x40] sm:$0xff]  ;;  %v288_v29 = vld [vmem:[#allocation3 + $0xc8] sm:$0xff]  ;;  %v289_v31 = vld [vmem:[#allocation3 + $0xd0] sm:$0xff]  ;;  %590 = vst [vmem:[#allocation2 + $0x14] sm:$0x1] %v6619_v47 }
  0x14   : > { %480 = vmatpush.msra.mxu0 %v6324_v2  ;;  %6502 = vmatpush.msra.mxu3 %v6324_v2  ;;  %v272_v30 = vld [vmem:[#allocation3 + $0x48] sm:$0xff]  ;;  %v273_v32 = vld [vmem:[#allocation3 + $0x50] sm:$0xff]  ;;  %v290_v33 = vld [vmem:[#allocation3 + $0xd8] sm:$0xff]  ;;  %591 = vst [vmem:[#allocation2 + $0x18] sm:$0xf] %v6619_v47  ;;  %vm1002_vm12 = vcmask 1040384  }
  0x15   : > { %v6228_v34 = vld [vmem:[%s8639_s3 + $0xb8] sm:$0xff]  ;;  %v6227_v36 = vld [vmem:[%s8639_s3 + $0xb0] sm:$0xff]  ;;  %v6226_v40 = vld [vmem:[%s8639_s3 + $0xa8] sm:$0xff]  ;;  %592 = vst [vmem:[#allocation2 + $0x1c] sm:$0xf] %v6619_v47 }
  0x16   : > { %481 = vmatpush.msra.mxu0 %v6323_v3  ;;  %6503 = vmatpush.msra.mxu3 %v6323_v3  ;;  %v6220_v35 = vld [vmem:[%s8639_s3 + $0x78] sm:$0xff]  ;;  %v274_v37 = vld [vmem:[#allocation3 + $0x58] sm:$0xff]  ;;  %v292_v43 = vld [vmem:[#allocation3 + $0xe8] sm:$0xff]  ;;  %593 = vst [vmem:[#allocation2 + $0x20] sm:$0x1] %v6619_v47 }
  0x17   : > { %1692 = vmatpush.bf16.msra.mxu1 %v6220_v35  ;;  %6510 = vmatpush.bf16.msra.mxu2 %v6220_v35  ;;  %v291_v38 = vld [vmem:[#allocation3 + $0xe0] sm:$0xff]  ;;  %v6219_v39 = vld [vmem:[%s8639_s3 + $0x70] sm:$0xff]  ;;  %v6218_v44 = vld [vmem:[%s8639_s3 + $0x68] sm:$0xff]  ;;  %594 = vst [vmem:[#allocation2 + $0x24] sm:$0xf] %v6619_v47 }
  0x18   : > { %482 = vmatpush.msra.mxu0 %v6320_v4  ;;  %6504 = vmatpush.msra.mxu3 %v6320_v4  ;;  %v6252_v41 = vld [vmem:[%s8639_s3 + $0xf8] sm:$0xff]  ;;  %v6225_v45 = vld [vmem:[%s8639_s3 + $0xa0] sm:$0xff]  ;;  %v6251_v46 = vld [vmem:[%s8639_s3 + $0xf0] sm:$0xff]  ;;  %595 = vst [vmem:[#allocation2 + $0x28] sm:$0xf] %v6619_v47 }
  0x19   : > { %v275_v42 = vld [vmem:[#allocation3 + $0x60] sm:$0xff]  ;;  %v6217_v48 = vld [vmem:[%s8639_s3 + $0x60] sm:$0xff]  ;;  %v6250_v50 = vld [vmem:[%s8639_s3 + $0xe8] sm:$0xff]  ;;  %596 = vst [vmem:[#allocation2 + $0x2c] sm:$0x1] %v6619_v47 }
  0x1a   : > { %483 = vmatpush.msra.mxu0 %v6319_v6  ;;  %6505 = vmatpush.msra.mxu3 %v6319_v6  ;;  %v6224_v49 = vld [vmem:[%s8639_s3 + $0x98] sm:$0xff]  ;;  %v276_v51 = vld [vmem:[#allocation3 + $0x68] sm:$0xff]  ;;  %v293_v52 = vld [vmem:[#allocation3 + $0xf0] sm:$0xff]  ;;  %597 = vst [vmem:[#allocation2 + $0x30] sm:$0xf] %v6619_v47 }
  0x1b   : > { %1693 = vmatpush.bf16.msra.mxu1 %v6219_v39  ;;  %6511 = vmatpush.bf16.msra.mxu2 %v6219_v39  ;;  %v6216_v53 = vld [vmem:[%s8639_s3 + $0x58] sm:$0xff]  ;;  %v6223_v54 = vld [vmem:[%s8639_s3 + $0x90] sm:$0xff]  ;;  %v6249_v55 = vld [vmem:[%s8639_s3 + $0xe0] sm:$0xff]  ;;  %598 = vst [vmem:[#allocation2 + $0x34] sm:$0xf] %v6619_v47 }
  0x1c   : > { %484 = vmatpush.msra.mxu0 %v6316_v7  ;;  %6506 = vmatpush.msra.mxu3 %v6316_v7  ;;  %v277_v56 = vld [vmem:[#allocation3 + $0x70] sm:$0xff]  ;;  %599 = vst [vmem:[#allocation2 + $0x38] sm:$0x1] %v6619_v47  ;;  %v6756_v57 = vld [vmem:[#allocation2 + $0x4] sm:$0xf]  ;;  %v294_v59 = vld [vmem:[#allocation3 + $0xf8] sm:$0xff] }
  0x1d   : > { %600 = vst [vmem:[#allocation2 + $0x3c] sm:$0xf] %v6619_v47  ;;  %v1112_v58 = vld [vmem:[#allocation2] sm:$0xf]  ;;  %v6215_v60 = vld [vmem:[%s8639_s3 + $0x50] sm:$0xff]  ;;  %v6222_v61 = vld [vmem:[%s8639_s3 + $0x88] sm:$0xff] }
  0x1e   : > { %485 = vmatpush.msra.mxu0 %v6315_v9  ;;  %6507 = vmatpush.msra.mxu3 %v6315_v9  ;;  %601 = vst [vmem:[#allocation2 + $0x40] sm:$0xf] %v6619_v47  ;;  %v2067_v62 = vrot.slane %v6756_v57, 5  ;;  %v6248_v63 = vld [vmem:[%s8639_s3 + $0xd8] sm:$0xff]  ;;  %v6773_v0 = vld [vmem:[#allocation2 + $0x8] sm:$0x1]  ;;  %vm6799_vm3 = vmor %vm2062_vm1, %vm2063_vm2 }
  0x1f   : > { %1694 = vmatpush.bf16.msra.mxu1 %v6218_v44  ;;  %6512 = vmatpush.bf16.msra.mxu2 %v6218_v44  ;;  %602 = vst [vmem:[#allocation2 + $0x44] sm:$0x1] %v6619_v47  ;;  %v2014_v1 = vld [vmem:[#allocation2] sm:$0xe]  ;;  %v1180_v2 = vshrl.u32 %v1112_v58, 16  ;;  %v6214_v5 = vld [vmem:[%s8639_s3 + $0x48] sm:$0xff] }
  0x20   : > { %486 = vmatpush.msra.mxu0 %v6312_v10  ;;  %6508 = vmatpush.msra.mxu3 %v6312_v10  ;;  %603 = vst [vmem:[#allocation2 + $0x48] sm:$0xf] %v6619_v47  ;;  %v5672_v3 = vrot.slane %v2014_v1, 9  ;;  %v2069_v4 = vrot.slane %v2067_v62, 4  ;;  %v6221_v6 = vld [vmem:[%s8639_s3 + $0x80] sm:$0xff]  ;;  %v6247_v7 = vld [vmem:[%s8639_s3 + $0xd0] sm:$0xff] }
  0x21   : > { %604 = vst [vmem:[#allocation2 + $0x4c] sm:$0xf] %v6619_v47  ;;  %v278_v8 = vld [vmem:[#allocation3 + $0x78] sm:$0xff]  ;;  %v2070_v9 = vrot.slane %v6773_v0, 5  ;;  %vm1176_vm4 = vsmask.f32 3328 }
  0x22   : > { %487 = vmatpush.msra.mxu0 %v6311_v11  ;;  %6509 = vmatpush.msra.mxu3 %v6311_v11  ;;  %605 = vst [vmem:[#allocation2 + $0x50] sm:$0x1] %v6619_v47  ;;  %v1182_v11 = vrot.slane %v1180_v2, 4  ;;  %vm1177_vm5 = vsmask.f32 7440 }
  0x23   : > { %5496 = vmatmul.msk.f32.vlgmr.msra.gmra.mxu0 %vm375_vm0, %v263_v12  ;;  %5513 = vmatmul.msk.f32.vlgmr.msra.gmra.mxu3 %vm375_vm0, %v280_v13  ;;  %606 = vst [vmem:[#allocation2 + $0x54] sm:$0xf] %v6619_v47  ;;  %v6804_v12 = vld [vmem:[%s6782_s24] sm:$0xff]   ;;  %v2068_v13 = vsel %vm6799_vm3, %v5672_v3, %v2067_v62  ;;  %vm6829_vm6 = vmor %vm1176_vm4, %vm1177_vm5  ;;  %vm996_vm8 = vsmask.f32 7938 }
  0x24   : > { %2306 = vmatpush.bf16.msrb.mxu3 %v6228_v34  ;;  %2620 = vmatpush.bf16.msrb.mxu0 %v6252_v41  ;;  %607 = vst [vmem:[#allocation2 + $0x58] sm:$0xf] %v6619_v47  ;;  %v6328_v41 = vunpack.c.h.bf16 %v6804_v12  ;;  %vm6850_vm9 = vmand %vm995_vm7, %vm996_vm8  ;;  %vm671_vm10 = vsmask.f32 256  ;;  %vm672_vm11 = vsmask.f32 4368 }
  0x25   : > { %1695 = vmatpush.bf16.msra.mxu1 %v6217_v48  ;;  %6513 = vmatpush.bf16.msra.mxu2 %v6217_v48  ;;  %608 = vst [vmem:[#allocation2 + $0x5c] sm:$0x1] %v6619_v47  ;;  %vm6870_vm13 = vmor %vm671_vm10, %vm672_vm11 }
  0x26   : > { %609 = vst [vmem:[#allocation2 + $0x60] sm:$0xf] %v6619_v47  ;;  %vm6877_vm14 = vmand %vm1002_vm12, %vm671_vm10 }
  0x27   : > { %610 = vst [vmem:[#allocation2 + $0x64] sm:$0xf] %v6619_v47 }
  0x28   : > { %2307 = vmatpush.bf16.msrb.mxu3 %v6227_v36  ;;  %2621 = vmatpush.bf16.msrb.mxu0 %v6251_v46  ;;  %611 = vst [vmem:[#allocation2 + $0x68] sm:$0x1] %v6619_v47 }
  0x29   : > { %1696 = vmatpush.bf16.msra.mxu1 %v6216_v53  ;;  %6514 = vmatpush.bf16.msra.mxu2 %v6216_v53  ;;  %612 = vst [vmem:[#allocation2 + $0x6c] sm:$0xf] %v6619_v47 }
  0x2a   : > { %613 = vst [vmem:[#allocation2 + $0x70] sm:$0xf] %v6619_v47 }
  0x2b   : > { %5497 = vmatmul.msk.f32.gmra.mxu0 %vm375_vm0, %v264_v14  ;;  %5514 = vmatmul.msk.f32.gmra.mxu3 %vm375_vm0, %v281_v15  ;;  %v2071_v14 = vsel %vm6799_vm3, %v2069_v4, %v2070_v9  ;;  %v1183_v15 = vshll.u32 %v1112_v58, 16  ;;  %614 = vst [vmem:[#allocation2 + $0x74] sm:$0x1] %v6619_v47  ;;  %v6479_v58 = vld [vmem:[%s6782_s24 + $0x40] sm:$0xff]  }
  0x2c   : > { %2308 = vmatpush.bf16.msrb.mxu3 %v6226_v40  ;;  %2622 = vmatpush.bf16.msrb.mxu0 %v6250_v50  ;;  %615 = vst [vmem:[#allocation2 + $0x78] sm:$0xf] %v6619_v47 }
  0x2d   : > { %1697 = vmatpush.bf16.msra.mxu1 %v6215_v60  ;;  %6515 = vmatpush.bf16.msra.mxu2 %v6215_v60  ;;  %616 = vst [vmem:[#allocation2 + $0x7c] sm:$0xf] %v6619_v47 }
  0x2e   : > { %617 = vst [vmem:[#allocation2 + $0x80] sm:$0x1] %v6619_v47 }
  0x2f   : > { %618 = vst [vmem:[#allocation2 + $0x84] sm:$0xf] %v6619_v47 }
  0x30   : > { %2309 = vmatpush.bf16.msrb.mxu3 %v6225_v45  ;;  %2623 = vmatpush.bf16.msrb.mxu0 %v6249_v55  ;;  %619 = vst [vmem:[#allocation2 + $0x88] sm:$0xf] %v6619_v47  ;;  %v6472_v55 = vld [vmem:[%s6782_s24 + $0x8] sm:$0xff]  }
  0x31   : > { %1698 = vmatpush.bf16.msra.mxu1 %v6214_v5  ;;  %6516 = vmatpush.bf16.msra.mxu2 %v6214_v5  ;;  %620 = vst [vmem:[#allocation2 + $0x8c] sm:$0x1] %v6619_v47  ;;  %v6331_v60 = vunpack.c.l.bf16 %v6472_v55 }
  0x32   : > { %621 = vst [vmem:[#allocation2 + $0x90] sm:$0xf] %v6619_v47 }
  0x33   : > { %5498 = vmatmul.msk.f32.gmra.mxu0 %vm375_vm0, %v265_v16  ;;  %5515 = vmatmul.msk.f32.gmra.mxu3 %vm375_vm0, %v282_v17  ;;  %v1189_v16 = vshll.u32 %v6756_v57, 16  ;;  %v2194_v17 = vunpack.c.l.b16 %v2068_v13  ;;  %622 = vst [vmem:[#allocation2 + $0x94] sm:$0xf] %v6619_v47 }
  0x34   : > { %2310 = vmatpush.bf16.msrb.mxu3 %v6224_v49  ;;  %2624 = vmatpush.bf16.msrb.mxu0 %v6248_v63  ;;  %623 = vst [vmem:[#allocation2 + $0x98] sm:$0x1] %v6619_v47 }
  0x35   : > { %624 = vst [vmem:[#allocation2 + $0x9c] sm:$0xf] %v6619_v47 }
  0x36   : > { %625 = vst [vmem:[#allocation2 + $0xa0] sm:$0xf] %v6619_v47 }
  0x37   : > { %626 = vst [vmem:[#allocation2 + $0xa4] sm:$0x1] %v6619_v47 }
  0x38   : > { %2311 = vmatpush.bf16.msrb.mxu3 %v6223_v54  ;;  %2625 = vmatpush.bf16.msrb.mxu0 %v6247_v7  ;;  %627 = vst [vmem:[#allocation2 + $0xa8] sm:$0xf] %v6619_v47  ;;  %v1004_v7 = vld [vmem:[#allocation2 + $0x14] sm:$0x1] }
  0x39   : > { %628 = vst [vmem:[#allocation2 + $0xac] sm:$0xf] %v6619_v47 }
  0x3a   : > { %629 = vst [vmem:[#allocation2 + $0xb0] sm:$0x1] %v6619_v47 }
  0x3b   : > { %5499 = vmatmul.msk.f32.gmra.mxu0 %vm375_vm0, %v266_v18  ;;  %5516 = vmatmul.msk.f32.gmra.mxu3 %vm375_vm0, %v283_v19  ;;  %v2195_v18 = vunpack.c.l.b16 %v2071_v14  ;;  %v6213_v19 = vld [vmem:[%s8639_s3 + $0x40] sm:$0xff]  ;;  %630 = vst [vmem:[#allocation2 + $0xb4] sm:$0xf] %v6619_v47 }
  0x3c   : > { %2312 = vmatpush.bf16.msrb.mxu3 %v6222_v61  ;;  %1699 = vmatpush.bf16.msra.mxu1 %v6213_v19  ;;  %v6360_v61 = vunpack.c.h.bf16 %v6479_v58  ;;  %631 = vst [vmem:[#allocation2 + $0xb8] sm:$0xf] %v6619_v47 }
  0x3d   : > { %6517 = vmatpush.bf16.msra.mxu2 %v6213_v19  ;;  %632 = vst [vmem:[#allocation2 + $0xbc] sm:$0x1] %v6619_v47  ;;  %v6480_v19 = vld [vmem:[%s6782_s24 + $0x48] sm:$0xff]  }
  0x3e   : > { %633 = vst [vmem:[#allocation2 + $0xc0] sm:$0xf] %v6619_v47 }
  0x3f   : > { %634 = vst [vmem:[#allocation2 + $0xc4] sm:$0xf] %v6619_v47 }
  0x40   : > { %2313 = vmatpush.bf16.msrb.mxu3 %v6221_v6  ;;  %635 = vst [vmem:[#allocation2 + $0xc8] sm:$0x1] %v6619_v47 }
  0x41   : > { %636 = vst [vmem:[#allocation2 + $0xcc] sm:$0xf] %v6619_v47 }
  0x42   : > { %637 = vst [vmem:[#allocation2 + $0xd0] sm:$0xf] %v6619_v47 }
  0x43   : > { %5500 = vmatmul.msk.f32.gmra.mxu0 %vm375_vm0, %v267_v20  ;;  %5517 = vmatmul.msk.f32.gmra.mxu3 %vm375_vm0, %v284_v21  ;;  %v6246_v20 = vld [vmem:[%s8639_s3 + $0xc8] sm:$0xff]  ;;  %v1185_v21 = vrot.slane %v1183_v15, 5  ;;  %638 = vst [vmem:[#allocation2 + $0xd4] sm:$0x1] %v6619_v47  ;;  %v6903_v47 = vld [vmem:[%s6782_s24 + $0x18] sm:$0xff]  }
  0x44   : > { %2626 = vmatpush.bf16.msrb.mxu0 %v6246_v20 }
  0x4b   : > { %5501 = vmatmul.msk.f32.gmra.mxu0 %vm375_vm0, %v268_v22  ;;  %5518 = vmatmul.msk.f32.gmra.mxu3 %vm375_vm0, %v285_v23  ;;  %v1191_v22 = vrot.slane %v1189_v16, 5  ;;  %v1193_v23 = vshrl.u32 %v6756_v57, 16  ;;  %v6332_v16 = vunpack.c.h.bf16 %v6472_v55 }
  0x53   : > { %5502 = vmatmul.msk.f32.gmra.mxu0 %vm375_vm0, %v269_v24  ;;  %5519 = vmatmul.msk.f32.gmra.mxu3 %vm375_vm0, %v286_v25  ;;  %v6327_v24 = vunpack.c.l.bf16 %v6804_v12  ;;  %v2226_v25 = vpack.c.b16 %v2195_v18, %v2194_v17  ;;  %v1060_v18 = vld [vmem:[#allocation2 + $0x74] sm:$0x1] }
  0x5b   : > { %5503 = vmatmul.msk.f32.gmra.mxu0 %vm375_vm0, %v270_v26  ;;  %5520 = vmatmul.msk.f32.gmra.mxu3 %vm375_vm0, %v287_v27  ;;  %v1199_v26 = vshll.u32 %v6773_v0, 16  ;;  %v1186_v27 = vor.u32 %v1185_v21, %v1182_v11 }
  0x5d   : > { %v1201_v35 = vrot.slane %v1199_v26, 5 }
  0x63   : > { %5504 = vmatmul.msk.f32.gmra.mxu0 %vm375_vm0, %v271_v28  ;;  %5521 = vmatmul.msk.f32.gmra.mxu3 %vm375_vm0, %v288_v29  ;;  %v1195_v28 = vrot.slane %v1193_v23, 4  ;;  %v8647_v29 = vmov 0 }
  0x64   : > { %v8648_v29 = vsel %vm6829_vm6, 4294967295, %v8647_v29 }
  0x65   : > { %8649 = vst [vmem:[#allocation6_spill] sm:$0xff] %v8648_v29  ;;  %v1196_v34 = vor.u32 %v1195_v28, %v1191_v22 }
  0x6b   : > { %5505 = vmatmul.msk.f32.gmra.mxu0 %vm375_vm0, %v272_v30  ;;  %5522 = vmatmul.msk.f32.gmra.mxu3 %vm375_vm0, %v289_v31  ;;  %v6245_v30 = vld [vmem:[%s8639_s3 + $0xc0] sm:$0xff] }
  0x6c   : > { %2627 = vmatpush.bf16.msrb.mxu0 %v6245_v30  ;;  %v1007_v30 = vld [vmem:[#allocation2 + $0x18] sm:$0xf] }
  0x73   : > { %5506 = vmatmul.msk.f32.gmra.mxu0 %vm375_vm0, %v273_v32  ;;  %5523 = vmatmul.msk.f32.gmra.mxu3 %vm375_vm0, %v290_v33  ;;  %v279_v32 = vld [vmem:[#allocation3 + $0x80] sm:$0xff]  ;;  %v1187_v33 = vrot.slane %v1186_v27, 4 }
  0x7b   : > { %5507 = vmatmul.msk.f32.gmra.mxu0 %vm375_vm0, %v274_v37  ;;  %5524 = vmatmul.msk.f32.gmra.mxu3 %vm375_vm0, %v291_v38  ;;  %v1192_v37 = vsel %vm6829_vm6, %v1187_v33, %v1191_v22  ;;  %v1197_v38 = vrot.slane %v1196_v34, 4  ;;  %v6363_v22 = vunpack.c.l.bf16 %v6480_v19 }
  0x7c   : > { %v1580_v40 = vunpack.c.l.b16 %v1192_v37  ;;  %v6896_v37 = vld [vmem:[%s6782_s24 + $0x10] sm:$0xff]  }
  0x83   : > { %5508 = vmatmul.msk.f32.gmra.mxu0 %vm375_vm0, %v275_v42  ;;  %5525 = vmatmul.msk.f32.gmra.mxu3 %vm375_vm0, %v292_v43  ;;  %v1202_v42 = vsel %vm6829_vm6, %v1197_v38, %v1201_v35 }
  0x84   : > { %v1581_v44 = vunpack.c.l.b16 %v1202_v42 }
  0x86   : > { %v1612_v48 = vpack.c.b16 %v1581_v44, %v1580_v40 }
  0x88   : > { %1700 = vmatmul.bf16.vlgmr.msra.gmra.mxu1 %v1612_v48 }
  0x8b   : > { %5509 = vmatmul.msk.f32.gmra.mxu0 %vm375_vm0, %v276_v51  ;;  %5526 = vmatmul.msk.f32.gmra.mxu3 %vm375_vm0, %v293_v52  ;;  %v998_v51 = vld [vmem:[#allocation2 + $0xc] sm:$0xf] }
  0x93   : > { %5510 = vmatmul.msk.f32.gmra.mxu0 %vm375_vm0, %v277_v56  ;;  %5527 = vmatmul.msk.f32.gmra.mxu3 %vm375_vm0, %v294_v59 }
  0x9b   : > { %5511 = vmatmul.msk.f32.gmra.mxu0 %vm375_vm0, %v278_v8  ;;  %2314 = vmatmul.bf16.vlgmr.msrb.gmra.mxu3 %v2226_v25 }
  0xa0   : > { %v489_v31 = vpop.f32.mrf.mxu0 }
  0xa1   : > { %v490_v36 = vadd.f32 %v6327_v24, %v489_v31 }
  0xa3   : > { %v639_v39 = vpack.c.bf16 %v490_v36, %v490_v36  ;;  %5512 = vmatmul.msk.f32.gmra.mxu0 %vm375_vm0, %v279_v32 }
  0xa5   : > { %v675_v43 = vshrl.u32 %v639_v39, 16  ;;  %v678_v46 = vshll.u32 %v639_v39, 16 }
  0xa6   : > { %v540_v49 = vpop.f32.mrf.mxu3 }
  0xa7   : > { %v677_v45 = vrot.slane %v675_v43, 7  ;;  %v541_v63 = vadd.f32 %v6360_v61, %v540_v49  ;;  %v6364_v49 = vunpack.c.h.bf16 %v6480_v19 }
  0xa8   : > { %v492_v52 = vpop.f32.mrf.mxu0 }
  0xa9   : > { %v680_v53 = vor.u32 %v678_v46, %v677_v45  ;;  %v493_v54 = vadd.f32 %v6328_v41, %v492_v52  ;;  %v656_v4 = vpack.c.bf16 %v541_v63, %v541_v63  ;;  %v681_v11 = vrot.slane %v677_v45, 4 }
  0xab   : > { %v999_v56 = vsel %vm6850_vm9, %v680_v53, %v998_v51  ;;  %v640_v57 = vpack.c.bf16 %v493_v54, %v493_v54  ;;  %v819_v9 = vshrl.u32 %v656_v4, 16  ;;  %v822_v13 = vshll.u32 %v656_v4, 16 }
  0xac   : > { %1000 = vst [vmem:[#allocation2 + $0xc] sm:$0xf] %v999_v56  ;;  %v6335_v53 = vunpack.c.l.bf16 %v6896_v37  ;;  %v6336_v54 = vunpack.c.h.bf16 %v6896_v37  ;;  %v6340_v4 = vunpack.c.h.bf16 %v6903_v47 }
  0xad   : > { %v683_v59 = vshrl.u32 %v640_v57, 16  ;;  %v686_v1 = vshll.u32 %v640_v57, 16  ;;  %v821_v17 = vrot.slane %v819_v9, 7  ;;  %v6339_v57 = vunpack.c.l.bf16 %v6903_v47 }
  0xae   : > { %v543_v0 = vpop.f32.mrf.mxu3 }
  0xaf   : > { %v685_v62 = vrot.slane %v683_v59, 7  ;;  %v6888_v25 = vor.u32 %v822_v13, %v821_v17  ;;  %v826_v26 = vrot.slane %v821_v17, 4  ;;  %v544_v32 = vadd.f32 %v6363_v22, %v543_v0  ;;  %v1011_v0 = vld [vmem:[#allocation2 + $0x20] sm:$0x1] }
  0xb0   : > { %v495_v2 = vpop.f32.mrf.mxu0 }
  0xb1   : > { %v496_v3 = vadd.f32 %v6331_v60, %v495_v2  ;;  %v688_v5 = vor.u32 %v686_v1, %v685_v62  ;;  %v690_v12 = vrot.slane %v685_v62, 4  ;;  %v1061_v38 = vsel %vm6877_vm14, %v826_v26, %v1060_v18  ;;  %v1063_v62 = vld [vmem:[#allocation2 + $0x78] sm:$0xf] }
  0xb2   : > { %v657_v39 = vpack.c.bf16 %v544_v32, %v544_v32  ;;  %1062 = vst [vmem:[#allocation2 + $0x74] sm:$0x1] %v1061_v38 }
  0xb3   : > { %v641_v8 = vpack.c.bf16 %v496_v3, %v496_v3  ;;  %v689_v20 = vsel %vm6870_vm13, %v681_v11, %v688_v5  ;;  %v1114_v23 = vld [vmem:[#allocation2 + $0xc] sm:$0xf]  ;;  %v1005_v28 = vsel %vm6877_vm14, %v690_v12, %v1004_v7 }
  0xb4   : > { %v1204_v27 = vshrl.u32 %v1114_v23, 16  ;;  %v1207_v33 = vshll.u32 %v1114_v23, 16  ;;  %1001 = vst [vmem:[#allocation2 + $0x10] sm:$0xf] %v689_v20  ;;  %v2015_v44 = vld [vmem:[#allocation2 + $0xc] sm:$0xe] }
  0xb5   : > { %v692_v15 = vshrl.u32 %v641_v8, 16  ;;  %v695_v21 = vshll.u32 %v641_v8, 16  ;;  %1006 = vst [vmem:[#allocation2 + $0x14] sm:$0x1] %v1005_v28  ;;  %v828_v45 = vshrl.u32 %v657_v39, 16  ;;  %v831_v46 = vshll.u32 %v657_v39, 16 }
  0xb6   : > { %v546_v36 = vpop.f32.mrf.mxu3  ;;  %v1206_v40 = vrot.slane %v1204_v27, 4  ;;  %v1209_v41 = vrot.slane %v1207_v33, 5  ;;  %v6905_v51 = vld [vmem:[#allocation2 + $0xc] sm:$0xf]  ;;  %v5673_v55 = vrot.slane %v2015_v44, 9 }
  0xb7   : > { %v6886_v24 = vrot.slane %v692_v15, 7  ;;  %v6909_v56 = vrot.slane %v828_v45, 7  ;;  %v547_v58 = vadd.f32 %v6364_v49, %v546_v36  ;;  %v2790_v63 = vshrl.u32 %v6905_v51, 16 }
  0xb8   : > { %v498_v31 = vpop.f32.mrf.mxu0  ;;  %v1210_v48 = vor.u32 %v1209_v41, %v1206_v40  ;;  %v2793_v5 = vshll.u32 %v6905_v51, 16 }
  0xb9   : > { %v697_v34 = vor.u32 %v695_v21, %v6886_v24  ;;  %v499_v35 = vadd.f32 %v6332_v16, %v498_v31  ;;  %v698_v59 = vrot.slane %v6886_v24, 4  ;;  %v833_v2 = vor.u32 %v831_v46, %v6909_v56  ;;  %v6933_v46 = vld [vmem:[%s6782_s24 + $0x50] sm:$0xff]  }
  0xba   : > { %v1211_v3 = vrot.slane %v1210_v48, 4  ;;  %v658_v13 = vpack.c.bf16 %v547_v58, %v547_v58  ;;  %v834_v33 = vrot.slane %v6909_v56, 4 }
  0xbb   : > { %v1008_v42 = vsel %vm6850_vm9, %v697_v34, %v1007_v30  ;;  %v642_v43 = vpack.c.bf16 %v499_v35, %v499_v35  ;;  %v6229_v9 = vld [vmem:[#allocation2 + $0xc] sm:$0xff]  ;;  %v1064_v17 = vsel %vm6850_vm9, %v833_v2, %v1063_v62 }
  0xbc   : > { %1009 = vst [vmem:[#allocation2 + $0x18] sm:$0xf] %v1008_v42  ;;  %v1115_v12 = vld [vmem:[#allocation2 + $0x10] sm:$0xf]  ;;  %v1161_v15 = vld [vmem:[#allocation2 + $0x14] sm:$0x1]  ;;  %2628 = vmatmul.bf16.vlgmr.msrb.gmra.mxu0 %v6229_v9 }
  0xbd   : > { %v700_v52 = vshrl.u32 %v642_v43, 16  ;;  %v703_v61 = vshll.u32 %v642_v43, 16  ;;  %v2074_v16 = vrot.slane %v1115_v12, 5  ;;  %v1213_v18 = vshll.u32 %v1115_v12, 16  ;;  %1065 = vst [vmem:[#allocation2 + $0x78] sm:$0xf] %v1064_v17 }
  0xbe   : > { %v1217_v19 = vshrl.u32 %v1115_v12, 16  ;;  %v549_v20 = vpop.f32.mrf.mxu3  ;;  %v2077_v24 = vrot.slane %v1161_v15, 5  ;;  %v1223_v34 = vshll.u32 %v1161_v15, 16  ;;  %v836_v39 = vshrl.u32 %v658_v13, 16  ;;  %v1014_v42 = vld [vmem:[#allocation2 + $0x24] sm:$0xf] }
  0xbf   : > { %v702_v60 = vrot.slane %v700_v52, 7  ;;  %v2075_v26 = vsel %vm6799_vm3, %v5673_v55, %v2074_v16  ;;  %v2076_v27 = vrot.slane %v2074_v16, 4  ;;  %v1215_v28 = vrot.slane %v1213_v18, 5 }
  0xc0   : > { %v501_v1 = vpop.f32.mrf.mxu0  ;;  %v1219_v30 = vrot.slane %v1217_v19, 4  ;;  %v2196_v43 = vunpack.c.l.b16 %v2075_v26  ;;  %v1225_v45 = vrot.slane %v1223_v34, 5  ;;  %v839_v55 = vshll.u32 %v658_v13, 16 }
  0xc1   : > { %v705_v7 = vor.u32 %v703_v61, %v702_v60  ;;  %v707_v8 = vrot.slane %v702_v60, 4  ;;  %v502_v11 = vadd.f32 %v6335_v53, %v501_v1  ;;  %v2078_v35 = vsel %vm6799_vm3, %v2076_v27, %v2077_v24  ;;  %v1067_v61 = vld [vmem:[#allocation2 + $0x80] sm:$0x1] }
  0xc2   : > { %v1216_v36 = vsel %vm6829_vm6, %v1211_v3, %v1215_v28  ;;  %v1220_v38 = vor.u32 %v1219_v30, %v1215_v28  ;;  %v2197_v44 = vunpack.c.l.b16 %v2078_v35  ;;  %v838_v53 = vrot.slane %v836_v39, 7 }
  0xc3   : > { %v706_v21 = vsel %vm6870_vm13, %v698_v59, %v705_v7  ;;  %v1012_v22 = vsel %vm6877_vm14, %v707_v8, %v1011_v0  ;;  %v643_v23 = vpack.c.bf16 %v502_v11, %v502_v11  ;;  %v2016_v40 = vld [vmem:[#allocation2 + $0x18] sm:$0xe]  ;;  %v1582_v52 = vunpack.c.l.b16 %v1216_v36 }
  0xc4   : > { %1010 = vst [vmem:[#allocation2 + $0x1c] sm:$0xf] %v706_v21  ;;  %v1221_v49 = vrot.slane %v1220_v38, 4  ;;  %v1116_v56 = vld [vmem:[#allocation2 + $0x18] sm:$0xf]  ;;  %v2227_v59 = vpack.c.b16 %v2197_v44, %v2196_v43  ;;  %v5674_v62 = vrot.slane %v2016_v40, 9  ;;  %v841_v1 = vor.u32 %v839_v55, %v838_v53 }
  0xc5   : > { %1013 = vst [vmem:[#allocation2 + $0x20] sm:$0x1] %v1012_v22  ;;  %v709_v31 = vshrl.u32 %v643_v23, 16  ;;  %v712_v32 = vshll.u32 %v643_v23, 16  ;;  %v843_v2 = vrot.slane %v838_v53, 4  ;;  %v6367_v3 = vunpack.c.l.bf16 %v6933_v46 }
  0xc6   : > { %v1226_v0 = vsel %vm6829_vm6, %v1221_v49, %v1225_v45  ;;  %2319 = vmatmul.bf16.gmra.mxu3 %v2227_v59  ;;  %v1228_v12 = vshrl.u32 %v1116_v56, 16  ;;  %v842_v37 = vsel %vm6870_vm13, %v834_v33, %v841_v1  ;;  %v6947_v17 = vpop.f32.mrf.mxu3  ;;  %v1018_v33 = vld [vmem:[#allocation2 + $0x2c] sm:$0x1] }
  0xc7   : > { %v6930_v41 = vrot.slane %v709_v31, 7  ;;  %v1583_v9 = vunpack.c.l.b16 %v1226_v0  ;;  %v550_v16 = vadd.f32 %v6367_v3, %v549_v20  ;;  %1066 = vst [vmem:[#allocation2 + $0x7c] sm:$0xf] %v842_v37  ;;  %v1231_v20 = vshll.u32 %v1116_v56, 16 }
  0xc8   : > { %v504_v48 = vpop.f32.mrf.mxu0  ;;  %v1230_v31 = vrot.slane %v1228_v12, 4 }
  0xc9   : > { %v714_v58 = vor.u32 %v712_v32, %v6930_v41  ;;  %v505_v60 = vadd.f32 %v6336_v54, %v504_v48  ;;  %v1068_v54 = vsel %vm6877_vm14, %v843_v2, %v1067_v61  ;;  %v715_v18 = vrot.slane %v6930_v41, 4 }
  0xca   : > { %v1613_v22 = vpack.c.b16 %v1583_v9, %v1582_v52  ;;  %1069 = vst [vmem:[#allocation2 + $0x80] sm:$0x1] %v1068_v54  ;;  %v659_v27 = vpack.c.bf16 %v550_v16, %v550_v16  ;;  %v1233_v45 = vrot.slane %v1231_v20, 5  ;;  %v6968_v9 = vld [vmem:[%s6782_s24 + $0x58] sm:$0xff]   ;;  %v6368_v54 = vunpack.c.h.bf16 %v6933_v46 }
  0xcb   : > { %v1015_v7 = vsel %vm6850_vm9, %v714_v58, %v1014_v42  ;;  %v644_v8 = vpack.c.bf16 %v505_v60, %v505_v60  ;;  %v1117_v11 = vld [vmem:[#allocation2 + $0x1c] sm:$0xf]  ;;  %v1070_v58 = vld [vmem:[#allocation2 + $0x84] sm:$0xf] }
  0xcc   : > { %1016 = vst [vmem:[#allocation2 + $0x24] sm:$0xf] %v1015_v7  ;;  %v1162_v13 = vld [vmem:[#allocation2 + $0x20] sm:$0x1]  ;;  %v2081_v15 = vrot.slane %v1117_v11, 5  ;;  %1705 = vmatmul.bf16.gmra.mxu1 %v1613_v22  ;;  %v6230_v30 = vld [vmem:[#allocation2 + $0x18] sm:$0xff]  ;;  %v1234_v60 = vor.u32 %v1233_v45, %v1230_v31 }
  0xcd   : > { %v717_v19 = vshrl.u32 %v644_v8, 16  ;;  %v720_v21 = vshll.u32 %v644_v8, 16  ;;  %v2084_v26 = vrot.slane %v1162_v13, 5  ;;  %v1237_v32 = vshll.u32 %v1117_v11, 16  ;;  %2633 = vmatmul.bf16.gmra.mxu0 %v6230_v30  ;;  %v1021_v22 = vld [vmem:[#allocation2 + $0x30] sm:$0xf] }
  0xce   : > { %v2082_v23 = vsel %vm6799_vm3, %v5674_v62, %v2081_v15  ;;  %v2083_v24 = vrot.slane %v2081_v15, 4  ;;  %v845_v36 = vshrl.u32 %v659_v27, 16  ;;  %v848_v38 = vshll.u32 %v659_v27, 16  ;;  %v6965_v62 = vld [vmem:[%s6782_s24 + $0x20] sm:$0xff]   ;;  %v555_v1 = vpop.f32.mrf.mxu3 }
  0xcf   : > { %v719_v28 = vrot.slane %v717_v19, 7  ;;  %v1241_v39 = vshrl.u32 %v1117_v11, 16  ;;  %v1239_v48 = vrot.slane %v1237_v32, 5  ;;  %v2198_v56 = vunpack.c.l.b16 %v2082_v23 }
  0xd0   : > { %v507_v34 = vpop.f32.mrf.mxu0  ;;  %v2085_v35 = vsel %vm6799_vm3, %v2083_v24, %v2084_v26  ;;  %v6956_v44 = vrot.slane %v845_v36, 7  ;;  %v1247_v8 = vshll.u32 %v1162_v13, 16  ;;  %v1235_v12 = vrot.slane %v1234_v60, 4 }
  0xd1   : > { %v722_v40 = vor.u32 %v720_v21, %v719_v28  ;;  %v724_v41 = vrot.slane %v719_v28, 4  ;;  %v508_v42 = vadd.f32 %v6339_v57, %v507_v34  ;;  %v2199_v43 = vunpack.c.l.b16 %v2085_v35 }
  0xd2   : > { %v1243_v49 = vrot.slane %v1241_v39, 4  ;;  %v850_v57 = vor.u32 %v848_v38, %v6956_v44  ;;  %v851_v59 = vrot.slane %v6956_v44, 4  ;;  %v6343_v19 = vunpack.c.l.bf16 %v6965_v62  ;;  %v7013_v44 = vld [vmem:[%s6782_s24 + $0x28] sm:$0xff]  }
  0xd3   : > { %v723_v52 = vsel %vm6870_vm13, %v715_v18, %v722_v40  ;;  %v1019_v53 = vsel %vm6877_vm14, %v724_v41, %v1018_v33  ;;  %v645_v55 = vpack.c.bf16 %v508_v42, %v508_v42  ;;  %v2017_v0 = vld [vmem:[#allocation2 + $0x24] sm:$0xe]  ;;  %v2228_v7 = vpack.c.b16 %v2199_v43, %v2198_v56 }
  0xd4   : > { %1017 = vst [vmem:[#allocation2 + $0x28] sm:$0xf] %v723_v52  ;;  %v1244_v61 = vor.u32 %v1243_v49, %v1239_v48  ;;  %v1071_v11 = vsel %vm6850_vm9, %v850_v57, %v1070_v58  ;;  %v1118_v15 = vld [vmem:[#allocation2 + $0x24] sm:$0xf]  ;;  %v1249_v18 = vrot.slane %v1247_v8, 5  ;;  %v5675_v21 = vrot.slane %v2017_v0, 9 }
  0xd5   : > { %1020 = vst [vmem:[#allocation2 + $0x2c] sm:$0x1] %v1019_v53  ;;  %v726_v2 = vshrl.u32 %v645_v55, 16  ;;  %v729_v3 = vshll.u32 %v645_v55, 16  ;;  %v1240_v13 = vsel %vm6829_vm6, %v1235_v12, %v1239_v48  ;;  %v553_v24 = vadd.f32 %v6368_v54, %v6947_v17 }
  0xd6   : > { %v1245_v37 = vrot.slane %v1244_v61, 4  ;;  %1072 = vst [vmem:[#allocation2 + $0x84] sm:$0xf] %v1071_v11  ;;  %v6344_v26 = vunpack.c.h.bf16 %v6965_v62  ;;  %v6371_v27 = vunpack.c.l.bf16 %v6968_v9  ;;  %v1252_v31 = vshrl.u32 %v1118_v15, 16  ;;  %2324 = vmatmul.bf16.gmra.mxu3 %v2228_v7  ;;  %v6991_v43 = vpop.f32.mrf.mxu3  ;;  %v1074_v61 = vld [vmem:[#allocation2 + $0x8c] sm:$0x1] }
  0xd7   : > { %v6973_v16 = vrot.slane %v726_v2, 7  ;;  %v1584_v20 = vunpack.c.l.b16 %v1240_v13  ;;  %v660_v33 = vpack.c.bf16 %v553_v24, %v553_v24  ;;  %v1255_v39 = vshll.u32 %v1118_v15, 16 }
  0xd8   : > { %v510_v23 = vpop.f32.mrf.mxu0  ;;  %v1250_v30 = vsel %vm6829_vm6, %v1245_v37, %v1249_v18  ;;  %v556_v34 = vadd.f32 %v6371_v27, %v555_v1  ;;  %v1254_v52 = vrot.slane %v1252_v31, 4 }
  0xd9   : > { %v731_v46 = vor.u32 %v729_v3, %v6973_v16  ;;  %v511_v28 = vadd.f32 %v6340_v4, %v510_v23  ;;  %v1585_v32 = vunpack.c.l.b16 %v1250_v30  ;;  %v732_v35 = vrot.slane %v6973_v16, 4  ;;  %v1025_v3 = vld [vmem:[#allocation2 + $0x38] sm:$0x1] }
  0xda   : > { %v853_v4 = vshrl.u32 %v660_v33, 16  ;;  %v856_v40 = vshll.u32 %v660_v33, 16  ;;  %v661_v42 = vpack.c.bf16 %v556_v34, %v556_v34  ;;  %v1257_v2 = vrot.slane %v1255_v39, 5 }
  0xdb   : > { %v1022_v17 = vsel %vm6850_vm9, %v731_v46, %v1021_v22  ;;  %v646_v36 = vpack.c.bf16 %v511_v28, %v511_v28  ;;  %v6989_v38 = vld [vmem:[#allocation2 + $0x28] sm:$0xf]  ;;  %v1614_v47 = vpack.c.b16 %v1585_v32, %v1584_v20  ;;  %v1077_v22 = vld [vmem:[#allocation2 + $0x90] sm:$0xf] }
  0xdc   : > { %1023 = vst [vmem:[#allocation2 + $0x30] sm:$0xf] %v1022_v17  ;;  %v1163_v41 = vld [vmem:[#allocation2 + $0x2c] sm:$0x1]  ;;  %v2088_v49 = vrot.slane %v6989_v38, 5  ;;  %v855_v53 = vrot.slane %v853_v4, 7  ;;  %v1258_v31 = vor.u32 %v1257_v2, %v1254_v52  ;;  %v6347_v4 = vunpack.c.l.bf16 %v7013_v44 }
  0xdd   : > { %v734_v45 = vshrl.u32 %v646_v36, 16  ;;  %v737_v48 = vshll.u32 %v646_v36, 16  ;;  %v2091_v55 = vrot.slane %v1163_v41, 5  ;;  %v862_v56 = vshrl.u32 %v661_v42, 16  ;;  %1710 = vmatmul.bf16.gmra.mxu1 %v1614_v47  ;;  %v6231_v60 = vld [vmem:[#allocation2 + $0x24] sm:$0xff] }
  0xde   : > { %v865_v58 = vshll.u32 %v661_v42, 16  ;;  %v2089_v0 = vsel %vm6799_vm3, %v5675_v21, %v2088_v49  ;;  %v2090_v1 = vrot.slane %v2088_v49, 4  ;;  %v858_v8 = vor.u32 %v856_v40, %v855_v53  ;;  %2638 = vmatmul.bf16.gmra.mxu0 %v6231_v60  ;;  %v561_v33 = vpop.f32.mrf.mxu3  ;;  %v7022_v42 = vld [vmem:[%s6782_s24 + $0x60] sm:$0xff]  }
  0xdf   : > { %v736_v57 = vrot.slane %v734_v45, 7  ;;  %v860_v11 = vrot.slane %v855_v53, 4  ;;  %v6996_v12 = vrot.slane %v862_v56, 7  ;;  %v1261_v37 = vshll.u32 %v6989_v38, 16  ;;  %v7025_v45 = vld [vmem:[%s6782_s24 + $0x30] sm:$0xff]  }
  0xe0   : > { %v513_v7 = vpop.f32.mrf.mxu0  ;;  %v2092_v18 = vsel %vm6799_vm3, %v2090_v1, %v2091_v55  ;;  %v859_v21 = vsel %vm6870_vm13, %v851_v59, %v858_v8  ;;  %v2200_v28 = vunpack.c.l.b16 %v2089_v0  ;;  %v1265_v17 = vshrl.u32 %v6989_v38, 16  ;;  %v1028_v55 = vld [vmem:[#allocation2 + $0x3c] sm:$0xf] }
  0xe1   : > { %v739_v54 = vor.u32 %v737_v48, %v736_v57  ;;  %v741_v15 = vrot.slane %v736_v57, 4  ;;  %v514_v16 = vadd.f32 %v6343_v19, %v513_v7  ;;  %v1075_v23 = vsel %vm6877_vm14, %v860_v11, %v1074_v61  ;;  %1073 = vst [vmem:[#allocation2 + $0x88] sm:$0xf] %v859_v21 }
  0xe2   : > { %v2201_v13 = vunpack.c.l.b16 %v2092_v18  ;;  %v867_v24 = vor.u32 %v865_v58, %v6996_v12  ;;  %v868_v59 = vrot.slane %v6996_v12, 4  ;;  %v1263_v20 = vrot.slane %v1261_v37, 5  ;;  %1076 = vst [vmem:[#allocation2 + $0x8c] sm:$0x1] %v1075_v23 }
  0xe3   : > { %v740_v27 = vsel %vm6870_vm13, %v732_v35, %v739_v54  ;;  %v1026_v19 = vsel %vm6877_vm14, %v741_v15, %v1025_v3  ;;  %v647_v46 = vpack.c.bf16 %v514_v16, %v514_v16  ;;  %v2018_v32 = vld [vmem:[#allocation2 + $0x30] sm:$0xe]  ;;  %v1271_v36 = vshll.u32 %v1163_v41, 16 }
  0xe4   : > { %1024 = vst [vmem:[#allocation2 + $0x34] sm:$0xf] %v740_v27  ;;  %v1078_v30 = vsel %vm6850_vm9, %v867_v24, %v1077_v22  ;;  %v2229_v35 = vpack.c.b16 %v2201_v13, %v2200_v28  ;;  %v1259_v47 = vrot.slane %v1258_v31, 4  ;;  %v6372_v40 = vunpack.c.h.bf16 %v6968_v9  ;;  %v1120_v57 = vld [vmem:[#allocation2 + $0x30] sm:$0xf] }
  0xe5   : > { %1027 = vst [vmem:[#allocation2 + $0x38] sm:$0x1] %v1026_v19  ;;  %v743_v34 = vshrl.u32 %v647_v46, 16  ;;  %v746_v39 = vshll.u32 %v647_v46, 16  ;;  %v1267_v49 = vrot.slane %v1265_v17, 4  ;;  %v1273_v52 = vrot.slane %v1271_v36, 5 }
  0xe6   : > { %1079 = vst [vmem:[#allocation2 + $0x90] sm:$0xf] %v1078_v30  ;;  %v5676_v53 = vrot.slane %v2018_v32, 9  ;;  %v1264_v41 = vsel %vm6829_vm6, %v1259_v47, %v1263_v20  ;;  %v559_v56 = vadd.f32 %v6372_v40, %v6991_v43  ;;  %v6348_v58 = vunpack.c.h.bf16 %v7013_v44  ;;  %2329 = vmatmul.bf16.gmra.mxu3 %v2229_v35  ;;  %v564_v21 = vpop.f32.mrf.mxu3  ;;  %v1081_v32 = vld [vmem:[#allocation2 + $0x98] sm:$0x1] }
  0xe7   : > { %v7027_v48 = vrot.slane %v743_v34, 7  ;;  %v6375_v9 = vunpack.c.l.bf16 %v7022_v42  ;;  %v1268_v0 = vor.u32 %v1267_v49, %v1263_v20  ;;  %v6351_v1 = vunpack.c.l.bf16 %v7025_v45  ;;  %v1032_v17 = vld [vmem:[#allocation2 + $0x44] sm:$0x1] }
  0xe8   : > { %v516_v38 = vpop.f32.mrf.mxu0  ;;  %v662_v3 = vpack.c.bf16 %v559_v56, %v559_v56  ;;  %v1276_v8 = vshrl.u32 %v1120_v57, 16  ;;  %v1279_v15 = vshll.u32 %v1120_v57, 16  ;;  %v1586_v62 = vunpack.c.l.b16 %v1264_v41  ;;  %v1088_v44 = vld [vmem:[#allocation2 + $0xa4] sm:$0x1] }
  0xe9   : > { %v748_v60 = vor.u32 %v746_v39, %v7027_v48  ;;  %v517_v61 = vadd.f32 %v6344_v26, %v516_v38  ;;  %v749_v2 = vrot.slane %v7027_v48, 4  ;;  %v562_v7 = vadd.f32 %v6375_v9, %v561_v33 }
  0xea   : > { %v1269_v37 = vrot.slane %v1268_v0, 4  ;;  %v870_v26 = vshrl.u32 %v662_v3, 16  ;;  %v873_v16 = vshll.u32 %v662_v3, 16  ;;  %v6376_v27 = vunpack.c.h.bf16 %v7022_v42 }
  0xeb   : > { %v1029_v43 = vsel %vm6850_vm9, %v748_v60, %v1028_v55  ;;  %v648_v11 = vpack.c.bf16 %v517_v61, %v517_v61  ;;  %v7041_v54 = vld [vmem:[#allocation2 + $0x34] sm:$0xf]  ;;  %v663_v22 = vpack.c.bf16 %v562_v7, %v562_v7  ;;  %v1084_v60 = vld [vmem:[#allocation2 + $0x9c] sm:$0xf]  ;;  %v1278_v12 = vrot.slane %v1276_v8, 4 }
  0xec   : > { %1030 = vst [vmem:[#allocation2 + $0x3c] sm:$0xf] %v1029_v43  ;;  %v7043_v18 = vld [vmem:[#allocation2 + $0x38] sm:$0x1]  ;;  %v1274_v13 = vsel %vm6829_vm6, %v1269_v37, %v1273_v52  ;;  %v2095_v24 = vrot.slane %v7041_v54, 5  ;;  %v872_v28 = vrot.slane %v870_v26, 7 }
  0xed   : > { %v751_v23 = vshrl.u32 %v648_v11, 16  ;;  %v754_v19 = vshll.u32 %v648_v11, 16  ;;  %v1587_v46 = vunpack.c.l.b16 %v1274_v13  ;;  %v879_v30 = vshrl.u32 %v663_v22, 16  ;;  %v6232_v20 = vld [vmem:[#allocation2 + $0x30] sm:$0xff] }
  0xee   : > { %v2096_v33 = vsel %vm6799_vm3, %v5676_v53, %v2095_v24  ;;  %v2097_v34 = vrot.slane %v2095_v24, 4  ;;  %v2098_v35 = vrot.slane %v7043_v18, 5  ;;  %v875_v47 = vor.u32 %v873_v16, %v872_v28  ;;  %2643 = vmatmul.bf16.gmra.mxu0 %v6232_v20 }
  0xef   : > { %v753_v31 = vrot.slane %v751_v23, 7  ;;  %v1615_v36 = vpack.c.b16 %v1587_v46, %v1586_v62  ;;  %v877_v40 = vrot.slane %v872_v28, 4  ;;  %v882_v48 = vshll.u32 %v663_v22, 16  ;;  %v567_v62 = vpop.f32.mrf.mxu3  ;;  %v1035_v46 = vld [vmem:[#allocation2 + $0x48] sm:$0xf] }
  0xf0   : > { %v519_v39 = vpop.f32.mrf.mxu0  ;;  %v2099_v55 = vsel %vm6799_vm3, %v2097_v34, %v2098_v35  ;;  %v876_v53 = vsel %vm6870_vm13, %v868_v59, %v875_v47  ;;  %v7060_v56 = vrot.slane %v879_v30, 7  ;;  %v2202_v61 = vunpack.c.l.b16 %v2096_v33 }
  0xf1   : > { %v756_v42 = vor.u32 %v754_v19, %v753_v31  ;;  %v758_v49 = vrot.slane %v753_v31, 4  ;;  %v520_v52 = vadd.f32 %v6347_v4, %v519_v39  ;;  %1715 = vmatmul.bf16.gmra.mxu1 %v1615_v36  ;;  %v1082_v38 = vsel %vm6877_vm14, %v877_v40, %v1081_v32  ;;  %1080 = vst [vmem:[#allocation2 + $0x94] sm:$0xf] %v876_v53  ;;  %v7076_v19 = vld [vmem:[%s6782_s24 + $0x68] sm:$0xff]  }
  0xf2   : > { %v2203_v41 = vunpack.c.l.b16 %v2099_v55  ;;  %v884_v59 = vor.u32 %v882_v48, %v7060_v56  ;;  %v885_v0 = vrot.slane %v7060_v56, 4  ;;  %v1281_v3 = vrot.slane %v1279_v15, 5  ;;  %1083 = vst [vmem:[#allocation2 + $0x98] sm:$0x1] %v1082_v38 }
  0xf3   : > { %v757_v9 = vsel %vm6870_vm13, %v749_v2, %v756_v42  ;;  %v1033_v4 = vsel %vm6877_vm14, %v758_v49, %v1032_v17  ;;  %v649_v57 = vpack.c.bf16 %v520_v52, %v520_v52  ;;  %v2019_v7 = vld [vmem:[#allocation2 + $0x3c] sm:$0xe]  ;;  %v1285_v11 = vshll.u32 %v7041_v54, 16 }
  0xf4   : > { %1031 = vst [vmem:[#allocation2 + $0x40] sm:$0xf] %v757_v9  ;;  %v1289_v37 = vshrl.u32 %v7041_v54, 16  ;;  %v1085_v8 = vsel %vm6850_vm9, %v884_v59, %v1084_v60  ;;  %v1282_v26 = vor.u32 %v1281_v3, %v1278_v12  ;;  %v1295_v16 = vshll.u32 %v7043_v18, 16 }
  0xf5   : > { %1034 = vst [vmem:[#allocation2 + $0x44] sm:$0x1] %v1033_v4  ;;  %v760_v43 = vshrl.u32 %v649_v57, 16  ;;  %v763_v2 = vshll.u32 %v649_v57, 16  ;;  %v565_v22 = vadd.f32 %v6376_v27, %v564_v21  ;;  %v2230_v15 = vpack.c.b16 %v2203_v41, %v2202_v61  ;;  %v1122_v4 = vld [vmem:[#allocation2 + $0x3c] sm:$0xf] }
  0xf6   : > { %1086 = vst [vmem:[#allocation2 + $0x9c] sm:$0xf] %v1085_v8  ;;  %v1287_v13 = vrot.slane %v1285_v11, 5  ;;  %v1291_v24 = vrot.slane %v1289_v37, 4  ;;  %v1283_v54 = vrot.slane %v1282_v26, 4  ;;  %v1297_v30 = vrot.slane %v1295_v16, 5 }
  0xf7   : > { %v7073_v23 = vrot.slane %v760_v43, 7  ;;  %v664_v31 = vpack.c.bf16 %v565_v22, %v565_v22  ;;  %v5677_v20 = vrot.slane %v2019_v7, 9  ;;  %v6352_v27 = vunpack.c.h.bf16 %v7025_v45  ;;  %2334 = vmatmul.bf16.gmra.mxu3 %v2230_v15  ;;  %v7095_v59 = vpop.f32.mrf.mxu3  ;;  %v1039_v37 = vld [vmem:[#allocation2 + $0x50] sm:$0x1] }
  0xf8   : > { %v522_v28 = vpop.f32.mrf.mxu0  ;;  %v1292_v21 = vor.u32 %v1291_v24, %v1287_v13  ;;  %v1288_v33 = vsel %vm6829_vm6, %v1283_v54, %v1287_v13  ;;  %v6379_v17 = vunpack.c.l.bf16 %v7076_v19  ;;  %v1300_v22 = vshrl.u32 %v1122_v4, 16 }
  0xf9   : > { %v765_v32 = vor.u32 %v763_v2, %v7073_v23  ;;  %v523_v18 = vadd.f32 %v6348_v58, %v522_v28  ;;  %v887_v34 = vshrl.u32 %v664_v31, 16  ;;  %v890_v35 = vshll.u32 %v664_v31, 16 }
  0xfa   : > { %v766_v36 = vrot.slane %v7073_v23, 4  ;;  %v1293_v40 = vrot.slane %v1292_v21, 4  ;;  %v1588_v48 = vunpack.c.l.b16 %v1288_v33  ;;  %v568_v55 = vadd.f32 %v6379_v17, %v567_v62 }
  0xfb   : > { %v1036_v39 = vsel %vm6850_vm9, %v765_v32, %v1035_v46  ;;  %v650_v47 = vpack.c.bf16 %v523_v18, %v523_v18  ;;  %v1123_v58 = vld [vmem:[#allocation2 + $0x40] sm:$0xf]  ;;  %v889_v42 = vrot.slane %v887_v34, 7  ;;  %v7108_v46 = vld [vmem:[%s6782_s24 + $0x38] sm:$0xff]   ;;  %v1302_v54 = vrot.slane %v1300_v22, 4 }
  0xfc   : > { %1037 = vst [vmem:[#allocation2 + $0x48] sm:$0xf] %v1036_v39  ;;  %v7088_v49 = vld [vmem:[#allocation2 + $0x44] sm:$0x1]  ;;  %v2102_v52 = vrot.slane %v1123_v58, 5  ;;  %v1298_v41 = vsel %vm6829_vm6, %v1293_v40, %v1297_v30  ;;  %v6233_v7 = vld [vmem:[#allocation2 + $0x3c] sm:$0xff]  ;;  %v665_v11 = vpack.c.bf16 %v568_v55, %v568_v55 }
  0xfd   : > { %v768_v53 = vshrl.u32 %v650_v47, 16  ;;  %v771_v38 = vshll.u32 %v650_v47, 16  ;;  %v2105_v9 = vrot.slane %v7088_v49, 5  ;;  %v1589_v57 = vunpack.c.l.b16 %v1298_v41  ;;  %v6260_v41 = vld [vmem:[%s8639_s3 + $0x138] sm:$0xff] }
  0xfe   : > { %v892_v60 = vor.u32 %v890_v35, %v889_v42  ;;  %v894_v12 = vrot.slane %v889_v42, 4  ;;  %v2103_v61 = vsel %vm6799_vm3, %v5677_v20, %v2102_v52  ;;  %v2104_v43 = vrot.slane %v2102_v52, 4  ;;  %2648 = vmatmul.bf16.gmra.mxu0 %v6233_v7  ;;  %v1091_v20 = vld [vmem:[#allocation2 + $0xa8] sm:$0xf]  ;;  %3302 = vmatpush.bf16.msrb.mxu1 %v6260_v41 }
  0xff   : > { %v770_v3 = vrot.slane %v768_v53, 7  ;;  %v2204_v2 = vunpack.c.l.b16 %v2103_v61  ;;  %v1616_v62 = vpack.c.b16 %v1589_v57, %v1588_v48  ;;  %v896_v28 = vshrl.u32 %v665_v11, 16  ;;  %v573_v61 = vpop.f32.mrf.mxu3 }
 0x100   : > { %v525_v8 = vpop.f32.mrf.mxu0  ;;  %v893_v26 = vsel %vm6870_vm13, %v885_v0, %v892_v60  ;;  %v1089_v16 = vsel %vm6877_vm14, %v894_v12, %v1088_v44  ;;  %v2106_v24 = vsel %vm6799_vm3, %v2104_v43, %v2105_v9  ;;  %v899_v0 = vshll.u32 %v665_v11, 16  ;;  %v1042_v9 = vld [vmem:[#allocation2 + $0x54] sm:$0xf] }
 0x101   : > { %v773_v23 = vor.u32 %v771_v38, %v770_v3  ;;  %v775_v15 = vrot.slane %v770_v3, 4  ;;  %v526_v13 = vadd.f32 %v6351_v1, %v525_v8  ;;  %1087 = vst [vmem:[#allocation2 + $0xa0] sm:$0xf] %v893_v26  ;;  %1720 = vmatmul.bf16.gmra.mxu1 %v1616_v62  ;;  %v2205_v56 = vunpack.c.l.b16 %v2106_v24  ;;  %v7126_v38 = vld [vmem:[%s6782_s24 + $0x70] sm:$0xff]  }
 0x102   : > { %1090 = vst [vmem:[#allocation2 + $0xa4] sm:$0x1] %v1089_v16  ;;  %v1303_v32 = vshll.u32 %v1122_v4, 16  ;;  %v7116_v21 = vrot.slane %v896_v28, 7  ;;  %v1309_v33 = vshll.u32 %v1123_v58, 16  ;;  %v1313_v34 = vshrl.u32 %v1123_v58, 16 }
 0x103   : > { %v774_v30 = vsel %vm6870_vm13, %v766_v36, %v773_v23  ;;  %v1040_v31 = vsel %vm6877_vm14, %v775_v15, %v1039_v37  ;;  %v651_v1 = vpack.c.bf16 %v526_v13, %v526_v13  ;;  %v7114_v18 = vld [vmem:[#allocation2 + $0x48] sm:$0xe]  ;;  %v6355_v35 = vunpack.c.l.bf16 %v7108_v46  ;;  %v6259_v11 = vld [vmem:[%s8639_s3 + $0x130] sm:$0xff] }
 0x104   : > { %1038 = vst [vmem:[#allocation2 + $0x4c] sm:$0xf] %v774_v30  ;;  %v2231_v36 = vpack.c.b16 %v2205_v56, %v2204_v2  ;;  %v1305_v39 = vrot.slane %v1303_v32, 5  ;;  %v1319_v47 = vshll.u32 %v7088_v49, 16  ;;  %v901_v44 = vor.u32 %v899_v0, %v7116_v21  ;;  %v1124_v3 = vld [vmem:[#allocation2 + $0x48] sm:$0xf]  ;;  %3303 = vmatpush.bf16.msrb.mxu1 %v6259_v11 }
 0x105   : > { %1041 = vst [vmem:[#allocation2 + $0x50] sm:$0x1] %v1040_v31  ;;  %v777_v17 = vshrl.u32 %v651_v1, 16  ;;  %v780_v40 = vshll.u32 %v651_v1, 16  ;;  %v1311_v48 = vrot.slane %v1309_v33, 5  ;;  %v1315_v42 = vrot.slane %v1313_v34, 4 }
 0x106   : > { %v902_v55 = vrot.slane %v7116_v21, 4  ;;  %v1306_v53 = vor.u32 %v1305_v39, %v1302_v54  ;;  %v6380_v58 = vunpack.c.h.bf16 %v7076_v19  ;;  %v1092_v4 = vsel %vm6850_vm9, %v901_v44, %v1091_v20  ;;  %v6258_v31 = vld [vmem:[%s8639_s3 + $0x128] sm:$0xff]  ;;  %v6256_v21 = vld [vmem:[%s8639_s3 + $0x118] sm:$0xff] }
 0x107   : > { %v7121_v52 = vrot.slane %v777_v17, 7  ;;  %v1316_v57 = vor.u32 %v1315_v42, %v1311_v48  ;;  %v1321_v60 = vrot.slane %v1319_v47, 5  ;;  %v5678_v12 = vrot.slane %v7114_v18, 9  ;;  %1093 = vst [vmem:[#allocation2 + $0xa8] sm:$0xf] %v1092_v4  ;;  %2339 = vmatmul.bf16.gmra.mxu3 %v2231_v36  ;;  %v6257_v4 = vld [vmem:[%s8639_s3 + $0x120] sm:$0xff] }
 0x108   : > { %v528_v49 = vpop.f32.mrf.mxu0  ;;  %v1307_v43 = vrot.slane %v1306_v53, 4  ;;  %v6356_v2 = vunpack.c.h.bf16 %v7108_v46  ;;  %v571_v8 = vadd.f32 %v6380_v58, %v7095_v59  ;;  %v6383_v26 = vunpack.c.l.bf16 %v7126_v38  ;;  %v1046_v47 = vld [vmem:[#allocation2 + $0x5c] sm:$0x1]  ;;  %3304 = vmatpush.bf16.msrb.mxu1 %v6258_v31  ;;  %v6541_v31 = vld [vmem:[%s6782_s24 + $0x40] sm:$0xff]  }
 0x109   : > { %v782_v7 = vor.u32 %v780_v40, %v7121_v52  ;;  %v529_v19 = vadd.f32 %v6352_v27, %v528_v49  ;;  %v783_v37 = vrot.slane %v7121_v52, 4  ;;  %v1317_v62 = vrot.slane %v1316_v57, 4 }
 0x10a   : > { %v1312_v16 = vsel %vm6829_vm6, %v1307_v43, %v1311_v48  ;;  %v1324_v23 = vshrl.u32 %v1124_v3, 16  ;;  %v666_v13 = vpack.c.bf16 %v571_v8, %v571_v8  ;;  %v1327_v56 = vshll.u32 %v1124_v3, 16  ;;  %v576_v3 = vpop.f32.mrf.mxu3 }
 0x10b   : > { %v1043_v45 = vsel %vm6850_vm9, %v782_v7, %v1042_v9  ;;  %v652_v27 = vpack.c.bf16 %v529_v19, %v529_v19  ;;  %v7148_v22 = vld [vmem:[#allocation2 + $0x4c] sm:$0xf]  ;;  %v1322_v15 = vsel %vm6829_vm6, %v1317_v62, %v1321_v60  ;;  %v1590_v54 = vunpack.c.l.b16 %v1312_v16  ;;  %v1095_v9 = vld [vmem:[#allocation2 + $0xb0] sm:$0x1] }
 0x10c   : > { %1044 = vst [vmem:[#allocation2 + $0x54] sm:$0xf] %v1043_v45  ;;  %v7152_v24 = vld [vmem:[#allocation2 + $0x50] sm:$0x1]  ;;  %v2109_v59 = vrot.slane %v7148_v22, 5  ;;  %v1591_v30 = vunpack.c.l.b16 %v1322_v15  ;;  %v904_v1 = vshrl.u32 %v666_v13, 16  ;;  %v574_v39 = vadd.f32 %v6383_v26, %v573_v61  ;;  %3305 = vmatpush.bf16.msrb.mxu1 %v6257_v4 }
 0x10d   : > { %v785_v28 = vshrl.u32 %v652_v27, 16  ;;  %v788_v0 = vshll.u32 %v652_v27, 16  ;;  %v907_v20 = vshll.u32 %v666_v13, 16  ;;  %v2112_v18 = vrot.slane %v7152_v24, 5  ;;  %v6234_v17 = vld [vmem:[#allocation2 + $0x48] sm:$0xff] }
 0x10e   : > { %v2111_v32 = vrot.slane %v2109_v59, 4  ;;  %v1617_v34 = vpack.c.b16 %v1591_v30, %v1590_v54  ;;  %v2110_v36 = vsel %vm6799_vm3, %v5678_v12, %v2109_v59  ;;  %v906_v44 = vrot.slane %v904_v1, 7  ;;  %2653 = vmatmul.bf16.gmra.mxu0 %v6234_v17 }
 0x10f   : > { %v787_v33 = vrot.slane %v785_v28, 7  ;;  %v1326_v42 = vrot.slane %v1324_v23, 4  ;;  %v1329_v52 = vrot.slane %v1327_v56, 5  ;;  %v2206_v12 = vunpack.c.l.b16 %v2110_v36  ;;  %v1098_v23 = vld [vmem:[#allocation2 + $0xb4] sm:$0xf] }
 0x110   : > { %v531_v40 = vpop.f32.mrf.mxu0  ;;  %v2113_v48 = vsel %vm6799_vm3, %v2111_v32, %v2112_v18  ;;  %v909_v57 = vor.u32 %v907_v20, %v906_v44  ;;  %v911_v60 = vrot.slane %v906_v44, 4  ;;  %v667_v61 = vpack.c.bf16 %v574_v39, %v574_v39  ;;  %3306 = vmatpush.bf16.msrb.mxu1 %v6256_v21 }
 0x111   : > { %v790_v53 = vor.u32 %v788_v0, %v787_v33  ;;  %v792_v58 = vrot.slane %v787_v33, 4  ;;  %v532_v41 = vadd.f32 %v6355_v35, %v531_v40  ;;  %v2207_v49 = vunpack.c.l.b16 %v2113_v48  ;;  %1725 = vmatmul.bf16.gmra.mxu1 %v1617_v34 }
 0x112   : > { %v1330_v43 = vor.u32 %v1329_v52, %v1326_v42  ;;  %v910_v11 = vsel %vm6870_vm13, %v902_v55, %v909_v57  ;;  %v1096_v62 = vsel %vm6877_vm14, %v911_v60, %v1095_v9  ;;  %v913_v8 = vshrl.u32 %v667_v61, 16  ;;  %v1049_v55 = vld [vmem:[#allocation2 + $0x60] sm:$0xf]  ;;  %v579_v60 = vpop.f32.mrf.mxu3 }
 0x113   : > { %v791_v7 = vsel %vm6870_vm13, %v783_v37, %v790_v53  ;;  %v1047_v19 = vsel %vm6877_vm14, %v792_v58, %v1046_v47  ;;  %v653_v35 = vpack.c.bf16 %v532_v41, %v532_v41  ;;  %v916_v26 = vshll.u32 %v667_v61, 16  ;;  %v7178_v45 = vld [vmem:[#allocation2 + $0x54] sm:$0xe]  ;;  %1094 = vst [vmem:[#allocation2 + $0xac] sm:$0xf] %v910_v11 }
 0x114   : > { %1045 = vst [vmem:[#allocation2 + $0x58] sm:$0xf] %v791_v7  ;;  %v2232_v16 = vpack.c.b16 %v2207_v49, %v2206_v12  ;;  %v1333_v15 = vshll.u32 %v7148_v22, 16  ;;  %v7184_v13 = vrot.slane %v913_v8, 7  ;;  %v1337_v59 = vshrl.u32 %v7148_v22, 16  ;;  %v7196_v22 = vld [vmem:[%s6782_s24 + $0x78] sm:$0xff]   ;;  %s8330_s24 = scalar_lea.vmem %s8641_s5, %s6187_s17 }
 0x115   : > { %1048 = vst [vmem:[#allocation2 + $0x5c] sm:$0x1] %v1047_v19  ;;  %v794_v37 = vshrl.u32 %v653_v35, 16  ;;  %v797_v27 = vshll.u32 %v653_v35, 16  ;;  %v1343_v56 = vshll.u32 %v7152_v24, 16  ;;  %v6384_v28 = vunpack.c.h.bf16 %v7126_v38  ;;  %v6255_v47 = vld [vmem:[%s8639_s3 + $0x110] sm:$0xff] }
 0x116   : > { %1097 = vst [vmem:[#allocation2 + $0xb0] sm:$0x1] %v1096_v62  ;;  %v1331_v54 = vrot.slane %v1330_v43, 4  ;;  %v1335_v30 = vrot.slane %v1333_v15, 5  ;;  %v6359_v1 = vunpack.c.l.bf16 %v6541_v31  ;;  %v918_v32 = vor.u32 %v916_v26, %v7184_v13  ;;  %v7198_v24 = vld [vmem:[#allocation2 + $0x54] sm:$0xf]  ;;  %3307 = vmatpush.bf16.msrb.mxu1 %v6255_v47 }
 0x117   : > { %v7189_v0 = vrot.slane %v794_v37, 7  ;;  %v919_v18 = vrot.slane %v7184_v13, 4  ;;  %v1339_v33 = vrot.slane %v1337_v59, 4  ;;  %v5679_v34 = vrot.slane %v7178_v45, 9  ;;  %2344 = vmatmul.bf16.gmra.mxu3 %v2232_v16  ;;  %v6254_v19 = vld [vmem:[%s8639_s3 + $0x108] sm:$0xff]  ;;  %v6212_v8 = vld [vmem:[%s8639_s3 + $0x38] sm:$0xff] }
 0x118   : > { %v534_v20 = vpop.f32.mrf.mxu0  ;;  %v1336_v36 = vsel %vm6829_vm6, %v1331_v54, %v1335_v30  ;;  %v1345_v39 = vrot.slane %v1343_v56, 5  ;;  %v1099_v44 = vsel %vm6850_vm9, %v918_v32, %v1098_v23  ;;  %v577_v42 = vadd.f32 %v6384_v28, %v576_v3  ;;  %v1053_v23 = vld [vmem:[#allocation2 + $0x68] sm:$0x1]  ;;  %1925 = vmatpush.bf16.msrb.mxu2 %v6212_v8 }
 0x119   : > { %v799_v38 = vor.u32 %v797_v27, %v7189_v0  ;;  %v535_v17 = vadd.f32 %v6356_v2, %v534_v20  ;;  %v800_v40 = vrot.slane %v7189_v0, 4  ;;  %v1340_v48 = vor.u32 %v1339_v33, %v1335_v30  ;;  %1100 = vst [vmem:[#allocation2 + $0xb4] sm:$0xf] %v1099_v44  ;;  %v1102_v30 = vld [vmem:[#allocation2 + $0xbc] sm:$0x1]  ;;  %v6253_v20 = vld [vmem:[%s8639_s3 + $0x100] sm:$0xff] }
 0x11a   : > { %v6387_v53 = vunpack.c.l.bf16 %v7196_v22  ;;  %v1348_v58 = vshrl.u32 %v7198_v24, 16  ;;  %v1592_v9 = vunpack.c.l.b16 %v1336_v36  ;;  %v668_v49 = vpack.c.bf16 %v577_v42, %v577_v42  ;;  %3308 = vmatpush.bf16.msrb.mxu1 %v6254_v19 }
 0x11b   : > { %v1050_v46 = vsel %vm6850_vm9, %v799_v38, %v1049_v55  ;;  %v654_v2 = vpack.c.bf16 %v535_v17, %v535_v17  ;;  %v7213_v52 = vld [vmem:[#allocation2 + $0x58] sm:$0xf]  ;;  %v1341_v41 = vrot.slane %v1340_v48, 4  ;;  %v6388_v7 = vunpack.c.h.bf16 %v7196_v22 }
 0x11c   : > { %1051 = vst [vmem:[#allocation2 + $0x60] sm:$0xf] %v1050_v46  ;;  %v7217_v4 = vld [vmem:[#allocation2 + $0x5c] sm:$0x1]  ;;  %v2116_v57 = vrot.slane %v7213_v52, 5  ;;  %v580_v3 = vadd.f32 %v6387_v53, %v579_v60  ;;  %v921_v43 = vshrl.u32 %v668_v49, 16 }
 0x11d   : > { %v802_v12 = vshrl.u32 %v654_v2, 16  ;;  %v805_v61 = vshll.u32 %v654_v2, 16  ;;  %v1346_v35 = vsel %vm6829_vm6, %v1341_v41, %v1345_v39  ;;  %v924_v11 = vshll.u32 %v668_v49, 16  ;;  %v6235_v37 = vld [vmem:[#allocation2 + $0x54] sm:$0xff] }
 0x11e   : > { %v2119_v62 = vrot.slane %v7217_v4, 5  ;;  %v1593_v45 = vunpack.c.l.b16 %v1346_v35  ;;  %v2117_v27 = vsel %vm6799_vm3, %v5679_v34, %v2116_v57  ;;  %v2118_v16 = vrot.slane %v2116_v57, 4  ;;  %2658 = vmatmul.bf16.gmra.mxu0 %v6235_v37  ;;  %3309 = vmatpush.bf16.msrb.mxu1 %v6253_v20 }
 0x11f   : > { %v804_v26 = vrot.slane %v802_v12, 7  ;;  %v923_v15 = vrot.slane %v921_v43, 7  ;;  %v669_v55 = vpack.c.bf16 %v580_v3, %v580_v3  ;;  %v1350_v59 = vrot.slane %v1348_v58, 4  ;;  %v582_v58 = vpop.f32.mrf.mxu3 }
 0x120   : > { %v537_v21 = vpop.f32.mrf.mxu0  ;;  %v1351_v56 = vshll.u32 %v7198_v24, 16  ;;  %v1618_v54 = vpack.c.b16 %v1593_v45, %v1592_v9  ;;  %v2120_v34 = vsel %vm6799_vm3, %v2118_v16, %v2119_v62  ;;  %v2208_v46 = vunpack.c.l.b16 %v2117_v27 }
 0x121   : > { %v807_v28 = vor.u32 %v805_v61, %v804_v26  ;;  %v809_v0 = vrot.slane %v804_v26, 4  ;;  %v538_v31 = vadd.f32 %v6359_v1, %v537_v21  ;;  %v926_v32 = vor.u32 %v924_v11, %v923_v15  ;;  %v1056_v61 = vld [vmem:[#allocation2 + $0x6c] sm:$0xf] }
 0x122   : > { %v928_v33 = vrot.slane %v923_v15, 4  ;;  %v930_v22 = vshrl.u32 %v669_v55, 16  ;;  %1730 = vmatmul.bf16.gmra.mxu1 %v1618_v54  ;;  %v2209_v17 = vunpack.c.l.b16 %v2120_v34  ;;  %v933_v44 = vshll.u32 %v669_v55, 16 }
 0x123   : > { %v808_v24 = vsel %vm6870_vm13, %v800_v40, %v807_v28  ;;  %v1054_v38 = vsel %vm6877_vm14, %v809_v0, %v1053_v23  ;;  %v655_v1 = vpack.c.bf16 %v538_v31, %v538_v31  ;;  %v927_v36 = vsel %vm6870_vm13, %v919_v18, %v926_v32  ;;  %v1105_v40 = vld [vmem:[#allocation2 + $0xc0] sm:$0xf]  ;;  %v1109_v32 = vld [vmem:[#allocation2 + $0xc8] sm:$0x1] }
 0x124   : > { %1052 = vst [vmem:[#allocation2 + $0x64] sm:$0xf] %v808_v24  ;;  %v1103_v39 = vsel %vm6877_vm14, %v928_v33, %v1102_v30  ;;  %v7248_v47 = vrot.slane %v930_v22, 7  ;;  %v1353_v2 = vrot.slane %v1351_v56, 5  ;;  %v1357_v13 = vshll.u32 %v7213_v52, 16  ;;  %v6211_v30 = vld [vmem:[%s8639_s3 + $0x30] sm:$0xff] }
 0x125   : > { %1055 = vst [vmem:[#allocation2 + $0x68] sm:$0x1] %v1054_v38  ;;  %v811_v48 = vshrl.u32 %v655_v1, 16  ;;  %v814_v42 = vshll.u32 %v655_v1, 16  ;;  %v1361_v18 = vshrl.u32 %v7213_v52, 16  ;;  %v7255_v41 = vrot.slane %v2790_v63, 4  ;;  %1926 = vmatpush.bf16.msrb.mxu2 %v6211_v30 }
 0x126   : > { %1101 = vst [vmem:[#allocation2 + $0xb8] sm:$0xf] %v927_v36  ;;  %v935_v53 = vor.u32 %v933_v44, %v7248_v47  ;;  %v2233_v49 = vpack.c.b16 %v2209_v17, %v2208_v46  ;;  %v1354_v57 = vor.u32 %v1353_v2, %v1350_v59  ;;  %v583_v60 = vadd.f32 %v6388_v7, %v582_v58  ;;  %v1128_v12 = vld [vmem:[#allocation2 + $0x60] sm:$0xf]  ;;  %v7277_v36 = vld [vmem:[#allocation2 + $0x10] sm:$0xf] }
 0x127   : > { %1104 = vst [vmem:[#allocation2 + $0xbc] sm:$0x1] %v1103_v39  ;;  %v813_v9 = vrot.slane %v811_v48, 7  ;;  %v1359_v19 = vrot.slane %v1357_v13, 5  ;;  %v1363_v35 = vrot.slane %v1361_v18, 4  ;;  %v1367_v43 = vshll.u32 %v7217_v4, 16 }
 0x128   : > { %v1106_v3 = vsel %vm6850_vm9, %v935_v53, %v1105_v40  ;;  %v1355_v62 = vrot.slane %v1354_v57, 4  ;;  %v7262_v63 = vrot.slane %v2793_v5, 5  ;;  %v670_v26 = vpack.c.bf16 %v583_v60, %v583_v60  ;;  %2349 = vmatmul.bf16.gmra.mxu3 %v2233_v49  ;;  %v2022_v5 = vld [vmem:[#allocation2 + $0x60] sm:$0xe]  ;;  %v2743_v53 = vld [vmem:[#allocation2 + $0x14] sm:$0x1] }
 0x129   : > { %v816_v52 = vor.u32 %v814_v42, %v813_v9  ;;  %v817_v11 = vrot.slane %v813_v9, 4  ;;  %1107 = vst [vmem:[#allocation2 + $0xc0] sm:$0xf] %v1106_v3  ;;  %v1364_v8 = vor.u32 %v1363_v35, %v1359_v19  ;;  %v1372_v7 = vshrl.u32 %v1128_v12, 16  ;;  %v2745_v30 = vld [vmem:[#allocation2 + $0x1c] sm:$0xf] }
 0x12a   : > { %v1375_v45 = vshll.u32 %v1128_v12, 16  ;;  %v936_v4 = vrot.slane %v7248_v47, 4  ;;  %v1360_v16 = vsel %vm6829_vm6, %v1355_v62, %v1359_v19  ;;  %v1369_v15 = vrot.slane %v1367_v43, 5 }
 0x12b   : > { %v825_v37 = vsel %vm6870_vm13, %v817_v11, %v6888_v25  ;;  %v1057_v27 = vsel %vm6850_vm9, %v816_v52, %v1056_v61  ;;  %v1129_v51 = vld [vmem:[#allocation2 + $0x64] sm:$0xf]  ;;  %v1365_v23 = vrot.slane %v1364_v8, 4  ;;  %v938_v21 = vshrl.u32 %v670_v26, 16  ;;  %v7293_v11 = vpop.f32.mrf.mxu1 }
 0x12c   : > { %1058 = vst [vmem:[#allocation2 + $0x6c] sm:$0xf] %v1057_v27  ;;  %v941_v55 = vshll.u32 %v670_v26, 16  ;;  %v1168_v59 = vld [vmem:[#allocation2 + $0x68] sm:$0x1]  ;;  %v2123_v56 = vrot.slane %v1129_v51, 5  ;;  %v1594_v28 = vunpack.c.l.b16 %v1360_v16  ;;  %v2796_v14 = vor.u32 %v7262_v63, %v7255_v41  ;;  %v7297_v16 = vpop.f32.mrf.mxu3 }
 0x12d   : > { %1059 = vst [vmem:[#allocation2 + $0x70] sm:$0xf] %v825_v37  ;;  %v1374_v25 = vrot.slane %v1372_v7, 4  ;;  %v1370_v50 = vsel %vm6829_vm6, %v1365_v23, %v1369_v15  ;;  %v940_v0 = vrot.slane %v938_v21, 7  ;;  %v1377_v54 = vrot.slane %v1375_v45, 5  ;;  %v6236_v20 = vld [vmem:[#allocation2 + $0x60] sm:$0xff] }
 0x12e   : > { %v1595_v31 = vunpack.c.l.b16 %v1370_v50  ;;  %v2125_v33 = vrot.slane %v2123_v56, 4  ;;  %v2126_v34 = vrot.slane %v1168_v59, 5  ;;  %v1381_v22 = vshll.u32 %v1129_v51, 16  ;;  %2663 = vmatmul.bf16.gmra.mxu0 %v6236_v20  ;;  %v1169_v37 = vld [vmem:[#allocation2 + $0x74] sm:$0x1] }
 0x12f   : > { %v943_v24 = vor.u32 %v941_v55, %v940_v0  ;;  %v945_v38 = vrot.slane %v940_v0, 4  ;;  %v5680_v1 = vrot.slane %v2022_v5, 9  ;;  %v1378_v17 = vor.u32 %v1377_v54, %v1374_v25  ;;  %v2744_v25 = vld [vmem:[#allocation2 + $0x18] sm:$0xf] }
 0x130   : > { %v1619_v39 = vpack.c.b16 %v1595_v31, %v1594_v28  ;;  %v2127_v47 = vsel %vm6799_vm3, %v2125_v33, %v2126_v34  ;;  %v1383_v44 = vrot.slane %v1381_v22, 5  ;;  %v1385_v40 = vshrl.u32 %v1129_v51, 16 }
 0x131   : > { %v944_v48 = vsel %vm6870_vm13, %v936_v4, %v943_v24  ;;  %v1110_v42 = vsel %vm6877_vm14, %v945_v38, %v1109_v32  ;;  %v2124_v46 = vsel %vm6799_vm3, %v5680_v1, %v2123_v56  ;;  %v2211_v2 = vunpack.c.l.b16 %v2127_v47  ;;  %v6210_v1 = vld [vmem:[%s8639_s3 + $0x28] sm:$0xff] }
 0x132   : > { %1735 = vmatmul.bf16.gmra.mxu1 %v1619_v39  ;;  %1108 = vst [vmem:[#allocation2 + $0xc4] sm:$0xf] %v944_v48  ;;  %v1387_v13 = vrot.slane %v1385_v40, 4  ;;  %v1391_v18 = vshll.u32 %v1168_v59, 16  ;;  %v2799_v58 = vshll.u32 %v7277_v36, 16  ;;  %v2803_v9 = vshrl.u32 %v7277_v36, 16  ;;  %1927 = vmatpush.bf16.msrb.mxu2 %v6210_v1 }
 0x133   : > { %1111 = vst [vmem:[#allocation2 + $0xc8] sm:$0x1] %v1110_v42  ;;  %v1379_v6 = vrot.slane %v1378_v17, 4  ;;  %v2210_v49 = vunpack.c.l.b16 %v2124_v46  ;;  %v2809_v12 = vshll.u32 %v2743_v53, 16  ;;  %v1130_v19 = vld [vmem:[#allocation2 + $0x6c] sm:$0xf] }
 0x134   : > { %v1388_v57 = vor.u32 %v1387_v13, %v1383_v44  ;;  %v2801_v60 = vrot.slane %v2799_v58, 5  ;;  %v2805_v3 = vrot.slane %v2803_v9, 4  ;;  %v1393_v52 = vrot.slane %v1391_v18, 5  ;;  %v1131_v26 = vld [vmem:[#allocation2 + $0x70] sm:$0xf] }
 0x135   : > { %v1384_v61 = vsel %vm6829_vm6, %v1379_v6, %v1383_v44  ;;  %v2234_v35 = vpack.c.b16 %v2211_v2, %v2210_v49  ;;  %v2797_v62 = vrot.slane %v2796_v14, 4  ;;  %v1396_v7 = vshrl.u32 %v1130_v19, 16  ;;  %v2023_v27 = vld [vmem:[#allocation2 + $0x6c] sm:$0xe]  ;;  %v1132_v46 = vld [vmem:[#allocation2 + $0x78] sm:$0xf]  ;;  %v7310_v6 = vpop.f32.mrf.mxu1 }
 0x136   : > { %v1389_v43 = vrot.slane %v1388_v57, 4  ;;  %v2806_v8 = vor.u32 %v2805_v3, %v2801_v60  ;;  %v1596_v63 = vunpack.c.l.b16 %v1384_v61  ;;  %v2811_v45 = vrot.slane %v2809_v12, 5  ;;  %v6237_v53 = vld [vmem:[#allocation2 + $0x6c] sm:$0xff]  ;;  %v2746_v58 = vld [vmem:[#allocation2 + $0x20] sm:$0x1]  ;;  %v7316_v3 = vpop.f32.mrf.mxu3 }
 0x137   : > { %v1399_v4 = vshll.u32 %v1130_v19, 16  ;;  %v2130_v23 = vrot.slane %v1131_v26, 5  ;;  %v1398_v15 = vrot.slane %v1396_v7, 4  ;;  %v2802_v21 = vsel %vm6829_vm6, %v2797_v62, %v2801_v60  ;;  %v7314_v12 = vld [vmem:[#allocation2 + $0x7c] sm:$0xf] }
 0x138   : > { %v1394_v41 = vsel %vm6829_vm6, %v1389_v43, %v1393_v52  ;;  %v2807_v5 = vrot.slane %v2806_v8, 4  ;;  %2354 = vmatmul.bf16.gmra.mxu3 %v2234_v35  ;;  %v1405_v59 = vshll.u32 %v1131_v26, 16  ;;  %v1409_v56 = vshrl.u32 %v1131_v26, 16 }
 0x139   : > { %v1597_v51 = vunpack.c.l.b16 %v1394_v41  ;;  %v1401_v55 = vrot.slane %v1399_v4, 5  ;;  %v5681_v0 = vrot.slane %v2023_v27, 9  ;;  %v1415_v54 = vshll.u32 %v1169_v37, 16  ;;  %v7306_v44 = vpop.f32.mrf.mxu0  ;;  %v2748_v4 = vld [vmem:[#allocation2 + $0x28] sm:$0xf] }
 0x13a   : > { %v2812_v28 = vsel %vm6829_vm6, %v2807_v5, %v2811_v45  ;;  %v1407_v32 = vrot.slane %v1405_v59, 5  ;;  %v1411_v33 = vrot.slane %v1409_v56, 4  ;;  %v2132_v34 = vrot.slane %v2130_v23, 4  ;;  %v1170_v59 = vld [vmem:[#allocation2 + $0x80] sm:$0x1] }
 0x13b   : > { %v1620_v50 = vpack.c.b16 %v1597_v51, %v1596_v63  ;;  %v3191_v31 = vunpack.c.l.b16 %v2812_v28  ;;  %v1402_v20 = vor.u32 %v1401_v55, %v1398_v15  ;;  %v2133_v22 = vrot.slane %v1169_v37, 5 }
 0x13c   : > { %v2814_v24 = vshrl.u32 %v2744_v25, 16  ;;  %v2817_v38 = vshll.u32 %v2744_v25, 16  ;;  %v3190_v17 = vunpack.c.l.b16 %v2802_v21  ;;  %v1412_v39 = vor.u32 %v1411_v33, %v1407_v32  ;;  %v2747_v25 = vld [vmem:[#allocation2 + $0x24] sm:$0xf] }
 0x13d   : > { %1740 = vmatmul.bf16.vlgmr.msra.gmra.mxu2 %v1620_v50  ;;  %v2823_v47 = vshll.u32 %v2745_v30, 16  ;;  %v2131_v40 = vsel %vm6799_vm3, %v5681_v0, %v2130_v23  ;;  %v1403_v48 = vrot.slane %v1402_v20, 4  ;;  %v2827_v42 = vshrl.u32 %v2745_v30, 16  ;;  %v2024_v0 = vld [vmem:[#allocation2 + $0x78] sm:$0xe] }
 0x13e   : > { %v3222_v2 = vpack.c.b16 %v3191_v31, %v3190_v17  ;;  %v1413_v13 = vrot.slane %v1412_v39, 4  ;;  %v1417_v18 = vrot.slane %v1415_v54, 5  ;;  %v2134_v14 = vsel %vm6799_vm3, %v2132_v34, %v2133_v22  ;;  %2668 = vmatmul.bf16.gmra.mxu0 %v6237_v53 }
 0x13f   : > { %v2825_v9 = vrot.slane %v2823_v47, 5  ;;  %v2816_v49 = vrot.slane %v2814_v24, 4  ;;  %v2819_v57 = vrot.slane %v2817_v38, 5  ;;  %v2829_v60 = vrot.slane %v2827_v42, 4 }
 0x140   : > { %v1420_v61 = vshrl.u32 %v1132_v46, 16  ;;  %v1408_v19 = vsel %vm6829_vm6, %v1403_v48, %v1407_v32  ;;  %v2833_v43 = vshll.u32 %v2746_v58, 16  ;;  %v1423_v52 = vshll.u32 %v1132_v46, 16  ;;  %v6209_v58 = vld [vmem:[%s8639_s3 + $0x20] sm:$0xff] }
 0x141   : > { %v2830_v35 = vor.u32 %v2829_v60, %v2825_v9  ;;  %v2212_v62 = vunpack.c.l.b16 %v2131_v40  ;;  %v2213_v8 = vunpack.c.l.b16 %v2134_v14  ;;  %v1418_v26 = vsel %vm6829_vm6, %v1413_v13, %v1417_v18  ;;  %v7323_v51 = vpop.f32.mrf.mxu0  ;;  %v6238_v14 = vld [vmem:[#allocation2 + $0x78] sm:$0xff]  ;;  %1928 = vmatpush.bf16.msrb.mxu2 %v6209_v58 }
 0x142   : > { %3310 = vmatmul.bf16.vlgmr.msrb.gmra.mxu1 %v3222_v2  ;;  %v1429_v7 = vshll.u32 %v7314_v12, 16  ;;  %v2820_v41 = vor.u32 %v2819_v57, %v2816_v49  ;;  %v1598_v45 = vunpack.c.l.b16 %v1408_v19  ;;  %v1422_v37 = vrot.slane %v1420_v61, 4  ;;  %v2749_v49 = vld [vmem:[#allocation2 + $0x2c] sm:$0x1]  ;;  %v1135_v61 = vld [vmem:[#allocation2 + $0x88] sm:$0xf] }
 0x143   : > { %v2831_v63 = vrot.slane %v2830_v35, 4  ;;  %v1425_v27 = vrot.slane %v1423_v52, 5  ;;  %v1599_v5 = vunpack.c.l.b16 %v1418_v26  ;;  %v2835_v23 = vrot.slane %v2833_v43, 5  ;;  %v1134_v19 = vld [vmem:[#allocation2 + $0x84] sm:$0xf] }
 0x144   : > { %v1431_v15 = vrot.slane %v1429_v7, 5  ;;  %v1433_v21 = vshrl.u32 %v7314_v12, 16  ;;  %v2235_v55 = vpack.c.b16 %v2213_v8, %v2212_v62  ;;  %v2137_v56 = vrot.slane %v7314_v12, 5 }
 0x145   : > { %v2821_v50 = vrot.slane %v2820_v41, 4  ;;  %v2836_v28 = vsel %vm6829_vm6, %v2831_v63, %v2835_v23  ;;  %v2847_v30 = vshll.u32 %v2748_v4, 16  ;;  %v1426_v31 = vor.u32 %v1425_v27, %v1422_v37 }
 0x146   : > { %v1435_v54 = vrot.slane %v1433_v21, 4  ;;  %v1439_v20 = vshll.u32 %v1170_v59, 16  ;;  %v1621_v33 = vpack.c.b16 %v1599_v5, %v1598_v45  ;;  %v2851_v24 = vshrl.u32 %v2748_v4, 16 }
 0x147   : > { %v2826_v34 = vsel %vm6829_vm6, %v2821_v50, %v2825_v9  ;;  %v3193_v38 = vunpack.c.l.b16 %v2836_v28  ;;  %v5682_v1 = vrot.slane %v2024_v0, 9  ;;  %v2838_v17 = vshrl.u32 %v2747_v25, 16  ;;  %v2751_v50 = vld [vmem:[#allocation2 + $0x34] sm:$0xf]  ;;  %v2025_v0 = vld [vmem:[#allocation2 + $0x84] sm:$0xe] }
 0x148   : > { %2359 = vmatmul.bf16.gmra.mxu3 %v2235_v55  ;;  %v1436_v22 = vor.u32 %v1435_v54, %v1431_v15  ;;  %v2841_v39 = vshll.u32 %v2747_v25, 16  ;;  %v2139_v40 = vrot.slane %v2137_v56, 4  ;;  %v2140_v48 = vrot.slane %v1170_v59, 5 }
 0x149   : > { %v7329_v32 = vpop.f32.mrf.mxu1  ;;  %v7333_v47 = vpop.f32.mrf.mxu3  ;;  %v7335_v42 = vrot.slane %v2847_v30, 5  ;;  %v2853_v46 = vrot.slane %v2851_v24, 4  ;;  %v3192_v2 = vunpack.c.l.b16 %v2826_v34  ;;  %v1427_v53 = vrot.slane %v1426_v31, 4 }
 0x14a   : > { %v1437_v13 = vrot.slane %v1436_v22, 4  ;;  %v1441_v18 = vrot.slane %v1439_v20, 5  ;;  %v7340_v9 = vpop.f32.mrf.mxu0  ;;  %v2840_v60 = vrot.slane %v2838_v17, 4  ;;  %v2843_v12 = vrot.slane %v2841_v39, 5 }
 0x14b   : > { %v3223_v57 = vpack.c.b16 %v3193_v38, %v3192_v2  ;;  %v2138_v35 = vsel %vm6799_vm3, %v5682_v1, %v2137_v56  ;;  %v2141_v43 = vsel %vm6799_vm3, %v2139_v40, %v2140_v48  ;;  %v2854_v52 = vor.u32 %v2853_v46, %v7335_v42  ;;  %v2750_v48 = vld [vmem:[#allocation2 + $0x30] sm:$0xf] }
 0x14c   : > { %v1432_v62 = vsel %vm6829_vm6, %v1427_v53, %v1431_v15  ;;  %v1442_v8 = vsel %vm6829_vm6, %v1437_v13, %v1441_v18  ;;  %v2857_v26 = vshll.u32 %v2749_v49, 16  ;;  %v1444_v41 = vshrl.u32 %v1134_v19, 16  ;;  %v1171_v15 = vld [vmem:[#allocation2 + $0x8c] sm:$0x1] }
 0x14d   : > { %1745 = vmatmul.bf16.gmra.mxu2 %v1621_v33  ;;  %v1447_v63 = vshll.u32 %v1134_v19, 16  ;;  %v1453_v45 = vshll.u32 %v1135_v61, 16  ;;  %v1457_v37 = vshrl.u32 %v1135_v61, 16  ;;  %v2214_v27 = vunpack.c.l.b16 %v2138_v35  ;;  %v6208_v19 = vld [vmem:[%s8639_s3 + $0x18] sm:$0xff] }
 0x14e   : > { %2673 = vmatmul.bf16.gmra.mxu0 %v6238_v14  ;;  %v2215_v4 = vunpack.c.l.b16 %v2141_v43  ;;  %v2844_v5 = vor.u32 %v2843_v12, %v2840_v60  ;;  %v2855_v21 = vrot.slane %v2854_v52, 4  ;;  %v1600_v55 = vunpack.c.l.b16 %v1432_v62  ;;  %1929 = vmatpush.bf16.msrb.mxu2 %v6208_v19 }
 0x14f   : > { %v1601_v59 = vunpack.c.l.b16 %v1442_v8  ;;  %v2859_v56 = vrot.slane %v2857_v26, 5  ;;  %v2144_v25 = vrot.slane %v1135_v61, 5  ;;  %v1446_v54 = vrot.slane %v1444_v41, 4  ;;  %v6239_v41 = vld [vmem:[#allocation2 + $0x84] sm:$0xff] }
 0x150   : > { %v1449_v30 = vrot.slane %v1447_v63, 5  ;;  %v1455_v31 = vrot.slane %v1453_v45, 5  ;;  %v1459_v20 = vrot.slane %v1457_v37, 4  ;;  %v2236_v33 = vpack.c.b16 %v2215_v4, %v2214_v27  ;;  %v2752_v63 = vld [vmem:[#allocation2 + $0x38] sm:$0x1] }
 0x151   : > { %v7351_v7 = vpop.f32.mrf.mxu1  ;;  %v7353_v23 = vpop.f32.mrf.mxu3  ;;  %v2845_v34 = vrot.slane %v2844_v5, 4  ;;  %v2860_v22 = vsel %vm6829_vm6, %v2855_v21, %v2859_v56  ;;  %v2871_v24 = vshll.u32 %v2751_v50, 16  ;;  %v2875_v38 = vshrl.u32 %v2751_v50, 16  ;;  %v1137_v4 = vld [vmem:[#allocation2 + $0x94] sm:$0xf] }
 0x152   : > { %3315 = vmatmul.bf16.gmra.mxu1 %v3223_v57  ;;  %v7355_v28 = vpop.f32.mrf.mxu0  ;;  %v5683_v17 = vrot.slane %v2025_v0, 9  ;;  %v2146_v39 = vrot.slane %v2144_v25, 4  ;;  %v2147_v40 = vrot.slane %v1171_v15, 5  ;;  %v1622_v2 = vpack.c.b16 %v1601_v59, %v1600_v55  ;;  %v1136_v5 = vld [vmem:[#allocation2 + $0x90] sm:$0xf] }
 0x153   : > { %v2850_v1 = vsel %vm6829_vm6, %v2845_v34, %v7335_v42  ;;  %v1450_v53 = vor.u32 %v1449_v30, %v1446_v54  ;;  %v1460_v13 = vor.u32 %v1459_v20, %v1455_v31  ;;  %v1463_v18 = vshll.u32 %v1171_v15, 16 }
 0x154   : > { %v3195_v58 = vunpack.c.l.b16 %v2860_v22  ;;  %v2862_v49 = vshrl.u32 %v2750_v48, 16  ;;  %v2865_v57 = vshll.u32 %v2750_v48, 16  ;;  %v7366_v60 = vrot.slane %v2871_v24, 5  ;;  %v2754_v24 = vld [vmem:[#allocation2 + $0x40] sm:$0xf] }
 0x155   : > { %v2877_v12 = vrot.slane %v2875_v38, 4  ;;  %v3194_v42 = vunpack.c.l.b16 %v2850_v1  ;;  %v2145_v61 = vsel %vm6799_vm3, %v5683_v17, %v2144_v25  ;;  %v2148_v43 = vsel %vm6799_vm3, %v2146_v39, %v2147_v40  ;;  %v2753_v40 = vld [vmem:[#allocation2 + $0x3c] sm:$0xf]  ;;  %v2026_v48 = vld [vmem:[#allocation2 + $0x90] sm:$0xe] }
 0x156   : > { %v1451_v52 = vrot.slane %v1450_v53, 4  ;;  %v1461_v62 = vrot.slane %v1460_v13, 4  ;;  %v1465_v8 = vrot.slane %v1463_v18, 5  ;;  %v2864_v45 = vrot.slane %v2862_v49, 4 }
 0x157   : > { %v3224_v26 = vpack.c.b16 %v3195_v58, %v3194_v42  ;;  %v2867_v37 = vrot.slane %v2865_v57, 5  ;;  %v2878_v27 = vor.u32 %v2877_v12, %v7366_v60  ;;  %v2216_v21 = vunpack.c.l.b16 %v2145_v61  ;;  %v1172_v42 = vld [vmem:[#allocation2 + $0x98] sm:$0x1] }
 0x158   : > { %2364 = vmatmul.bf16.gmra.mxu3 %v2236_v33  ;;  %v2217_v55 = vunpack.c.l.b16 %v2148_v43  ;;  %v1456_v59 = vsel %vm6829_vm6, %v1451_v52, %v1455_v31  ;;  %v1466_v56 = vsel %vm6829_vm6, %v1461_v62, %v1465_v8  ;;  %v2881_v15 = vshll.u32 %v2752_v63, 16 }
 0x159   : > { %v7364_v14 = vpop.f32.mrf.mxu3  ;;  %v1468_v50 = vshrl.u32 %v1136_v5, 16  ;;  %v1471_v0 = vshll.u32 %v1136_v5, 16  ;;  %v1477_v54 = vshll.u32 %v1137_v4, 16  ;;  %v1481_v30 = vshrl.u32 %v1137_v4, 16 }
 0x15a   : > { %v7362_v46 = vpop.f32.mrf.mxu1  ;;  %v2868_v33 = vor.u32 %v2867_v37, %v2864_v45  ;;  %v2879_v34 = vrot.slane %v2878_v27, 4  ;;  %v2237_v22 = vpack.c.b16 %v2217_v55, %v2216_v21  ;;  %v1602_v1 = vunpack.c.l.b16 %v1456_v59 }
 0x15b   : > { %v7373_v35 = vpop.f32.mrf.mxu0  ;;  %v1603_v31 = vunpack.c.l.b16 %v1466_v56  ;;  %v2883_v17 = vrot.slane %v2881_v15, 5  ;;  %v2151_v39 = vrot.slane %v1137_v4, 5  ;;  %v1473_v53 = vrot.slane %v1471_v0, 5  ;;  %v7406_v0 = vld [vmem:[#allocation2 + $0xa0] sm:$0xf] }
 0x15c   : > { %8656 = vst [vmem:[#allocation7_spill] sm:$0xff] %v7373_v35  ;;  %v1479_v13 = vrot.slane %v1477_v54, 5  ;;  %v1483_v18 = vrot.slane %v1481_v30, 4  ;;  %v2869_v58 = vrot.slane %v2868_v33, 4  ;;  %v2895_v57 = vshll.u32 %v2754_v24, 16  ;;  %v6240_v33 = vld [vmem:[#allocation2 + $0x90] sm:$0xff] }
 0x15d   : > { %1750 = vmatmul.bf16.gmra.mxu2 %v1622_v2  ;;  %v1470_v2 = vrot.slane %v1468_v50, 4  ;;  %v2884_v49 = vsel %vm6829_vm6, %v2879_v34, %v2883_v17  ;;  %v2899_v12 = vshrl.u32 %v2754_v24, 16  ;;  %v2886_v61 = vshrl.u32 %v2753_v40, 16  ;;  %v1138_v54 = vld [vmem:[#allocation2 + $0x9c] sm:$0xf] }
 0x15e   : > { %2678 = vmatmul.bf16.gmra.mxu0 %v6239_v41  ;;  %v1623_v19 = vpack.c.b16 %v1603_v31, %v1602_v1  ;;  %v2874_v43 = vsel %vm6829_vm6, %v2869_v58, %v7366_v60  ;;  %v5684_v52 = vrot.slane %v2026_v48, 9  ;;  %v2889_v62 = vshll.u32 %v2753_v40, 16  ;;  %v6207_v60 = vld [vmem:[%s8639_s3 + $0x10] sm:$0xff]  ;;  %v2755_v1 = vld [vmem:[#allocation2 + $0x44] sm:$0x1] }
 0x15f   : > { %v3197_v8 = vunpack.c.l.b16 %v2884_v49  ;;  %v1484_v41 = vor.u32 %v1483_v18, %v1479_v13  ;;  %v1487_v63 = vshll.u32 %v1172_v42, 16  ;;  %v2153_v37 = vrot.slane %v2151_v39, 4  ;;  %1930 = vmatpush.bf16.msrb.mxu2 %v6207_v60 }
 0x160   : > { %v2154_v27 = vrot.slane %v1172_v42, 5  ;;  %v7395_v4 = vrot.slane %v2895_v57, 5  ;;  %v2901_v5 = vrot.slane %v2899_v12, 4  ;;  %v3196_v55 = vunpack.c.l.b16 %v2874_v43 }
 0x161   : > { %v7384_v20 = vpop.f32.mrf.mxu3  ;;  %v2152_v56 = vsel %vm6799_vm3, %v5684_v52, %v2151_v39  ;;  %v2888_v15 = vrot.slane %v2886_v61, 4  ;;  %v2891_v50 = vrot.slane %v2889_v62, 5  ;;  %v1489_v24 = vrot.slane %v1487_v63, 5 }
 0x162   : > { %3320 = vmatmul.bf16.gmra.mxu1 %v3224_v26  ;;  %v7382_v25 = vpop.f32.mrf.mxu1  ;;  %8658 = vst [vmem:[#allocation9_spill] sm:$0xff] %v7384_v20  ;;  %v1474_v26 = vor.u32 %v1473_v53, %v1470_v2  ;;  %v3225_v30 = vpack.c.b16 %v3197_v8, %v3196_v55  ;;  %v2155_v31 = vsel %vm6799_vm3, %v2153_v37, %v2154_v27  ;;  %v1492_v39 = vshrl.u32 %v1138_v54, 16  ;;  %v2756_v55 = vld [vmem:[#allocation2 + $0x48] sm:$0xf] }
 0x163   : > { %8657 = vst [vmem:[#allocation8_spill] sm:$0xff] %v7382_v25  ;;  %v7386_v38 = vpop.f32.mrf.mxu0  ;;  %v2902_v17 = vor.u32 %v2901_v5, %v7395_v4  ;;  %v1495_v40 = vshll.u32 %v1138_v54, 16  ;;  %v1501_v48 = vshll.u32 %v7406_v0, 16  ;;  %v1505_v2 = vshrl.u32 %v7406_v0, 16 }
 0x164   : > { %8659 = vst [vmem:[#allocation10_spill] sm:$0xff] %v7386_v38  ;;  %v1475_v34 = vrot.slane %v1474_v26, 4  ;;  %v2218_v53 = vunpack.c.l.b16 %v2152_v56  ;;  %v2905_v18 = vshll.u32 %v2755_v1, 16  ;;  %v2219_v58 = vunpack.c.l.b16 %v2155_v31 }
 0x165   : > { %v2892_v12 = vor.u32 %v2891_v50, %v2888_v15  ;;  %v2903_v61 = vrot.slane %v2902_v17, 4  ;;  %v1494_v52 = vrot.slane %v1492_v39, 4  ;;  %v1497_v62 = vrot.slane %v1495_v40, 5  ;;  %v1173_v15 = vld [vmem:[#allocation2 + $0xa4] sm:$0x1] }
 0x166   : > { %v1480_v49 = vsel %vm6829_vm6, %v1475_v34, %v1479_v13  ;;  %v7421_v8 = vrot.slane %v1501_v48, 5  ;;  %v1507_v26 = vrot.slane %v1505_v2, 4  ;;  %v2907_v13 = vrot.slane %v2905_v18, 5  ;;  %v2027_v50 = vld [vmem:[#allocation2 + $0x9c] sm:$0xe] }
 0x167   : > { %v1604_v63 = vunpack.c.l.b16 %v1480_v49  ;;  %v2238_v27 = vpack.c.b16 %v2219_v58, %v2218_v53  ;;  %v2893_v5 = vrot.slane %v2892_v12, 4  ;;  %v2158_v54 = vrot.slane %v7406_v0, 5 }
 0x168   : > { %2369 = vmatmul.bf16.gmra.mxu3 %v2237_v22  ;;  %v1485_v22 = vrot.slane %v1484_v41, 4  ;;  %v2908_v56 = vsel %vm6829_vm6, %v2903_v61, %v2907_v13  ;;  %v1508_v34 = vor.u32 %v1507_v26, %v7421_v8  ;;  %v2910_v31 = vshrl.u32 %v2756_v55, 16  ;;  %v7443_v13 = vld [vmem:[#allocation2 + $0xac] sm:$0xf] }
 0x169   : > { %v7393_v45 = vpop.f32.mrf.mxu3  ;;  %v2898_v1 = vsel %vm6829_vm6, %v2893_v5, %v7395_v4  ;;  %v3199_v17 = vunpack.c.l.b16 %v2908_v56  ;;  %v5685_v39 = vrot.slane %v2027_v50, 9  ;;  %v2913_v40 = vshll.u32 %v2756_v55, 16  ;;  %v2758_v4 = vld [vmem:[#allocation2 + $0x50] sm:$0x1]  ;;  %v6206_v5 = vld [vmem:[%s8639_s3 + $0x8] sm:$0xff] }
 0x16a   : > { %8660 = vst [vmem:[#allocation11_spill] sm:$0xff] %v7393_v45  ;;  %v1490_v57 = vsel %vm6829_vm6, %v1485_v22, %v1489_v24  ;;  %v1511_v22 = vshll.u32 %v1173_v15, 16  ;;  %v2160_v2 = vrot.slane %v2158_v54, 4  ;;  %v2161_v0 = vrot.slane %v1173_v15, 5  ;;  %1931 = vmatpush.bf16.msrb.mxu2 %v6206_v5 }
 0x16b   : > { %v7402_v59 = vpop.f32.mrf.mxu0  ;;  %v1605_v37 = vunpack.c.l.b16 %v1490_v57  ;;  %v3198_v49 = vunpack.c.l.b16 %v2898_v1  ;;  %v1509_v12 = vrot.slane %v1508_v34, 4  ;;  %v2159_v55 = vsel %vm6799_vm3, %v5685_v39, %v2158_v54  ;;  %v6291_v54 = vld [vmem:[%s8639_s3 + $0x1b0] sm:$0xff] }
 0x16c   : > { %8662 = vst [vmem:[#allocation13_spill] sm:$0xff] %v7402_v59  ;;  %v1513_v61 = vrot.slane %v1511_v22, 5  ;;  %v1525_v22 = vshll.u32 %v7443_v13, 16  ;;  %v2220_v1 = vunpack.c.l.b16 %v2159_v55 }
 0x16d   : > { %1755 = vmatmul.bf16.gmra.mxu2 %v1623_v19  ;;  %v2757_v19 = vld [vmem:[#allocation2 + $0x4c] sm:$0xf]  ;;  %v1624_v24 = vpack.c.b16 %v1605_v37, %v1604_v63  ;;  %v3226_v26 = vpack.c.b16 %v3199_v17, %v3198_v49  ;;  %v2915_v37 = vrot.slane %v2913_v40, 5  ;;  %v2760_v40 = vld [vmem:[#allocation2 + $0x58] sm:$0xf] }
 0x16e   : > { %v7397_v21 = vpop.f32.mrf.mxu1  ;;  %2683 = vmatmul.bf16.gmra.mxu0 %v6240_v33  ;;  %v2919_v60 = vshll.u32 %v2757_v19, 16  ;;  %v1498_v33 = vor.u32 %v1497_v62, %v1494_v52  ;;  %v2912_v52 = vrot.slane %v2910_v31, 4  ;;  %v6292_v62 = vld [vmem:[%s8639_s3 + $0x1b8] sm:$0xff]  ;;  %v1514_v50 = vsel %vm6829_vm6, %v1509_v12, %v1513_v61 }
 0x16f   : > { %8661 = vst [vmem:[#allocation12_spill] sm:$0xff] %v7397_v21  ;;  %4043 = vmatpush.bf16.msra.mxu3 %v6292_v62  ;;  %v6300_v62 = vld [vmem:[%s8639_s3 + $0x1f8] sm:$0xff]  ;;  %v2943_v5 = vshll.u32 %v2760_v40, 16 }
 0x170   : > { %v7434_v53 = vrot.slane %v2919_v60, 5  ;;  %v1499_v57 = vrot.slane %v1498_v33, 4  ;;  %v2162_v60 = vsel %vm6799_vm3, %v2160_v2, %v2161_v0  ;;  %v2916_v17 = vor.u32 %v2915_v37, %v2912_v52  ;;  %v6290_v52 = vld [vmem:[%s8639_s3 + $0x1a8] sm:$0xff]  ;;  %4725 = vmatpush.bf16.msra.mxu0 %v6300_v62 }
 0x171   : > { %v7417_v42 = vpop.f32.mrf.mxu3  ;;  %v2221_v31 = vunpack.c.l.b16 %v2162_v60  ;;  %v1174_v60 = vld [vmem:[#allocation2 + $0xb0] sm:$0x1]  ;;  %v7492_v62 = vrot.slane %v2943_v5, 5  ;;  %v6298_v5 = vld [vmem:[%s8639_s3 + $0x1e8] sm:$0xff] }
 0x172   : > { %3325 = vmatmul.bf16.gmra.mxu1 %v3225_v30  ;;  %8663 = vst [vmem:[#allocation14_spill] sm:$0xff] %v7417_v42  ;;  %v2923_v30 = vshrl.u32 %v2757_v19, 16  ;;  %v6241_v19 = vld [vmem:[#allocation2 + $0x9c] sm:$0xff]  ;;  %v1504_v15 = vsel %vm6829_vm6, %v1499_v57, %v7421_v8  ;;  %v2759_v57 = vld [vmem:[#allocation2 + $0x54] sm:$0xf]  ;;  %v2917_v37 = vrot.slane %v2916_v17, 4 }
 0x173   : > { %v7423_v41 = vpop.f32.mrf.mxu0  ;;  %4044 = vmatpush.bf16.msra.mxu3 %v6291_v54  ;;  %v1606_v0 = vunpack.c.l.b16 %v1504_v15  ;;  %v2947_v15 = vshrl.u32 %v2760_v40, 16  ;;  %v2934_v54 = vshrl.u32 %v2759_v57, 16 }
 0x174   : > { %8665 = vst [vmem:[#allocation16_spill] sm:$0xff] %v7423_v41  ;;  %v2925_v18 = vrot.slane %v2923_v30, 4  ;;  %v2929_v30 = vshll.u32 %v2758_v4, 16  ;;  %v4848_v41 = vld [vmem:[#allocation2 + $0x30] sm:$0xe] }
 0x176   : > { %v7419_v43 = vpop.f32.mrf.mxu1  ;;  %v2926_v56 = vor.u32 %v2925_v18, %v7434_v53  ;;  %v1607_v18 = vunpack.c.l.b16 %v1514_v50  ;;  %v2931_v49 = vrot.slane %v2929_v30, 5  ;;  %v6289_v50 = vld [vmem:[%s8639_s3 + $0x1a0] sm:$0xff] }
 0x177   : > { %8664 = vst [vmem:[#allocation15_spill] sm:$0xff] %v7419_v43  ;;  %4045 = vmatpush.bf16.msra.mxu3 %v6290_v52 }
 0x178   : > { %2374 = vmatmul.bf16.gmra.mxu3 %v2238_v27  ;;  %v1140_v27 = vld [vmem:[#allocation2 + $0xa8] sm:$0xf]  ;;  %v2927_v8 = vrot.slane %v2926_v56, 4 }
 0x179   : > { %v1516_v33 = vshrl.u32 %v1140_v27, 16  ;;  %v1519_v34 = vshll.u32 %v1140_v27, 16  ;;  %v2165_v27 = vrot.slane %v7443_v13, 5  ;;  %v2028_v56 = vld [vmem:[#allocation2 + $0xa8] sm:$0xe] }
 0x17a   : > { %v7432_v48 = vpop.f32.mrf.mxu3  ;;  %v2932_v55 = vsel %vm6829_vm6, %v2927_v8, %v2931_v49  ;;  %v5686_v8 = vrot.slane %v2028_v56, 9  ;;  %v2168_v49 = vrot.slane %v1174_v60, 5  ;;  %v6242_v56 = vld [vmem:[#allocation2 + $0xa8] sm:$0xff] }
 0x17b   : > { %8666 = vst [vmem:[#allocation17_spill] sm:$0xff] %v7432_v48  ;;  %v7441_v63 = vpop.f32.mrf.mxu0  ;;  %v1518_v12 = vrot.slane %v1516_v33, 4  ;;  %v1521_v61 = vrot.slane %v1519_v34, 5  ;;  %v2937_v33 = vshll.u32 %v2759_v57, 16  ;;  %v6299_v34 = vld [vmem:[%s8639_s3 + $0x1f0] sm:$0xff]  ;;  %v3201_v17 = vunpack.c.l.b16 %v2932_v55  ;;  %4046 = vmatpush.bf16.msra.mxu3 %v6289_v50  ;;  %v6288_v55 = vld [vmem:[%s8639_s3 + $0x198] sm:$0xff] }
 0x17c   : > { %8668 = vst [vmem:[#allocation19_spill] sm:$0xff] %v7441_v63  ;;  %v2167_v40 = vrot.slane %v2165_v27, 4  ;;  %4726 = vmatpush.bf16.msra.mxu0 %v6299_v34  ;;  %v1142_v34 = vld [vmem:[#allocation2 + $0xb4] sm:$0xf] }
 0x17d   : > { %1760 = vmatmul.bf16.gmra.mxu2 %v1624_v24  ;;  %v1529_v24 = vshrl.u32 %v7443_v13, 16  ;;  %v2922_v13 = vsel %vm6829_vm6, %v2917_v37, %v7434_v53  ;;  %v2949_v53 = vrot.slane %v2947_v15, 4  ;;  %v2761_v37 = vld [vmem:[#allocation2 + $0x5c] sm:$0x1]  ;;  %v2166_v15 = vsel %vm6799_vm3, %v5686_v8, %v2165_v27  ;;  %v6287_v27 = vld [vmem:[%s8639_s3 + $0x190] sm:$0xff] }
 0x17e   : > { %v7436_v58 = vpop.f32.mrf.mxu1  ;;  %2688 = vmatmul.bf16.gmra.mxu0 %v6241_v19  ;;  %v7467_v19 = vrot.slane %v1525_v22, 5  ;;  %v1625_v22 = vpack.c.b16 %v1607_v18, %v1606_v0  ;;  %v2936_v0 = vrot.slane %v2934_v54, 4  ;;  %v2939_v18 = vrot.slane %v2937_v33, 5  ;;  %v7510_v33 = vld [vmem:[#allocation2 + $0xb8] sm:$0xf] }
 0x17f   : > { %8667 = vst [vmem:[#allocation18_spill] sm:$0xff] %v7436_v58  ;;  %v1531_v4 = vrot.slane %v1529_v24, 4  ;;  %v1522_v24 = vor.u32 %v1521_v61, %v1518_v12  ;;  %v2169_v50 = vsel %vm6799_vm3, %v2167_v40, %v2168_v49  ;;  %v2950_v54 = vor.u32 %v2949_v53, %v7492_v62  ;;  %4047 = vmatpush.bf16.msra.mxu3 %v6288_v55  ;;  %v2762_v49 = vld [vmem:[#allocation2 + $0x60] sm:$0xf] }
 0x180   : > { %4727 = vmatpush.bf16.msra.mxu0 %v6298_v5  ;;  %v6297_v53 = vld [vmem:[%s8639_s3 + $0x1e0] sm:$0xff]  ;;  %v1553_v55 = vshrl.u32 %v7510_v33, 16 }
 0x181   : > { %v1523_v12 = vrot.slane %v1522_v24, 4  ;;  %v2953_v24 = vshll.u32 %v2761_v37, 16  ;;  %v1540_v37 = vshrl.u32 %v1142_v34, 16 }
 0x182   : > { %3330 = vmatmul.bf16.gmra.mxu1 %v3226_v26  ;;  %v7463_v39 = vpop.f32.mrf.mxu3  ;;  %v2239_v26 = vpack.c.b16 %v2221_v31, %v2220_v1  ;;  %v1532_v1 = vor.u32 %v1531_v4, %v7467_v19  ;;  %v1535_v31 = vshll.u32 %v1174_v60, 16 }
 0x183   : > { %8669 = vst [vmem:[#allocation20_spill] sm:$0xff] %v7463_v39  ;;  %v7481_v30 = vpop.f32.mrf.mxu0  ;;  %v1528_v8 = vsel %vm6829_vm6, %v1523_v12, %v7467_v19  ;;  %4048 = vmatpush.bf16.msra.mxu3 %v6287_v27  ;;  %v2029_v27 = vld [vmem:[#allocation2 + $0xb4] sm:$0xe]  ;;  %v2767_v39 = vld [vmem:[#allocation2 + $0x74] sm:$0x1] }
 0x184   : > { %8671 = vst [vmem:[#allocation22_spill] sm:$0xff] %v7481_v30  ;;  %v1533_v61 = vrot.slane %v1532_v1, 4  ;;  %v1537_v4 = vrot.slane %v1535_v31, 5  ;;  %v2763_v1 = vld [vmem:[#allocation2 + $0x64] sm:$0xf]  ;;  %v2222_v31 = vunpack.c.l.b16 %v2166_v15  ;;  %v2958_v15 = vshrl.u32 %v2762_v49, 16  ;;  %4728 = vmatpush.bf16.msra.mxu0 %v6297_v53 }
 0x185   : > { %v2967_v19 = vshll.u32 %v2763_v1, 16  ;;  %v2971_v12 = vshrl.u32 %v2763_v1, 16  ;;  %v6296_v1 = vld [vmem:[%s8639_s3 + $0x1d8] sm:$0xff]  ;;  %v6285_v53 = vld [vmem:[%s8639_s3 + $0x180] sm:$0xff] }
 0x186   : > { %v7465_v2 = vpop.f32.mrf.mxu1  ;;  %v1538_v40 = vsel %vm6829_vm6, %v1533_v61, %v1537_v4 }
 0x187   : > { %8670 = vst [vmem:[#allocation21_spill] sm:$0xff] %v7465_v2 }
 0x188   : > { %2379 = vmatmul.bf16.gmra.mxu3 %v2239_v26  ;;  %v3200_v26 = vunpack.c.l.b16 %v2922_v13  ;;  %v6205_v13 = vld [vmem:[%s8639_s3] sm:$0xff]  ;;  %4729 = vmatpush.bf16.msra.mxu0 %v6296_v1 }
 0x189   : > { %1932 = vmatpush.bf16.msrb.mxu2 %v6205_v13  ;;  %v1608_v13 = vunpack.c.l.b16 %v1528_v8  ;;  %v2961_v8 = vshll.u32 %v2762_v49, 16  ;;  %v6295_v49 = vld [vmem:[%s8639_s3 + $0x1d0] sm:$0xff] }
 0x18a   : > { %v7490_v52 = vpop.f32.mrf.mxu3  ;;  %v3227_v60 = vpack.c.b16 %v3201_v17, %v3200_v26  ;;  %v2223_v17 = vunpack.c.l.b16 %v2169_v50 }
 0x18b   : > { %8672 = vst [vmem:[#allocation23_spill] sm:$0xff] %v7490_v52  ;;  %v7523_v26 = vpop.f32.mrf.mxu0  ;;  %v1175_v52 = vld [vmem:[#allocation2 + $0xbc] sm:$0x1]  ;;  %v2963_v30 = vrot.slane %v2961_v8, 5 }
 0x18c   : > { %8674 = vst [vmem:[#allocation25_spill] sm:$0xff] %v7523_v26  ;;  %v2240_v50 = vpack.c.b16 %v2223_v17, %v2222_v31  ;;  %v1609_v26 = vunpack.c.l.b16 %v1538_v40  ;;  %v1555_v31 = vrot.slane %v1553_v55, 4  ;;  %v2973_v40 = vrot.slane %v2971_v12, 4  ;;  %4730 = vmatpush.bf16.msra.mxu0 %v6295_v49 }
 0x18d   : > { %1765 = vmatmul.bf16.gmra.mxu2 %v1625_v22  ;;  %v2940_v22 = vor.u32 %v2939_v18, %v2936_v0  ;;  %v1543_v0 = vshll.u32 %v1142_v34, 16  ;;  %v1549_v18 = vshll.u32 %v7510_v33, 16  ;;  %v2172_v34 = vrot.slane %v7510_v33, 5 }
 0x18e   : > { %v7494_v57 = vpop.f32.mrf.mxu1  ;;  %2693 = vmatmul.bf16.gmra.mxu0 %v6242_v56  ;;  %v2955_v56 = vrot.slane %v2953_v24, 5  ;;  %v7542_v33 = vrot.slane %v2967_v19, 5 }
 0x18f   : > { %8673 = vst [vmem:[#allocation24_spill] sm:$0xff] %v7494_v57  ;;  %v2941_v5 = vrot.slane %v2940_v22, 4  ;;  %v1545_v22 = vrot.slane %v1543_v0, 5  ;;  %v7538_v24 = vrot.slane %v1549_v18, 5  ;;  %v1626_v0 = vpack.c.b16 %v1609_v26, %v1608_v13 }
 0x190   : > { %v5687_v18 = vrot.slane %v2029_v27, 9  ;;  %v2174_v55 = vrot.slane %v2172_v34, 4  ;;  %v8642_v13 = vrot.slane %v7277_v36, 5 }
 0x191   : > { %v1556_v12 = vor.u32 %v1555_v31, %v7538_v24 }
 0x192   : > { %3335 = vmatmul.bf16.gmra.mxu1 %v3227_v60  ;;  %v2951_v60 = vrot.slane %v2950_v54, 4  ;;  %v7529_v4 = vpop.f32.mrf.mxu3  ;;  %v6286_v54 = vld [vmem:[%s8639_s3 + $0x188] sm:$0xff] }
 0x193   : > { %8676 = vst [vmem:[#allocation27_spill] sm:$0xff] %v7529_v4  ;;  %v1542_v4 = vrot.slane %v1540_v37, 4  ;;  %4049 = vmatpush.bf16.msra.mxu3 %v6286_v54  ;;  %v2946_v37 = vsel %vm6829_vm6, %v2941_v5, %v7492_v62  ;;  %v2764_v54 = vld [vmem:[#allocation2 + $0x68] sm:$0x1]  ;;  %v2974_v62 = vor.u32 %v2973_v40, %v7542_v33  ;;  %v7555_v26 = vpop.f32.mrf.mxu0  ;;  %v1557_v40 = vrot.slane %v1556_v12, 4 }
 0x194   : > { %v2956_v17 = vsel %vm6829_vm6, %v2951_v60, %v2955_v56  ;;  %v1559_v56 = vshll.u32 %v1175_v52, 16  ;;  %8677 = vst [vmem:[#allocation28_spill] sm:$0xff] %v7555_v26  ;;  %v3202_v5 = vunpack.c.l.b16 %v2946_v37  ;;  %v2977_v27 = vshll.u32 %v2764_v54, 16  ;;  %v2765_v54 = vld [vmem:[#allocation2 + $0x6c] sm:$0xf] }
 0x195   : > { %v3203_v60 = vunpack.c.l.b16 %v2956_v17  ;;  %v1546_v19 = vor.u32 %v1545_v22, %v1542_v4  ;;  %v2173_v4 = vsel %vm6799_vm3, %v5687_v18, %v2172_v34  ;;  %v6243_v17 = vld [vmem:[#allocation2 + $0xb4] sm:$0xff] }
 0x196   : > { %v7527_v61 = vpop.f32.mrf.mxu1  ;;  %v2224_v34 = vunpack.c.l.b16 %v2173_v4  ;;  %v2979_v49 = vrot.slane %v2977_v27, 5  ;;  %v7579_v12 = vld [vmem:[#allocation2 + $0x14] sm:$0x1]  ;;  %v7589_v27 = vld [vmem:[#allocation2 + $0x20] sm:$0x1] }
 0x197   : > { %8675 = vst [vmem:[#allocation26_spill] sm:$0xff] %v7527_v61  ;;  %v2175_v61 = vrot.slane %v1175_v52, 5  ;;  %4050 = vmatpush.bf16.msra.mxu3 %v6285_v53  ;;  %v3228_v31 = vpack.c.b16 %v3203_v60, %v3202_v5  ;;  %v1547_v8 = vrot.slane %v1546_v19, 4  ;;  %v1561_v53 = vrot.slane %v1559_v56, 5  ;;  %v6293_v60 = vld [vmem:[%s8639_s3 + $0x1c0] sm:$0xff] }
 0x198   : > { %2384 = vmatmul.bf16.gmra.mxu3 %v2240_v50  ;;  %v2960_v50 = vrot.slane %v2958_v15, 4  ;;  %v6294_v15 = vld [vmem:[%s8639_s3 + $0x1c8] sm:$0xff]  ;;  %v4846_v19 = vld [vmem:[#allocation2 + $0x18] sm:$0xe]  ;;  %v2766_v5 = vld [vmem:[#allocation2 + $0x70] sm:$0xf] }
 0x199   : > { %v2176_v52 = vsel %vm6799_vm3, %v2174_v55, %v2175_v61  ;;  %v6268_v61 = vld [vmem:[%s8639_s3 + $0x178] sm:$0xff]  ;;  %4731 = vmatpush.bf16.msra.mxu0 %v6294_v15 }
 0x19a   : > { %v7567_v22 = vpop.f32.mrf.mxu3  ;;  %v2964_v37 = vor.u32 %v2963_v30, %v2960_v50  ;;  %v2225_v18 = vunpack.c.l.b16 %v2176_v52  ;;  %v4165_v55 = vld [vmem:[#allocation2 + $0x1c] sm:$0xf]  ;;  %v7577_v30 = vrot.slane %v8642_v13, 4  ;;  %v1552_v50 = vsel %vm6829_vm6, %v1547_v8, %v7538_v24  ;;  %3728 = vmatpush.bf16.msra.mxu2 %v6268_v61  ;;  %v4164_v56 = vld [vmem:[#allocation2 + $0x18] sm:$0xf] }
 0x19b   : > { %8679 = vst [vmem:[#allocation30_spill] sm:$0xff] %v7567_v22  ;;  %v4222_v15 = vshll.u32 %v4165_v55, 16  ;;  %v2982_v13 = vshrl.u32 %v2765_v54, 16  ;;  %v6120_v22 = vrot.slane %v4846_v19, 9  ;;  %v4912_v26 = vrot.slane %v4165_v55, 5 }
 0x19c   : > { %v2965_v4 = vrot.slane %v2964_v37, 4  ;;  %v1610_v24 = vunpack.c.l.b16 %v1552_v50  ;;  %v7593_v37 = vpop.f32.mrf.mxu0  ;;  %v2995_v61 = vshrl.u32 %v2766_v5, 16  ;;  %v4213_v19 = vshrl.u32 %v4164_v56, 16 }
 0x19d   : > { %1770 = vmatmul.bf16.gmra.mxu2 %v1626_v0  ;;  %v2975_v0 = vrot.slane %v2974_v62, 4  ;;  %v1562_v62 = vsel %vm6829_vm6, %v1557_v40, %v1561_v53  ;;  %v2985_v40 = vshll.u32 %v2765_v54, 16  ;;  %v2991_v53 = vshll.u32 %v2766_v5, 16  ;;  %4732 = vmatpush.bf16.msra.mxu0 %v6293_v60  ;;  %8681 = vst [vmem:[#allocation32_spill] sm:$0xff] %v7593_v37 }
 0x19e   : > { %2698 = vmatmul.bf16.gmra.mxu0 %v6243_v17  ;;  %v2241_v17 = vpack.c.b16 %v2225_v18, %v2224_v34  ;;  %v1611_v8 = vunpack.c.l.b16 %v1562_v62  ;;  %v4914_v34 = vrot.slane %v4912_v26, 4  ;;  %v4915_v18 = vrot.slane %v7589_v27, 5  ;;  %v4847_v62 = vld [vmem:[#allocation2 + $0x24] sm:$0xe] }
 0x19f   : > { %v7558_v1 = vpop.f32.mrf.mxu1  ;;  %v2980_v52 = vsel %vm6829_vm6, %v2975_v0, %v2979_v49  ;;  %v7595_v0 = vld [vmem:[#allocation2 + $0x28] sm:$0xf]  ;;  %v4913_v49 = vsel %vm6799_vm3, %v6120_v22, %v4912_v26  ;;  %v7600_v57 = vrot.slane %v4222_v15, 5  ;;  %v2970_v60 = vsel %vm6829_vm6, %v2965_v4, %v7542_v33  ;;  %v6308_v26 = vld [vmem:[%s8639_s3 + $0x238] sm:$0xff]  ;;  %v7610_v22 = vld [vmem:[#allocation2 + $0x2c] sm:$0x1] }
 0x1a0   : > { %8678 = vst [vmem:[#allocation29_spill] sm:$0xff] %v7558_v1  ;;  %v3205_v5 = vunpack.c.l.b16 %v2980_v52  ;;  %v2984_v37 = vrot.slane %v2982_v13, 4  ;;  %v4916_v15 = vsel %vm6799_vm3, %v4914_v34, %v4915_v18  ;;  %v2987_v33 = vrot.slane %v2985_v40, 5  ;;  %5151 = vmatpush.bf16.msra.mxu1 %v6308_v26  ;;  %v7626_v26 = vld [vmem:[#allocation2 + $0x38] sm:$0x1] }
 0x1a1   : > { %v7617_v4 = vrot.slane %v2991_v53, 5  ;;  %v2997_v13 = vrot.slane %v2995_v61, 4  ;;  %v6121_v52 = vrot.slane %v4847_v62, 9  ;;  %v4922_v48 = vrot.slane %v7610_v22, 5 }
 0x1a2   : > { %3340 = vmatmul.bf16.gmra.mxu1 %v3228_v31  ;;  %v4226_v31 = vshrl.u32 %v4165_v55, 16  ;;  %v4216_v55 = vshll.u32 %v4164_v56, 16  ;;  %v7602_v54 = vpop.f32.mrf.mxu3  ;;  %v7612_v56 = vld [vmem:[#allocation2 + $0x34] sm:$0xf]  ;;  %v4215_v34 = vrot.slane %v4213_v19, 4  ;;  %v3001_v61 = vshll.u32 %v2767_v39, 16 }
 0x1a3   : > { %8682 = vst [vmem:[#allocation33_spill] sm:$0xff] %v7602_v54  ;;  %v5039_v54 = vunpack.c.l.b16 %v4913_v49  ;;  %v6244_v49 = vld [vmem:[#allocation2 + $0xc0] sm:$0xff]  ;;  %v6122_v39 = vrot.slane %v4848_v41, 9 }
 0x1a4   : > { %v4228_v50 = vrot.slane %v4226_v31, 4  ;;  %v1627_v31 = vpack.c.b16 %v1611_v8, %v1610_v24  ;;  %v4926_v24 = vrot.slane %v7612_v56, 5  ;;  %v3204_v8 = vunpack.c.l.b16 %v2970_v60 }
 0x1a5   : > { %v4218_v18 = vrot.slane %v4216_v55, 5  ;;  %v2998_v60 = vor.u32 %v2997_v13, %v7617_v4 }
 0x1a6   : > { %v4229_v40 = vor.u32 %v4228_v50, %v7600_v57  ;;  %v3229_v55 = vpack.c.b16 %v3205_v5, %v3204_v8  ;;  %v2988_v50 = vor.u32 %v2987_v33, %v2984_v37  ;;  %v3003_v5 = vrot.slane %v3001_v61, 5  ;;  %v4167_v61 = vld [vmem:[#allocation2 + $0x24] sm:$0xf] }
 0x1a7   : > { %v7591_v1 = vpop.f32.mrf.mxu1  ;;  %v2999_v13 = vrot.slane %v2998_v60, 4 }
 0x1a8   : > { %8680 = vst [vmem:[#allocation31_spill] sm:$0xff] %v7591_v1  ;;  %2389 = vmatmul.bf16.gmra.mxu3 %v2241_v17  ;;  %v5040_v17 = vunpack.c.l.b16 %v4916_v15  ;;  %v4919_v1 = vrot.slane %v7595_v0, 5  ;;  %v8684_v15 = vrot.slane %v7579_v12, 5  ;;  %v4927_v12 = vsel %vm6799_vm3, %v6122_v39, %v4926_v24 }
 0x1a9   : > { %v4230_v37 = vrot.slane %v4229_v40, 4  ;;  %v2989_v41 = vrot.slane %v2988_v50, 4  ;;  %v4250_v50 = vshrl.u32 %v7595_v0, 16 }
 0x1aa   : > { %v7619_v63 = vpack.c.b16 %v5040_v17, %v5039_v54  ;;  %v4921_v2 = vrot.slane %v4919_v1, 4  ;;  %v4920_v62 = vsel %vm6799_vm3, %v6121_v52, %v4919_v1  ;;  %v7637_v19 = vsel %vm6799_vm3, %v7577_v30, %v8684_v15  ;;  %v7641_v1 = vpop.f32.mrf.mxu0 }
 0x1ab   : > { %8685 = vst [vmem:[#allocation35_spill] sm:$0xff] %v7641_v1  ;;  %v4929_v30 = vrot.slane %v7626_v26, 5  ;;  %v7646_v33 = vpop.f32.mrf.mxu3  ;;  %v2994_v39 = vsel %vm6829_vm6, %v2989_v41, %v7617_v4  ;;  %v4240_v4 = vshll.u32 %v4167_v61, 16  ;;  %v8688_v41 = vrot.slane %v7277_v36, 5 }
 0x1ac   : > { %v4923_v54 = vsel %vm6799_vm3, %v4921_v2, %v4922_v48  ;;  %v4219_v48 = vor.u32 %v4218_v18, %v4215_v34  ;;  %v5041_v2 = vunpack.c.l.b16 %v4920_v62  ;;  %8686 = vst [vmem:[#allocation36_spill] sm:$0xff] %v7646_v33  ;;  %v5043_v34 = vunpack.c.l.b16 %v4927_v12  ;;  %v3423_v62 = vld [vmem:[#allocation2 + $0xc] sm:$0xe]  ;;  %v7679_v33 = vld [vmem:[#allocation2 + $0x44] sm:$0x1] }
 0x1ad   : > { %1775 = vmatmul.bf16.gmra.mxu2 %v1627_v31  ;;  %v4232_v31 = vshll.u32 %v7589_v27, 16  ;;  %v5042_v17 = vunpack.c.l.b16 %v4923_v54 }
 0x1ae   : > { %2703 = vmatmul.bf16.gmra.mxu0 %v6244_v49  ;;  %v2768_v49 = vld [vmem:[#allocation2 + $0x78] sm:$0xf]  ;;  %v4220_v54 = vrot.slane %v4219_v48, 4  ;;  %v5896_v48 = vrot.slane %v3423_v62, 9 }
 0x1af   : > { %v7624_v53 = vpop.f32.mrf.mxu1  ;;  %v7648_v27 = vpack.c.b16 %v5042_v17, %v5041_v2  ;;  %v4234_v8 = vrot.slane %v4232_v31, 5  ;;  %v3004_v31 = vsel %vm6829_vm6, %v2999_v13, %v3003_v5  ;;  %v3006_v17 = vshrl.u32 %v2768_v49, 16  ;;  %v6189_v2 = vld [vmem:[#allocation2] sm:$0xff] }
 0x1b0   : > { %8683 = vst [vmem:[#allocation34_spill] sm:$0xff] %v7624_v53  ;;  %v4928_v53 = vrot.slane %v4926_v24, 4  ;;  %v2769_v24 = vld [vmem:[#allocation2 + $0x7c] sm:$0xf]  ;;  %v3009_v12 = vshll.u32 %v2768_v49, 16  ;;  %v3490_v5 = vsel %vm6799_vm3, %v5896_v48, %v8688_v41 }
 0x1b1   : > { %v4235_v40 = vsel %vm6829_vm6, %v4230_v37, %v4234_v8  ;;  %v3019_v37 = vshrl.u32 %v2769_v24, 16  ;;  %v4225_v8 = vsel %vm6829_vm6, %v4220_v54, %v7600_v57  ;;  %v3616_v62 = vunpack.c.l.b16 %v3490_v5  ;;  %v4849_v57 = vld [vmem:[#allocation2 + $0x3c] sm:$0xe] }
 0x1b2   : > { %3345 = vmatmul.bf16.gmra.mxu1 %v3229_v55  ;;  %v4930_v52 = vsel %vm6799_vm3, %v4928_v53, %v4929_v30  ;;  %v4246_v55 = vshll.u32 %v7595_v0, 16  ;;  %v6269_v53 = vld [vmem:[#allocation2 + $0x18] sm:$0xff]  ;;  %v3015_v30 = vshll.u32 %v2769_v24, 16  ;;  %v3617_v0 = vunpack.c.l.b16 %v7637_v19  ;;  %v7677_v24 = vpop.f32.mrf.mxu0 }
 0x1b3   : > { %v5044_v18 = vunpack.c.l.b16 %v4930_v52  ;;  %v7665_v52 = vld [vmem:[#allocation2 + $0x40] sm:$0xf]  ;;  %v4614_v13 = vunpack.c.l.b16 %v4235_v40  ;;  %8689 = vst [vmem:[#allocation38_spill] sm:$0xff] %v7677_v24  ;;  %v3206_v19 = vunpack.c.l.b16 %v2994_v39  ;;  %v3011_v36 = vrot.slane %v3009_v12, 5  ;;  %v7684_v40 = vpop.f32.mrf.mxu3 }
 0x1b4   : > { %v7675_v49 = vrot.slane %v4246_v55, 5  ;;  %v4933_v54 = vrot.slane %v7665_v52, 5  ;;  %v3021_v1 = vrot.slane %v3019_v37, 4  ;;  %v7682_v48 = vpack.c.b16 %v3617_v0, %v3616_v62  ;;  %8690 = vst [vmem:[#allocation39_spill] sm:$0xff] %v7684_v40  ;;  %v2770_v39 = vld [vmem:[#allocation2 + $0x80] sm:$0x1] }
 0x1b5   : > { %v7658_v60 = vpack.c.b16 %v5044_v18, %v5043_v34  ;;  %v4237_v34 = vshrl.u32 %v4167_v61, 16  ;;  %v4252_v18 = vrot.slane %v4250_v50, 4  ;;  %v3017_v61 = vrot.slane %v3015_v30, 5 }
 0x1b6   : > { %v4613_v55 = vunpack.c.l.b16 %v4225_v8  ;;  %v4935_v50 = vrot.slane %v4933_v54, 4  ;;  %v6123_v5 = vrot.slane %v4849_v57, 9  ;;  %v4936_v24 = vrot.slane %v7679_v33, 5 }
 0x1b7   : > { %v7652_v15 = vpop.f32.mrf.mxu1  ;;  %v3025_v12 = vshll.u32 %v2770_v39, 16  ;;  %v4253_v30 = vor.u32 %v4252_v18, %v7675_v49  ;;  %v3022_v0 = vor.u32 %v3021_v1, %v3017_v61  ;;  %v4270_v39 = vshll.u32 %v7612_v56, 16 }
 0x1b8   : > { %8687 = vst [vmem:[#allocation37_spill] sm:$0xff] %v7652_v15  ;;  %4051 = vmatmul.bf16.vlgmr.msra.gmra.mxu3 %v6269_v53  ;;  %v3207_v53 = vunpack.c.l.b16 %v3004_v31  ;;  %v3008_v15 = vrot.slane %v3006_v17, 4  ;;  %v4239_v31 = vrot.slane %v4237_v34, 4  ;;  %v4242_v17 = vrot.slane %v4240_v4, 5  ;;  %v6267_v4 = vld [vmem:[%s8639_s3 + $0x170] sm:$0xff] }
 0x1b9   : > { %v4934_v8 = vsel %vm6799_vm3, %v6123_v5, %v4933_v54  ;;  %v4937_v62 = vsel %vm6799_vm3, %v4935_v50, %v4936_v24  ;;  %v4256_v34 = vshll.u32 %v7610_v22, 16  ;;  %3729 = vmatpush.bf16.msra.mxu2 %v6267_v4  ;;  %v3027_v57 = vrot.slane %v3025_v12, 5  ;;  %v2771_v54 = vld [vmem:[#allocation2 + $0x84] sm:$0xf]  ;;  %v4170_v50 = vld [vmem:[#allocation2 + $0x30] sm:$0xf] }
 0x1ba   : > { %v3230_v58 = vpack.c.b16 %v3207_v53, %v3206_v19  ;;  %v3012_v37 = vor.u32 %v3011_v36, %v3008_v15  ;;  %v4254_v19 = vrot.slane %v4253_v30, 4  ;;  %v5045_v18 = vunpack.c.l.b16 %v4934_v8  ;;  %v7700_v36 = vpop.f32.mrf.mxu0 }
 0x1bb   : > { %v5046_v15 = vunpack.c.l.b16 %v4937_v62  ;;  %v3023_v53 = vrot.slane %v3022_v0, 4  ;;  %8692 = vst [vmem:[#allocation41_spill] sm:$0xff] %v7700_v36  ;;  %v4258_v24 = vrot.slane %v4256_v34, 5  ;;  %v3033_v0 = vshll.u32 %v2771_v54, 16 }
 0x1bc   : > { %v3013_v1 = vrot.slane %v3012_v37, 4  ;;  %v3030_v37 = vshrl.u32 %v2771_v54, 16  ;;  %v4264_v54 = vshll.u32 %v4170_v50, 16 }
 0x1bd   : > { %1933 = vmatmul.bf16.vlgmr.msrb.gmra.mxu2 %v6189_v2  ;;  %v4645_v2 = vpack.c.b16 %v4614_v13, %v4613_v55  ;;  %v4243_v13 = vor.u32 %v4242_v17, %v4239_v31  ;;  %v7702_v55 = vpack.c.b16 %v5046_v15, %v5045_v18  ;;  %v4274_v31 = vshrl.u32 %v7612_v56, 16  ;;  %v7708_v17 = vpop.f32.mrf.mxu3 }
 0x1be   : > { %8693 = vst [vmem:[#allocation42_spill] sm:$0xff] %v7708_v17  ;;  %v4259_v30 = vsel %vm6829_vm6, %v4254_v19, %v4258_v24  ;;  %v3018_v8 = vsel %vm6829_vm6, %v3013_v1, %v3017_v61  ;;  %v3028_v62 = vsel %vm6829_vm6, %v3023_v53, %v3027_v57  ;;  %v4261_v18 = vshrl.u32 %v4170_v50, 16  ;;  %v6190_v19 = vld [vmem:[#allocation2 + $0xc] sm:$0xff]  ;;  %v4850_v17 = vld [vmem:[#allocation2 + $0x48] sm:$0xe] }
 0x1bf   : > { %v7686_v41 = vpop.f32.mrf.mxu1  ;;  %4733 = vmatmul.bf16.vlgmr.msra.gmra.mxu0 %v4645_v2  ;;  %v6270_v2 = vld [vmem:[#allocation2 + $0x24] sm:$0xff]  ;;  %v4244_v12 = vrot.slane %v4243_v13, 4  ;;  %v6307_v13 = vld [vmem:[%s8639_s3 + $0x230] sm:$0xff]  ;;  %v4616_v15 = vunpack.c.l.b16 %v4259_v30  ;;  %v7724_v24 = vrot.slane %v4270_v39, 5  ;;  %v4276_v61 = vrot.slane %v4274_v31, 4 }
 0x1c0   : > { %v7689_v42 = vpop.f32.mrf.mxu2  ;;  %v3208_v1 = vunpack.c.l.b16 %v3018_v8  ;;  %v3209_v53 = vunpack.c.l.b16 %v3028_v62  ;;  %v3032_v57 = vrot.slane %v3030_v37, 4  ;;  %5152 = vmatpush.bf16.msra.mxu1 %v6307_v13  ;;  %v2773_v8 = vld [vmem:[#allocation2 + $0x8c] sm:$0x1]  ;;  %v4266_v13 = vrot.slane %v4264_v54, 5 }
 0x1c1   : > { %8691 = vst [vmem:[#allocation40_spill] sm:$0xff] %v7689_v42  ;;  %v4249_v56 = vsel %vm6829_vm6, %v4244_v12, %v7675_v49  ;;  %v4263_v42 = vrot.slane %v4261_v18, 4  ;;  %v4277_v50 = vor.u32 %v4276_v61, %v7724_v24  ;;  %v6124_v18 = vrot.slane %v4850_v17, 9  ;;  %v2775_v17 = vld [vmem:[#allocation2 + $0x94] sm:$0xf] }
 0x1c2   : > { %3350 = vmatmul.bf16.gmra.mxu1 %v3230_v58  ;;  %v2772_v58 = vld [vmem:[#allocation2 + $0x88] sm:$0xf]  ;;  %v7732_v31 = vpop.f32.mrf.mxu0  ;;  %v3231_v30 = vpack.c.b16 %v3209_v53, %v3208_v1 }
 0x1c3   : > { %v3039_v34 = vshll.u32 %v2772_v58, 16  ;;  %v3043_v4 = vshrl.u32 %v2772_v58, 16  ;;  %v3035_v58 = vrot.slane %v3033_v0, 5  ;;  %8695 = vst [vmem:[#allocation44_spill] sm:$0xff] %v7732_v31  ;;  %v4278_v61 = vrot.slane %v4277_v50, 4 }
 0x1c4   : > { %v4267_v54 = vor.u32 %v4266_v13, %v4263_v42  ;;  %v4298_v42 = vshrl.u32 %v7665_v52, 16  ;;  %v6271_v13 = vld [vmem:[#allocation2 + $0x30] sm:$0xff] }
 0x1c5   : > { %v3041_v49 = vrot.slane %v3039_v34, 5  ;;  %v3045_v12 = vrot.slane %v3043_v4, 4  ;;  %v3036_v62 = vor.u32 %v3035_v58, %v3032_v57  ;;  %v7736_v34 = vld [vmem:[#allocation2 + $0x50] sm:$0x1]  ;;  %v7739_v40 = vpop.f32.mrf.mxu3 }
 0x1c6   : > { %8697 = vst [vmem:[#allocation46_spill] sm:$0xff] %v7739_v40  ;;  %v3067_v40 = vshrl.u32 %v2775_v17, 16 }
 0x1c7   : > { %v7704_v22 = vpop.f32.mrf.mxu1  ;;  %v3046_v4 = vor.u32 %v3045_v12, %v3041_v49 }
 0x1c8   : > { %v7710_v5 = vpop.f32.mrf.mxu2  ;;  %4056 = vmatmul.bf16.gmra.mxu3 %v6270_v2  ;;  %v7726_v2 = vld [vmem:[#allocation2 + $0x4c] sm:$0xf] }
 0x1c9   : > { %8694 = vst [vmem:[#allocation43_spill] sm:$0xff] %v7710_v5  ;;  %v4615_v5 = vunpack.c.l.b16 %v4249_v56  ;;  %v4940_v39 = vrot.slane %v7726_v2, 5  ;;  %v3049_v56 = vshll.u32 %v2773_v8, 16  ;;  %v3047_v57 = vrot.slane %v3046_v4, 4  ;;  %v2774_v8 = vld [vmem:[#allocation2 + $0x90] sm:$0xf] }
 0x1cb   : > { %v4646_v0 = vpack.c.b16 %v4616_v15, %v4615_v5  ;;  %v4941_v1 = vsel %vm6799_vm3, %v6124_v18, %v4940_v39  ;;  %v4942_v53 = vrot.slane %v4940_v39, 4  ;;  %v4943_v5 = vrot.slane %v7736_v34, 5  ;;  %v4173_v18 = vld [vmem:[#allocation2 + $0x3c] sm:$0xf] }
 0x1cc   : > { %v3037_v15 = vrot.slane %v3036_v62, 4  ;;  %v3051_v58 = vrot.slane %v3049_v56, 5  ;;  %v3054_v56 = vshrl.u32 %v2774_v8, 16 }
 0x1cd   : > { %1938 = vmatmul.bf16.gmra.mxu2 %v6190_v19  ;;  %v4280_v19 = vshll.u32 %v7626_v26, 16  ;;  %v4944_v26 = vsel %vm6799_vm3, %v4942_v53, %v4943_v5  ;;  %v4268_v5 = vrot.slane %v4267_v54, 4  ;;  %v4851_v54 = vld [vmem:[#allocation2 + $0x54] sm:$0xe] }
 0x1ce   : > { %v5048_v50 = vunpack.c.l.b16 %v4944_v26  ;;  %v3042_v4 = vsel %vm6829_vm6, %v3037_v15, %v3041_v49  ;;  %v3063_v26 = vshll.u32 %v2775_v17, 16  ;;  %v6191_v49 = vld [vmem:[#allocation2 + $0x18] sm:$0xff]  ;;  %v6125_v43 = vrot.slane %v4851_v54, 9 }
 0x1cf   : > { %v7728_v36 = vpop.f32.mrf.mxu1  ;;  %4738 = vmatmul.bf16.gmra.mxu0 %v4646_v0  ;;  %v4282_v12 = vrot.slane %v4280_v19, 5  ;;  %v5047_v0 = vunpack.c.l.b16 %v4941_v1  ;;  %v3057_v19 = vshll.u32 %v2774_v8, 16  ;;  %v3052_v1 = vsel %vm6829_vm6, %v3047_v57, %v3051_v58  ;;  %v7769_v58 = vpop.f32.mrf.mxu3 }
 0x1d0   : > { %v7734_v37 = vpop.f32.mrf.mxu2  ;;  %v3210_v15 = vunpack.c.l.b16 %v3042_v4  ;;  %v4273_v8 = vsel %vm6829_vm6, %v4268_v5, %v7724_v24  ;;  %v4300_v57 = vrot.slane %v4298_v42, 4  ;;  %8701 = vst [vmem:[#allocation50_spill] sm:$0xff] %v7769_v58  ;;  %v3211_v17 = vunpack.c.l.b16 %v3052_v1  ;;  %v2776_v58 = vld [vmem:[#allocation2 + $0x98] sm:$0x1] }
 0x1d1   : > { %8696 = vst [vmem:[#allocation45_spill] sm:$0xff] %v7734_v37  ;;  %v4283_v39 = vsel %vm6829_vm6, %v4278_v61, %v4282_v12  ;;  %v7756_v53 = vpack.c.b16 %v5048_v50, %v5047_v0  ;;  %v7760_v61 = vld [vmem:[#allocation2 + $0x58] sm:$0xf]  ;;  %v7762_v12 = vpop.f32.mrf.mxu0  ;;  %v3056_v50 = vrot.slane %v3054_v56, 4  ;;  %v3059_v59 = vrot.slane %v3057_v19, 5 }
 0x1d2   : > { %3355 = vmatmul.bf16.gmra.mxu1 %v3231_v30  ;;  %v4294_v30 = vshll.u32 %v7665_v52, 16  ;;  %8700 = vst [vmem:[#allocation49_spill] sm:$0xff] %v7762_v12  ;;  %v4285_v52 = vshrl.u32 %v4173_v18, 16  ;;  %v4618_v0 = vunpack.c.l.b16 %v4283_v39  ;;  %v7771_v12 = vld [vmem:[#allocation2 + $0x5c] sm:$0x1]  ;;  %v4617_v4 = vunpack.c.l.b16 %v4273_v8 }
 0x1d3   : > { %v4950_v1 = vrot.slane %v7771_v12, 5  ;;  %v3232_v56 = vpack.c.b16 %v3211_v17, %v3210_v15  ;;  %v3060_v21 = vor.u32 %v3059_v59, %v3056_v50  ;;  %v2777_v17 = vld [vmem:[#allocation2 + $0x9c] sm:$0xf] }
 0x1d4   : > { %v7764_v31 = vrot.slane %v4294_v30, 5  ;;  %v3065_v30 = vrot.slane %v3063_v26, 5  ;;  %v4287_v24 = vrot.slane %v4285_v52, 4  ;;  %v4647_v5 = vpack.c.b16 %v4618_v0, %v4617_v4  ;;  %v6266_v52 = vld [vmem:[%s8639_s3 + $0x168] sm:$0xff] }
 0x1d5   : > { %v3061_v54 = vrot.slane %v3060_v21, 4  ;;  %3730 = vmatpush.bf16.msra.mxu2 %v6266_v52  ;;  %v4176_v4 = vld [vmem:[#allocation2 + $0x48] sm:$0xf]  ;;  %v3078_v21 = vshrl.u32 %v2777_v17, 16 }
 0x1d6   : > { %v4301_v42 = vor.u32 %v4300_v57, %v7764_v31 }
 0x1d7   : > { %v7747_v37 = vpop.f32.mrf.mxu1 }
 0x1d8   : > { %8698 = vst [vmem:[#allocation47_spill] sm:$0xff] %v7747_v37  ;;  %v7752_v62 = vpop.f32.mrf.mxu2  ;;  %4061 = vmatmul.bf16.gmra.mxu3 %v6271_v13  ;;  %v3069_v13 = vrot.slane %v3067_v40, 4 }
 0x1d9   : > { %8699 = vst [vmem:[#allocation48_spill] sm:$0xff] %v7752_v62  ;;  %v4288_v62 = vshll.u32 %v4173_v18, 16  ;;  %v4947_v18 = vrot.slane %v7760_v61, 5  ;;  %v7788_v59 = vpop.f32.mrf.mxu0 }
 0x1da   : > { %v3070_v26 = vor.u32 %v3069_v13, %v3065_v30  ;;  %8704 = vst [vmem:[#allocation53_spill] sm:$0xff] %v7788_v59  ;;  %v7792_v13 = vpop.f32.mrf.mxu3 }
 0x1db   : > { %v4949_v45 = vrot.slane %v4947_v18, 4  ;;  %v4290_v39 = vrot.slane %v4288_v62, 5  ;;  %v4948_v40 = vsel %vm6799_vm3, %v6125_v43, %v4947_v18  ;;  %v4304_v62 = vshll.u32 %v7679_v33, 16  ;;  %8705 = vst [vmem:[#allocation54_spill] sm:$0xff] %v7792_v13 }
 0x1dc   : > { %v5049_v0 = vunpack.c.l.b16 %v4948_v40  ;;  %v4302_v43 = vrot.slane %v4301_v42, 4  ;;  %v3081_v42 = vshll.u32 %v2777_v17, 16  ;;  %v6272_v40 = vld [vmem:[#allocation2 + $0x3c] sm:$0xff] }
 0x1dd   : > { %1943 = vmatmul.bf16.gmra.mxu2 %v6191_v49  ;;  %v3073_v49 = vshll.u32 %v2776_v58, 16  ;;  %v4951_v8 = vsel %vm6799_vm3, %v4949_v45, %v4950_v1  ;;  %v4291_v15 = vor.u32 %v4290_v39, %v4287_v24  ;;  %v3071_v58 = vrot.slane %v3070_v26, 4  ;;  %v2778_v45 = vld [vmem:[#allocation2 + $0xa0] sm:$0xf] }
 0x1de   : > { %v5050_v57 = vunpack.c.l.b16 %v4951_v8  ;;  %v4306_v33 = vrot.slane %v4304_v62, 5  ;;  %v4318_v1 = vshll.u32 %v7726_v2, 16  ;;  %v4322_v24 = vshrl.u32 %v7726_v2, 16 }
 0x1df   : > { %v7774_v38 = vpop.f32.mrf.mxu1  ;;  %4743 = vmatmul.bf16.gmra.mxu0 %v4647_v5  ;;  %v3075_v50 = vrot.slane %v3073_v49, 5  ;;  %v3066_v26 = vsel %vm6829_vm6, %v3061_v54, %v3065_v30  ;;  %v3087_v8 = vshll.u32 %v2778_v45, 16  ;;  %v3091_v62 = vshrl.u32 %v2778_v45, 16  ;;  %v6306_v54 = vld [vmem:[%s8639_s3 + $0x228] sm:$0xff] }
 0x1e0   : > { %8702 = vst [vmem:[#allocation51_spill] sm:$0xff] %v7774_v38  ;;  %v7778_v19 = vpop.f32.mrf.mxu2  ;;  %v7790_v18 = vpack.c.b16 %v5050_v57, %v5049_v0  ;;  %v4307_v49 = vsel %vm6829_vm6, %v4302_v43, %v4306_v33  ;;  %v4309_v2 = vshrl.u32 %v4176_v4, 16  ;;  %v7806_v0 = vld [vmem:[#allocation2 + $0x64] sm:$0xf]  ;;  %v4312_v57 = vshll.u32 %v4176_v4, 16  ;;  %5153 = vmatpush.bf16.msra.mxu1 %v6306_v54 }
 0x1e1   : > { %8703 = vst [vmem:[#allocation52_spill] sm:$0xff] %v7778_v19  ;;  %v3076_v52 = vsel %vm6829_vm6, %v3071_v58, %v3075_v50  ;;  %v7811_v17 = vrot.slane %v4318_v1, 5  ;;  %v4324_v30 = vrot.slane %v4322_v24, 4  ;;  %v6192_v43 = vld [vmem:[#allocation2 + $0x24] sm:$0xff]  ;;  %v3212_v45 = vunpack.c.l.b16 %v3066_v26 }
 0x1e2   : > { %3360 = vmatmul.bf16.gmra.mxu1 %v3232_v56  ;;  %v4292_v56 = vrot.slane %v4291_v15, 4  ;;  %v4620_v33 = vunpack.c.l.b16 %v4307_v49  ;;  %v3080_v58 = vrot.slane %v3078_v21, 4  ;;  %v3083_v50 = vrot.slane %v3081_v42, 5  ;;  %v7828_v38 = vpop.f32.mrf.mxu3 }
 0x1e3   : > { %v3213_v19 = vunpack.c.l.b16 %v3076_v52  ;;  %v3093_v13 = vrot.slane %v3091_v62, 4  ;;  %v4954_v4 = vrot.slane %v7806_v0, 5  ;;  %v4311_v24 = vrot.slane %v4309_v2, 4  ;;  %v2779_v52 = vld [vmem:[#allocation2 + $0xa4] sm:$0x1]  ;;  %8710 = vst [vmem:[#allocation59_spill] sm:$0xff] %v7828_v38 }
 0x1e4   : > { %v4297_v15 = vsel %vm6829_vm6, %v4292_v56, %v7764_v31  ;;  %v7818_v31 = vld [vmem:[#allocation2 + $0x68] sm:$0x1]  ;;  %v7821_v56 = vpop.f32.mrf.mxu0  ;;  %v4314_v59 = vrot.slane %v4312_v57, 5  ;;  %v4325_v26 = vor.u32 %v4324_v30, %v7811_v17  ;;  %v3084_v62 = vor.u32 %v3083_v50, %v3080_v58  ;;  %v4179_v50 = vld [vmem:[#allocation2 + $0x54] sm:$0xf] }
 0x1e5   : > { %v4619_v1 = vunpack.c.l.b16 %v4297_v15  ;;  %8708 = vst [vmem:[#allocation57_spill] sm:$0xff] %v7821_v56  ;;  %v4956_v42 = vrot.slane %v4954_v4, 4  ;;  %v4328_v54 = vshll.u32 %v7736_v34, 16  ;;  %v3233_v15 = vpack.c.b16 %v3213_v19, %v3212_v45  ;;  %v2780_v56 = vld [vmem:[#allocation2 + $0xa8] sm:$0xf] }
 0x1e6   : > { %v4326_v34 = vrot.slane %v4325_v26, 4  ;;  %v3085_v58 = vrot.slane %v3084_v62, 4  ;;  %v7848_v62 = vld [vmem:[#allocation2 + $0x70] sm:$0xf] }
 0x1e7   : > { %v7796_v39 = vpop.f32.mrf.mxu1 }
 0x1e8   : > { %8706 = vst [vmem:[#allocation55_spill] sm:$0xff] %v7796_v39  ;;  %v7798_v5 = vpop.f32.mrf.mxu2  ;;  %4066 = vmatmul.bf16.gmra.mxu3 %v6272_v40  ;;  %v7816_v40 = vrot.slane %v3087_v8, 5  ;;  %v4648_v8 = vpack.c.b16 %v4620_v33, %v4619_v1  ;;  %v4957_v39 = vrot.slane %v7818_v31, 5  ;;  %v4315_v33 = vor.u32 %v4314_v59, %v4311_v24 }
 0x1e9   : > { %8707 = vst [vmem:[#allocation56_spill] sm:$0xff] %v7798_v5  ;;  %v4852_v5 = vld [vmem:[#allocation2 + $0x60] sm:$0xe]  ;;  %v4346_v59 = vshrl.u32 %v7760_v61, 16 }
 0x1ea   : > { %v6126_v21 = vrot.slane %v4852_v5, 9  ;;  %v3094_v57 = vor.u32 %v3093_v13, %v7816_v40  ;;  %v4958_v30 = vsel %vm6799_vm3, %v4956_v42, %v4957_v39  ;;  %v2781_v13 = vld [vmem:[#allocation2 + $0xac] sm:$0xf]  ;;  %v3090_v26 = vsel %vm6829_vm6, %v3085_v58, %v7816_v40  ;;  %v7864_v58 = vpop.f32.mrf.mxu3 }
 0x1eb   : > { %v5052_v38 = vunpack.c.l.b16 %v4958_v30  ;;  %v3102_v42 = vshrl.u32 %v2780_v56, 16  ;;  %v4336_v30 = vshll.u32 %v4179_v50, 16  ;;  %8715 = vst [vmem:[#allocation64_spill] sm:$0xff] %v7864_v58  ;;  %v2782_v58 = vld [vmem:[#allocation2 + $0xb0] sm:$0x1] }
 0x1ec   : > { %v4955_v5 = vsel %vm6799_vm3, %v6126_v21, %v4954_v4  ;;  %v3095_v19 = vrot.slane %v3094_v57, 4  ;;  %v4316_v4 = vrot.slane %v4315_v33, 4  ;;  %v4333_v21 = vshrl.u32 %v4179_v50, 16 }
 0x1ed   : > { %1948 = vmatmul.bf16.gmra.mxu2 %v6192_v43  ;;  %v3097_v43 = vshll.u32 %v2779_v52, 16  ;;  %v5051_v1 = vunpack.c.l.b16 %v4955_v5  ;;  %v4342_v52 = vshll.u32 %v7760_v61, 16  ;;  %v3111_v57 = vshll.u32 %v2781_v13, 16 }
 0x1ee   : > { %v4961_v5 = vrot.slane %v7848_v62, 5  ;;  %v4321_v40 = vsel %vm6829_vm6, %v4316_v4, %v7811_v17  ;;  %v3104_v20 = vrot.slane %v3102_v42, 4  ;;  %v4338_v37 = vrot.slane %v4336_v30, 5 }
 0x1ef   : > { %v7824_v49 = vpop.f32.mrf.mxu1  ;;  %4748 = vmatmul.bf16.gmra.mxu0 %v4648_v8  ;;  %v3099_v45 = vrot.slane %v3097_v43, 5  ;;  %v3105_v8 = vshll.u32 %v2780_v56, 16  ;;  %v3115_v43 = vshrl.u32 %v2781_v13, 16  ;;  %v7862_v33 = vrot.slane %v4342_v52, 5 }
 0x1f0   : > { %8709 = vst [vmem:[#allocation58_spill] sm:$0xff] %v7824_v49  ;;  %v7830_v2 = vpop.f32.mrf.mxu2  ;;  %v7838_v49 = vpack.c.b16 %v5052_v38, %v5051_v1  ;;  %v7852_v38 = vpop.f32.mrf.mxu0  ;;  %v4348_v1 = vrot.slane %v4346_v59, 4  ;;  %v3214_v13 = vunpack.c.l.b16 %v3090_v26  ;;  %v3113_v25 = vrot.slane %v3111_v57, 5 }
 0x1f1   : > { %8711 = vst [vmem:[#allocation60_spill] sm:$0xff] %v7830_v2  ;;  %v4330_v2 = vrot.slane %v4328_v54, 5  ;;  %v7850_v54 = vld [vmem:[#allocation2 + $0x74] sm:$0x1]  ;;  %v3100_v61 = vsel %vm6829_vm6, %v3095_v19, %v3099_v45  ;;  %v3107_v35 = vrot.slane %v3105_v8, 5  ;;  %v3117_v17 = vrot.slane %v3115_v43, 4 }
 0x1f2   : > { %3365 = vmatmul.bf16.gmra.mxu1 %v3233_v15  ;;  %8713 = vst [vmem:[#allocation62_spill] sm:$0xff] %v7852_v38  ;;  %v4963_v38 = vrot.slane %v4961_v5, 4  ;;  %v4964_v19 = vrot.slane %v7850_v54, 5  ;;  %v6193_v45 = vld [vmem:[#allocation2 + $0x30] sm:$0xff]  ;;  %v4621_v4 = vunpack.c.l.b16 %v4321_v40  ;;  %v4349_v26 = vor.u32 %v4348_v1, %v7862_v33  ;;  %v7884_v30 = vpop.f32.mrf.mxu3 }
 0x1f3   : > { %v4331_v39 = vsel %vm6829_vm6, %v4326_v34, %v4330_v2  ;;  %v6273_v2 = vld [vmem:[#allocation2 + $0x48] sm:$0xff]  ;;  %v3118_v43 = vor.u32 %v3117_v17, %v3113_v25  ;;  %8719 = vst [vmem:[#allocation68_spill] sm:$0xff] %v7884_v30 }
 0x1f4   : > { %v4622_v56 = vunpack.c.l.b16 %v4331_v39  ;;  %v4853_v34 = vld [vmem:[#allocation2 + $0x6c] sm:$0xe]  ;;  %v4965_v52 = vsel %vm6799_vm3, %v4963_v38, %v4964_v19  ;;  %v3121_v38 = vshll.u32 %v2782_v58, 16  ;;  %v2784_v58 = vld [vmem:[#allocation2 + $0xb8] sm:$0xf] }
 0x1f5   : > { %v5054_v59 = vunpack.c.l.b16 %v4965_v52 }
 0x1f6   : > { %v3123_v19 = vrot.slane %v3121_v38, 5  ;;  %v6194_v38 = vld [vmem:[#allocation2 + $0x3c] sm:$0xff] }
 0x1f7   : > { %v7843_v24 = vpop.f32.mrf.mxu1 }
 0x1f8   : > { %8712 = vst [vmem:[#allocation61_spill] sm:$0xff] %v7843_v24  ;;  %v7854_v15 = vpop.f32.mrf.mxu2  ;;  %4071 = vmatmul.bf16.gmra.mxu3 %v6273_v2  ;;  %v3215_v24 = vunpack.c.l.b16 %v3100_v61  ;;  %v4335_v2 = vrot.slane %v4333_v21, 4  ;;  %v7879_v40 = vpop.f32.mrf.mxu0  ;;  %v6265_v21 = vld [vmem:[%s8639_s3 + $0x160] sm:$0xff] }
 0x1f9   : > { %8714 = vst [vmem:[#allocation63_spill] sm:$0xff] %v7854_v15  ;;  %v6127_v15 = vrot.slane %v4853_v34, 9  ;;  %v4649_v34 = vpack.c.b16 %v4622_v56, %v4621_v4  ;;  %3731 = vmatpush.bf16.msra.mxu2 %v6265_v21 }
 0x1fa   : > { %v3234_v61 = vpack.c.b16 %v3215_v24, %v3214_v13  ;;  %8718 = vst [vmem:[#allocation67_spill] sm:$0xff] %v7879_v40  ;;  %v4339_v56 = vor.u32 %v4338_v37, %v4335_v2  ;;  %v3119_v24 = vrot.slane %v3118_v43, 4  ;;  %v4370_v13 = vshrl.u32 %v7806_v0, 16 }
 0x1fb   : > { %v4962_v50 = vsel %vm6799_vm3, %v6127_v15, %v4961_v5  ;;  %v3108_v15 = vor.u32 %v3107_v35, %v3104_v20  ;;  %v4352_v5 = vshll.u32 %v7771_v12, 16  ;;  %v2783_v20 = vld [vmem:[#allocation2 + $0xb4] sm:$0xf]  ;;  %v4366_v12 = vshll.u32 %v7806_v0, 16 }
 0x1fc   : > { %v5053_v39 = vunpack.c.l.b16 %v4962_v50  ;;  %v6274_v50 = vld [vmem:[#allocation2 + $0x54] sm:$0xff]  ;;  %v3124_v52 = vsel %vm6829_vm6, %v3119_v24, %v3123_v19  ;;  %v4340_v4 = vrot.slane %v4339_v56, 4  ;;  %v3126_v2 = vshrl.u32 %v2783_v20, 16 }
 0x1fd   : > { %1953 = vmatmul.bf16.gmra.mxu2 %v6193_v45  ;;  %v3109_v1 = vrot.slane %v3108_v15, 4  ;;  %v4350_v45 = vrot.slane %v4349_v26, 4  ;;  %v4354_v35 = vrot.slane %v4352_v5, 5  ;;  %v3135_v26 = vshll.u32 %v2784_v58, 16 }
 0x1fe   : > { %v7872_v42 = vpack.c.b16 %v5054_v59, %v5053_v39  ;;  %v4182_v59 = vld [vmem:[#allocation2 + $0x60] sm:$0xf]  ;;  %v7898_v0 = vrot.slane %v4366_v12, 5  ;;  %v4372_v43 = vrot.slane %v4370_v13, 4  ;;  %v4345_v5 = vsel %vm6829_vm6, %v4340_v4, %v7862_v33  ;;  %v7908_v13 = vpop.f32.mrf.mxu3 }
 0x1ff   : > { %v7874_v8 = vpop.f32.mrf.mxu1  ;;  %4753 = vmatmul.bf16.gmra.mxu0 %v4649_v34  ;;  %v3114_v37 = vsel %vm6829_vm6, %v3109_v1, %v3113_v25  ;;  %v4355_v39 = vsel %vm6829_vm6, %v4350_v45, %v4354_v35  ;;  %v3129_v34 = vshll.u32 %v2783_v20, 16  ;;  %v6305_v25 = vld [vmem:[%s8639_s3 + $0x220] sm:$0xff]  ;;  %v4357_v21 = vshrl.u32 %v4182_v59, 16  ;;  %8723 = vst [vmem:[#allocation72_spill] sm:$0xff] %v7908_v13 }
 0x200   : > { %8716 = vst [vmem:[#allocation65_spill] sm:$0xff] %v7874_v8  ;;  %v7876_v57 = vpop.f32.mrf.mxu2  ;;  %v7906_v56 = vpop.f32.mrf.mxu0  ;;  %v3216_v1 = vunpack.c.l.b16 %v3114_v37  ;;  %v3217_v24 = vunpack.c.l.b16 %v3124_v52  ;;  %v4624_v19 = vunpack.c.l.b16 %v4355_v39  ;;  %v4360_v45 = vshll.u32 %v4182_v59, 16  ;;  %5154 = vmatpush.bf16.msra.mxu1 %v6305_v25  ;;  %v2785_v37 = vld [vmem:[#allocation2 + $0xbc] sm:$0x1]  ;;  %v8119_v8 = vld [vmem:[#allocation2 + $0xc4] sm:$0xf] }
 0x201   : > { %8717 = vst [vmem:[#allocation66_spill] sm:$0xff] %v7876_v57  ;;  %v3128_v35 = vrot.slane %v3126_v2, 4  ;;  %v3131_v20 = vrot.slane %v3129_v34, 5  ;;  %v4359_v57 = vrot.slane %v4357_v21, 4  ;;  %v4376_v39 = vshll.u32 %v7818_v31, 16 }
 0x202   : > { %3370 = vmatmul.bf16.gmra.mxu1 %v3234_v61  ;;  %v3139_v61 = vshrl.u32 %v2784_v58, 16  ;;  %8722 = vst [vmem:[#allocation71_spill] sm:$0xff] %v7906_v56  ;;  %v3137_v58 = vrot.slane %v3135_v26, 5  ;;  %v3235_v33 = vpack.c.b16 %v3217_v24, %v3216_v1  ;;  %v4362_v52 = vrot.slane %v4360_v45, 5  ;;  %v6304_v26 = vld [vmem:[%s8639_s3 + $0x218] sm:$0xff] }
 0x203   : > { %v3132_v59 = vor.u32 %v3131_v20, %v3128_v35  ;;  %v3145_v2 = vshll.u32 %v2785_v37, 16  ;;  %v2786_v21 = vld [vmem:[#allocation2 + $0xc0] sm:$0xf]  ;;  %v2787_v1 = vld [vmem:[#allocation2 + $0xc4] sm:$0xf] }
 0x204   : > { %v3141_v12 = vrot.slane %v3139_v61, 4  ;;  %v4185_v61 = vld [vmem:[#allocation2 + $0x6c] sm:$0xf]  ;;  %5155 = vmatpush.bf16.msra.mxu1 %v6304_v26  ;;  %v3150_v20 = vshrl.u32 %v2786_v21, 16 }
 0x205   : > { %v3133_v24 = vrot.slane %v3132_v59, 4  ;;  %v4384_v35 = vshll.u32 %v4185_v61, 16 }
 0x206   : > { %v3142_v25 = vor.u32 %v3141_v12, %v3137_v58  ;;  %v3153_v12 = vshll.u32 %v2786_v21, 16  ;;  %v7926_v37 = vpop.f32.mrf.mxu3 }
 0x207   : > { %v7896_v15 = vpop.f32.mrf.mxu1  ;;  %8727 = vst [vmem:[#allocation76_spill] sm:$0xff] %v7926_v37 }
 0x208   : > { %v7888_v17 = vpop.f32.mrf.mxu2  ;;  %8721 = vst [vmem:[#allocation70_spill] sm:$0xff] %v7896_v15  ;;  %4076 = vmatmul.bf16.gmra.mxu3 %v6274_v50  ;;  %v4623_v50 = vunpack.c.l.b16 %v4345_v5  ;;  %v4378_v5 = vrot.slane %v4376_v39, 5  ;;  %v3143_v31 = vrot.slane %v3142_v25, 4  ;;  %v7919_v45 = vpop.f32.mrf.mxu0  ;;  %v6275_v39 = vld [vmem:[#allocation2 + $0x60] sm:$0xff]  ;;  %v4390_v25 = vshll.u32 %v7848_v62, 16 }
 0x209   : > { %8720 = vst [vmem:[#allocation69_spill] sm:$0xff] %v7888_v17  ;;  %v4373_v17 = vor.u32 %v4372_v43, %v7898_v0 }
 0x20a   : > { %v4650_v56 = vpack.c.b16 %v4624_v19, %v4623_v50  ;;  %v3147_v19 = vrot.slane %v3145_v2, 5  ;;  %8726 = vst [vmem:[#allocation75_spill] sm:$0xff] %v7919_v45  ;;  %v3159_v50 = vshll.u32 %v2787_v1, 16  ;;  %v4394_v2 = vshrl.u32 %v7848_v62, 16  ;;  %v6195_v62 = vld [vmem:[#allocation2 + $0x48] sm:$0xff] }
 0x20b   : > { %v4374_v34 = vrot.slane %v4373_v17, 4 }
 0x20c   : > { %v3148_v26 = vsel %vm6829_vm6, %v3143_v31, %v3147_v19  ;;  %v2788_v19 = vld [vmem:[#allocation2 + $0xc8] sm:$0x1]  ;;  %v4396_v45 = vrot.slane %v4394_v2, 4 }
 0x20d   : > { %1958 = vmatmul.bf16.gmra.mxu2 %v6194_v38  ;;  %v4363_v38 = vor.u32 %v4362_v52, %v4359_v57  ;;  %v4379_v17 = vsel %vm6829_vm6, %v4374_v34, %v4378_v5  ;;  %v6303_v57 = vld [vmem:[%s8639_s3 + $0x210] sm:$0xff]  ;;  %v3138_v34 = vsel %vm6829_vm6, %v3133_v24, %v3137_v58  ;;  %v3161_v58 = vrot.slane %v3159_v50, 5 }
 0x20e   : > { %5156 = vmatpush.bf16.msra.mxu1 %v6303_v57  ;;  %v4626_v5 = vunpack.c.l.b16 %v4379_v17  ;;  %v3218_v37 = vunpack.c.l.b16 %v3138_v34  ;;  %v3219_v31 = vunpack.c.l.b16 %v3148_v26  ;;  %v4392_v57 = vrot.slane %v4390_v25, 5  ;;  %v4190_v34 = vld [vmem:[#allocation2 + $0x80] sm:$0x1] }
 0x20f   : > { %4758 = vmatmul.bf16.gmra.mxu0 %v4650_v56  ;;  %v7917_v43 = vpop.f32.mrf.mxu1  ;;  %v4381_v56 = vshrl.u32 %v4185_v61, 16  ;;  %v4364_v59 = vrot.slane %v4363_v38, 4  ;;  %v6302_v61 = vld [vmem:[%s8639_s3 + $0x208] sm:$0xff]  ;;  %v3169_v17 = vshll.u32 %v2788_v19, 16 }
 0x210   : > { %v7911_v4 = vpop.f32.mrf.mxu2  ;;  %8725 = vst [vmem:[#allocation74_spill] sm:$0xff] %v7917_v43  ;;  %v7950_v50 = vpop.f32.mrf.mxu0  ;;  %v4397_v2 = vor.u32 %v4396_v45, %v4392_v57  ;;  %v4971_v45 = vrot.slane %v4190_v34, 5 }
 0x211   : > { %8724 = vst [vmem:[#allocation73_spill] sm:$0xff] %v7911_v4  ;;  %v4369_v38 = vsel %vm6829_vm6, %v4364_v59, %v7898_v0  ;;  %v4383_v21 = vrot.slane %v4381_v56, 4  ;;  %v3155_v4 = vrot.slane %v3153_v12, 5  ;;  %v4189_v12 = vld [vmem:[#allocation2 + $0x7c] sm:$0xf] }
 0x212   : > { %3375 = vmatmul.bf16.gmra.mxu1 %v3235_v33  ;;  %v3163_v33 = vshrl.u32 %v2787_v1, 16  ;;  %v4386_v1 = vrot.slane %v4384_v35, 5  ;;  %v4625_v13 = vunpack.c.l.b16 %v4369_v38  ;;  %v6301_v35 = vld [vmem:[%s8639_s3 + $0x200] sm:$0xff]  ;;  %8730 = vst [vmem:[#allocation79_spill] sm:$0xff] %v7950_v50  ;;  %v4968_v26 = vrot.slane %v4189_v12, 5 }
 0x213   : > { %5157 = vmatpush.bf16.msra.mxu1 %v6302_v61 }
 0x214   : > { %v3165_v24 = vrot.slane %v3163_v33, 4  ;;  %v4387_v56 = vor.u32 %v4386_v1, %v4383_v21  ;;  %v3236_v33 = vpack.c.b16 %v3219_v31, %v3218_v37  ;;  %v4651_v25 = vpack.c.b16 %v4626_v5, %v4625_v13  ;;  %v4188_v5 = vld [vmem:[#allocation2 + $0x78] sm:$0xf] }
 0x215   : > { %v3171_v21 = vrot.slane %v3169_v17, 5  ;;  %v4398_v37 = vrot.slane %v4397_v2, 4  ;;  %v4970_v13 = vrot.slane %v4968_v26, 4 }
 0x216   : > { %v3166_v0 = vor.u32 %v3165_v24, %v3161_v58  ;;  %v4388_v1 = vrot.slane %v4387_v56, 4 }
 0x217   : > { %5158 = vmatpush.bf16.msra.mxu1 %v6301_v35 }
 0x218   : > { %v7928_v52 = vpop.f32.mrf.mxu2  ;;  %4081 = vmatmul.bf16.gmra.mxu3 %v6275_v39  ;;  %v7942_v39 = vpop.f32.mrf.mxu1  ;;  %v3167_v38 = vrot.slane %v3166_v0, 4 }
 0x219   : > { %8728 = vst [vmem:[#allocation77_spill] sm:$0xff] %v7928_v52  ;;  %v3152_v52 = vrot.slane %v3150_v20, 4  ;;  %v6264_v20 = vld [vmem:[%s8639_s3 + $0x158] sm:$0xff] }
 0x21a   : > { %8729 = vst [vmem:[#allocation78_spill] sm:$0xff] %v7942_v39  ;;  %3732 = vmatpush.bf16.msra.mxu2 %v6264_v20  ;;  %v3172_v35 = vsel %vm6829_vm6, %v3167_v38, %v3171_v21  ;;  %v6276_v20 = vld [vmem:[#allocation2 + $0x6c] sm:$0xff]  ;;  %v7973_v38 = vpop.f32.mrf.mxu0 }
 0x21b   : > { %v3156_v30 = vor.u32 %v3155_v4, %v3152_v52  ;;  %v4400_v4 = vshll.u32 %v7850_v54, 16  ;;  %v7955_v52 = vpop.f32.mrf.mxu3  ;;  %8735 = vst [vmem:[#allocation84_spill] sm:$0xff] %v7973_v38 }
 0x21c   : > { %8732 = vst [vmem:[#allocation81_spill] sm:$0xff] %v7955_v52 }
 0x21d   : > { %1963 = vmatmul.bf16.gmra.mxu2 %v6195_v62  ;;  %v3157_v61 = vrot.slane %v3156_v30, 4  ;;  %v4854_v62 = vld [vmem:[#allocation2 + $0x78] sm:$0xe]  ;;  %v4402_v24 = vrot.slane %v4400_v4, 5  ;;  %v4972_v30 = vsel %vm6799_vm3, %v4970_v13, %v4971_v45  ;;  %v4408_v4 = vshll.u32 %v4188_v5, 16 }
 0x21e   : > { %v6128_v31 = vrot.slane %v4854_v62, 9  ;;  %v5056_v2 = vunpack.c.l.b16 %v4972_v30  ;;  %v3221_v62 = vunpack.c.l.b16 %v3172_v35  ;;  %v6196_v13 = vld [vmem:[#allocation2 + $0x54] sm:$0xff] }
 0x21f   : > { %4763 = vmatmul.bf16.gmra.mxu0 %v4651_v25  ;;  %v3162_v19 = vsel %vm6829_vm6, %v3157_v61, %v3161_v58  ;;  %v4403_v25 = vsel %vm6829_vm6, %v4398_v37, %v4402_v24  ;;  %v4405_v58 = vshrl.u32 %v4188_v5, 16  ;;  %v4418_v61 = vshrl.u32 %v4189_v12, 16 }
 0x220   : > { %v7952_v59 = vpop.f32.mrf.mxu2  ;;  %v4969_v54 = vsel %vm6799_vm3, %v6128_v31, %v4968_v26  ;;  %v7965_v17 = vpop.f32.mrf.mxu1  ;;  %v4414_v26 = vshll.u32 %v4189_v12, 16  ;;  %v3220_v21 = vunpack.c.l.b16 %v3162_v19  ;;  %v4410_v37 = vrot.slane %v4408_v4, 5 }
 0x221   : > { %8731 = vst [vmem:[#allocation80_spill] sm:$0xff] %v7952_v59  ;;  %v5055_v0 = vunpack.c.l.b16 %v4969_v54  ;;  %v4420_v30 = vrot.slane %v4418_v61, 4  ;;  %v4424_v59 = vshll.u32 %v4190_v34, 16 }
 0x222   : > { %3380 = vmatmul.bf16.gmra.mxu1 %v3236_v33  ;;  %8733 = vst [vmem:[#allocation82_spill] sm:$0xff] %v7965_v17  ;;  %v4393_v33 = vsel %vm6829_vm6, %v4388_v1, %v4392_v57  ;;  %v4628_v57 = vunpack.c.l.b16 %v4403_v25  ;;  %v4407_v1 = vrot.slane %v4405_v58, 4  ;;  %v4416_v24 = vrot.slane %v4414_v26, 5  ;;  %v4855_v25 = vld [vmem:[#allocation2 + $0x84] sm:$0xe]  ;;  %v7983_v58 = vpop.f32.mrf.mxu0 }
 0x223   : > { %v7975_v31 = vpack.c.b16 %v5056_v2, %v5055_v0  ;;  %v7977_v45 = vpop.f32.mrf.mxu3  ;;  %v4627_v54 = vunpack.c.l.b16 %v4393_v33  ;;  %v3237_v5 = vpack.c.b16 %v3221_v62, %v3220_v21  ;;  %v4193_v2 = vld [vmem:[#allocation2 + $0x8c] sm:$0x1]  ;;  %v4191_v33 = vld [vmem:[#allocation2 + $0x84] sm:$0xf]  ;;  %8739 = vst [vmem:[#allocation88_spill] sm:$0xff] %v7983_v58  ;;  %v4426_v4 = vrot.slane %v4424_v59, 5 }
 0x224   : > { %8736 = vst [vmem:[#allocation85_spill] sm:$0xff] %v7977_v45  ;;  %v4411_v19 = vor.u32 %v4410_v37, %v4407_v1  ;;  %v4421_v35 = vor.u32 %v4420_v30, %v4416_v24  ;;  %v6129_v26 = vrot.slane %v4855_v25, 9  ;;  %v4432_v1 = vshll.u32 %v4191_v33, 16  ;;  %v6277_v59 = vld [vmem:[#allocation2 + $0x78] sm:$0xff] }
 0x225   : > { %v4652_v12 = vpack.c.b16 %v4628_v57, %v4627_v54  ;;  %v4978_v54 = vrot.slane %v4193_v2, 5  ;;  %v4429_v57 = vshrl.u32 %v4191_v33, 16 }
 0x226   : > { %v4412_v61 = vrot.slane %v4411_v19, 4  ;;  %v4422_v21 = vrot.slane %v4421_v35, 4 }
 0x227   : > { %v4431_v33 = vrot.slane %v4429_v57, 4 }
 0x228   : > { %v7967_v56 = vpop.f32.mrf.mxu2  ;;  %4086 = vmatmul.bf16.gmra.mxu3 %v6276_v20  ;;  %v4192_v20 = vld [vmem:[#allocation2 + $0x88] sm:$0xf]  ;;  %v7981_v0 = vpop.f32.mrf.mxu1  ;;  %v4417_v35 = vsel %vm6829_vm6, %v4412_v61, %v4416_v24  ;;  %v4427_v25 = vsel %vm6829_vm6, %v4422_v21, %v4426_v4  ;;  %v4448_v61 = vshll.u32 %v4193_v2, 16  ;;  %v6263_v4 = vld [vmem:[%s8639_s3 + $0x150] sm:$0xff] }
 0x229   : > { %8734 = vst [vmem:[#allocation83_spill] sm:$0xff] %v7967_v56  ;;  %v4438_v30 = vshll.u32 %v4192_v20, 16  ;;  %3733 = vmatpush.bf16.msra.mxu2 %v6263_v4 }
 0x22a   : > { %8738 = vst [vmem:[#allocation87_spill] sm:$0xff] %v7981_v0 }
 0x22b   : > { %v7985_v34 = vpop.f32.mrf.mxu3 }
 0x22c   : > { %8740 = vst [vmem:[#allocation89_spill] sm:$0xff] %v7985_v34  ;;  %v4434_v34 = vrot.slane %v4432_v1, 5  ;;  %v4195_v1 = vld [vmem:[#allocation2 + $0x94] sm:$0xf] }
 0x22d   : > { %1968 = vmatmul.bf16.gmra.mxu2 %v6196_v13  ;;  %v4975_v13 = vrot.slane %v4192_v20, 5  ;;  %v4982_v2 = vrot.slane %v4195_v1, 5  ;;  %v4466_v38 = vshrl.u32 %v4195_v1, 16 }
 0x22f   : > { %4768 = vmatmul.bf16.gmra.mxu0 %v4652_v12  ;;  %v4977_v62 = vrot.slane %v4975_v13, 4  ;;  %v4976_v37 = vsel %vm6799_vm3, %v6129_v26, %v4975_v13  ;;  %v4440_v26 = vrot.slane %v4438_v30, 5 }
 0x230   : > { %v7979_v56 = vpop.f32.mrf.mxu2 }
 0x231   : > { %8737 = vst [vmem:[#allocation86_spill] sm:$0xff] %v7979_v56  ;;  %v4979_v12 = vsel %vm6799_vm3, %v4977_v62, %v4978_v54  ;;  %v5057_v56 = vunpack.c.l.b16 %v4976_v37  ;;  %v7999_v62 = vpop.f32.mrf.mxu1  ;;  %v4629_v54 = vunpack.c.l.b16 %v4417_v35  ;;  %v4630_v37 = vunpack.c.l.b16 %v4427_v25 }
 0x232   : > { %3385 = vmatmul.bf16.gmra.mxu1 %v3237_v5  ;;  %v4442_v5 = vshrl.u32 %v4192_v20, 16  ;;  %v5058_v19 = vunpack.c.l.b16 %v4979_v12  ;;  %v6197_v20 = vld [vmem:[#allocation2 + $0x60] sm:$0xff]  ;;  %8742 = vst [vmem:[#allocation91_spill] sm:$0xff] %v7999_v62  ;;  %v8001_v12 = vpop.f32.mrf.mxu0  ;;  %v4984_v25 = vrot.slane %v4982_v2, 4 }
 0x233   : > { %8743 = vst [vmem:[#allocation92_spill] sm:$0xff] %v8001_v12  ;;  %v8006_v21 = vpop.f32.mrf.mxu3  ;;  %v4653_v57 = vpack.c.b16 %v4630_v37, %v4629_v54  ;;  %v4462_v12 = vshll.u32 %v4195_v1, 16 }
 0x234   : > { %v7997_v13 = vpack.c.b16 %v5058_v19, %v5057_v56  ;;  %v4444_v45 = vrot.slane %v4442_v5, 4  ;;  %8744 = vst [vmem:[#allocation93_spill] sm:$0xff] %v8006_v21  ;;  %v4196_v5 = vld [vmem:[#allocation2 + $0x98] sm:$0x1]  ;;  %v4194_v19 = vld [vmem:[#allocation2 + $0x90] sm:$0xf] }
 0x235   : > { %v4456_v21 = vshll.u32 %v4194_v19, 16  ;;  %v4472_v40 = vshll.u32 %v4196_v5, 16 }
 0x236   : > { %v4445_v24 = vor.u32 %v4444_v45, %v4440_v26  ;;  %v4856_v45 = vld [vmem:[#allocation2 + $0x90] sm:$0xe] }
 0x237   : > { %v6130_v35 = vrot.slane %v4856_v45, 9  ;;  %v6278_v45 = vld [vmem:[#allocation2 + $0x84] sm:$0xff] }
 0x238   : > { %v7991_v58 = vpop.f32.mrf.mxu2  ;;  %4091 = vmatmul.bf16.gmra.mxu3 %v6277_v59  ;;  %v4446_v59 = vrot.slane %v4445_v24, 4 }
 0x239   : > { %8741 = vst [vmem:[#allocation90_spill] sm:$0xff] %v7991_v58  ;;  %v4435_v58 = vor.u32 %v4434_v34, %v4431_v33  ;;  %v4450_v34 = vrot.slane %v4448_v61, 5  ;;  %v4985_v33 = vrot.slane %v4196_v5, 5  ;;  %v4983_v37 = vsel %vm6799_vm3, %v6130_v35, %v4982_v2 }
 0x23a   : > { %v5059_v61 = vunpack.c.l.b16 %v4983_v37  ;;  %v8021_v4 = vpop.f32.mrf.mxu0  ;;  %v4468_v37 = vrot.slane %v4466_v38, 4 }
 0x23b   : > { %v4436_v30 = vrot.slane %v4435_v58, 4  ;;  %v4453_v58 = vshrl.u32 %v4194_v19, 16  ;;  %v4986_v24 = vsel %vm6799_vm3, %v4984_v25, %v4985_v33  ;;  %8746 = vst [vmem:[#allocation95_spill] sm:$0xff] %v8021_v4  ;;  %v4458_v25 = vrot.slane %v4456_v21, 5 }
 0x23c   : > { %v4464_v33 = vrot.slane %v4462_v12, 5 }
 0x23d   : > { %1973 = vmatmul.bf16.gmra.mxu2 %v6197_v20  ;;  %v8011_v20 = vpop.f32.mrf.mxu1  ;;  %v4441_v54 = vsel %vm6829_vm6, %v4436_v30, %v4440_v26  ;;  %v5060_v26 = vunpack.c.l.b16 %v4986_v24  ;;  %v8025_v30 = vpop.f32.mrf.mxu3  ;;  %v4455_v52 = vrot.slane %v4453_v58, 4 }
 0x23e   : > { %8745 = vst [vmem:[#allocation94_spill] sm:$0xff] %v8011_v20  ;;  %v4469_v24 = vor.u32 %v4468_v37, %v4464_v33  ;;  %v6279_v37 = vld [vmem:[#allocation2 + $0x90] sm:$0xff] }
 0x23f   : > { %4773 = vmatmul.bf16.gmra.mxu0 %v4653_v57  ;;  %8747 = vst [vmem:[#allocation96_spill] sm:$0xff] %v8025_v30  ;;  %v8027_v2 = vpack.c.b16 %v5060_v26, %v5059_v61  ;;  %v4459_v1 = vor.u32 %v4458_v25, %v4455_v52  ;;  %v4198_v30 = vld [vmem:[#allocation2 + $0xa0] sm:$0xf]  ;;  %v4474_v61 = vrot.slane %v4472_v40, 5  ;;  %v4197_v52 = vld [vmem:[#allocation2 + $0x9c] sm:$0xf] }
 0x240   : > { %v8008_v56 = vpop.f32.mrf.mxu2  ;;  %v4989_v21 = vrot.slane %v4198_v30, 5  ;;  %v4470_v58 = vrot.slane %v4469_v24, 4  ;;  %v4477_v24 = vshrl.u32 %v4197_v52, 16 }
 0x241   : > { %v4460_v38 = vrot.slane %v4459_v1, 4 }
 0x242   : > { %5159 = vmatmul.bf16.vlgmr.msra.gmra.mxu1 %v7619_v63  ;;  %v4451_v63 = vsel %vm6829_vm6, %v4446_v59, %v4450_v34  ;;  %v6198_v59 = vld [vmem:[#allocation2 + $0x6c] sm:$0xff]  ;;  %v4631_v34 = vunpack.c.l.b16 %v4441_v54  ;;  %v4199_v54 = vld [vmem:[#allocation2 + $0xa4] sm:$0x1]  ;;  %v4475_v40 = vsel %vm6829_vm6, %v4470_v58, %v4474_v61 }
 0x243   : > { %v4632_v35 = vunpack.c.l.b16 %v4451_v63  ;;  %v4857_v63 = vld [vmem:[#allocation2 + $0x9c] sm:$0xe] }
 0x244   : > { %v6131_v26 = vrot.slane %v4857_v63, 9  ;;  %v4480_v63 = vshll.u32 %v4197_v52, 16  ;;  %v4201_v52 = vld [vmem:[#allocation2 + $0xac] sm:$0xf] }
 0x245   : > { %v8029_v4 = vpop.f32.mrf.mxu1  ;;  %v4654_v19 = vpack.c.b16 %v4632_v35, %v4631_v34  ;;  %v8036_v12 = vpop.f32.mrf.mxu3  ;;  %v4992_v34 = vrot.slane %v4199_v54, 5 }
 0x246   : > { %8748 = vst [vmem:[#allocation97_spill] sm:$0xff] %v8029_v4  ;;  %v4990_v5 = vsel %vm6799_vm3, %v6131_v26, %v4989_v21  ;;  %v6199_v26 = vld [vmem:[#allocation2 + $0x78] sm:$0xff] }
 0x247   : > { %8750 = vst [vmem:[#allocation99_spill] sm:$0xff] %v8036_v12  ;;  %v4486_v12 = vshll.u32 %v4198_v30, 16 }
 0x248   : > { %v8023_v57 = vpop.f32.mrf.mxu2  ;;  %4096 = vmatmul.bf16.gmra.mxu3 %v6278_v45  ;;  %v8033_v45 = vpop.f32.mrf.mxu0 }
 0x249   : > { %8749 = vst [vmem:[#allocation98_spill] sm:$0xff] %v8033_v45  ;;  %v4490_v45 = vshrl.u32 %v4198_v30, 16  ;;  %v4488_v20 = vrot.slane %v4486_v12, 5  ;;  %v6262_v30 = vld [vmem:[%s8639_s3 + $0x148] sm:$0xff]  ;;  %v4996_v12 = vrot.slane %v4201_v52, 5 }
 0x24a   : > { %3734 = vmatpush.bf16.msra.mxu2 %v6262_v30 }
 0x24b   : > { %v4492_v58 = vrot.slane %v4490_v45, 4  ;;  %v4200_v45 = vld [vmem:[#allocation2 + $0xa8] sm:$0xf] }
 0x24d   : > { %1978 = vmatmul.bf16.gmra.mxu2 %v6198_v59  ;;  %v4991_v59 = vrot.slane %v4989_v21, 4  ;;  %v8048_v4 = vpop.f32.mrf.mxu1  ;;  %v8054_v61 = vpop.f32.mrf.mxu3 }
 0x24e   : > { %8751 = vst [vmem:[#allocation100_spill] sm:$0xff] %v8048_v4 }
 0x24f   : > { %4778 = vmatmul.bf16.gmra.mxu0 %v4654_v19  ;;  %v4993_v35 = vsel %vm6799_vm3, %v4991_v59, %v4992_v34  ;;  %v4465_v19 = vsel %vm6829_vm6, %v4460_v38, %v4464_v33  ;;  %v4479_v33 = vrot.slane %v4477_v24, 4  ;;  %v4482_v38 = vrot.slane %v4480_v63, 5  ;;  %8753 = vst [vmem:[#allocation102_spill] sm:$0xff] %v8054_v61 }
 0x250   : > { %v8031_v50 = vpop.f32.mrf.mxu2  ;;  %v5062_v1 = vunpack.c.l.b16 %v4993_v35  ;;  %v8052_v59 = vpop.f32.mrf.mxu0  ;;  %v4633_v34 = vunpack.c.l.b16 %v4465_v19  ;;  %v4202_v19 = vld [vmem:[#allocation2 + $0xb0] sm:$0x1] }
 0x251   : > { %8752 = vst [vmem:[#allocation101_spill] sm:$0xff] %v8052_v59  ;;  %v4496_v59 = vshll.u32 %v4199_v54, 16  ;;  %v4999_v61 = vrot.slane %v4202_v19, 5  ;;  %v4504_v54 = vshll.u32 %v4200_v45, 16  ;;  %v4520_v43 = vshll.u32 %v4202_v19, 16 }
 0x252   : > { %5164 = vmatmul.bf16.gmra.mxu1 %v7648_v27  ;;  %v5061_v27 = vunpack.c.l.b16 %v4990_v5  ;;  %v4634_v5 = vunpack.c.l.b16 %v4475_v40  ;;  %v4858_v40 = vld [vmem:[#allocation2 + $0xa8] sm:$0xe] }
 0x253   : > { %v6132_v63 = vrot.slane %v4858_v40, 9  ;;  %v4498_v0 = vrot.slane %v4496_v59, 5 }
 0x254   : > { %v8050_v21 = vpack.c.b16 %v5062_v1, %v5061_v27  ;;  %v4655_v27 = vpack.c.b16 %v4634_v5, %v4633_v34  ;;  %v4493_v1 = vor.u32 %v4492_v58, %v4488_v20  ;;  %v4501_v5 = vshrl.u32 %v4200_v45, 16 }
 0x255   : > { %v8062_v24 = vpop.f32.mrf.mxu1  ;;  %v4514_v58 = vshrl.u32 %v4201_v52, 16  ;;  %v8070_v40 = vpop.f32.mrf.mxu3 }
 0x256   : > { %8754 = vst [vmem:[#allocation103_spill] sm:$0xff] %v8062_v24  ;;  %v4494_v62 = vrot.slane %v4493_v1, 4 }
 0x258   : > { %v8042_v25 = vpop.f32.mrf.mxu2  ;;  %4101 = vmatmul.bf16.gmra.mxu3 %v6279_v37  ;;  %v4483_v37 = vor.u32 %v4482_v38, %v4479_v33  ;;  %v8064_v34 = vpop.f32.mrf.mxu0  ;;  %v4997_v33 = vsel %vm6799_vm3, %v6132_v63, %v4996_v12  ;;  %v4510_v38 = vshll.u32 %v4201_v52, 16  ;;  %v4499_v1 = vsel %vm6829_vm6, %v4494_v62, %v4498_v0 }
 0x259   : > { %8755 = vst [vmem:[#allocation104_spill] sm:$0xff] %v8064_v34  ;;  %v5063_v30 = vunpack.c.l.b16 %v4997_v33  ;;  %v4506_v63 = vrot.slane %v4504_v54, 5 }
 0x25a   : > { %v4484_v4 = vrot.slane %v4483_v37, 4  ;;  %v6280_v37 = vld [vmem:[#allocation2 + $0x9c] sm:$0xff]  ;;  %v4512_v52 = vrot.slane %v4510_v38, 5 }
 0x25c   : > { %v4489_v59 = vsel %vm6829_vm6, %v4484_v4, %v4488_v20  ;;  %v4204_v20 = vld [vmem:[#allocation2 + $0xb8] sm:$0xf] }
 0x25d   : > { %1983 = vmatmul.bf16.gmra.mxu2 %v6199_v26  ;;  %v4998_v26 = vrot.slane %v4996_v12, 4  ;;  %v6200_v12 = vld [vmem:[#allocation2 + $0x84] sm:$0xff]  ;;  %v4635_v33 = vunpack.c.l.b16 %v4489_v59  ;;  %v8080_v34 = vpop.f32.mrf.mxu1 }
 0x25e   : > { %8756 = vst [vmem:[#allocation105_spill] sm:$0xff] %v8080_v34  ;;  %v4534_v34 = vshll.u32 %v4204_v20, 16 }
 0x25f   : > { %4783 = vmatmul.bf16.gmra.mxu0 %v4655_v27 }
 0x260   : > { %v8059_v35 = vpop.f32.mrf.mxu2  ;;  %v8082_v4 = vpop.f32.mrf.mxu0 }
 0x262   : > { %5169 = vmatmul.bf16.gmra.mxu1 %v7658_v60  ;;  %v5000_v60 = vsel %vm6799_vm3, %v4998_v26, %v4999_v61  ;;  %v4503_v61 = vrot.slane %v4501_v5, 4  ;;  %v4516_v26 = vrot.slane %v4514_v58, 4  ;;  %v5003_v5 = vrot.slane %v4204_v20, 5 }
 0x263   : > { %v5064_v27 = vunpack.c.l.b16 %v5000_v60  ;;  %v4636_v60 = vunpack.c.l.b16 %v4499_v1  ;;  %v4522_v58 = vrot.slane %v4520_v43, 5 }
 0x264   : > { %v4507_v17 = vor.u32 %v4506_v63, %v4503_v61  ;;  %v4517_v39 = vor.u32 %v4516_v26, %v4512_v52  ;;  %v5005_v1 = vrot.slane %v5003_v5, 4 }
 0x265   : > { %v8078_v45 = vpack.c.b16 %v5064_v27, %v5063_v30  ;;  %v4656_v62 = vpack.c.b16 %v4636_v60, %v4635_v33  ;;  %v4205_v30 = vld [vmem:[#allocation2 + $0xbc] sm:$0x1]  ;;  %v8086_v27 = vpop.f32.mrf.mxu3  ;;  %v8097_v43 = vpop.f32.mrf.mxu1  ;;  %v6281_v60 = vld [vmem:[#allocation2 + $0xa8] sm:$0xff] }
 0x266   : > { %v4508_v54 = vrot.slane %v4507_v17, 4  ;;  %v4518_v38 = vrot.slane %v4517_v39, 4  ;;  %v5006_v19 = vrot.slane %v4205_v30, 5  ;;  %8758 = vst [vmem:[#allocation107_spill] sm:$0xff] %v8097_v43 }
 0x268   : > { %v8072_v24 = vpop.f32.mrf.mxu2  ;;  %4106 = vmatmul.bf16.gmra.mxu3 %v6280_v37  ;;  %v4859_v37 = vld [vmem:[#allocation2 + $0xb4] sm:$0xe]  ;;  %v5007_v63 = vsel %vm6799_vm3, %v5005_v1, %v5006_v19  ;;  %v4513_v26 = vsel %vm6829_vm6, %v4508_v54, %v4512_v52  ;;  %v8103_v1 = vpop.f32.mrf.mxu0 }
 0x269   : > { %v6133_v59 = vrot.slane %v4859_v37, 9  ;;  %v5066_v39 = vunpack.c.l.b16 %v5007_v63  ;;  %v6201_v52 = vld [vmem:[#allocation2 + $0x90] sm:$0xff]  ;;  %v4637_v54 = vunpack.c.l.b16 %v4513_v26  ;;  %v4536_v63 = vrot.slane %v4534_v34, 5 }
 0x26b   : > { %v5004_v61 = vsel %vm6799_vm3, %v6133_v59, %v5003_v5  ;;  %v4538_v5 = vshrl.u32 %v4204_v20, 16 }
 0x26c   : > { %v5065_v17 = vunpack.c.l.b16 %v5004_v61 }
 0x26d   : > { %1988 = vmatmul.bf16.gmra.mxu2 %v6200_v12  ;;  %v4203_v12 = vld [vmem:[#allocation2 + $0xb4] sm:$0xf]  ;;  %v4540_v43 = vrot.slane %v4538_v5, 4  ;;  %v8112_v26 = vpop.f32.mrf.mxu1 }
 0x26e   : > { %v4528_v37 = vshll.u32 %v4203_v12, 16  ;;  %v8101_v59 = vpack.c.b16 %v5066_v39, %v5065_v17  ;;  %8761 = vst [vmem:[#allocation110_spill] sm:$0xff] %v8112_v26 }
 0x26f   : > { %4788 = vmatmul.bf16.gmra.mxu0 %v4656_v62  ;;  %v4525_v62 = vshrl.u32 %v4203_v12, 16  ;;  %v6261_v12 = vld [vmem:[%s8639_s3 + $0x140] sm:$0xff]  ;;  %v4541_v15 = vor.u32 %v4540_v43, %v4536_v63  ;;  %v6282_v43 = vld [vmem:[#allocation2 + $0xb4] sm:$0xff] }
 0x270   : > { %v8084_v0 = vpop.f32.mrf.mxu2  ;;  %v4530_v61 = vrot.slane %v4528_v37, 5  ;;  %3735 = vmatpush.bf16.msra.mxu2 %v6261_v12  ;;  %v6202_v12 = vld [vmem:[#allocation2 + $0x9c] sm:$0xff] }
 0x271   : > { %8757 = vst [vmem:[#allocation106_spill] sm:$0xff] %v8084_v0 }
 0x272   : > { %5174 = vmatmul.bf16.gmra.mxu1 %v7702_v55  ;;  %v4523_v55 = vsel %vm6829_vm6, %v4518_v38, %v4522_v58  ;;  %v8105_v38 = vpop.f32.mrf.mxu3  ;;  %v4527_v58 = vrot.slane %v4525_v62, 4  ;;  %v4542_v62 = vrot.slane %v4541_v15, 4  ;;  %v4562_v15 = vshrl.u32 %v8119_v8, 16 }
 0x273   : > { %v4638_v19 = vunpack.c.l.b16 %v4523_v55  ;;  %v8115_v55 = vpop.f32.mrf.mxu0 }
 0x274   : > { %v4531_v39 = vor.u32 %v4530_v61, %v4527_v58  ;;  %v4558_v61 = vshll.u32 %v8119_v8, 16 }
 0x275   : > { %v4657_v17 = vpack.c.b16 %v4638_v19, %v4637_v54 }
 0x276   : > { %v4532_v34 = vrot.slane %v4531_v39, 4 }
 0x278   : > { %v8099_v33 = vpop.f32.mrf.mxu2  ;;  %4111 = vmatmul.bf16.gmra.mxu3 %v6281_v60  ;;  %v4544_v60 = vshll.u32 %v4205_v30, 16  ;;  %v4537_v30 = vsel %vm6829_vm6, %v4532_v34, %v4536_v63  ;;  %v4564_v63 = vrot.slane %v4562_v15, 4 }
 0x279   : > { %8759 = vst [vmem:[#allocation108_spill] sm:$0xff] %v8099_v33  ;;  %v4639_v39 = vunpack.c.l.b16 %v4537_v30  ;;  %v8137_v33 = vld [vmem:[#allocation2 + $0xc8] sm:$0x1] }
 0x27a   : > { %v4546_v37 = vrot.slane %v4544_v60, 5  ;;  %v8117_v5 = vpop.f32.mrf.mxu3 }
 0x27b   : > { %v8131_v34 = vpop.f32.mrf.mxu0 }
 0x27d   : > { %1993 = vmatmul.bf16.gmra.mxu2 %v6201_v52  ;;  %v4206_v52 = vld [vmem:[#allocation2 + $0xc0] sm:$0xf] }
 0x27e   : > { %v4549_v19 = vshrl.u32 %v4206_v52, 16  ;;  %v4552_v58 = vshll.u32 %v4206_v52, 16 }
 0x27f   : > { %4793 = vmatmul.bf16.gmra.mxu0 %v4657_v17  ;;  %v8129_v17 = vpop.f32.mrf.mxu1 }
 0x280   : > { %v8110_v20 = vpop.f32.mrf.mxu2  ;;  %8763 = vst [vmem:[#allocation112_spill] sm:$0xff] %v8129_v17  ;;  %v4551_v26 = vrot.slane %v4549_v19, 4  ;;  %v4568_v17 = vshll.u32 %v8137_v33, 16 }
 0x281   : > { %8760 = vst [vmem:[#allocation109_spill] sm:$0xff] %v8110_v20  ;;  %v4560_v20 = vrot.slane %v4558_v61, 5 }
 0x282   : > { %5179 = vmatmul.bf16.gmra.mxu1 %v7756_v53  ;;  %v4547_v53 = vsel %vm6829_vm6, %v4542_v62, %v4546_v37  ;;  %v8133_v62 = vpop.f32.mrf.mxu3  ;;  %v4570_v19 = vrot.slane %v4568_v17, 5 }
 0x283   : > { %v4640_v60 = vunpack.c.l.b16 %v4547_v53  ;;  %v4565_v0 = vor.u32 %v4564_v63, %v4560_v20  ;;  %v8143_v61 = vpop.f32.mrf.mxu0 }
 0x285   : > { %v4658_v52 = vpack.c.b16 %v4640_v60, %v4639_v39  ;;  %v4566_v53 = vrot.slane %v4565_v0, 4 }
 0x288   : > { %v8121_v54 = vpop.f32.mrf.mxu2  ;;  %4116 = vmatmul.bf16.gmra.mxu3 %v6282_v43 }
 0x289   : > { %8762 = vst [vmem:[#allocation111_spill] sm:$0xff] %v8121_v54  ;;  %v4554_v54 = vrot.slane %v4552_v58, 5  ;;  %v8141_v58 = vpop.f32.mrf.mxu1 }
 0x28a   : > { %8764 = vst [vmem:[#allocation113_spill] sm:$0xff] %v8141_v58 }
 0x28b   : > { %v4555_v43 = vor.u32 %v4554_v54, %v4551_v26  ;;  %v4571_v26 = vsel %vm6829_vm6, %v4566_v53, %v4570_v19  ;;  %v8151_v54 = vpop.f32.mrf.mxu3  ;;  %v6204_v53 = vld [vmem:[#allocation2 + $0xb4] sm:$0xff] }
 0x28c   : > { %v4642_v0 = vunpack.c.l.b16 %v4571_v26  ;;  %v6543_v26 = vld [vmem:[#allocation2 + $0x1c] sm:$0xf] }
 0x28d   : > { %1998 = vmatmul.bf16.gmra.mxu2 %v6202_v12  ;;  %v4556_v30 = vrot.slane %v4555_v43, 4  ;;  %v6283_v12 = vld [vmem:[#allocation2 + $0xc0] sm:$0xff]  ;;  %v8157_v43 = vpop.f32.mrf.mxu0 }
 0x28f   : > { %4798 = vmatmul.bf16.gmra.mxu0 %v4658_v52  ;;  %v4561_v39 = vsel %vm6829_vm6, %v4556_v30, %v4560_v20 }
 0x290   : > { %v8135_v37 = vpop.f32.mrf.mxu2  ;;  %v4641_v60 = vunpack.c.l.b16 %v4561_v39 }
 0x291   : > { %v8153_v17 = vpop.f32.mrf.mxu1 }
 0x292   : > { %5184 = vmatmul.bf16.gmra.mxu1 %v7790_v18  ;;  %v6203_v18 = vld [vmem:[#allocation2 + $0xa8] sm:$0xff]  ;;  %8765 = vst [vmem:[#allocation114_spill] sm:$0xff] %v8153_v17  ;;  %v4659_v52 = vpack.c.b16 %v4642_v0, %v4641_v60 }
 0x298   : > { %v8145_v15 = vpop.f32.mrf.mxu2  ;;  %4121 = vmatmul.bf16.gmra.mxu3 %v6283_v12 }
 0x299   : > { %v8162_v30 = vpop.f32.mrf.mxu1 }
 0x29a   : > { %8767 = vst [vmem:[#allocation116_spill] sm:$0xff] %v8162_v30 }
 0x29d   : > { %2003 = vmatmul.bf16.gmra.mxu2 %v6203_v18  ;;  %v3496_v18 = vrot.slane %v6543_v26, 5 }
 0x29f   : > { %4803 = vmatmul.bf16.gmra.mxu0 %v4659_v52  ;;  %v3498_v0 = vrot.slane %v3496_v18, 4  ;;  %v3424_v52 = vld [vmem:[#allocation2 + $0x18] sm:$0xe] }
 0x2a0   : > { %v8155_v63 = vpop.f32.mrf.mxu2  ;;  %v5897_v17 = vrot.slane %v3424_v52, 9  ;;  %v3425_v52 = vld [vmem:[#allocation2 + $0x24] sm:$0xe] }
 0x2a1   : > { %v8167_v12 = vpop.f32.mrf.mxu1 }
 0x2a2   : > { %5189 = vmatmul.bf16.gmra.mxu1 %v7838_v49  ;;  %8769 = vst [vmem:[#allocation118_spill] sm:$0xff] %v8167_v12  ;;  %v3497_v12 = vsel %vm6799_vm3, %v5897_v17, %v3496_v18  ;;  %v5898_v18 = vrot.slane %v3425_v52, 9  ;;  %v3426_v52 = vld [vmem:[#allocation2 + $0x30] sm:$0xe] }
 0x2a8   : > { %v8160_v20 = vpop.f32.mrf.mxu2 }
 0x2a9   : > { %8766 = vst [vmem:[#allocation115_spill] sm:$0xff] %v8160_v20  ;;  %v8172_v49 = vpop.f32.mrf.mxu1 }
 0x2aa   : > { %8771 = vst [vmem:[#allocation120_spill] sm:$0xff] %v8172_v49  ;;  %v3618_v49 = vunpack.c.l.b16 %v3497_v12 }
 0x2ad   : > { %2008 = vmatmul.bf16.gmra.mxu2 %v6204_v53  ;;  %v6544_v53 = vld [vmem:[#allocation2 + $0x20] sm:$0x1] }
 0x2ae   : > { %v3499_v30 = vrot.slane %v6544_v53, 5 }
 0x2b0   : > { %v8164_v19 = vpop.f32.mrf.mxu2 }
 0x2b1   : > { %8768 = vst [vmem:[#allocation117_spill] sm:$0xff] %v8164_v19  ;;  %v8181_v58 = vpop.f32.mrf.mxu1 }
 0x2b2   : > { %5194 = vmatmul.bf16.gmra.mxu1 %v7872_v42  ;;  %v3500_v42 = vsel %vm6799_vm3, %v3498_v0, %v3499_v30  ;;  %8773 = vst [vmem:[#allocation122_spill] sm:$0xff] %v8181_v58  ;;  %v6546_v30 = vld [vmem:[#allocation2 + $0x2c] sm:$0x1]  ;;  %v6547_v58 = vld [vmem:[#allocation2 + $0x34] sm:$0xf] }
 0x2b3   : > { %v3619_v26 = vunpack.c.l.b16 %v3500_v42  ;;  %v3506_v17 = vrot.slane %v6546_v30, 5 }
 0x2b8   : > { %v8169_v39 = vpop.f32.mrf.mxu2 }
 0x2b9   : > { %8770 = vst [vmem:[#allocation119_spill] sm:$0xff] %v8169_v39  ;;  %v6545_v39 = vld [vmem:[#allocation2 + $0x28] sm:$0xf]  ;;  %v8187_v29 = vpop.f32.mrf.mxu1 }
 0x2ba   : > { %v3503_v19 = vrot.slane %v6545_v39, 5  ;;  %8776 = vst [vmem:[#allocation125_spill] sm:$0xff] %v8187_v29  ;;  %v3510_v29 = vrot.slane %v6547_v58, 5 }
 0x2bc   : > { %v3505_v53 = vrot.slane %v3503_v19, 4  ;;  %v3504_v12 = vsel %vm6799_vm3, %v5898_v18, %v3503_v19  ;;  %v3512_v30 = vrot.slane %v3510_v29, 4 }
 0x2bd   : > { %3736 = vmatmul.bf16.vlgmr.msra.gmra.mxu2 %v7682_v48 }
 0x2be   : > { %v3507_v0 = vsel %vm6799_vm3, %v3505_v53, %v3506_v17  ;;  %v6548_v53 = vld [vmem:[#allocation2 + $0x38] sm:$0x1] }
 0x2bf   : > { %v3513_v17 = vrot.slane %v6548_v53, 5 }
 0x2c0   : > { %v8174_v60 = vpop.f32.mrf.mxu2 }
 0x2c1   : > { %8772 = vst [vmem:[#allocation121_spill] sm:$0xff] %v8174_v60  ;;  %v3649_v60 = vpack.c.b16 %v3619_v26, %v3618_v49  ;;  %v3621_v49 = vunpack.c.l.b16 %v3507_v0  ;;  %v8196_v26 = vpop.f32.mrf.mxu1  ;;  %v3514_v19 = vsel %vm6799_vm3, %v3512_v30, %v3513_v17  ;;  %v6550_v30 = vld [vmem:[#allocation2 + $0x44] sm:$0x1] }
 0x2c2   : > { %5199 = vmatmul.bf16.gmra.mxu1 %v7975_v31  ;;  %8778 = vst [vmem:[#allocation127_spill] sm:$0xff] %v8196_v26  ;;  %v3520_v17 = vrot.slane %v6550_v30, 5 }
 0x2c8   : > { %v8183_v48 = vpop.f32.mrf.mxu2 }
 0x2c9   : > { %8774 = vst [vmem:[#allocation123_spill] sm:$0xff] %v8183_v48  ;;  %v8203_v18 = vpop.f32.mrf.mxu1 }
 0x2ca   : > { %8780 = vst [vmem:[#allocation129_spill] sm:$0xff] %v8203_v18 }
 0x2cd   : > { %3741 = vmatmul.bf16.gmra.mxu2 %v3649_v60  ;;  %v3620_v60 = vunpack.c.l.b16 %v3504_v12  ;;  %v3623_v12 = vunpack.c.l.b16 %v3514_v19 }
 0x2cf   : > { %v3650_v42 = vpack.c.b16 %v3621_v49, %v3620_v60 }
 0x2d0   : > { %v8185_v31 = vpop.f32.mrf.mxu2 }
 0x2d1   : > { %8775 = vst [vmem:[#allocation124_spill] sm:$0xff] %v8185_v31  ;;  %v5899_v31 = vrot.slane %v3426_v52, 9 }
 0x2d2   : > { %5204 = vmatmul.bf16.gmra.mxu1 %v7997_v13 }
 0x2d3   : > { %v3511_v0 = vsel %vm6799_vm3, %v5899_v31, %v3510_v29 }
 0x2d4   : > { %v3622_v49 = vunpack.c.l.b16 %v3511_v0 }
 0x2d6   : > { %v3651_v60 = vpack.c.b16 %v3623_v12, %v3622_v49 }
 0x2d8   : > { %v8194_v39 = vpop.f32.mrf.mxu2 }
 0x2d9   : > { %8777 = vst [vmem:[#allocation126_spill] sm:$0xff] %v8194_v39  ;;  %v5010_v39 = vrot.slane %v8119_v8, 5 }
 0x2dd   : > { %3746 = vmatmul.bf16.gmra.mxu2 %v3650_v42  ;;  %v6549_v42 = vld [vmem:[#allocation2 + $0x40] sm:$0xf] }
 0x2de   : > { %v3517_v26 = vrot.slane %v6549_v42, 5  ;;  %v6551_v42 = vld [vmem:[#allocation2 + $0x4c] sm:$0xf] }
 0x2e0   : > { %v8198_v13 = vpop.f32.mrf.mxu2  ;;  %v3519_v52 = vrot.slane %v3517_v26, 4 }
 0x2e1   : > { %8779 = vst [vmem:[#allocation128_spill] sm:$0xff] %v8198_v13  ;;  %v3427_v13 = vld [vmem:[#allocation2 + $0x3c] sm:$0xe] }
 0x2e2   : > { %5209 = vmatmul.bf16.gmra.mxu1 %v8027_v2  ;;  %v8209_v2 = vpop.f32.mrf.mxu1  ;;  %v5900_v18 = vrot.slane %v3427_v13, 9  ;;  %v3521_v29 = vsel %vm6799_vm3, %v3519_v52, %v3520_v17  ;;  %v3428_v13 = vld [vmem:[#allocation2 + $0x48] sm:$0xe]  ;;  %v6552_v52 = vld [vmem:[#allocation2 + $0x50] sm:$0x1] }
 0x2e3   : > { %v3625_v19 = vunpack.c.l.b16 %v3521_v29  ;;  %v3527_v17 = vrot.slane %v6552_v52, 5 }
 0x2e4   : > { %v3518_v31 = vsel %vm6799_vm3, %v5900_v18, %v3517_v26  ;;  %v5901_v26 = vrot.slane %v3428_v13, 9  ;;  %v3429_v13 = vld [vmem:[#allocation2 + $0x54] sm:$0xe] }
 0x2e5   : > { %v3624_v12 = vunpack.c.l.b16 %v3518_v31 }
 0x2e8   : > { %v8207_v58 = vpop.f32.mrf.mxu2 }
 0x2e9   : > { %8781 = vst [vmem:[#allocation130_spill] sm:$0xff] %v8207_v58 }
 0x2ea   : > { %v8220_v49 = vpop.f32.mrf.mxu1 }
 0x2ed   : > { %3751 = vmatmul.bf16.gmra.mxu2 %v3651_v60  ;;  %v3652_v60 = vpack.c.b16 %v3625_v19, %v3624_v12 }
 0x2f0   : > { %v8211_v53 = vpop.f32.mrf.mxu2 }
 0x2f1   : > { %8782 = vst [vmem:[#allocation131_spill] sm:$0xff] %v8211_v53  ;;  %v3524_v53 = vrot.slane %v6551_v42, 5  ;;  %v6553_v42 = vld [vmem:[#allocation2 + $0x58] sm:$0xf] }
 0x2f2   : > { %5214 = vmatmul.bf16.gmra.mxu1 %v8050_v21  ;;  %v8225_v58 = vpop.f32.mrf.mxu1 }
 0x2f3   : > { %v3526_v30 = vrot.slane %v3524_v53, 4  ;;  %v3525_v29 = vsel %vm6799_vm3, %v5901_v26, %v3524_v53  ;;  %v5902_v26 = vrot.slane %v3429_v13, 9 }
 0x2f4   : > { %v3626_v12 = vunpack.c.l.b16 %v3525_v29 }
 0x2f5   : > { %v3528_v18 = vsel %vm6799_vm3, %v3526_v30, %v3527_v17  ;;  %v6554_v30 = vld [vmem:[#allocation2 + $0x5c] sm:$0x1]  ;;  %v4860_v17 = vld [vmem:[#allocation2 + $0xc0] sm:$0xe] }
 0x2f6   : > { %v3627_v31 = vunpack.c.l.b16 %v3528_v18  ;;  %v3534_v53 = vrot.slane %v6554_v30, 5  ;;  %v6134_v29 = vrot.slane %v4860_v17, 9 }
 0x2f8   : > { %v8218_v0 = vpop.f32.mrf.mxu2  ;;  %v5011_v30 = vsel %vm6799_vm3, %v6134_v29, %v5010_v39 }
 0x2f9   : > { %8783 = vst [vmem:[#allocation132_spill] sm:$0xff] %v8218_v0 }
 0x2fd   : > { %3756 = vmatmul.bf16.gmra.mxu2 %v3652_v60  ;;  %v3653_v60 = vpack.c.b16 %v3627_v31, %v3626_v12  ;;  %v5012_v31 = vrot.slane %v5010_v39, 4  ;;  %v5013_v12 = vrot.slane %v8137_v33, 5 }
 0x2ff   : > { %v5014_v13 = vsel %vm6799_vm3, %v5012_v31, %v5013_v12 }
 0x300   : > { %v8222_v21 = vpop.f32.mrf.mxu2  ;;  %v5068_v17 = vunpack.c.l.b16 %v5014_v13 }
 0x301   : > { %8784 = vst [vmem:[#allocation133_spill] sm:$0xff] %v8222_v21  ;;  %v3531_v21 = vrot.slane %v6553_v42, 5 }
 0x302   : > { %5219 = vmatmul.bf16.gmra.mxu1 %v8078_v45  ;;  %v8233_v45 = vpop.f32.mrf.mxu1 }
 0x303   : > { %v3533_v0 = vrot.slane %v3531_v21, 4 }
 0x305   : > { %v3535_v18 = vsel %vm6799_vm3, %v3533_v0, %v3534_v53  ;;  %v5067_v53 = vunpack.c.l.b16 %v5011_v30  ;;  %v6557_v30 = vld [vmem:[#allocation2 + $0x70] sm:$0xf] }
 0x306   : > { %v3629_v42 = vunpack.c.l.b16 %v3535_v18  ;;  %v3430_v18 = vld [vmem:[#allocation2 + $0x60] sm:$0xe]  ;;  %v3545_v13 = vrot.slane %v6557_v30, 5 }
 0x307   : > { %v5085_v48 = vpack.c.b16 %v5068_v17, %v5067_v53  ;;  %v5903_v39 = vrot.slane %v3430_v18, 9  ;;  %v6558_v18 = vld [vmem:[#allocation2 + $0x74] sm:$0x1] }
 0x308   : > { %v8231_v19 = vpop.f32.mrf.mxu2  ;;  %v3547_v17 = vrot.slane %v3545_v13, 4 }
 0x309   : > { %8785 = vst [vmem:[#allocation134_spill] sm:$0xff] %v8231_v19  ;;  %v6555_v19 = vld [vmem:[#allocation2 + $0x64] sm:$0xf] }
 0x30a   : > { %v3538_v33 = vrot.slane %v6555_v19, 5 }
 0x30c   : > { %v3539_v31 = vsel %vm6799_vm3, %v5903_v39, %v3538_v33 }
 0x30d   : > { %3761 = vmatmul.bf16.gmra.mxu2 %v3653_v60  ;;  %v3532_v60 = vsel %vm6799_vm3, %v5902_v26, %v3531_v21  ;;  %v3540_v26 = vrot.slane %v3538_v33, 4 }
 0x310   : > { %v8235_v52 = vpop.f32.mrf.mxu2 }
 0x311   : > { %8786 = vst [vmem:[#allocation135_spill] sm:$0xff] %v8235_v52  ;;  %v8244_v52 = vpop.f32.mrf.mxu1 }
 0x312   : > { %5224 = vmatmul.bf16.gmra.mxu1 %v8101_v59  ;;  %v3628_v59 = vunpack.c.l.b16 %v3532_v60  ;;  %v6556_v60 = vld [vmem:[#allocation2 + $0x68] sm:$0x1] }
 0x314   : > { %v3654_v0 = vpack.c.b16 %v3629_v42, %v3628_v59  ;;  %v3630_v42 = vunpack.c.l.b16 %v3539_v31 }
 0x318   : > { %v8246_v8 = vpop.f32.mrf.mxu2 }
 0x319   : > { %8787 = vst [vmem:[#allocation136_spill] sm:$0xff] %v8246_v8  ;;  %v8254_v20 = vpop.f32.mrf.mxu1  ;;  %v3541_v8 = vrot.slane %v6556_v60, 5  ;;  %v3548_v60 = vrot.slane %v6558_v18, 5  ;;  %v6560_v18 = vld [vmem:[#allocation2 + $0x80] sm:$0x1] }
 0x31b   : > { %v3542_v29 = vsel %vm6799_vm3, %v3540_v26, %v3541_v8  ;;  %v1935_v8 = vadd.f32 %v8008_v56, %v7293_v11  ;;  %v3549_v26 = vsel %vm6799_vm3, %v3547_v17, %v3548_v60  ;;  %v6559_v11 = vld [vmem:[#allocation2 + $0x7c] sm:$0xf]  ;;  %v3555_v60 = vrot.slane %v6560_v18, 5 }
 0x31c   : > { %v3631_v12 = vunpack.c.l.b16 %v3542_v29  ;;  %v3633_v31 = vunpack.c.l.b16 %v3549_v26  ;;  %v3552_v56 = vrot.slane %v6559_v11, 5  ;;  %v8278_v26 = vpop.f32.mrf.mxu3  ;;  %v6561_v11 = vld [vmem:[#allocation2 + $0x88] sm:$0xf] }
 0x31d   : > { %3766 = vmatmul.bf16.gmra.mxu2 %v3654_v0  ;;  %v3431_v0 = vld [vmem:[#allocation2 + $0x6c] sm:$0xe]  ;;  %v2395_v39 = vadd.f32 %v7297_v16, %v1935_v8 }
 0x31e   : > { %v3655_v59 = vpack.c.b16 %v3631_v12, %v3630_v42  ;;  %v1937_v42 = vadd.f32 %v8023_v57, %v7310_v6  ;;  %v3554_v16 = vrot.slane %v3552_v56, 4 }
 0x31f   : > { %v2709_v30 = vadd.f32 %v7306_v44, %v2395_v39  ;;  %v1940_v44 = vadd.f32 %v8031_v50, %v7329_v32 }
 0x320   : > { %v8252_v21 = vpop.f32.mrf.mxu2 }
 0x321   : > { %v3391_v17 = vadd.f32 %v7686_v41, %v2709_v30  ;;  %v8288_v41 = vpop.f32.mrf.mxu0 }
 0x322   : > { %5229 = vmatmul.bf16.gmra.mxu1 %v5085_v48  ;;  %v5904_v48 = vrot.slane %v3431_v0, 9  ;;  %v3432_v0 = vld [vmem:[#allocation2 + $0x78] sm:$0xe] }
 0x324   : > { %v3546_v33 = vsel %vm6799_vm3, %v5904_v48, %v3545_v13  ;;  %v5905_v13 = vrot.slane %v3432_v0, 9  ;;  %v2396_v48 = vadd.f32 %v7316_v3, %v1937_v42  ;;  %v3556_v3 = vsel %vm6799_vm3, %v3554_v16, %v3555_v60 }
 0x325   : > { %v3632_v29 = vunpack.c.l.b16 %v3546_v33  ;;  %v3635_v42 = vunpack.c.l.b16 %v3556_v3 }
 0x326   : > { %v3553_v6 = vsel %vm6799_vm3, %v5905_v13, %v3552_v56  ;;  %v2710_v39 = vadd.f32 %v7323_v51, %v2396_v48  ;;  %v3559_v51 = vrot.slane %v6561_v11, 5  ;;  %v1942_v56 = vadd.f32 %v8042_v25, %v7351_v7  ;;  %v8301_v48 = vld [vmem:[%s8640_s4] ss:$0 sm:$0xff] }
 0x328   : > { %v8260_v19 = vpop.f32.mrf.mxu2  ;;  %v3392_v0 = vadd.f32 %v7704_v22, %v2710_v39  ;;  %v3433_v22 = vld [vmem:[#allocation2 + $0x84] sm:$0xe]  ;;  %v3561_v25 = vrot.slane %v3559_v51, 4  ;;  %v1945_v39 = vadd.f32 %v8059_v35, %v7362_v46 }
 0x329   : > { %v8308_v18 = vpop.f32.mrf.mxu0  ;;  %v5906_v7 = vrot.slane %v3433_v22, 9 }
 0x32b   : > { %v3560_v3 = vsel %vm6799_vm3, %v5906_v7, %v3559_v51  ;;  %v8790_v7 = vld [vmem:[#allocation7_spill] sm:$0xff] }
 0x32d   : > { %3771 = vmatmul.bf16.gmra.mxu2 %v3655_v59  ;;  %v3656_v59 = vpack.c.b16 %v3633_v31, %v3632_v29  ;;  %v8290_v29 = vpop.f32.mrf.mxu1  ;;  %v3634_v31 = vunpack.c.l.b16 %v3553_v6 }
 0x330   : > { %v8262_v53 = vpop.f32.mrf.mxu2 }
 0x335   : > { %v8314_v6 = vpop.f32.mrf.mxu1 }
 0x338   : > { %v8271_v12 = vpop.f32.mrf.mxu2 }
 0x33d   : > { %3776 = vmatmul.bf16.gmra.mxu2 %v3656_v59  ;;  %v2397_v59 = vadd.f32 %v7333_v47, %v1940_v44  ;;  %v8340_v51 = vpop.f32.mrf.mxu1 }
 0x340   : > { %v3737_v8 = vpop.f32.mrf.mxu2 }
 0x341   : > { %v3817_v33 = vadd.f32 %v3737_v8, %v3391_v17  ;;  %v8305_v17 = vpop.f32.mrf.mxu3  ;;  %v2398_v8 = vadd.f32 %v7353_v23, %v1942_v56 }
 0x343   : > { %v4132_v57 = vadd.f32 %v8070_v40, %v3817_v33  ;;  %v3657_v40 = vpack.c.b16 %v3635_v42, %v3634_v31 }
 0x345   : > { %v4814_v30 = vadd.f32 %v8082_v4, %v4132_v57  ;;  %v2711_v4 = vadd.f32 %v7340_v9, %v2397_v59  ;;  %v3636_v59 = vunpack.c.l.b16 %v3560_v3 }
 0x347   : > { %v5240_v13 = vadd.f32 %v8209_v2, %v4814_v30  ;;  %v6562_v2 = vld [vmem:[#allocation2 + $0x8c] sm:$0x1]  ;;  %v3393_v9 = vadd.f32 %v7728_v36, %v2711_v4  ;;  %v2712_v36 = vadd.f32 %v7355_v28, %v2398_v8  ;;  %v8338_v28 = vpop.f32.mrf.mxu0 }
 0x348   : > { %v3739_v32 = vpop.f32.mrf.mxu2  ;;  %v3562_v60 = vrot.slane %v6562_v2, 5  ;;  %v8789_v4 = vld [vmem:[#allocation8_spill] sm:$0xff] }
 0x349   : > { %v3818_v50 = vadd.f32 %v3739_v32, %v3392_v0  ;;  %v5276_v33 = vadd.f32 %v8301_v48, %v5240_v13  ;;  %v8332_v35 = vpop.f32.mrf.mxu3  ;;  %v2399_v0 = vadd.f32 %v7364_v14, %v1945_v39  ;;  %v6563_v13 = vld [vmem:[#allocation2 + $0x94] sm:$0xf]  ;;  %v1947_v22 = vadd.f32 %v8072_v24, %v8789_v4 }
 0x34a   : > { %v3563_v23 = vsel %vm6799_vm3, %v3561_v25, %v3562_v60  ;;  %v3434_v25 = vld [vmem:[#allocation2 + $0x90] sm:$0xe] }
 0x34b   : > { %v4133_v47 = vadd.f32 %v8086_v27, %v3818_v50  ;;  %v5308_v31 = vmax.f32 %v5276_v33, 0.0  ;;  %v3637_v30 = vunpack.c.l.b16 %v3563_v23  ;;  %v5907_v60 = vrot.slane %v3434_v25, 9  ;;  %v6564_v33 = vld [vmem:[#allocation2 + $0x98] sm:$0x1]  ;;  %v8793_v23 = vld [vmem:[#allocation12_spill] sm:$0xff] }
 0x34d   : > { %v4815_v16 = vadd.f32 %v8103_v1, %v4133_v47  ;;  %3781 = vmatmul.bf16.gmra.mxu2 %v3657_v40  ;;  %v3658_v56 = vpack.c.b16 %v3637_v30, %v3636_v59  ;;  %v3566_v47 = vrot.slane %v6563_v13, 5 }
 0x34f   : > { %v5241_v27 = vadd.f32 %v8220_v49, %v4815_v16  ;;  %v3568_v8 = vrot.slane %v3566_v47, 4 }
 0x350   : > { %v3742_v44 = vpop.f32.mrf.mxu2 }
 0x351   : > { %v5277_v1 = vadd.f32 %v8301_v48, %v5241_v27  ;;  %v3819_v57 = vadd.f32 %v3742_v44, %v3393_v9  ;;  %v3569_v27 = vrot.slane %v6564_v33, 5  ;;  %v8791_v9 = vld [vmem:[#allocation9_spill] sm:$0xff]  ;;  %v8352_v39 = vpop.f32.mrf.mxu3 }
 0x352   : > { %v2400_v44 = vadd.f32 %v8791_v9, %v1947_v22  ;;  %v8800_v9 = vld [vmem:[#allocation13_spill] sm:$0xff] }
 0x353   : > { %v5309_v42 = vmax.f32 %v5277_v1, 0.0  ;;  %v4134_v49 = vadd.f32 %v8105_v38, %v3819_v57  ;;  %v8788_v38 = vld [vmem:[#allocation47_spill] sm:$0xff] }
 0x354   : > { %v3394_v50 = vadd.f32 %v8788_v38, %v2712_v36  ;;  %v8792_v57 = vld [vmem:[#allocation51_spill] sm:$0xff]  ;;  %v3567_v36 = vsel %vm6799_vm3, %v5907_v60, %v3566_v47  ;;  %v8365_v38 = vpop.f32.mrf.mxu1  ;;  %v8799_v60 = vld [vmem:[#allocation108_spill] sm:$0xff] }
 0x355   : > { %v6392_v46 = vpack.c.bf16 %v5309_v42, %v5308_v31  ;;  %v4816_v32 = vadd.f32 %v8115_v55, %v4134_v49  ;;  %v2713_v55 = vadd.f32 %v8790_v7, %v2399_v0  ;;  %v8794_v31 = vld [vmem:[#allocation106_spill] sm:$0xff]  ;;  %v8357_v49 = vpop.f32.mrf.mxu0  ;;  %v8797_v47 = vld [vmem:[#allocation55_spill] sm:$0xff] }
 0x356   : > { %v1950_v42 = vadd.f32 %v8794_v31, %v8793_v23  ;;  %v8795_v0 = vld [vmem:[#allocation10_spill] sm:$0xff] }
 0x357   : > { %6393 = vst [vmem:[%s8330_s24] sm:$0xff] %v6392_v46   ;;  %v5242_v16 = vadd.f32 %v8225_v58, %v4816_v32  ;;  %v3395_v58 = vadd.f32 %v8792_v57, %v2713_v55  ;;  %v2714_v32 = vadd.f32 %v8795_v0, %v2400_v44  ;;  %v8801_v23 = vld [vmem:[#allocation14_spill] sm:$0xff] }
 0x358   : > { %v3744_v40 = vpop.f32.mrf.mxu2 }
 0x359   : > { %v3820_v11 = vadd.f32 %v3744_v40, %v3394_v50  ;;  %v5278_v1 = vadd.f32 %v8301_v48, %v5242_v16  ;;  %v3638_v40 = vunpack.c.l.b16 %v3567_v36  ;;  %v3396_v22 = vadd.f32 %v8797_v47, %v2714_v32  ;;  %v8371_v7 = vpop.f32.mrf.mxu3 }
 0x35b   : > { %v4135_v14 = vadd.f32 %v8117_v5, %v3820_v11  ;;  %v5310_v46 = vmax.f32 %v5278_v1, 0.0  ;;  %v3435_v1 = vld [vmem:[#allocation2 + $0x9c] sm:$0xe] }
 0x35c   : > { %v8381_v57 = vpop.f32.mrf.mxu1 }
 0x35d   : > { %v4817_v2 = vadd.f32 %v8131_v34, %v4135_v14  ;;  %3786 = vmatmul.bf16.gmra.mxu2 %v3658_v56  ;;  %v8796_v56 = vld [vmem:[#allocation11_spill] sm:$0xff] }
 0x35e   : > { %v2401_v13 = vadd.f32 %v8796_v56, %v1950_v42  ;;  %v8802_v42 = vld [vmem:[#allocation58_spill] sm:$0xff]  ;;  %v8805_v56 = vld [vmem:[#allocation16_spill] sm:$0xff] }
 0x35f   : > { %v5243_v24 = vadd.f32 %v8233_v45, %v4817_v2  ;;  %v3570_v45 = vsel %vm6799_vm3, %v3568_v8, %v3569_v27  ;;  %v8798_v2 = vld [vmem:[#allocation15_spill] sm:$0xff] }
 0x360   : > { %v3747_v5 = vpop.f32.mrf.mxu2  ;;  %v3639_v11 = vunpack.c.l.b16 %v3570_v45  ;;  %v1952_v8 = vadd.f32 %v8799_v60, %v8798_v2  ;;  %v2715_v44 = vadd.f32 %v8800_v9, %v2401_v13  ;;  %v8807_v2 = vld [vmem:[#allocation61_spill] sm:$0xff]  ;;  %v6567_v9 = vld [vmem:[#allocation2 + $0xac] sm:$0xf] }
 0x361   : > { %v5279_v3 = vadd.f32 %v8301_v48, %v5243_v24  ;;  %v3821_v34 = vadd.f32 %v3747_v5, %v3395_v58  ;;  %v5908_v58 = vrot.slane %v3435_v1, 9  ;;  %v8808_v1 = vld [vmem:[#allocation21_spill] sm:$0xff] }
 0x362   : > { %v3659_v55 = vpack.c.b16 %v3639_v11, %v3638_v40  ;;  %v2402_v31 = vadd.f32 %v8801_v23, %v1952_v8  ;;  %v3397_v36 = vadd.f32 %v8802_v42, %v2715_v44  ;;  %v3580_v44 = vrot.slane %v6567_v9, 5  ;;  %v8816_v9 = vld [vmem:[#allocation70_spill] sm:$0xff] }
 0x363   : > { %v5311_v59 = vmax.f32 %v5279_v3, 0.0  ;;  %v4136_v30 = vadd.f32 %v8133_v62, %v3821_v34  ;;  %v6565_v62 = vld [vmem:[#allocation2 + $0xa0] sm:$0xf]  ;;  %v6566_v3 = vld [vmem:[#allocation2 + $0xa4] sm:$0x1] }
 0x364   : > { %v3573_v25 = vrot.slane %v6565_v62, 5  ;;  %v3576_v34 = vrot.slane %v6566_v3, 5  ;;  %v2716_v13 = vadd.f32 %v8805_v56, %v2402_v31  ;;  %v8404_v8 = vpop.f32.mrf.mxu1  ;;  %v3436_v31 = vld [vmem:[#allocation2 + $0xa8] sm:$0xe]  ;;  %v3582_v42 = vrot.slane %v3580_v44, 4 }
 0x365   : > { %v6397_v50 = vpack.c.bf16 %v5311_v59, %v5310_v46  ;;  %v4818_v4 = vadd.f32 %v8143_v61, %v4136_v30  ;;  %v8378_v61 = vpop.f32.mrf.mxu0  ;;  %v8803_v59 = vld [vmem:[#allocation18_spill] sm:$0xff]  ;;  %v8804_v30 = vld [vmem:[#allocation109_spill] sm:$0xff] }
 0x366   : > { %v3575_v5 = vrot.slane %v3573_v25, 4  ;;  %v1955_v0 = vadd.f32 %v8804_v30, %v8803_v59  ;;  %v3574_v32 = vsel %vm6799_vm3, %v5908_v58, %v3573_v25  ;;  %v3398_v60 = vadd.f32 %v8807_v2, %v2716_v13  ;;  %v8812_v30 = vld [vmem:[#allocation65_spill] sm:$0xff] }
 0x367   : > { %6487 = vst [vmem:[%s8330_s24 + $0x8] sm:$0xff] %v6397_v50   ;;  %v5244_v33 = vadd.f32 %v8244_v52, %v4818_v4  ;;  %v8396_v4 = vpop.f32.mrf.mxu3 }
 0x368   : > { %v3749_v16 = vpop.f32.mrf.mxu2  ;;  %v3577_v50 = vsel %vm6799_vm3, %v3575_v5, %v3576_v34  ;;  %v8810_v34 = vld [vmem:[#allocation19_spill] sm:$0xff] }
 0x369   : > { %v3822_v14 = vadd.f32 %v3749_v16, %v3396_v22  ;;  %v5280_v52 = vadd.f32 %v8301_v48, %v5244_v33  ;;  %v3640_v16 = vunpack.c.l.b16 %v3574_v32 }
 0x36b   : > { %v4137_v27 = vadd.f32 %v8151_v54, %v3822_v14  ;;  %v5312_v40 = vmax.f32 %v5280_v52, 0.0  ;;  %v3641_v14 = vunpack.c.l.b16 %v3577_v50 }
 0x36d   : > { %v4819_v24 = vadd.f32 %v8157_v43, %v4137_v27  ;;  %3791 = vmatmul.bf16.gmra.mxu2 %v3659_v55  ;;  %v8398_v22 = vpop.f32.mrf.mxu0  ;;  %v8806_v55 = vld [vmem:[#allocation17_spill] sm:$0xff]  ;;  %v3660_v27 = vpack.c.b16 %v3641_v14, %v3640_v16  ;;  %v8814_v14 = vld [vmem:[#allocation22_spill] sm:$0xff] }
 0x36e   : > { %v2403_v62 = vadd.f32 %v8806_v55, %v1955_v0 }
 0x36f   : > { %v5245_v54 = vadd.f32 %v8254_v20, %v4819_v24  ;;  %v8809_v24 = vld [vmem:[#allocation111_spill] sm:$0xff]  ;;  %v8412_v52 = vpop.f32.mrf.mxu3 }
 0x370   : > { %v3752_v45 = vpop.f32.mrf.mxu2  ;;  %v1957_v58 = vadd.f32 %v8809_v24, %v8808_v1  ;;  %v2717_v23 = vadd.f32 %v8810_v34, %v2403_v62  ;;  %v3437_v1 = vld [vmem:[#allocation2 + $0xb4] sm:$0xe] }
 0x371   : > { %v5281_v46 = vadd.f32 %v8301_v48, %v5245_v54  ;;  %v3823_v43 = vadd.f32 %v3752_v45, %v3397_v36  ;;  %v5909_v54 = vrot.slane %v3436_v31, 9  ;;  %v6568_v36 = vld [vmem:[#allocation2 + $0xb0] sm:$0x1]  ;;  %v5910_v34 = vrot.slane %v3437_v1, 9  ;;  %v6570_v31 = vld [vmem:[#allocation2 + $0xbc] sm:$0x1] }
 0x372   : > { %v3583_v45 = vrot.slane %v6568_v36, 5 }
 0x373   : > { %v5313_v11 = vmax.f32 %v5281_v46, 0.0  ;;  %v4138_v20 = vadd.f32 %v8278_v26, %v3823_v43  ;;  %v8811_v46 = vld [vmem:[#allocation20_spill] sm:$0xff]  ;;  %v3581_v56 = vsel %vm6799_vm3, %v5909_v54, %v3580_v44  ;;  %v8817_v54 = vld [vmem:[#allocation26_spill] sm:$0xff] }
 0x374   : > { %v2404_v43 = vadd.f32 %v8811_v46, %v1957_v58 }
 0x375   : > { %v6402_v47 = vpack.c.bf16 %v5313_v11, %v5312_v40  ;;  %v4820_v25 = vadd.f32 %v8288_v41, %v4138_v20  ;;  %v8418_v0 = vpop.f32.mrf.mxu0  ;;  %v8813_v40 = vld [vmem:[#allocation24_spill] sm:$0xff]  ;;  %v8423_v20 = vpop.f32.mrf.mxu1 }
 0x376   : > { %v1960_v11 = vadd.f32 %v8135_v37, %v8813_v40  ;;  %v2718_v55 = vadd.f32 %v8814_v14, %v2404_v43  ;;  %v8815_v37 = vld [vmem:[#allocation23_spill] sm:$0xff]  ;;  %v6284_v43 = vld [vmem:[#allocation2 + $0xcc] sm:$0xff] }
 0x377   : > { %6488 = vst [vmem:[%s8330_s24 + $0x10] sm:$0xff] %v6402_v47   ;;  %v5246_v5 = vadd.f32 %v8290_v29, %v4820_v25  ;;  %v3642_v25 = vunpack.c.l.b16 %v3581_v56  ;;  %v8435_v24 = vpop.f32.mrf.mxu3  ;;  %4126 = vmatmul.bf16.gmra.mxu3 %v6284_v43 }
 0x378   : > { %v3754_v33 = vpop.f32.mrf.mxu2  ;;  %v3400_v44 = vadd.f32 %v8816_v9, %v2718_v55 }
 0x379   : > { %v3824_v26 = vadd.f32 %v3754_v33, %v3398_v60  ;;  %v5282_v59 = vadd.f32 %v8301_v48, %v5246_v5  ;;  %v6569_v60 = vld [vmem:[#allocation2 + $0xb8] sm:$0xf] }
 0x37a   : > { %v3587_v33 = vrot.slane %v6569_v60, 5  ;;  %v8824_v60 = vld [vmem:[#allocation28_spill] sm:$0xff] }
 0x37b   : > { %v4139_v3 = vadd.f32 %v8305_v17, %v3824_v26  ;;  %v3399_v17 = vadd.f32 %v8812_v30, %v2717_v23  ;;  %v5314_v13 = vmax.f32 %v5282_v59, 0.0  ;;  %v2405_v26 = vadd.f32 %v8815_v37, %v1960_v11  ;;  %v8821_v11 = vld [vmem:[#allocation29_spill] sm:$0xff] }
 0x37c   : > { %v3589_v23 = vrot.slane %v3587_v33, 4  ;;  %v3588_v30 = vsel %vm6799_vm3, %v5910_v34, %v3587_v33 }
 0x37d   : > { %v4821_v41 = vadd.f32 %v8308_v18, %v4139_v3  ;;  %3796 = vmatmul.bf16.gmra.mxu2 %v3660_v27  ;;  %v8444_v59 = vpop.f32.mrf.mxu1  ;;  %v3644_v55 = vunpack.c.l.b16 %v3588_v30 }
 0x37f   : > { %v5247_v29 = vadd.f32 %v8314_v6, %v4821_v41  ;;  %v3584_v6 = vsel %vm6799_vm3, %v3582_v42, %v3583_v45  ;;  %v3590_v41 = vrot.slane %v6570_v31, 5  ;;  %v1962_v42 = vadd.f32 %v8145_v15, %v8817_v54  ;;  %v8818_v45 = vld [vmem:[#allocation25_spill] sm:$0xff]  ;;  %v8819_v15 = vld [vmem:[#allocation27_spill] sm:$0xff]  ;;  %v8460_v14 = vpop.f32.mrf.mxu3 }
 0x380   : > { %v3757_v32 = vpop.f32.mrf.mxu2  ;;  %v3643_v2 = vunpack.c.l.b16 %v3584_v6  ;;  %v2719_v46 = vadd.f32 %v8818_v45, %v2405_v26  ;;  %v4210_v31 = vld [vmem:[#allocation2 + $0xd0] sm:$0xf] }
 0x381   : > { %v5283_v18 = vadd.f32 %v8301_v48, %v5247_v29  ;;  %v3825_v50 = vadd.f32 %v3757_v32, %v3399_v17  ;;  %v3591_v17 = vsel %vm6799_vm3, %v3589_v23, %v3590_v41  ;;  %v2406_v32 = vadd.f32 %v8819_v15, %v1962_v42  ;;  %v4209_v23 = vld [vmem:[#allocation2 + $0xcc] sm:$0xf]  ;;  %v4211_v41 = vld [vmem:[#allocation2 + $0xd4] sm:$0x1]  ;;  %v3438_v15 = vld [vmem:[#allocation2 + $0xc0] sm:$0xe] }
 0x382   : > { %v3661_v3 = vpack.c.b16 %v3643_v2, %v3642_v25  ;;  %v4573_v54 = vshrl.u32 %v4209_v23, 16  ;;  %v4576_v42 = vshll.u32 %v4209_v23, 16 }
 0x383   : > { %v5315_v47 = vmax.f32 %v5283_v18, 0.0  ;;  %v4140_v16 = vadd.f32 %v8332_v35, %v3825_v50  ;;  %v8437_v35 = vpop.f32.mrf.mxu0  ;;  %v8820_v18 = vld [vmem:[#allocation74_spill] sm:$0xff]  ;;  %v2720_v33 = vadd.f32 %v8824_v60, %v2406_v32 }
 0x384   : > { %v3401_v50 = vadd.f32 %v8820_v18, %v2719_v46  ;;  %v8828_v46 = vld [vmem:[#allocation32_spill] sm:$0xff]  ;;  %v4575_v32 = vrot.slane %v4573_v54, 4 }
 0x385   : > { %v6407_v62 = vpack.c.bf16 %v5315_v47, %v5314_v13  ;;  %v4822_v27 = vadd.f32 %v8338_v28, %v4140_v16  ;;  %v8822_v13 = vld [vmem:[#allocation31_spill] sm:$0xff]  ;;  %v8467_v9 = vpop.f32.mrf.mxu1 }
 0x386   : > { %v8823_v47 = vld [vmem:[#allocation115_spill] sm:$0xff] }
 0x387   : > { %6489 = vst [vmem:[%s8330_s24 + $0x18] sm:$0xff] %v6407_v62   ;;  %v5248_v36 = vadd.f32 %v8340_v51, %v4822_v27  ;;  %v1967_v16 = vadd.f32 %v8823_v47, %v8822_v13  ;;  %v3645_v62 = vunpack.c.l.b16 %v3591_v17  ;;  %v4592_v17 = vshll.u32 %v4211_v41, 16 }
 0x388   : > { %v3759_v58 = vpop.f32.mrf.mxu2 }
 0x389   : > { %v3826_v5 = vadd.f32 %v3759_v58, %v3400_v44  ;;  %v5284_v51 = vadd.f32 %v8301_v48, %v5248_v36  ;;  %v8826_v44 = vld [vmem:[#allocation33_spill] sm:$0xff]  ;;  %v3662_v34 = vpack.c.b16 %v3645_v62, %v3644_v55  ;;  %v4582_v36 = vshll.u32 %v4210_v31, 16 }
 0x38a   : > { %v2408_v1 = vadd.f32 %v8826_v44, %v1967_v16  ;;  %v5020_v16 = vrot.slane %v4211_v41, 5  ;;  %v5911_v62 = vrot.slane %v3438_v15, 9 }
 0x38b   : > { %v4141_v28 = vadd.f32 %v8352_v39, %v3826_v5  ;;  %v5316_v25 = vmax.f32 %v5284_v51, 0.0  ;;  %v8464_v37 = vpop.f32.mrf.mxu0  ;;  %v8827_v5 = vld [vmem:[#allocation78_spill] sm:$0xff]  ;;  %v4584_v51 = vrot.slane %v4582_v36, 5 }
 0x38d   : > { %v4823_v29 = vadd.f32 %v8357_v49, %v4141_v28  ;;  %3801 = vmatmul.bf16.gmra.mxu2 %v3661_v3  ;;  %v1965_v49 = vadd.f32 %v8155_v63, %v8821_v11  ;;  %v8825_v63 = vld [vmem:[#allocation30_spill] sm:$0xff]  ;;  %v3402_v3 = vadd.f32 %v8827_v5, %v2720_v33  ;;  %v4586_v28 = vshrl.u32 %v4210_v31, 16  ;;  %v4861_v11 = vld [vmem:[#allocation2 + $0xcc] sm:$0xe] }
 0x38e   : > { %v6135_v47 = vrot.slane %v4861_v11, 9 }
 0x38f   : > { %v5249_v39 = vadd.f32 %v8365_v38, %v4823_v29  ;;  %v2407_v26 = vadd.f32 %v8825_v63, %v1965_v49  ;;  %v6571_v29 = vld [vmem:[#allocation2 + $0xc4] sm:$0xf]  ;;  %v5017_v49 = vrot.slane %v4210_v31, 5 }
 0x390   : > { %v3762_v40 = vpop.f32.mrf.mxu2  ;;  %v3594_v30 = vrot.slane %v6571_v29, 5 }
 0x391   : > { %v5285_v56 = vadd.f32 %v8301_v48, %v5249_v39  ;;  %v3827_v6 = vadd.f32 %v3762_v40, %v3401_v50  ;;  %v2721_v43 = vadd.f32 %v8828_v46, %v2407_v26  ;;  %v4588_v39 = vrot.slane %v4586_v28, 4  ;;  %v8831_v28 = vld [vmem:[#allocation34_spill] sm:$0xff] }
 0x392   : > { %v4594_v40 = vrot.slane %v4592_v17, 5  ;;  %v5018_v63 = vsel %vm6799_vm3, %v6135_v47, %v5017_v49 }
 0x393   : > { %v5317_v2 = vmax.f32 %v5285_v56, 0.0  ;;  %v4142_v38 = vadd.f32 %v8371_v7, %v3827_v6  ;;  %v8476_v56 = vpop.f32.mrf.mxu3  ;;  %v4589_v13 = vor.u32 %v4588_v39, %v4584_v51  ;;  %v5069_v44 = vunpack.c.l.b16 %v5018_v63 }
 0x394   : > { %v3595_v39 = vsel %vm6799_vm3, %v5911_v62, %v3594_v30  ;;  %v8837_v62 = vld [vmem:[#allocation119_spill] sm:$0xff] }
 0x395   : > { %v6412_v27 = vpack.c.bf16 %v5317_v2, %v5316_v25  ;;  %v4824_v58 = vadd.f32 %v8378_v61, %v4142_v38  ;;  %v4578_v61 = vrot.slane %v4576_v42, 5  ;;  %v3596_v25 = vrot.slane %v3594_v30, 4  ;;  %v8479_v38 = vpop.f32.mrf.mxu0  ;;  %v8836_v30 = vld [vmem:[#allocation37_spill] sm:$0xff] }
 0x396   : > { %v5019_v2 = vrot.slane %v5017_v49, 4  ;;  %v4590_v33 = vrot.slane %v4589_v13, 4  ;;  %v3646_v47 = vunpack.c.l.b16 %v3595_v39  ;;  %v1972_v10 = vadd.f32 %v8837_v62, %v8836_v30  ;;  %v8846_v39 = vld [vmem:[#allocation43_spill] sm:$0xff]  ;;  %v8850_v30 = vld [vmem:[#allocation97_spill] sm:$0xff] }
 0x397   : > { %6490 = vst [vmem:[%s8330_s24 + $0x20] sm:$0xff] %v6412_v27   ;;  %v5250_v18 = vadd.f32 %v8381_v57, %v4824_v58  ;;  %v4579_v6 = vor.u32 %v4578_v61, %v4575_v32  ;;  %v8829_v57 = vld [vmem:[#allocation82_spill] sm:$0xff]  ;;  %v8488_v58 = vpop.f32.mrf.mxu1 }
 0x398   : > { %v3764_v7 = vpop.f32.mrf.mxu2  ;;  %v3403_v60 = vadd.f32 %v8829_v57, %v2721_v43  ;;  %v8833_v43 = vld [vmem:[#allocation35_spill] sm:$0xff] }
 0x399   : > { %v3828_v45 = vadd.f32 %v3764_v7, %v3402_v3  ;;  %v5286_v26 = vadd.f32 %v8301_v48, %v5250_v18  ;;  %v6572_v3 = vld [vmem:[#allocation2 + $0xc8] sm:$0x1]  ;;  %v4595_v7 = vsel %vm6829_vm6, %v4590_v33, %v4594_v40  ;;  %v2722_v29 = vadd.f32 %v8833_v43, %v2408_v1  ;;  %v8838_v33 = vld [vmem:[#allocation38_spill] sm:$0xff] }
 0x39a   : > { %v4644_v36 = vunpack.c.l.b16 %v4595_v7  ;;  %v8834_v40 = vld [vmem:[#allocation36_spill] sm:$0xff]  ;;  %v8842_v7 = vld [vmem:[#allocation121_spill] sm:$0xff] }
 0x39b   : > { %v4143_v50 = vadd.f32 %v8396_v4, %v3828_v45  ;;  %v4580_v4 = vrot.slane %v4579_v6, 4  ;;  %v8832_v45 = vld [vmem:[#allocation117_spill] sm:$0xff]  ;;  %v5318_v15 = vmax.f32 %v5286_v26, 0.0  ;;  %v4092_v49 = vpop.f32.mrf.mxu3  ;;  %v8835_v6 = vld [vmem:[#allocation87_spill] sm:$0xff] }
 0x39c   : > { %v1970_v46 = vadd.f32 %v8832_v45, %v8831_v28  ;;  %v3404_v13 = vadd.f32 %v8835_v6, %v2722_v29  ;;  %v8839_v26 = vld [vmem:[#allocation39_spill] sm:$0xff] }
 0x39d   : > { %v4825_v55 = vadd.f32 %v8398_v22, %v4143_v50  ;;  %3806 = vmatmul.bf16.gmra.mxu2 %v3662_v34  ;;  %v5021_v22 = vsel %vm6799_vm3, %v5019_v2, %v5020_v16  ;;  %v3597_v34 = vrot.slane %v6572_v3, 5  ;;  %v4585_v31 = vsel %vm6829_vm6, %v4580_v4, %v4584_v51  ;;  %v4774_v16 = vpop.f32.mrf.mxu0 }
 0x39e   : > { %v5070_v41 = vunpack.c.l.b16 %v5021_v22  ;;  %v2409_v11 = vadd.f32 %v8834_v40, %v1970_v46 }
 0x39f   : > { %v5251_v27 = vadd.f32 %v8404_v8, %v4825_v55  ;;  %v4643_v8 = vunpack.c.l.b16 %v4585_v31  ;;  %v3598_v18 = vsel %vm6799_vm3, %v3596_v25, %v3597_v34  ;;  %v5200_v25 = vpop.f32.mrf.mxu1  ;;  %v8841_v31 = vld [vmem:[#allocation40_spill] sm:$0xff] }
 0x3a0   : > { %v3767_v5 = vpop.f32.mrf.mxu2  ;;  %v5086_v17 = vpack.c.b16 %v5070_v41, %v5069_v44  ;;  %v2723_v63 = vadd.f32 %v8838_v33, %v2409_v11  ;;  %v1975_v41 = vadd.f32 %v8842_v7, %v8841_v31  ;;  %v8848_v11 = vld [vmem:[#allocation44_spill] sm:$0xff] }
 0x3a1   : > { %v5287_v54 = vadd.f32 %v8301_v48, %v5251_v27  ;;  %v3829_v42 = vadd.f32 %v3767_v5, %v3403_v60  ;;  %v4660_v51 = vpack.c.b16 %v4644_v36, %v4643_v8  ;;  %v2410_v27 = vadd.f32 %v8839_v26, %v1972_v10  ;;  %v8840_v5 = vld [vmem:[#allocation91_spill] sm:$0xff]  ;;  %v8843_v36 = vld [vmem:[#allocation41_spill] sm:$0xff] }
 0x3a2   : > { %5234 = vmatmul.bf16.gmra.mxu1 %v5086_v17  ;;  %v3405_v3 = vadd.f32 %v8840_v5, %v2723_v63  ;;  %v8845_v17 = vld [vmem:[#allocation94_spill] sm:$0xff] }
 0x3a3   : > { %v5319_v32 = vmax.f32 %v5287_v54, 0.0  ;;  %v4144_v61 = vadd.f32 %v8412_v52, %v3829_v42  ;;  %4808 = vmatmul.bf16.gmra.mxu0 %v4660_v51  ;;  %v3647_v52 = vunpack.c.l.b16 %v3598_v18  ;;  %v4094_v34 = vpop.f32.mrf.mxu3  ;;  %v2724_v28 = vadd.f32 %v8843_v36, %v2410_v27  ;;  %v8847_v18 = vld [vmem:[#allocation123_spill] sm:$0xff]  ;;  %v8854_v5 = vld [vmem:[#allocation50_spill] sm:$0xff] }
 0x3a5   : > { %v6417_v50 = vpack.c.bf16 %v5319_v32, %v5318_v15  ;;  %v4826_v1 = vadd.f32 %v8418_v0, %v4144_v61  ;;  %v3663_v4 = vpack.c.b16 %v3647_v52, %v3646_v47  ;;  %v4776_v54 = vpop.f32.mrf.mxu0  ;;  %v3406_v15 = vadd.f32 %v8845_v17, %v2724_v28  ;;  %v8849_v52 = vld [vmem:[#allocation46_spill] sm:$0xff] }
 0x3a7   : > { %6491 = vst [vmem:[%s8330_s24 + $0x28] sm:$0xff] %v6417_v50   ;;  %v5252_v57 = vadd.f32 %v8423_v20, %v4826_v1  ;;  %v5202_v45 = vpop.f32.mrf.mxu1  ;;  %v1977_v50 = vadd.f32 %v8847_v18, %v8846_v39 }
 0x3a8   : > { %v3769_v55 = vpop.f32.mrf.mxu2 }
 0x3a9   : > { %v3830_v2 = vadd.f32 %v3769_v55, %v3404_v13  ;;  %v5288_v22 = vadd.f32 %v8301_v48, %v5252_v57 }
 0x3ab   : > { %v4145_v60 = vadd.f32 %v8435_v24, %v3830_v2  ;;  %v4097_v51 = vpop.f32.mrf.mxu3 }
 0x3ad   : > { %v4827_v0 = vadd.f32 %v8437_v35, %v4145_v60  ;;  %3811 = vmatmul.bf16.gmra.mxu2 %v3663_v4  ;;  %v5320_v35 = vmax.f32 %v5288_v22, 0.0  ;;  %v4779_v6 = vpop.f32.mrf.mxu0  ;;  %v8852_v60 = vld [vmem:[#allocation124_spill] sm:$0xff] }
 0x3af   : > { %v5253_v44 = vadd.f32 %v8444_v59, %v4827_v0  ;;  %v8844_v59 = vld [vmem:[#allocation42_spill] sm:$0xff]  ;;  %v5205_v47 = vpop.f32.mrf.mxu1  ;;  %v8853_v0 = vld [vmem:[#allocation49_spill] sm:$0xff] }
 0x3b0   : > { %v3772_v23 = vpop.f32.mrf.mxu2  ;;  %v2411_v43 = vadd.f32 %v8844_v59, %v1975_v41  ;;  %v8856_v41 = vld [vmem:[#allocation48_spill] sm:$0xff] }
 0x3b1   : > { %v5289_v20 = vadd.f32 %v8301_v48, %v5253_v44  ;;  %v3831_v24 = vadd.f32 %v3772_v23, %v3405_v3  ;;  %v8855_v23 = vld [vmem:[#allocation100_spill] sm:$0xff] }
 0x3b2   : > { %v2725_v1 = vadd.f32 %v8848_v11, %v2411_v43  ;;  %v8859_v43 = vld [vmem:[#allocation54_spill] sm:$0xff] }
 0x3b3   : > { %v5321_v42 = vmax.f32 %v5289_v20, 0.0  ;;  %v4146_v8 = vadd.f32 %v8460_v14, %v3831_v24  ;;  %v4099_v27 = vpop.f32.mrf.mxu3 }
 0x3b4   : > { %v3407_v62 = vadd.f32 %v8850_v30, %v2725_v1  ;;  %v8865_v30 = vld [vmem:[#allocation105_spill] sm:$0xff] }
 0x3b5   : > { %v6422_v46 = vpack.c.bf16 %v5321_v42, %v5320_v35  ;;  %v4828_v29 = vadd.f32 %v8464_v37, %v4146_v8  ;;  %v2412_v37 = vadd.f32 %v8849_v52, %v1977_v50  ;;  %v4781_v44 = vpop.f32.mrf.mxu0  ;;  %v8857_v35 = vld [vmem:[#allocation126_spill] sm:$0xff] }
 0x3b6   : > { %v1982_v42 = vadd.f32 %v8857_v35, %v8856_v41 }
 0x3b7   : > { %6492 = vst [vmem:[%s8330_s24 + $0x30] sm:$0xff] %v6422_v46   ;;  %v5254_v40 = vadd.f32 %v8467_v9, %v4828_v29  ;;  %v2726_v26 = vadd.f32 %v8853_v0, %v2412_v37  ;;  %v5207_v24 = vpop.f32.mrf.mxu1  ;;  %v8868_v0 = vld [vmem:[#allocation62_spill] sm:$0xff] }
 0x3b8   : > { %v3774_v32 = vpop.f32.mrf.mxu2  ;;  %v2414_v29 = vadd.f32 %v8859_v43, %v1982_v42  ;;  %v8871_v42 = vld [vmem:[#allocation60_spill] sm:$0xff] }
 0x3b9   : > { %v3832_v61 = vadd.f32 %v3774_v32, %v3406_v15  ;;  %v5290_v55 = vadd.f32 %v8301_v48, %v5254_v40  ;;  %v3408_v20 = vadd.f32 %v8855_v23, %v2726_v26  ;;  %v8860_v15 = vld [vmem:[#allocation103_spill] sm:$0xff]  ;;  %v8861_v40 = vld [vmem:[#allocation52_spill] sm:$0xff] }
 0x3ba   : > { %v8870_v23 = vld [vmem:[#allocation107_spill] sm:$0xff] }
 0x3bb   : > { %v4147_v14 = vadd.f32 %v8476_v56, %v3832_v61  ;;  %v8851_v56 = vld [vmem:[#allocation45_spill] sm:$0xff]  ;;  %v5322_v33 = vmax.f32 %v5290_v55, 0.0  ;;  %v4102_v59 = vpop.f32.mrf.mxu3  ;;  %v8864_v55 = vld [vmem:[#allocation59_spill] sm:$0xff] }
 0x3bc   : > { %v1980_v4 = vadd.f32 %v8852_v60, %v8851_v56  ;;  %v8866_v60 = vld [vmem:[#allocation56_spill] sm:$0xff] }
 0x3bd   : > { %v4829_v13 = vadd.f32 %v8479_v38, %v4147_v14  ;;  %v4784_v61 = vpop.f32.mrf.mxu0 }
 0x3be   : > { %v2413_v3 = vadd.f32 %v8854_v5, %v1980_v4  ;;  %v8867_v4 = vld [vmem:[#allocation130_spill] sm:$0xff]  ;;  %v8869_v5 = vld [vmem:[#allocation64_spill] sm:$0xff] }
 0x3bf   : > { %v5255_v2 = vadd.f32 %v8488_v58, %v4829_v13  ;;  %v5210_v14 = vpop.f32.mrf.mxu1  ;;  %v8863_v13 = vld [vmem:[#allocation57_spill] sm:$0xff] }
 0x3c0   : > { %v3777_v10 = vpop.f32.mrf.mxu2  ;;  %v2728_v52 = vadd.f32 %v8863_v13, %v2414_v29 }
 0x3c1   : > { %v5291_v9 = vadd.f32 %v8301_v48, %v5255_v2  ;;  %v3833_v57 = vadd.f32 %v3777_v10, %v3407_v62 }
 0x3c2   : > { %v3410_v62 = vadd.f32 %v8865_v30, %v2728_v52 }
 0x3c3   : > { %v5323_v63 = vmax.f32 %v5291_v9, 0.0  ;;  %v4148_v38 = vadd.f32 %v4092_v49, %v3833_v57  ;;  %v8858_v49 = vld [vmem:[#allocation53_spill] sm:$0xff]  ;;  %v4104_v10 = vpop.f32.mrf.mxu3 }
 0x3c4   : > { %v2727_v28 = vadd.f32 %v8858_v49, %v2413_v3 }
 0x3c5   : > { %v6427_v22 = vpack.c.bf16 %v5323_v63, %v5322_v33  ;;  %v4830_v58 = vadd.f32 %v4774_v16, %v4148_v38  ;;  %v4786_v56 = vpop.f32.mrf.mxu0  ;;  %v1987_v33 = vadd.f32 %v8867_v4, %v8866_v60 }
 0x3c6   : > { %v3409_v32 = vadd.f32 %v8860_v15, %v2727_v28  ;;  %v8875_v15 = vld [vmem:[#allocation110_spill] sm:$0xff] }
 0x3c7   : > { %6493 = vst [vmem:[%s8330_s24 + $0x38] sm:$0xff] %v6427_v22   ;;  %v5256_v8 = vadd.f32 %v5200_v25, %v4830_v58  ;;  %v8862_v25 = vld [vmem:[#allocation128_spill] sm:$0xff]  ;;  %v5212_v26 = vpop.f32.mrf.mxu1  ;;  %v2416_v3 = vadd.f32 %v8869_v5, %v1987_v33 }
 0x3c8   : > { %v3779_v31 = vpop.f32.mrf.mxu2  ;;  %v8884_v5 = vld [vmem:[#allocation76_spill] sm:$0xff] }
 0x3c9   : > { %v3834_v7 = vadd.f32 %v3779_v31, %v3408_v20  ;;  %v5292_v17 = vadd.f32 %v8301_v48, %v5256_v8 }
 0x3cb   : > { %v4149_v36 = vadd.f32 %v4094_v34, %v3834_v7  ;;  %v1985_v34 = vadd.f32 %v8862_v25, %v8861_v40  ;;  %v5324_v11 = vmax.f32 %v5292_v17, 0.0  ;;  %v4107_v35 = vpop.f32.mrf.mxu3  ;;  %v8874_v17 = vld [vmem:[#allocation68_spill] sm:$0xff] }
 0x3cc   : > { %v8877_v40 = vld [vmem:[#allocation132_spill] sm:$0xff] }
 0x3cd   : > { %v4831_v46 = vadd.f32 %v4776_v54, %v4149_v36  ;;  %v2415_v2 = vadd.f32 %v8864_v55, %v1985_v34 }
 0x3cf   : > { %v5257_v16 = vadd.f32 %v5202_v45, %v4831_v46  ;;  %v4789_v46 = vpop.f32.mrf.mxu0  ;;  %v5215_v29 = vpop.f32.mrf.mxu1 }
 0x3d0   : > { %v3782_v39 = vpop.f32.mrf.mxu2 }
 0x3d1   : > { %v5293_v18 = vadd.f32 %v8301_v48, %v5257_v16  ;;  %v3835_v50 = vadd.f32 %v3782_v39, %v3409_v32 }
 0x3d3   : > { %v5325_v54 = vmax.f32 %v5293_v18, 0.0  ;;  %v4150_v1 = vadd.f32 %v4097_v51, %v3835_v50  ;;  %v2729_v51 = vadd.f32 %v8868_v0, %v2415_v2  ;;  %v8876_v50 = vld [vmem:[#allocation63_spill] sm:$0xff] }
 0x3d4   : > { %v1992_v25 = vadd.f32 %v8877_v40, %v8876_v50  ;;  %v8891_v50 = vld [vmem:[#allocation73_spill] sm:$0xff] }
 0x3d5   : > { %v6432_v37 = vpack.c.bf16 %v5325_v54, %v5324_v11  ;;  %v4832_v45 = vadd.f32 %v4779_v6, %v4150_v1  ;;  %v3411_v20 = vadd.f32 %v8870_v23, %v2729_v51  ;;  %v8878_v54 = vld [vmem:[#allocation71_spill] sm:$0xff]  ;;  %v4109_v1 = vpop.f32.mrf.mxu3 }
 0x3d7   : > { %6494 = vst [vmem:[%s8330_s24 + $0x40] sm:$0xff] %v6432_v37   ;;  %v5258_v63 = vadd.f32 %v5205_v47, %v4832_v45  ;;  %v8872_v47 = vld [vmem:[#allocation131_spill] sm:$0xff]  ;;  %v4791_v52 = vpop.f32.mrf.mxu0  ;;  %v8879_v37 = vld [vmem:[#allocation72_spill] sm:$0xff] }
 0x3d8   : > { %v3784_v9 = vpop.f32.mrf.mxu2  ;;  %v2418_v55 = vadd.f32 %v8879_v37, %v1992_v25  ;;  %v8880_v45 = vld [vmem:[#allocation112_spill] sm:$0xff] }
 0x3d9   : > { %v3836_v57 = vadd.f32 %v3784_v9, %v3410_v62  ;;  %v5294_v58 = vadd.f32 %v8301_v48, %v5258_v63  ;;  %v5217_v62 = vpop.f32.mrf.mxu1 }
 0x3db   : > { %v4151_v38 = vadd.f32 %v4099_v27, %v3836_v57  ;;  %v1990_v27 = vadd.f32 %v8872_v47, %v8871_v42  ;;  %v5326_v8 = vmax.f32 %v5294_v58, 0.0  ;;  %v8885_v58 = vld [vmem:[#allocation113_spill] sm:$0xff]  ;;  %v8887_v42 = vld [vmem:[#allocation134_spill] sm:$0xff] }
 0x3dd   : > { %v4833_v22 = vadd.f32 %v4781_v44, %v4151_v38  ;;  %v8873_v44 = vld [vmem:[#allocation67_spill] sm:$0xff] }
 0x3de   : > { %v2730_v28 = vadd.f32 %v8873_v44, %v2416_v3  ;;  %v8883_v38 = vld [vmem:[#allocation75_spill] sm:$0xff]  ;;  %v8889_v44 = vld [vmem:[#allocation81_spill] sm:$0xff] }
 0x3df   : > { %v5259_v6 = vadd.f32 %v5207_v24, %v4833_v22  ;;  %v2417_v24 = vadd.f32 %v8874_v17, %v1990_v27  ;;  %v2732_v0 = vadd.f32 %v8883_v38, %v2418_v55  ;;  %v4112_v22 = vpop.f32.mrf.mxu3  ;;  %v4794_v23 = vpop.f32.mrf.mxu0  ;;  %v8890_v17 = vld [vmem:[#allocation114_spill] sm:$0xff] }
 0x3e0   : > { %v3787_v31 = vpop.f32.mrf.mxu2  ;;  %v3412_v32 = vadd.f32 %v8875_v15, %v2730_v28 }
 0x3e1   : > { %v5295_v7 = vadd.f32 %v8301_v48, %v5259_v6  ;;  %v3837_v41 = vadd.f32 %v3787_v31, %v3411_v20  ;;  %v3414_v6 = vadd.f32 %v8885_v58, %v2732_v0  ;;  %v8899_v0 = vld [vmem:[#allocation89_spill] sm:$0xff] }
 0x3e3   : > { %v5327_v36 = vmax.f32 %v5295_v7, 0.0  ;;  %v4152_v49 = vadd.f32 %v4102_v59, %v3837_v41  ;;  %v2731_v59 = vadd.f32 %v8878_v54, %v2417_v24  ;;  %v5220_v7 = vpop.f32.mrf.mxu1  ;;  %v8886_v41 = vld [vmem:[#allocation69_spill] sm:$0xff]  ;;  %v8893_v54 = vld [vmem:[#allocation84_spill] sm:$0xff] }
 0x3e4   : > { %v1997_v47 = vadd.f32 %v8887_v42, %v8886_v41 }
 0x3e5   : > { %v6437_v43 = vpack.c.bf16 %v5327_v36, %v5326_v8  ;;  %v4834_v16 = vadd.f32 %v4784_v61, %v4152_v49  ;;  %v3413_v30 = vadd.f32 %v8880_v45, %v2731_v59 }
 0x3e6   : > { %v2420_v28 = vadd.f32 %v8889_v44, %v1997_v47  ;;  %v8902_v47 = vld [vmem:[#allocation92_spill] sm:$0xff] }
 0x3e7   : > { %6495 = vst [vmem:[%s8330_s24 + $0x48] sm:$0xff] %v6437_v43   ;;  %v5260_v34 = vadd.f32 %v5210_v14, %v4834_v16  ;;  %v8881_v14 = vld [vmem:[#allocation66_spill] sm:$0xff]  ;;  %v4114_v16 = vpop.f32.mrf.mxu3 }
 0x3e8   : > { %v3789_v39 = vpop.f32.mrf.mxu2  ;;  %v2734_v59 = vadd.f32 %v8893_v54, %v2420_v28 }
 0x3e9   : > { %v3838_v18 = vadd.f32 %v3789_v39, %v3412_v32  ;;  %v5296_v2 = vadd.f32 %v8301_v48, %v5260_v34 }
 0x3eb   : > { %v4153_v11 = vadd.f32 %v4104_v10, %v3838_v18  ;;  %v8882_v10 = vld [vmem:[#allocation133_spill] sm:$0xff]  ;;  %v5328_v33 = vmax.f32 %v5296_v2, 0.0  ;;  %v4796_v18 = vpop.f32.mrf.mxu0  ;;  %v8895_v2 = vld [vmem:[#allocation116_spill] sm:$0xff] }
 0x3ec   : > { %v1995_v4 = vadd.f32 %v8882_v10, %v8881_v14 }
 0x3ed   : > { %v4835_v13 = vadd.f32 %v4786_v56, %v4153_v11 }
 0x3ee   : > { %v2419_v3 = vadd.f32 %v8884_v5, %v1995_v4  ;;  %v8898_v4 = vld [vmem:[#allocation88_spill] sm:$0xff] }
 0x3ef   : > { %v5261_v61 = vadd.f32 %v5212_v26, %v4835_v13 }
 0x3f0   : > { %v3792_v9 = vpop.f32.mrf.mxu2 }
 0x3f1   : > { %v5297_v57 = vadd.f32 %v8301_v48, %v5261_v61  ;;  %v3839_v60 = vadd.f32 %v3792_v9, %v3413_v30  ;;  %v3416_v61 = vadd.f32 %v8895_v2, %v2734_v59  ;;  %v8896_v9 = vld [vmem:[#allocation77_spill] sm:$0xff]  ;;  %v8908_v59 = vld [vmem:[#allocation122_spill] sm:$0xff] }
 0x3f3   : > { %v5329_v63 = vmax.f32 %v5297_v57, 0.0  ;;  %v4154_v56 = vadd.f32 %v4107_v35, %v3839_v60  ;;  %v8888_v35 = vld [vmem:[#allocation79_spill] sm:$0xff]  ;;  %v8897_v57 = vld [vmem:[#allocation136_spill] sm:$0xff] }
 0x3f4   : > { %v2733_v36 = vadd.f32 %v8888_v35, %v2419_v3  ;;  %v2002_v60 = vadd.f32 %v8897_v57, %v8896_v9  ;;  %v8900_v3 = vld [vmem:[#allocation118_spill] sm:$0xff] }
 0x3f5   : > { %v6442_v51 = vpack.c.bf16 %v5329_v63, %v5328_v33  ;;  %v4836_v26 = vadd.f32 %v4789_v46, %v4154_v56  ;;  %v4799_v63 = vpop.f32.mrf.mxu0  ;;  %v8910_v9 = vld [vmem:[#allocation98_spill] sm:$0xff] }
 0x3f6   : > { %v3415_v24 = vadd.f32 %v8890_v17, %v2733_v36 }
 0x3f7   : > { %6496 = vst [vmem:[%s8330_s24 + $0x50] sm:$0xff] %v6442_v51   ;;  %v5262_v27 = vadd.f32 %v5215_v29, %v4836_v26  ;;  %v8892_v29 = vld [vmem:[#allocation135_spill] sm:$0xff]  ;;  %v2422_v51 = vadd.f32 %v8899_v0, %v2002_v60 }
 0x3f8   : > { %v3794_v20 = vpop.f32.mrf.mxu2  ;;  %v2000_v40 = vadd.f32 %v8892_v29, %v8891_v50 }
 0x3f9   : > { %v3840_v31 = vadd.f32 %v3794_v20, %v3414_v6  ;;  %v5298_v43 = vadd.f32 %v8301_v48, %v5262_v27  ;;  %v8901_v20 = vld [vmem:[#allocation80_spill] sm:$0xff]  ;;  %v2736_v27 = vadd.f32 %v8902_v47, %v2422_v51  ;;  %v8913_v51 = vld [vmem:[#allocation90_spill] sm:$0xff] }
 0x3fb   : > { %v4155_v8 = vadd.f32 %v4109_v1, %v3840_v31  ;;  %v5330_v25 = vmax.f32 %v5298_v43, 0.0  ;;  %v5222_v1 = vpop.f32.mrf.mxu1  ;;  %v2005_v31 = vadd.f32 %v8252_v21, %v8901_v20  ;;  %v8904_v43 = vld [vmem:[#allocation120_spill] sm:$0xff] }
 0x3fd   : > { %v4837_v49 = vadd.f32 %v4791_v52, %v4155_v8  ;;  %v8894_v52 = vld [vmem:[#allocation85_spill] sm:$0xff]  ;;  %v4801_v36 = vpop.f32.mrf.mxu0 }
 0x3fe   : > { %v2421_v37 = vadd.f32 %v8894_v52, %v2000_v40 }
 0x3ff   : > { %v5263_v46 = vadd.f32 %v5217_v62, %v4837_v49  ;;  %v4117_v62 = vpop.f32.mrf.mxu3  ;;  %v8903_v49 = vld [vmem:[#allocation93_spill] sm:$0xff] }
 0x400   : > { %v3797_v15 = vpop.f32.mrf.mxu2  ;;  %v2735_v33 = vadd.f32 %v8898_v4, %v2421_v37  ;;  %v2423_v44 = vadd.f32 %v8903_v49, %v2005_v31  ;;  %v6573_v31 = vld [vmem:[%s8640_s4] ss:$0 sm:$0xff] }
 0x401   : > { %v5299_v32 = vadd.f32 %v8301_v48, %v5263_v46  ;;  %v3841_v39 = vadd.f32 %v3797_v15, %v3415_v24  ;;  %v3418_v46 = vadd.f32 %v8904_v43, %v2736_v27  ;;  %v8905_v15 = vld [vmem:[#allocation83_spill] sm:$0xff]  ;;  %v8917_v43 = vld [vmem:[#allocation104_spill] sm:$0xff] }
 0x402   : > { %v3417_v26 = vadd.f32 %v8900_v3, %v2735_v33  ;;  %v2007_v21 = vadd.f32 %v8260_v19, %v8905_v15  ;;  %v8909_v19 = vld [vmem:[#allocation86_spill] sm:$0xff]  ;;  %v8912_v33 = vld [vmem:[#allocation125_spill] sm:$0xff] }
 0x403   : > { %v5331_v34 = vmax.f32 %v5299_v32, 0.0  ;;  %v4156_v11 = vadd.f32 %v4112_v22, %v3841_v39  ;;  %v5225_v38 = vpop.f32.mrf.mxu1  ;;  %v2010_v2 = vadd.f32 %v8262_v53, %v8909_v19  ;;  %v2012_v53 = vadd.f32 %v8271_v12, %v8913_v51  ;;  %v8914_v3 = vld [vmem:[#allocation101_spill] sm:$0xff] }
 0x404   : > { %v8918_v15 = vld [vmem:[#allocation129_spill] sm:$0xff] }
 0x405   : > { %v6447_v13 = vpack.c.bf16 %v5331_v34, %v5330_v25  ;;  %v4838_v55 = vadd.f32 %v4794_v23, %v4156_v11  ;;  %v8907_v25 = vld [vmem:[#allocation96_spill] sm:$0xff] }
 0x406   : > { %v2424_v34 = vadd.f32 %v8907_v25, %v2007_v21 }
 0x407   : > { %6497 = vst [vmem:[%s8330_s24 + $0x58] sm:$0xff] %v6447_v13   ;;  %v5264_v14 = vadd.f32 %v5220_v7, %v4838_v55  ;;  %v4119_v8 = vpop.f32.mrf.mxu3  ;;  %v4804_v13 = vpop.f32.mrf.mxu0 }
 0x408   : > { %v3799_v45 = vpop.f32.mrf.mxu2  ;;  %v2738_v57 = vadd.f32 %v8910_v9, %v2424_v34 }
 0x409   : > { %v3842_v30 = vadd.f32 %v3799_v45, %v3416_v61  ;;  %v5300_v22 = vadd.f32 %v8301_v48, %v5264_v14  ;;  %v8911_v14 = vld [vmem:[#allocation99_spill] sm:$0xff] }
 0x40b   : > { %v4157_v10 = vadd.f32 %v4114_v16, %v3842_v30  ;;  %v5332_v7 = vmax.f32 %v5300_v22, 0.0  ;;  %v5227_v17 = vpop.f32.mrf.mxu1 }
 0x40d   : > { %v4839_v56 = vadd.f32 %v4796_v18, %v4157_v10  ;;  %v8906_v18 = vld [vmem:[#allocation95_spill] sm:$0xff]  ;;  %v2425_v10 = vadd.f32 %v8911_v14, %v2010_v2 }
 0x40e   : > { %v2737_v50 = vadd.f32 %v8906_v18, %v2423_v44 }
 0x40f   : > { %v5265_v5 = vadd.f32 %v5222_v1, %v4839_v56  ;;  %v4122_v40 = vpop.f32.mrf.mxu3  ;;  %v4806_v0 = vpop.f32.mrf.mxu0 }
 0x410   : > { %v3802_v58 = vpop.f32.mrf.mxu2  ;;  %v3419_v1 = vadd.f32 %v8908_v59, %v2737_v50 }
 0x411   : > { %v5301_v6 = vadd.f32 %v8301_v48, %v5265_v5  ;;  %v3843_v23 = vadd.f32 %v3802_v58, %v3417_v26  ;;  %v2739_v26 = vadd.f32 %v8914_v3, %v2425_v10 }
 0x413   : > { %v5333_v41 = vmax.f32 %v5301_v6, 0.0  ;;  %v4158_v42 = vadd.f32 %v4117_v62, %v3843_v23  ;;  %v5230_v61 = vpop.f32.mrf.mxu1  ;;  %v8915_v23 = vld [vmem:[#allocation102_spill] sm:$0xff] }
 0x414   : > { %v2426_v20 = vadd.f32 %v8915_v23, %v2012_v53 }
 0x415   : > { %v6452_v35 = vpack.c.bf16 %v5333_v41, %v5332_v7  ;;  %v4840_v28 = vadd.f32 %v4799_v63, %v4158_v42  ;;  %v3420_v63 = vadd.f32 %v8912_v33, %v2738_v57  ;;  %v8916_v42 = vld [vmem:[#allocation127_spill] sm:$0xff] }
 0x416   : > { %v3421_v47 = vadd.f32 %v8916_v42, %v2739_v26 }
 0x417   : > { %6498 = vst [vmem:[%s8330_s24 + $0x60] sm:$0xff] %v6452_v35   ;;  %v5266_v32 = vadd.f32 %v5225_v38, %v4840_v28  ;;  %v4124_v56 = vpop.f32.mrf.mxu3 }
 0x418   : > { %v3804_v24 = vpop.f32.mrf.mxu2 }
 0x419   : > { %v3844_v16 = vadd.f32 %v3804_v24, %v3418_v46  ;;  %v5302_v11 = vadd.f32 %v8301_v48, %v5266_v32  ;;  %v2740_v46 = vadd.f32 %v8917_v43, %v2426_v20 }
 0x41b   : > { %v4159_v39 = vadd.f32 %v4119_v8, %v3844_v16  ;;  %v5334_v45 = vmax.f32 %v5302_v11, 0.0  ;;  %v5232_v58 = vpop.f32.mrf.mxu1  ;;  %v3422_v21 = vadd.f32 %v8918_v15, %v2740_v46 }
 0x41d   : > { %v4841_v29 = vadd.f32 %v4801_v36, %v4159_v39 }
 0x41f   : > { %v5267_v54 = vadd.f32 %v5227_v17, %v4841_v29  ;;  %v4127_v27 = vpop.f32.mrf.mxu3 }
 0x420   : > { %v3807_v52 = vpop.f32.mrf.mxu2  ;;  %v4809_v36 = vpop.f32.mrf.mxu0 }
 0x421   : > { %v5303_v37 = vadd.f32 %v8301_v48, %v5267_v54  ;;  %v3845_v55 = vadd.f32 %v3807_v52, %v3419_v1 }
 0x423   : > { %v5335_v30 = vmax.f32 %v5303_v37, 0.0  ;;  %v4160_v62 = vadd.f32 %v4122_v40, %v3845_v55  ;;  %v5235_v17 = vpop.f32.mrf.mxu1 }
 0x425   : > { %v6457_v60 = vpack.c.bf16 %v5335_v30, %v5334_v45  ;;  %v4842_v4 = vadd.f32 %v4804_v13, %v4160_v62 }
 0x427   : > { %6499 = vst [vmem:[%s8330_s24 + $0x68] sm:$0xff] %v6457_v60   ;;  %v5268_v22 = vadd.f32 %v5230_v61, %v4842_v4  ;;  %v4129_v18 = vpop.f32.mrf.mxu3 }
 0x428   : > { %v3809_v38 = vpop.f32.mrf.mxu2  ;;  %v4811_v40 = vpop.f32.mrf.mxu0 }
 0x429   : > { %v3846_v48 = vadd.f32 %v3809_v38, %v3420_v63  ;;  %v5304_v7 = vadd.f32 %v6573_v31, %v5268_v22 }
 0x42b   : > { %v4161_v5 = vadd.f32 %v4124_v56, %v3846_v48  ;;  %v5336_v49 = vmax.f32 %v5304_v7, 0.0  ;;  %v5237_v34 = vpop.f32.mrf.mxu1 }
 0x42d   : > { %v4843_v6 = vadd.f32 %v4806_v0, %v4161_v5 }
 0x42f   : > { %v5269_v41 = vadd.f32 %v5232_v58, %v4843_v6 }
 0x430   : > { %v3812_v8 = vpop.f32.mrf.mxu2 }
 0x431   : > { %v5305_v12 = vadd.f32 %v6573_v31, %v5269_v41  ;;  %v3847_v35 = vadd.f32 %v3812_v8, %v3421_v47 }
 0x433   : > { %v5337_v44 = vmax.f32 %v5305_v12, 0.0  ;;  %v4162_v28 = vadd.f32 %v4127_v27, %v3847_v35 }
 0x435   : > { %v6462_v24 = vpack.c.bf16 %v5337_v44, %v5336_v49  ;;  %v4844_v16 = vadd.f32 %v4809_v36, %v4162_v28 }
 0x437   : > { %6500 = vst [vmem:[%s8330_s24 + $0x70] sm:$0xff] %v6462_v24   ;;  %v5270_v50 = vadd.f32 %v5235_v17, %v4844_v16 }
 0x438   : > { %v3814_v32 = vpop.f32.mrf.mxu2 }
 0x439   : > { %v3848_v39 = vadd.f32 %v3814_v32, %v3422_v21  ;;  %v5306_v11 = vadd.f32 %v6573_v31, %v5270_v50 }
 0x43b   : > { %v4163_v29 = vadd.f32 %v4129_v18, %v3848_v39  ;;  %v5338_v1 = vmax.f32 %v5306_v11, 0.0 }
 0x43d   : > { %v4845_v25 = vadd.f32 %v4811_v40, %v4163_v29 }
 0x43f   : > { %v5271_v54 = vadd.f32 %v5237_v34, %v4845_v25 }
 0x441   : > { %v5307_v59 = vadd.f32 %v6573_v31, %v5271_v54 }
 0x443   : > { %v5339_v13 = vmax.f32 %v5307_v59, 0.0 }
 0x445   : > { %v6467_v52 = vpack.c.bf16 %v5339_v13, %v5338_v1 }
 0x447   : > { %6501 = vst [vmem:[%s8330_s24 + $0x78] sm:$0xff] %v6467_v52  }
 0x448 PF: > { %s16_s18 = sadd.s32 1, %s6614_s18  }
 0x449   : > { %p13_p7 = scmp.ge.s32.totalorder %s16_s18, 4  }
 0x44b   :  { %15 = sbr.rel (!%p13_p7) target bundleno = 1 (0x1), region = 88 }
 0x450   :  { %5425 = vsyncpa [#allocation4], 1 }
 0x451   :  { %5427 = vsyncpa [#allocation4 + $0x1], 1 }

</bundles_post_ra>
